<compile_context>
chip_gen: v6e
topology: v6e:2x2x1
jax: 0.10.0
libtpu: 0.0.40
codegen_flags: <defaults>
</compile_context>

<pallas_src>
import math
from functools import partial

import jax
import jax.numpy as jnp
from jax.experimental import pallas as pl
from jax.experimental.pallas import tpu as pltpu


def _inception_kernel(x_ref, w_ref, b_ref, o_ref, patch_ref, *, K, Wp, HWp, Cpad, bb):
    # x_ref:     (bb, Cpad, L)       zero-padded input (channels padded to Cpad),
    #                                spatially flattened with row stride Wp
    # w_ref:     (Cout, K*K*Cpad)    branch-mean weights, minor order (kh, kw, cpad)
    # b_ref:     (Cout, 1)           branch-mean bias
    # o_ref:     (bb, Cout, HWp)     output flattened with row stride Wp (cols >= W garbage)
    # patch_ref: (K*K*Cpad, HWp)     VMEM im2col scratch, reused across the bb batches
    for i in range(bb):
        # im2col: every (kh, kw) tap is a contiguous lane window of the flattened input
        # (valid output columns w < W never wrap across a padded row).  Static offsets;
        # destination offsets t*Cpad are 8-sublane aligned and HWp is a 128 multiple,
        # so every store is a full-tile vst.  Source comes from a ref slice so each
        # unrolled step has a bounded live range (no 121-tap vreg pressure build-up).
        for kh in range(K):
            for kw in range(K):
                t = kh * K + kw
                start = kh * Wp + kw
                patch_ref[pl.ds(t * Cpad, Cpad), :] = x_ref[i][:, start:start + HWp]

        # Single MXU matmul does the whole conv (contraction dim = K*K*Cpad), f32 acc.
        o_ref[i] = (
            jnp.dot(w_ref[...], patch_ref[...], preferred_element_type=jnp.float32)
            + b_ref[...]
        ).astype(o_ref.dtype)


def inception_block_v1(x_nchw, w_all, b_all, *, batch_block=None):
    """x_nchw: (B, Cin, H, W) f32; w_all: (nk, K, K, Cout, Cin); b_all: (nk, Cout)."""
    B, Cin, H, W = x_nchw.shape
    nk, K, _, Cout, _ = w_all.shape
    P = (K - 1) // 2

    # Sublane-align the channel group (im2col store alignment).
    Cpad = max(8, ((Cin + 7) // 8) * 8)

    # Lane-align the flattened spatial axis: Wp >= W + K - 1 and H*Wp % 128 == 0.
    g = 128 // math.gcd(H, 128)
    Wp = ((W + K - 1 + g - 1) // g) * g
    HWp = H * Wp

    # Batch blocking: >=2 grid steps keeps both v7x TensorCores busy; folding batches
    # per step amortizes grid-step overhead on single-TC v5e/v6e for larger B.
    if batch_block is None:
        batch_block = B // 2 if (B > 2 and B % 2 == 0) else 1
    assert B % batch_block == 0, "B must be divisible by batch_block"
    nb = B // batch_block

    # Fold the mean over the nk branches into one effective weight / bias (linear op);
    # pad Cin -> Cpad with zeros; minor order (kh, kw, cpad) matches the im2col rows.
    w_mean = jnp.mean(w_all, axis=0)                                   # (K, K, Cout, Cin)
    w_mean = jnp.pad(w_mean, ((0, 0), (0, 0), (0, 0), (0, Cpad - Cin)))
    w_eff = jnp.transpose(w_mean, (2, 0, 1, 3)).reshape(Cout, K * K * Cpad)
    b_eff = jnp.mean(b_all, axis=0).reshape(Cout, 1)

    # Shared 'same' padding for all branches (channels padded to Cpad, spatial padded to
    # (H+K, Wp)); the K-P extra bottom rows keep every flattened tap window in-bounds.
    # Stays NCHW -> no boundary transposes.
    x_pad = jnp.pad(
        x_nchw,
        ((0, 0), (0, Cpad - Cin), (P, K - P), (P, Wp - W - P)),
    )
    L = (H + K) * Wp
    x_flat = x_pad.reshape(B, Cpad, L)

    out_flat = pl.pallas_call(
        partial(_inception_kernel, K=K, Wp=Wp, HWp=HWp, Cpad=Cpad, bb=batch_block),
        out_shape=jax.ShapeDtypeStruct((B, Cout, HWp), jnp.float32),
        grid=(nb,),
        in_specs=[
            pl.BlockSpec((batch_block, Cpad, L), lambda b: (b, 0, 0)),
            pl.BlockSpec((Cout, K * K * Cpad), lambda b: (0, 0)),
            pl.BlockSpec((Cout, 1), lambda b: (0, 0)),
        ],
        out_specs=pl.BlockSpec((batch_block, Cout, HWp), lambda b: (b, 0, 0)),
        scratch_shapes=[pltpu.VMEM((K * K * Cpad, HWp), jnp.float32)],
        compiler_params=pltpu.CompilerParams(dimension_semantics=("parallel",)),
    )(x_flat, w_eff, b_eff)

    # Keep the W valid columns of each flattened output row -> (B, Cout, H, W), NCHW.
    return out_flat.reshape(B, Cout, H, Wp)[:, :, :, :W]


def make_params(key, in_channels, out_channels, num_kernels=6):
    """Deterministic kaiming_normal_(fan_out, relu) weights, zero bias (as in __init__)."""
    K = 2 * (num_kernels - 1) + 1
    ws, bs = [], []
    for i in range(num_kernels):
        k = 2 * i + 1
        key, sub = jax.random.split(key)
        fan_out = out_channels * k * k
        std = math.sqrt(2.0 / fan_out)
        w_oihw = jax.random.normal(sub, (out_channels, in_channels, k, k), jnp.float32) * std
        w_hwoi = jnp.transpose(w_oihw, (2, 3, 0, 1))                    # (k, k, Cout, Cin)
        p = (K - k) // 2
        ws.append(jnp.pad(w_hwoi, ((p, p), (p, p), (0, 0), (0, 0))))    # embed in K x K
        bs.append(jnp.zeros((out_channels,), jnp.float32))
    return jnp.stack(ws), jnp.stack(bs)


def _reference(x_nchw, w_all, b_all):
    # pure-JAX reference: per-branch 'same' conv -> stack -> mean (as in the PyTorch forward)
    outs = []
    for i in range(w_all.shape[0]):
        w = jnp.transpose(w_all[i], (2, 3, 0, 1))                       # (Cout, Cin, K, K)
        o = jax.lax.conv_general_dilated(
            x_nchw, w, window_strides=(1, 1), padding="SAME",
            dimension_numbers=("NCHW", "OIHW", "NCHW"))
        outs.append(o + b_all[i][None, :, None, None])
    return jnp.stack(outs, axis=-1).mean(-1)


if __name__ == "__main__":
    key = jax.random.PRNGKey(0)
    B, Cin, Cout, H, W = 2, 4, 8, 16, 16
    num_kernels = 6

    key, kx, kp = jax.random.split(key, 3)
    x = jax.random.normal(kx, (B, Cin, H, W), jnp.float32)
    w_all, b_all = make_params(kp, Cin, Cout, num_kernels)

    y = jax.jit(inception_block_v1)(x, w_all, b_all)
    y = jax.block_until_ready(y)

    y_ref = _reference(x, w_all, b_all)
    assert y.shape == (B, Cout, H, W)
    assert jnp.allclose(y, y_ref, rtol=1e-4, atol=1e-4)
    print("KERNEL_OK")
</pallas_src>

<mosaic_0001>
module attributes {stable_mosaic.version = 11 : i64} {
  func.func @_inception_kernel(%arg0: i32, %arg1: memref<1x8x864xf32, #tpu.memory_space<vmem>>, %arg2: memref<8x968xf32, #tpu.memory_space<vmem>>, %arg3: memref<8x1xf32, #tpu.memory_space<vmem>>, %arg4: memref<1x8x512xf32, #tpu.memory_space<vmem>>, %arg5: memref<968x512xf32, #tpu.memory_space<vmem>>) attributes {dimension_semantics = [#tpu.dimension_semantics<parallel>], iteration_bounds = array<i64: 2>, scalar_prefetch = 0 : i64, scratch_operands = 1 : i64, tpu.core_type = #tpu.core_type<tc>, window_params = [{transform_indices = @transform_0, window_bounds = array<i64: 1, 8, 864>}, {pipeline_mode = #tpu.pipeline_mode<synchronous>, transform_indices = @transform_1, window_bounds = array<i64: 8, 968>}, {pipeline_mode = #tpu.pipeline_mode<synchronous>, transform_indices = @transform_2, window_bounds = array<i64: 8, 1>}, {transform_indices = @transform_3, window_bounds = array<i64: 1, 8, 512>}]} {
    %c0 = arith.constant 0 : index
    %c0_0 = arith.constant 0 : index
    %c0_1 = arith.constant 0 : index
    %0 = vector.load %arg1[%c0, %c0_0, %c0_1] : memref<1x8x864xf32, #tpu.memory_space<vmem>>, vector<1x8x864xf32>
    %1 = vector.shape_cast %0 : vector<1x8x864xf32> to vector<8x864xf32>
    %2 = vector.extract_strided_slice %1 {offsets = [0, 0], sizes = [8, 512], strides = [1, 1]} : vector<8x864xf32> to vector<8x512xf32>
    %c0_2 = arith.constant 0 : index
    %c0_3 = arith.constant 0 : index
    %3 = vector.load %arg5[%c0_2, %c0_3] : memref<968x512xf32, #tpu.memory_space<vmem>>, vector<8x512xf32>
    tpu.vector_store %arg5[%c0_2, %c0_3], %2 {strides = array<i32>} : memref<968x512xf32, #tpu.memory_space<vmem>>, vector<8x512xf32>,
    %c0_4 = arith.constant 0 : index
    %c0_5 = arith.constant 0 : index
    %c0_6 = arith.constant 0 : index
    %4 = vector.load %arg1[%c0_4, %c0_5, %c0_6] : memref<1x8x864xf32, #tpu.memory_space<vmem>>, vector<1x8x864xf32>
    %5 = vector.shape_cast %4 : vector<1x8x864xf32> to vector<8x864xf32>
    %6 = vector.extract_strided_slice %5 {offsets = [0, 1], sizes = [8, 512], strides = [1, 1]} : vector<8x864xf32> to vector<8x512xf32>
    %c8 = arith.constant 8 : index
    %c0_7 = arith.constant 0 : index
    %7 = vector.load %arg5[%c8, %c0_7] : memref<968x512xf32, #tpu.memory_space<vmem>>, vector<8x512xf32>
    tpu.vector_store %arg5[%c8, %c0_7], %6 {strides = array<i32>} : memref<968x512xf32, #tpu.memory_space<vmem>>, vector<8x512xf32>,
    %c0_8 = arith.constant 0 : index
    %c0_9 = arith.constant 0 : index
    %c0_10 = arith.constant 0 : index
    %8 = vector.load %arg1[%c0_8, %c0_9, %c0_10] : memref<1x8x864xf32, #tpu.memory_space<vmem>>, vector<1x8x864xf32>
    %9 = vector.shape_cast %8 : vector<1x8x864xf32> to vector<8x864xf32>
    %10 = vector.extract_strided_slice %9 {offsets = [0, 2], sizes = [8, 512], strides = [1, 1]} : vector<8x864xf32> to vector<8x512xf32>
    %c16 = arith.constant 16 : index
    %c0_11 = arith.constant 0 : index
    %11 = vector.load %arg5[%c16, %c0_11] : memref<968x512xf32, #tpu.memory_space<vmem>>, vector<8x512xf32>
    tpu.vector_store %arg5[%c16, %c0_11], %10 {strides = array<i32>} : memref<968x512xf32, #tpu.memory_space<vmem>>, vector<8x512xf32>,
    %c0_12 = arith.constant 0 : index
    %c0_13 = arith.constant 0 : index
    %c0_14 = arith.constant 0 : index
    %12 = vector.load %arg1[%c0_12, %c0_13, %c0_14] : memref<1x8x864xf32, #tpu.memory_space<vmem>>, vector<1x8x864xf32>
    %13 = vector.shape_cast %12 : vector<1x8x864xf32> to vector<8x864xf32>
    %14 = vector.extract_strided_slice %13 {offsets = [0, 3], sizes = [8, 512], strides = [1, 1]} : vector<8x864xf32> to vector<8x512xf32>
    %c24 = arith.constant 24 : index
    %c0_15 = arith.constant 0 : index
    %15 = vector.load %arg5[%c24, %c0_15] : memref<968x512xf32, #tpu.memory_space<vmem>>, vector<8x512xf32>
    tpu.vector_store %arg5[%c24, %c0_15], %14 {strides = array<i32>} : memref<968x512xf32, #tpu.memory_space<vmem>>, vector<8x512xf32>,
    %c0_16 = arith.constant 0 : index
    %c0_17 = arith.constant 0 : index
    %c0_18 = arith.constant 0 : index
    %16 = vector.load %arg1[%c0_16, %c0_17, %c0_18] : memref<1x8x864xf32, #tpu.memory_space<vmem>>, vector<1x8x864xf32>
    %17 = vector.shape_cast %16 : vector<1x8x864xf32> to vector<8x864xf32>
    %18 = vector.extract_strided_slice %17 {offsets = [0, 4], sizes = [8, 512], strides = [1, 1]} : vector<8x864xf32> to vector<8x512xf32>
    %c32 = arith.constant 32 : index
    %c0_19 = arith.constant 0 : index
    %19 = vector.load %arg5[%c32, %c0_19] : memref<968x512xf32, #tpu.memory_space<vmem>>, vector<8x512xf32>
    tpu.vector_store %arg5[%c32, %c0_19], %18 {strides = array<i32>} : memref<968x512xf32, #tpu.memory_space<vmem>>, vector<8x512xf32>,
    %c0_20 = arith.constant 0 : index
    %c0_21 = arith.constant 0 : index
    %c0_22 = arith.constant 0 : index
    %20 = vector.load %arg1[%c0_20, %c0_21, %c0_22] : memref<1x8x864xf32, #tpu.memory_space<vmem>>, vector<1x8x864xf32>
    %21 = vector.shape_cast %20 : vector<1x8x864xf32> to vector<8x864xf32>
    %22 = vector.extract_strided_slice %21 {offsets = [0, 5], sizes = [8, 512], strides = [1, 1]} : vector<8x864xf32> to vector<8x512xf32>
    %c40 = arith.constant 40 : index
    %c0_23 = arith.constant 0 : index
    %23 = vector.load %arg5[%c40, %c0_23] : memref<968x512xf32, #tpu.memory_space<vmem>>, vector<8x512xf32>
    tpu.vector_store %arg5[%c40, %c0_23], %22 {strides = array<i32>} : memref<968x512xf32, #tpu.memory_space<vmem>>, vector<8x512xf32>,
    %c0_24 = arith.constant 0 : index
    %c0_25 = arith.constant 0 : index
    %c0_26 = arith.constant 0 : index
    %24 = vector.load %arg1[%c0_24, %c0_25, %c0_26] : memref<1x8x864xf32, #tpu.memory_space<vmem>>, vector<1x8x864xf32>
    %25 = vector.shape_cast %24 : vector<1x8x864xf32> to vector<8x864xf32>
    %26 = vector.extract_strided_slice %25 {offsets = [0, 6], sizes = [8, 512], strides = [1, 1]} : vector<8x864xf32> to vector<8x512xf32>
    %c48 = arith.constant 48 : index
    %c0_27 = arith.constant 0 : index
    %27 = vector.load %arg5[%c48, %c0_27] : memref<968x512xf32, #tpu.memory_space<vmem>>, vector<8x512xf32>
    tpu.vector_store %arg5[%c48, %c0_27], %26 {strides = array<i32>} : memref<968x512xf32, #tpu.memory_space<vmem>>, vector<8x512xf32>,
    %c0_28 = arith.constant 0 : index
    %c0_29 = arith.constant 0 : index
    %c0_30 = arith.constant 0 : index
    %28 = vector.load %arg1[%c0_28, %c0_29, %c0_30] : memref<1x8x864xf32, #tpu.memory_space<vmem>>, vector<1x8x864xf32>
    %29 = vector.shape_cast %28 : vector<1x8x864xf32> to vector<8x864xf32>
    %30 = vector.extract_strided_slice %29 {offsets = [0, 7], sizes = [8, 512], strides = [1, 1]} : vector<8x864xf32> to vector<8x512xf32>
    %c56 = arith.constant 56 : index
    %c0_31 = arith.constant 0 : index
    %31 = vector.load %arg5[%c56, %c0_31] : memref<968x512xf32, #tpu.memory_space<vmem>>, vector<8x512xf32>
    tpu.vector_store %arg5[%c56, %c0_31], %30 {strides = array<i32>} : memref<968x512xf32, #tpu.memory_space<vmem>>, vector<8x512xf32>,
    %c0_32 = arith.constant 0 : index
    %c0_33 = arith.constant 0 : index
    %c0_34 = arith.constant 0 : index
    %32 = vector.load %arg1[%c0_32, %c0_33, %c0_34] : memref<1x8x864xf32, #tpu.memory_space<vmem>>, vector<1x8x864xf32>
    %33 = vector.shape_cast %32 : vector<1x8x864xf32> to vector<8x864xf32>
    %34 = vector.extract_strided_slice %33 {offsets = [0, 8], sizes = [8, 512], strides = [1, 1]} : vector<8x864xf32> to vector<8x512xf32>
    %c64 = arith.constant 64 : index
    %c0_35 = arith.constant 0 : index
    %35 = vector.load %arg5[%c64, %c0_35] : memref<968x512xf32, #tpu.memory_space<vmem>>, vector<8x512xf32>
    tpu.vector_store %arg5[%c64, %c0_35], %34 {strides = array<i32>} : memref<968x512xf32, #tpu.memory_space<vmem>>, vector<8x512xf32>,
    %c0_36 = arith.constant 0 : index
    %c0_37 = arith.constant 0 : index
    %c0_38 = arith.constant 0 : index
    %36 = vector.load %arg1[%c0_36, %c0_37, %c0_38] : memref<1x8x864xf32, #tpu.memory_space<vmem>>, vector<1x8x864xf32>
    %37 = vector.shape_cast %36 : vector<1x8x864xf32> to vector<8x864xf32>
    %38 = vector.extract_strided_slice %37 {offsets = [0, 9], sizes = [8, 512], strides = [1, 1]} : vector<8x864xf32> to vector<8x512xf32>
    %c72 = arith.constant 72 : index
    %c0_39 = arith.constant 0 : index
    %39 = vector.load %arg5[%c72, %c0_39] : memref<968x512xf32, #tpu.memory_space<vmem>>, vector<8x512xf32>
    tpu.vector_store %arg5[%c72, %c0_39], %38 {strides = array<i32>} : memref<968x512xf32, #tpu.memory_space<vmem>>, vector<8x512xf32>,
    %c0_40 = arith.constant 0 : index
    %c0_41 = arith.constant 0 : index
    %c0_42 = arith.constant 0 : index
    %40 = vector.load %arg1[%c0_40, %c0_41, %c0_42] : memref<1x8x864xf32, #tpu.memory_space<vmem>>, vector<1x8x864xf32>
    %41 = vector.shape_cast %40 : vector<1x8x864xf32> to vector<8x864xf32>
    %42 = vector.extract_strided_slice %41 {offsets = [0, 10], sizes = [8, 512], strides = [1, 1]} : vector<8x864xf32> to vector<8x512xf32>
    %c80 = arith.constant 80 : index
    %c0_43 = arith.constant 0 : index
    %43 = vector.load %arg5[%c80, %c0_43] : memref<968x512xf32, #tpu.memory_space<vmem>>, vector<8x512xf32>
    tpu.vector_store %arg5[%c80, %c0_43], %42 {strides = array<i32>} : memref<968x512xf32, #tpu.memory_space<vmem>>, vector<8x512xf32>,
    %c0_44 = arith.constant 0 : index
    %c0_45 = arith.constant 0 : index
    %c0_46 = arith.constant 0 : index
    %44 = vector.load %arg1[%c0_44, %c0_45, %c0_46] : memref<1x8x864xf32, #tpu.memory_space<vmem>>, vector<1x8x864xf32>
    %45 = vector.shape_cast %44 : vector<1x8x864xf32> to vector<8x864xf32>
    %46 = vector.extract_strided_slice %45 {offsets = [0, 32], sizes = [8, 512], strides = [1, 1]} : vector<8x864xf32> to vector<8x512xf32>
    %c88 = arith.constant 88 : index
    %c0_47 = arith.constant 0 : index
    %47 = vector.load %arg5[%c88, %c0_47] : memref<968x512xf32, #tpu.memory_space<vmem>>, vector<8x512xf32>
    tpu.vector_store %arg5[%c88, %c0_47], %46 {strides = array<i32>} : memref<968x512xf32, #tpu.memory_space<vmem>>, vector<8x512xf32>,
    %c0_48 = arith.constant 0 : index
    %c0_49 = arith.constant 0 : index
    %c0_50 = arith.constant 0 : index
    %48 = vector.load %arg1[%c0_48, %c0_49, %c0_50] : memref<1x8x864xf32, #tpu.memory_space<vmem>>, vector<1x8x864xf32>
    %49 = vector.shape_cast %48 : vector<1x8x864xf32> to vector<8x864xf32>
    %50 = vector.extract_strided_slice %49 {offsets = [0, 33], sizes = [8, 512], strides = [1, 1]} : vector<8x864xf32> to vector<8x512xf32>
    %c96 = arith.constant 96 : index
    %c0_51 = arith.constant 0 : index
    %51 = vector.load %arg5[%c96, %c0_51] : memref<968x512xf32, #tpu.memory_space<vmem>>, vector<8x512xf32>
    tpu.vector_store %arg5[%c96, %c0_51], %50 {strides = array<i32>} : memref<968x512xf32, #tpu.memory_space<vmem>>, vector<8x512xf32>,
    %c0_52 = arith.constant 0 : index
    %c0_53 = arith.constant 0 : index
    %c0_54 = arith.constant 0 : index
    %52 = vector.load %arg1[%c0_52, %c0_53, %c0_54] : memref<1x8x864xf32, #tpu.memory_space<vmem>>, vector<1x8x864xf32>
    %53 = vector.shape_cast %52 : vector<1x8x864xf32> to vector<8x864xf32>
    %54 = vector.extract_strided_slice %53 {offsets = [0, 34], sizes = [8, 512], strides = [1, 1]} : vector<8x864xf32> to vector<8x512xf32>
    %c104 = arith.constant 104 : index
    %c0_55 = arith.constant 0 : index
    %55 = vector.load %arg5[%c104, %c0_55] : memref<968x512xf32, #tpu.memory_space<vmem>>, vector<8x512xf32>
    tpu.vector_store %arg5[%c104, %c0_55], %54 {strides = array<i32>} : memref<968x512xf32, #tpu.memory_space<vmem>>, vector<8x512xf32>,
    %c0_56 = arith.constant 0 : index
    %c0_57 = arith.constant 0 : index
    %c0_58 = arith.constant 0 : index
    %56 = vector.load %arg1[%c0_56, %c0_57, %c0_58] : memref<1x8x864xf32, #tpu.memory_space<vmem>>, vector<1x8x864xf32>
    %57 = vector.shape_cast %56 : vector<1x8x864xf32> to vector<8x864xf32>
    %58 = vector.extract_strided_slice %57 {offsets = [0, 35], sizes = [8, 512], strides = [1, 1]} : vector<8x864xf32> to vector<8x512xf32>
    %c112 = arith.constant 112 : index
    %c0_59 = arith.constant 0 : index
    %59 = vector.load %arg5[%c112, %c0_59] : memref<968x512xf32, #tpu.memory_space<vmem>>, vector<8x512xf32>
    tpu.vector_store %arg5[%c112, %c0_59], %58 {strides = array<i32>} : memref<968x512xf32, #tpu.memory_space<vmem>>, vector<8x512xf32>,
    %c0_60 = arith.constant 0 : index
    %c0_61 = arith.constant 0 : index
    %c0_62 = arith.constant 0 : index
    %60 = vector.load %arg1[%c0_60, %c0_61, %c0_62] : memref<1x8x864xf32, #tpu.memory_space<vmem>>, vector<1x8x864xf32>
    %61 = vector.shape_cast %60 : vector<1x8x864xf32> to vector<8x864xf32>
    %62 = vector.extract_strided_slice %61 {offsets = [0, 36], sizes = [8, 512], strides = [1, 1]} : vector<8x864xf32> to vector<8x512xf32>
    %c120 = arith.constant 120 : index
    %c0_63 = arith.constant 0 : index
    %63 = vector.load %arg5[%c120, %c0_63] : memref<968x512xf32, #tpu.memory_space<vmem>>, vector<8x512xf32>
    tpu.vector_store %arg5[%c120, %c0_63], %62 {strides = array<i32>} : memref<968x512xf32, #tpu.memory_space<vmem>>, vector<8x512xf32>,
    %c0_64 = arith.constant 0 : index
    %c0_65 = arith.constant 0 : index
    %c0_66 = arith.constant 0 : index
    %64 = vector.load %arg1[%c0_64, %c0_65, %c0_66] : memref<1x8x864xf32, #tpu.memory_space<vmem>>, vector<1x8x864xf32>
    %65 = vector.shape_cast %64 : vector<1x8x864xf32> to vector<8x864xf32>
    %66 = vector.extract_strided_slice %65 {offsets = [0, 37], sizes = [8, 512], strides = [1, 1]} : vector<8x864xf32> to vector<8x512xf32>
    %c128 = arith.constant 128 : index
    %c0_67 = arith.constant 0 : index
    %67 = vector.load %arg5[%c128, %c0_67] : memref<968x512xf32, #tpu.memory_space<vmem>>, vector<8x512xf32>
    tpu.vector_store %arg5[%c128, %c0_67], %66 {strides = array<i32>} : memref<968x512xf32, #tpu.memory_space<vmem>>, vector<8x512xf32>,
    %c0_68 = arith.constant 0 : index
    %c0_69 = arith.constant 0 : index
    %c0_70 = arith.constant 0 : index
    %68 = vector.load %arg1[%c0_68, %c0_69, %c0_70] : memref<1x8x864xf32, #tpu.memory_space<vmem>>, vector<1x8x864xf32>
    %69 = vector.shape_cast %68 : vector<1x8x864xf32> to vector<8x864xf32>
    %70 = vector.extract_strided_slice %69 {offsets = [0, 38], sizes = [8, 512], strides = [1, 1]} : vector<8x864xf32> to vector<8x512xf32>
    %c136 = arith.constant 136 : index
    %c0_71 = arith.constant 0 : index
    %71 = vector.load %arg5[%c136, %c0_71] : memref<968x512xf32, #tpu.memory_space<vmem>>, vector<8x512xf32>
    tpu.vector_store %arg5[%c136, %c0_71], %70 {strides = array<i32>} : memref<968x512xf32, #tpu.memory_space<vmem>>, vector<8x512xf32>,
    %c0_72 = arith.constant 0 : index
    %c0_73 = arith.constant 0 : index
    %c0_74 = arith.constant 0 : index
    %72 = vector.load %arg1[%c0_72, %c0_73, %c0_74] : memref<1x8x864xf32, #tpu.memory_space<vmem>>, vector<1x8x864xf32>
    %73 = vector.shape_cast %72 : vector<1x8x864xf32> to vector<8x864xf32>
    %74 = vector.extract_strided_slice %73 {offsets = [0, 39], sizes = [8, 512], strides = [1, 1]} : vector<8x864xf32> to vector<8x512xf32>
    %c144 = arith.constant 144 : index
    %c0_75 = arith.constant 0 : index
    %75 = vector.load %arg5[%c144, %c0_75] : memref<968x512xf32, #tpu.memory_space<vmem>>, vector<8x512xf32>
    tpu.vector_store %arg5[%c144, %c0_75], %74 {strides = array<i32>} : memref<968x512xf32, #tpu.memory_space<vmem>>, vector<8x512xf32>,
    %c0_76 = arith.constant 0 : index
    %c0_77 = arith.constant 0 : index
    %c0_78 = arith.constant 0 : index
    %76 = vector.load %arg1[%c0_76, %c0_77, %c0_78] : memref<1x8x864xf32, #tpu.memory_space<vmem>>, vector<1x8x864xf32>
    %77 = vector.shape_cast %76 : vector<1x8x864xf32> to vector<8x864xf32>
    %78 = vector.extract_strided_slice %77 {offsets = [0, 40], sizes = [8, 512], strides = [1, 1]} : vector<8x864xf32> to vector<8x512xf32>
    %c152 = arith.constant 152 : index
    %c0_79 = arith.constant 0 : index
    %79 = vector.load %arg5[%c152, %c0_79] : memref<968x512xf32, #tpu.memory_space<vmem>>, vector<8x512xf32>
    tpu.vector_store %arg5[%c152, %c0_79], %78 {strides = array<i32>} : memref<968x512xf32, #tpu.memory_space<vmem>>, vector<8x512xf32>,
    %c0_80 = arith.constant 0 : index
    %c0_81 = arith.constant 0 : index
    %c0_82 = arith.constant 0 : index
    %80 = vector.load %arg1[%c0_80, %c0_81, %c0_82] : memref<1x8x864xf32, #tpu.memory_space<vmem>>, vector<1x8x864xf32>
    %81 = vector.shape_cast %80 : vector<1x8x864xf32> to vector<8x864xf32>
    %82 = vector.extract_strided_slice %81 {offsets = [0, 41], sizes = [8, 512], strides = [1, 1]} : vector<8x864xf32> to vector<8x512xf32>
    %c160 = arith.constant 160 : index
    %c0_83 = arith.constant 0 : index
    %83 = vector.load %arg5[%c160, %c0_83] : memref<968x512xf32, #tpu.memory_space<vmem>>, vector<8x512xf32>
    tpu.vector_store %arg5[%c160, %c0_83], %82 {strides = array<i32>} : memref<968x512xf32, #tpu.memory_space<vmem>>, vector<8x512xf32>,
    %c0_84 = arith.constant 0 : index
    %c0_85 = arith.constant 0 : index
    %c0_86 = arith.constant 0 : index
    %84 = vector.load %arg1[%c0_84, %c0_85, %c0_86] : memref<1x8x864xf32, #tpu.memory_space<vmem>>, vector<1x8x864xf32>
    %85 = vector.shape_cast %84 : vector<1x8x864xf32> to vector<8x864xf32>
    %86 = vector.extract_strided_slice %85 {offsets = [0, 42], sizes = [8, 512], strides = [1, 1]} : vector<8x864xf32> to vector<8x512xf32>
    %c168 = arith.constant 168 : index
    %c0_87 = arith.constant 0 : index
    %87 = vector.load %arg5[%c168, %c0_87] : memref<968x512xf32, #tpu.memory_space<vmem>>, vector<8x512xf32>
    tpu.vector_store %arg5[%c168, %c0_87], %86 {strides = array<i32>} : memref<968x512xf32, #tpu.memory_space<vmem>>, vector<8x512xf32>,
    %c0_88 = arith.constant 0 : index
    %c0_89 = arith.constant 0 : index
    %c0_90 = arith.constant 0 : index
    %88 = vector.load %arg1[%c0_88, %c0_89, %c0_90] : memref<1x8x864xf32, #tpu.memory_space<vmem>>, vector<1x8x864xf32>
    %89 = vector.shape_cast %88 : vector<1x8x864xf32> to vector<8x864xf32>
    %90 = vector.extract_strided_slice %89 {offsets = [0, 64], sizes = [8, 512], strides = [1, 1]} : vector<8x864xf32> to vector<8x512xf32>
    %c176 = arith.constant 176 : index
    %c0_91 = arith.constant 0 : index
    %91 = vector.load %arg5[%c176, %c0_91] : memref<968x512xf32, #tpu.memory_space<vmem>>, vector<8x512xf32>
    tpu.vector_store %arg5[%c176, %c0_91], %90 {strides = array<i32>} : memref<968x512xf32, #tpu.memory_space<vmem>>, vector<8x512xf32>,
    %c0_92 = arith.constant 0 : index
    %c0_93 = arith.constant 0 : index
    %c0_94 = arith.constant 0 : index
    %92 = vector.load %arg1[%c0_92, %c0_93, %c0_94] : memref<1x8x864xf32, #tpu.memory_space<vmem>>, vector<1x8x864xf32>
    %93 = vector.shape_cast %92 : vector<1x8x864xf32> to vector<8x864xf32>
    %94 = vector.extract_strided_slice %93 {offsets = [0, 65], sizes = [8, 512], strides = [1, 1]} : vector<8x864xf32> to vector<8x512xf32>
    %c184 = arith.constant 184 : index
    %c0_95 = arith.constant 0 : index
    %95 = vector.load %arg5[%c184, %c0_95] : memref<968x512xf32, #tpu.memory_space<vmem>>, vector<8x512xf32>
    tpu.vector_store %arg5[%c184, %c0_95], %94 {strides = array<i32>} : memref<968x512xf32, #tpu.memory_space<vmem>>, vector<8x512xf32>,
    %c0_96 = arith.constant 0 : index
    %c0_97 = arith.constant 0 : index
    %c0_98 = arith.constant 0 : index
    %96 = vector.load %arg1[%c0_96, %c0_97, %c0_98] : memref<1x8x864xf32, #tpu.memory_space<vmem>>, vector<1x8x864xf32>
    %97 = vector.shape_cast %96 : vector<1x8x864xf32> to vector<8x864xf32>
    %98 = vector.extract_strided_slice %97 {offsets = [0, 66], sizes = [8, 512], strides = [1, 1]} : vector<8x864xf32> to vector<8x512xf32>
    %c192 = arith.constant 192 : index
    %c0_99 = arith.constant 0 : index
    %99 = vector.load %arg5[%c192, %c0_99] : memref<968x512xf32, #tpu.memory_space<vmem>>, vector<8x512xf32>
    tpu.vector_store %arg5[%c192, %c0_99], %98 {strides = array<i32>} : memref<968x512xf32, #tpu.memory_space<vmem>>, vector<8x512xf32>,
    %c0_100 = arith.constant 0 : index
    %c0_101 = arith.constant 0 : index
    %c0_102 = arith.constant 0 : index
    %100 = vector.load %arg1[%c0_100, %c0_101, %c0_102] : memref<1x8x864xf32, #tpu.memory_space<vmem>>, vector<1x8x864xf32>
    %101 = vector.shape_cast %100 : vector<1x8x864xf32> to vector<8x864xf32>
    %102 = vector.extract_strided_slice %101 {offsets = [0, 67], sizes = [8, 512], strides = [1, 1]} : vector<8x864xf32> to vector<8x512xf32>
    %c200 = arith.constant 200 : index
    %c0_103 = arith.constant 0 : index
    %103 = vector.load %arg5[%c200, %c0_103] : memref<968x512xf32, #tpu.memory_space<vmem>>, vector<8x512xf32>
    tpu.vector_store %arg5[%c200, %c0_103], %102 {strides = array<i32>} : memref<968x512xf32, #tpu.memory_space<vmem>>, vector<8x512xf32>,
    %c0_104 = arith.constant 0 : index
    %c0_105 = arith.constant 0 : index
    %c0_106 = arith.constant 0 : index
    %104 = vector.load %arg1[%c0_104, %c0_105, %c0_106] : memref<1x8x864xf32, #tpu.memory_space<vmem>>, vector<1x8x864xf32>
    %105 = vector.shape_cast %104 : vector<1x8x864xf32> to vector<8x864xf32>
    %106 = vector.extract_strided_slice %105 {offsets = [0, 68], sizes = [8, 512], strides = [1, 1]} : vector<8x864xf32> to vector<8x512xf32>
    %c208 = arith.constant 208 : index
    %c0_107 = arith.constant 0 : index
    %107 = vector.load %arg5[%c208, %c0_107] : memref<968x512xf32, #tpu.memory_space<vmem>>, vector<8x512xf32>
    tpu.vector_store %arg5[%c208, %c0_107], %106 {strides = array<i32>} : memref<968x512xf32, #tpu.memory_space<vmem>>, vector<8x512xf32>,
    %c0_108 = arith.constant 0 : index
    %c0_109 = arith.constant 0 : index
    %c0_110 = arith.constant 0 : index
    %108 = vector.load %arg1[%c0_108, %c0_109, %c0_110] : memref<1x8x864xf32, #tpu.memory_space<vmem>>, vector<1x8x864xf32>
    %109 = vector.shape_cast %108 : vector<1x8x864xf32> to vector<8x864xf32>
    %110 = vector.extract_strided_slice %109 {offsets = [0, 69], sizes = [8, 512], strides = [1, 1]} : vector<8x864xf32> to vector<8x512xf32>
    %c216 = arith.constant 216 : index
    %c0_111 = arith.constant 0 : index
    %111 = vector.load %arg5[%c216, %c0_111] : memref<968x512xf32, #tpu.memory_space<vmem>>, vector<8x512xf32>
    tpu.vector_store %arg5[%c216, %c0_111], %110 {strides = array<i32>} : memref<968x512xf32, #tpu.memory_space<vmem>>, vector<8x512xf32>,
    %c0_112 = arith.constant 0 : index
    %c0_113 = arith.constant 0 : index
    %c0_114 = arith.constant 0 : index
    %112 = vector.load %arg1[%c0_112, %c0_113, %c0_114] : memref<1x8x864xf32, #tpu.memory_space<vmem>>, vector<1x8x864xf32>
    %113 = vector.shape_cast %112 : vector<1x8x864xf32> to vector<8x864xf32>
    %114 = vector.extract_strided_slice %113 {offsets = [0, 70], sizes = [8, 512], strides = [1, 1]} : vector<8x864xf32> to vector<8x512xf32>
    %c224 = arith.constant 224 : index
    %c0_115 = arith.constant 0 : index
    %115 = vector.load %arg5[%c224, %c0_115] : memref<968x512xf32, #tpu.memory_space<vmem>>, vector<8x512xf32>
    tpu.vector_store %arg5[%c224, %c0_115], %114 {strides = array<i32>} : memref<968x512xf32, #tpu.memory_space<vmem>>, vector<8x512xf32>,
    %c0_116 = arith.constant 0 : index
    %c0_117 = arith.constant 0 : index
    %c0_118 = arith.constant 0 : index
    %116 = vector.load %arg1[%c0_116, %c0_117, %c0_118] : memref<1x8x864xf32, #tpu.memory_space<vmem>>, vector<1x8x864xf32>
    %117 = vector.shape_cast %116 : vector<1x8x864xf32> to vector<8x864xf32>
    %118 = vector.extract_strided_slice %117 {offsets = [0, 71], sizes = [8, 512], strides = [1, 1]} : vector<8x864xf32> to vector<8x512xf32>
    %c232 = arith.constant 232 : index
    %c0_119 = arith.constant 0 : index
    %119 = vector.load %arg5[%c232, %c0_119] : memref<968x512xf32, #tpu.memory_space<vmem>>, vector<8x512xf32>
    tpu.vector_store %arg5[%c232, %c0_119], %118 {strides = array<i32>} : memref<968x512xf32, #tpu.memory_space<vmem>>, vector<8x512xf32>,
    %c0_120 = arith.constant 0 : index
    %c0_121 = arith.constant 0 : index
    %c0_122 = arith.constant 0 : index
    %120 = vector.load %arg1[%c0_120, %c0_121, %c0_122] : memref<1x8x864xf32, #tpu.memory_space<vmem>>, vector<1x8x864xf32>
    %121 = vector.shape_cast %120 : vector<1x8x864xf32> to vector<8x864xf32>
    %122 = vector.extract_strided_slice %121 {offsets = [0, 72], sizes = [8, 512], strides = [1, 1]} : vector<8x864xf32> to vector<8x512xf32>
    %c240 = arith.constant 240 : index
    %c0_123 = arith.constant 0 : index
    %123 = vector.load %arg5[%c240, %c0_123] : memref<968x512xf32, #tpu.memory_space<vmem>>, vector<8x512xf32>
    tpu.vector_store %arg5[%c240, %c0_123], %122 {strides = array<i32>} : memref<968x512xf32, #tpu.memory_space<vmem>>, vector<8x512xf32>,
    %c0_124 = arith.constant 0 : index
    %c0_125 = arith.constant 0 : index
    %c0_126 = arith.constant 0 : index
    %124 = vector.load %arg1[%c0_124, %c0_125, %c0_126] : memref<1x8x864xf32, #tpu.memory_space<vmem>>, vector<1x8x864xf32>
    %125 = vector.shape_cast %124 : vector<1x8x864xf32> to vector<8x864xf32>
    %126 = vector.extract_strided_slice %125 {offsets = [0, 73], sizes = [8, 512], strides = [1, 1]} : vector<8x864xf32> to vector<8x512xf32>
    %c248 = arith.constant 248 : index
    %c0_127 = arith.constant 0 : index
    %127 = vector.load %arg5[%c248, %c0_127] : memref<968x512xf32, #tpu.memory_space<vmem>>, vector<8x512xf32>
    tpu.vector_store %arg5[%c248, %c0_127], %126 {strides = array<i32>} : memref<968x512xf32, #tpu.memory_space<vmem>>, vector<8x512xf32>,
    %c0_128 = arith.constant 0 : index
    %c0_129 = arith.constant 0 : index
    %c0_130 = arith.constant 0 : index
    %128 = vector.load %arg1[%c0_128, %c0_129, %c0_130] : memref<1x8x864xf32, #tpu.memory_space<vmem>>, vector<1x8x864xf32>
    %129 = vector.shape_cast %128 : vector<1x8x864xf32> to vector<8x864xf32>
    %130 = vector.extract_strided_slice %129 {offsets = [0, 74], sizes = [8, 512], strides = [1, 1]} : vector<8x864xf32> to vector<8x512xf32>
    %c256 = arith.constant 256 : index
    %c0_131 = arith.constant 0 : index
    %131 = vector.load %arg5[%c256, %c0_131] : memref<968x512xf32, #tpu.memory_space<vmem>>, vector<8x512xf32>
    tpu.vector_store %arg5[%c256, %c0_131], %130 {strides = array<i32>} : memref<968x512xf32, #tpu.memory_space<vmem>>, vector<8x512xf32>,
    %c0_132 = arith.constant 0 : index
    %c0_133 = arith.constant 0 : index
    %c0_134 = arith.constant 0 : index
    %132 = vector.load %arg1[%c0_132, %c0_133, %c0_134] : memref<1x8x864xf32, #tpu.memory_space<vmem>>, vector<1x8x864xf32>
    %133 = vector.shape_cast %132 : vector<1x8x864xf32> to vector<8x864xf32>
    %134 = vector.extract_strided_slice %133 {offsets = [0, 96], sizes = [8, 512], strides = [1, 1]} : vector<8x864xf32> to vector<8x512xf32>
    %c264 = arith.constant 264 : index
    %c0_135 = arith.constant 0 : index
    %135 = vector.load %arg5[%c264, %c0_135] : memref<968x512xf32, #tpu.memory_space<vmem>>, vector<8x512xf32>
    tpu.vector_store %arg5[%c264, %c0_135], %134 {strides = array<i32>} : memref<968x512xf32, #tpu.memory_space<vmem>>, vector<8x512xf32>,
    %c0_136 = arith.constant 0 : index
    %c0_137 = arith.constant 0 : index
    %c0_138 = arith.constant 0 : index
    %136 = vector.load %arg1[%c0_136, %c0_137, %c0_138] : memref<1x8x864xf32, #tpu.memory_space<vmem>>, vector<1x8x864xf32>
    %137 = vector.shape_cast %136 : vector<1x8x864xf32> to vector<8x864xf32>
    %138 = vector.extract_strided_slice %137 {offsets = [0, 97], sizes = [8, 512], strides = [1, 1]} : vector<8x864xf32> to vector<8x512xf32>
    %c272 = arith.constant 272 : index
    %c0_139 = arith.constant 0 : index
    %139 = vector.load %arg5[%c272, %c0_139] : memref<968x512xf32, #tpu.memory_space<vmem>>, vector<8x512xf32>
    tpu.vector_store %arg5[%c272, %c0_139], %138 {strides = array<i32>} : memref<968x512xf32, #tpu.memory_space<vmem>>, vector<8x512xf32>,
    %c0_140 = arith.constant 0 : index
    %c0_141 = arith.constant 0 : index
    %c0_142 = arith.constant 0 : index
    %140 = vector.load %arg1[%c0_140, %c0_141, %c0_142] : memref<1x8x864xf32, #tpu.memory_space<vmem>>, vector<1x8x864xf32>
    %141 = vector.shape_cast %140 : vector<1x8x864xf32> to vector<8x864xf32>
    %142 = vector.extract_strided_slice %141 {offsets = [0, 98], sizes = [8, 512], strides = [1, 1]} : vector<8x864xf32> to vector<8x512xf32>
    %c280 = arith.constant 280 : index
    %c0_143 = arith.constant 0 : index
    %143 = vector.load %arg5[%c280, %c0_143] : memref<968x512xf32, #tpu.memory_space<vmem>>, vector<8x512xf32>
    tpu.vector_store %arg5[%c280, %c0_143], %142 {strides = array<i32>} : memref<968x512xf32, #tpu.memory_space<vmem>>, vector<8x512xf32>,
    %c0_144 = arith.constant 0 : index
    %c0_145 = arith.constant 0 : index
    %c0_146 = arith.constant 0 : index
    %144 = vector.load %arg1[%c0_144, %c0_145, %c0_146] : memref<1x8x864xf32, #tpu.memory_space<vmem>>, vector<1x8x864xf32>
    %145 = vector.shape_cast %144 : vector<1x8x864xf32> to vector<8x864xf32>
    %146 = vector.extract_strided_slice %145 {offsets = [0, 99], sizes = [8, 512], strides = [1, 1]} : vector<8x864xf32> to vector<8x512xf32>
    %c288 = arith.constant 288 : index
    %c0_147 = arith.constant 0 : index
    %147 = vector.load %arg5[%c288, %c0_147] : memref<968x512xf32, #tpu.memory_space<vmem>>, vector<8x512xf32>
    tpu.vector_store %arg5[%c288, %c0_147], %146 {strides = array<i32>} : memref<968x512xf32, #tpu.memory_space<vmem>>, vector<8x512xf32>,
    %c0_148 = arith.constant 0 : index
    %c0_149 = arith.constant 0 : index
    %c0_150 = arith.constant 0 : index
    %148 = vector.load %arg1[%c0_148, %c0_149, %c0_150] : memref<1x8x864xf32, #tpu.memory_space<vmem>>, vector<1x8x864xf32>
    %149 = vector.shape_cast %148 : vector<1x8x864xf32> to vector<8x864xf32>
    %150 = vector.extract_strided_slice %149 {offsets = [0, 100], sizes = [8, 512], strides = [1, 1]} : vector<8x864xf32> to vector<8x512xf32>
    %c296 = arith.constant 296 : index
    %c0_151 = arith.constant 0 : index
    %151 = vector.load %arg5[%c296, %c0_151] : memref<968x512xf32, #tpu.memory_space<vmem>>, vector<8x512xf32>
    tpu.vector_store %arg5[%c296, %c0_151], %150 {strides = array<i32>} : memref<968x512xf32, #tpu.memory_space<vmem>>, vector<8x512xf32>,
    %c0_152 = arith.constant 0 : index
    %c0_153 = arith.constant 0 : index
    %c0_154 = arith.constant 0 : index
    %152 = vector.load %arg1[%c0_152, %c0_153, %c0_154] : memref<1x8x864xf32, #tpu.memory_space<vmem>>, vector<1x8x864xf32>
    %153 = vector.shape_cast %152 : vector<1x8x864xf32> to vector<8x864xf32>
    %154 = vector.extract_strided_slice %153 {offsets = [0, 101], sizes = [8, 512], strides = [1, 1]} : vector<8x864xf32> to vector<8x512xf32>
    %c304 = arith.constant 304 : index
    %c0_155 = arith.constant 0 : index
    %155 = vector.load %arg5[%c304, %c0_155] : memref<968x512xf32, #tpu.memory_space<vmem>>, vector<8x512xf32>
    tpu.vector_store %arg5[%c304, %c0_155], %154 {strides = array<i32>} : memref<968x512xf32, #tpu.memory_space<vmem>>, vector<8x512xf32>,
    %c0_156 = arith.constant 0 : index
    %c0_157 = arith.constant 0 : index
    %c0_158 = arith.constant 0 : index
    %156 = vector.load %arg1[%c0_156, %c0_157, %c0_158] : memref<1x8x864xf32, #tpu.memory_space<vmem>>, vector<1x8x864xf32>
    %157 = vector.shape_cast %156 : vector<1x8x864xf32> to vector<8x864xf32>
    %158 = vector.extract_strided_slice %157 {offsets = [0, 102], sizes = [8, 512], strides = [1, 1]} : vector<8x864xf32> to vector<8x512xf32>
    %c312 = arith.constant 312 : index
    %c0_159 = arith.constant 0 : index
    %159 = vector.load %arg5[%c312, %c0_159] : memref<968x512xf32, #tpu.memory_space<vmem>>, vector<8x512xf32>
    tpu.vector_store %arg5[%c312, %c0_159], %158 {strides = array<i32>} : memref<968x512xf32, #tpu.memory_space<vmem>>, vector<8x512xf32>,
    %c0_160 = arith.constant 0 : index
    %c0_161 = arith.constant 0 : index
    %c0_162 = arith.constant 0 : index
    %160 = vector.load %arg1[%c0_160, %c0_161, %c0_162] : memref<1x8x864xf32, #tpu.memory_space<vmem>>, vector<1x8x864xf32>
    %161 = vector.shape_cast %160 : vector<1x8x864xf32> to vector<8x864xf32>
    %162 = vector.extract_strided_slice %161 {offsets = [0, 103], sizes = [8, 512], strides = [1, 1]} : vector<8x864xf32> to vector<8x512xf32>
    %c320 = arith.constant 320 : index
    %c0_163 = arith.constant 0 : index
    %163 = vector.load %arg5[%c320, %c0_163] : memref<968x512xf32, #tpu.memory_space<vmem>>, vector<8x512xf32>
    tpu.vector_store %arg5[%c320, %c0_163], %162 {strides = array<i32>} : memref<968x512xf32, #tpu.memory_space<vmem>>, vector<8x512xf32>,
    %c0_164 = arith.constant 0 : index
    %c0_165 = arith.constant 0 : index
    %c0_166 = arith.constant 0 : index
    %164 = vector.load %arg1[%c0_164, %c0_165, %c0_166] : memref<1x8x864xf32, #tpu.memory_space<vmem>>, vector<1x8x864xf32>
    %165 = vector.shape_cast %164 : vector<1x8x864xf32> to vector<8x864xf32>
    %166 = vector.extract_strided_slice %165 {offsets = [0, 104], sizes = [8, 512], strides = [1, 1]} : vector<8x864xf32> to vector<8x512xf32>
    %c328 = arith.constant 328 : index
    %c0_167 = arith.constant 0 : index
    %167 = vector.load %arg5[%c328, %c0_167] : memref<968x512xf32, #tpu.memory_space<vmem>>, vector<8x512xf32>
    tpu.vector_store %arg5[%c328, %c0_167], %166 {strides = array<i32>} : memref<968x512xf32, #tpu.memory_space<vmem>>, vector<8x512xf32>,
    %c0_168 = arith.constant 0 : index
    %c0_169 = arith.constant 0 : index
    %c0_170 = arith.constant 0 : index
    %168 = vector.load %arg1[%c0_168, %c0_169, %c0_170] : memref<1x8x864xf32, #tpu.memory_space<vmem>>, vector<1x8x864xf32>
    %169 = vector.shape_cast %168 : vector<1x8x864xf32> to vector<8x864xf32>
    %170 = vector.extract_strided_slice %169 {offsets = [0, 105], sizes = [8, 512], strides = [1, 1]} : vector<8x864xf32> to vector<8x512xf32>
    %c336 = arith.constant 336 : index
    %c0_171 = arith.constant 0 : index
    %171 = vector.load %arg5[%c336, %c0_171] : memref<968x512xf32, #tpu.memory_space<vmem>>, vector<8x512xf32>
    tpu.vector_store %arg5[%c336, %c0_171], %170 {strides = array<i32>} : memref<968x512xf32, #tpu.memory_space<vmem>>, vector<8x512xf32>,
    %c0_172 = arith.constant 0 : index
    %c0_173 = arith.constant 0 : index
    %c0_174 = arith.constant 0 : index
    %172 = vector.load %arg1[%c0_172, %c0_173, %c0_174] : memref<1x8x864xf32, #tpu.memory_space<vmem>>, vector<1x8x864xf32>
    %173 = vector.shape_cast %172 : vector<1x8x864xf32> to vector<8x864xf32>
    %174 = vector.extract_strided_slice %173 {offsets = [0, 106], sizes = [8, 512], strides = [1, 1]} : vector<8x864xf32> to vector<8x512xf32>
    %c344 = arith.constant 344 : index
    %c0_175 = arith.constant 0 : index
    %175 = vector.load %arg5[%c344, %c0_175] : memref<968x512xf32, #tpu.memory_space<vmem>>, vector<8x512xf32>
    tpu.vector_store %arg5[%c344, %c0_175], %174 {strides = array<i32>} : memref<968x512xf32, #tpu.memory_space<vmem>>, vector<8x512xf32>,
    %c0_176 = arith.constant 0 : index
    %c0_177 = arith.constant 0 : index
    %c0_178 = arith.constant 0 : index
    %176 = vector.load %arg1[%c0_176, %c0_177, %c0_178] : memref<1x8x864xf32, #tpu.memory_space<vmem>>, vector<1x8x864xf32>
    %177 = vector.shape_cast %176 : vector<1x8x864xf32> to vector<8x864xf32>
    %178 = vector.extract_strided_slice %177 {offsets = [0, 128], sizes = [8, 512], strides = [1, 1]} : vector<8x864xf32> to vector<8x512xf32>
    %c352 = arith.constant 352 : index
    %c0_179 = arith.constant 0 : index
    %179 = vector.load %arg5[%c352, %c0_179] : memref<968x512xf32, #tpu.memory_space<vmem>>, vector<8x512xf32>
    tpu.vector_store %arg5[%c352, %c0_179], %178 {strides = array<i32>} : memref<968x512xf32, #tpu.memory_space<vmem>>, vector<8x512xf32>,
    %c0_180 = arith.constant 0 : index
    %c0_181 = arith.constant 0 : index
    %c0_182 = arith.constant 0 : index
    %180 = vector.load %arg1[%c0_180, %c0_181, %c0_182] : memref<1x8x864xf32, #tpu.memory_space<vmem>>, vector<1x8x864xf32>
    %181 = vector.shape_cast %180 : vector<1x8x864xf32> to vector<8x864xf32>
    %182 = vector.extract_strided_slice %181 {offsets = [0, 129], sizes = [8, 512], strides = [1, 1]} : vector<8x864xf32> to vector<8x512xf32>
    %c360 = arith.constant 360 : index
    %c0_183 = arith.constant 0 : index
    %183 = vector.load %arg5[%c360, %c0_183] : memref<968x512xf32, #tpu.memory_space<vmem>>, vector<8x512xf32>
    tpu.vector_store %arg5[%c360, %c0_183], %182 {strides = array<i32>} : memref<968x512xf32, #tpu.memory_space<vmem>>, vector<8x512xf32>,
    %c0_184 = arith.constant 0 : index
    %c0_185 = arith.constant 0 : index
    %c0_186 = arith.constant 0 : index
    %184 = vector.load %arg1[%c0_184, %c0_185, %c0_186] : memref<1x8x864xf32, #tpu.memory_space<vmem>>, vector<1x8x864xf32>
    %185 = vector.shape_cast %184 : vector<1x8x864xf32> to vector<8x864xf32>
    %186 = vector.extract_strided_slice %185 {offsets = [0, 130], sizes = [8, 512], strides = [1, 1]} : vector<8x864xf32> to vector<8x512xf32>
    %c368 = arith.constant 368 : index
    %c0_187 = arith.constant 0 : index
    %187 = vector.load %arg5[%c368, %c0_187] : memref<968x512xf32, #tpu.memory_space<vmem>>, vector<8x512xf32>
    tpu.vector_store %arg5[%c368, %c0_187], %186 {strides = array<i32>} : memref<968x512xf32, #tpu.memory_space<vmem>>, vector<8x512xf32>,
    %c0_188 = arith.constant 0 : index
    %c0_189 = arith.constant 0 : index
    %c0_190 = arith.constant 0 : index
    %188 = vector.load %arg1[%c0_188, %c0_189, %c0_190] : memref<1x8x864xf32, #tpu.memory_space<vmem>>, vector<1x8x864xf32>
    %189 = vector.shape_cast %188 : vector<1x8x864xf32> to vector<8x864xf32>
    %190 = vector.extract_strided_slice %189 {offsets = [0, 131], sizes = [8, 512], strides = [1, 1]} : vector<8x864xf32> to vector<8x512xf32>
    %c376 = arith.constant 376 : index
    %c0_191 = arith.constant 0 : index
    %191 = vector.load %arg5[%c376, %c0_191] : memref<968x512xf32, #tpu.memory_space<vmem>>, vector<8x512xf32>
    tpu.vector_store %arg5[%c376, %c0_191], %190 {strides = array<i32>} : memref<968x512xf32, #tpu.memory_space<vmem>>, vector<8x512xf32>,
    %c0_192 = arith.constant 0 : index
    %c0_193 = arith.constant 0 : index
    %c0_194 = arith.constant 0 : index
    %192 = vector.load %arg1[%c0_192, %c0_193, %c0_194] : memref<1x8x864xf32, #tpu.memory_space<vmem>>, vector<1x8x864xf32>
    %193 = vector.shape_cast %192 : vector<1x8x864xf32> to vector<8x864xf32>
    %194 = vector.extract_strided_slice %193 {offsets = [0, 132], sizes = [8, 512], strides = [1, 1]} : vector<8x864xf32> to vector<8x512xf32>
    %c384 = arith.constant 384 : index
    %c0_195 = arith.constant 0 : index
    %195 = vector.load %arg5[%c384, %c0_195] : memref<968x512xf32, #tpu.memory_space<vmem>>, vector<8x512xf32>
    tpu.vector_store %arg5[%c384, %c0_195], %194 {strides = array<i32>} : memref<968x512xf32, #tpu.memory_space<vmem>>, vector<8x512xf32>,
    %c0_196 = arith.constant 0 : index
    %c0_197 = arith.constant 0 : index
    %c0_198 = arith.constant 0 : index
    %196 = vector.load %arg1[%c0_196, %c0_197, %c0_198] : memref<1x8x864xf32, #tpu.memory_space<vmem>>, vector<1x8x864xf32>
    %197 = vector.shape_cast %196 : vector<1x8x864xf32> to vector<8x864xf32>
    %198 = vector.extract_strided_slice %197 {offsets = [0, 133], sizes = [8, 512], strides = [1, 1]} : vector<8x864xf32> to vector<8x512xf32>
    %c392 = arith.constant 392 : index
    %c0_199 = arith.constant 0 : index
    %199 = vector.load %arg5[%c392, %c0_199] : memref<968x512xf32, #tpu.memory_space<vmem>>, vector<8x512xf32>
    tpu.vector_store %arg5[%c392, %c0_199], %198 {strides = array<i32>} : memref<968x512xf32, #tpu.memory_space<vmem>>, vector<8x512xf32>,
    %c0_200 = arith.constant 0 : index
    %c0_201 = arith.constant 0 : index
    %c0_202 = arith.constant 0 : index
    %200 = vector.load %arg1[%c0_200, %c0_201, %c0_202] : memref<1x8x864xf32, #tpu.memory_space<vmem>>, vector<1x8x864xf32>
    %201 = vector.shape_cast %200 : vector<1x8x864xf32> to vector<8x864xf32>
    %202 = vector.extract_strided_slice %201 {offsets = [0, 134], sizes = [8, 512], strides = [1, 1]} : vector<8x864xf32> to vector<8x512xf32>
    %c400 = arith.constant 400 : index
    %c0_203 = arith.constant 0 : index
    %203 = vector.load %arg5[%c400, %c0_203] : memref<968x512xf32, #tpu.memory_space<vmem>>, vector<8x512xf32>
    tpu.vector_store %arg5[%c400, %c0_203], %202 {strides = array<i32>} : memref<968x512xf32, #tpu.memory_space<vmem>>, vector<8x512xf32>,
    %c0_204 = arith.constant 0 : index
    %c0_205 = arith.constant 0 : index
    %c0_206 = arith.constant 0 : index
    %204 = vector.load %arg1[%c0_204, %c0_205, %c0_206] : memref<1x8x864xf32, #tpu.memory_space<vmem>>, vector<1x8x864xf32>
    %205 = vector.shape_cast %204 : vector<1x8x864xf32> to vector<8x864xf32>
    %206 = vector.extract_strided_slice %205 {offsets = [0, 135], sizes = [8, 512], strides = [1, 1]} : vector<8x864xf32> to vector<8x512xf32>
    %c408 = arith.constant 408 : index
    %c0_207 = arith.constant 0 : index
    %207 = vector.load %arg5[%c408, %c0_207] : memref<968x512xf32, #tpu.memory_space<vmem>>, vector<8x512xf32>
    tpu.vector_store %arg5[%c408, %c0_207], %206 {strides = array<i32>} : memref<968x512xf32, #tpu.memory_space<vmem>>, vector<8x512xf32>,
    %c0_208 = arith.constant 0 : index
    %c0_209 = arith.constant 0 : index
    %c0_210 = arith.constant 0 : index
    %208 = vector.load %arg1[%c0_208, %c0_209, %c0_210] : memref<1x8x864xf32, #tpu.memory_space<vmem>>, vector<1x8x864xf32>
    %209 = vector.shape_cast %208 : vector<1x8x864xf32> to vector<8x864xf32>
    %210 = vector.extract_strided_slice %209 {offsets = [0, 136], sizes = [8, 512], strides = [1, 1]} : vector<8x864xf32> to vector<8x512xf32>
    %c416 = arith.constant 416 : index
    %c0_211 = arith.constant 0 : index
    %211 = vector.load %arg5[%c416, %c0_211] : memref<968x512xf32, #tpu.memory_space<vmem>>, vector<8x512xf32>
    tpu.vector_store %arg5[%c416, %c0_211], %210 {strides = array<i32>} : memref<968x512xf32, #tpu.memory_space<vmem>>, vector<8x512xf32>,
    %c0_212 = arith.constant 0 : index
    %c0_213 = arith.constant 0 : index
    %c0_214 = arith.constant 0 : index
    %212 = vector.load %arg1[%c0_212, %c0_213, %c0_214] : memref<1x8x864xf32, #tpu.memory_space<vmem>>, vector<1x8x864xf32>
    %213 = vector.shape_cast %212 : vector<1x8x864xf32> to vector<8x864xf32>
    %214 = vector.extract_strided_slice %213 {offsets = [0, 137], sizes = [8, 512], strides = [1, 1]} : vector<8x864xf32> to vector<8x512xf32>
    %c424 = arith.constant 424 : index
    %c0_215 = arith.constant 0 : index
    %215 = vector.load %arg5[%c424, %c0_215] : memref<968x512xf32, #tpu.memory_space<vmem>>, vector<8x512xf32>
    tpu.vector_store %arg5[%c424, %c0_215], %214 {strides = array<i32>} : memref<968x512xf32, #tpu.memory_space<vmem>>, vector<8x512xf32>,
    %c0_216 = arith.constant 0 : index
    %c0_217 = arith.constant 0 : index
    %c0_218 = arith.constant 0 : index
    %216 = vector.load %arg1[%c0_216, %c0_217, %c0_218] : memref<1x8x864xf32, #tpu.memory_space<vmem>>, vector<1x8x864xf32>
    %217 = vector.shape_cast %216 : vector<1x8x864xf32> to vector<8x864xf32>
    %218 = vector.extract_strided_slice %217 {offsets = [0, 138], sizes = [8, 512], strides = [1, 1]} : vector<8x864xf32> to vector<8x512xf32>
    %c432 = arith.constant 432 : index
    %c0_219 = arith.constant 0 : index
    %219 = vector.load %arg5[%c432, %c0_219] : memref<968x512xf32, #tpu.memory_space<vmem>>, vector<8x512xf32>
    tpu.vector_store %arg5[%c432, %c0_219], %218 {strides = array<i32>} : memref<968x512xf32, #tpu.memory_space<vmem>>, vector<8x512xf32>,
    %c0_220 = arith.constant 0 : index
    %c0_221 = arith.constant 0 : index
    %c0_222 = arith.constant 0 : index
    %220 = vector.load %arg1[%c0_220, %c0_221, %c0_222] : memref<1x8x864xf32, #tpu.memory_space<vmem>>, vector<1x8x864xf32>
    %221 = vector.shape_cast %220 : vector<1x8x864xf32> to vector<8x864xf32>
    %222 = vector.extract_strided_slice %221 {offsets = [0, 160], sizes = [8, 512], strides = [1, 1]} : vector<8x864xf32> to vector<8x512xf32>
    %c440 = arith.constant 440 : index
    %c0_223 = arith.constant 0 : index
    %223 = vector.load %arg5[%c440, %c0_223] : memref<968x512xf32, #tpu.memory_space<vmem>>, vector<8x512xf32>
    tpu.vector_store %arg5[%c440, %c0_223], %222 {strides = array<i32>} : memref<968x512xf32, #tpu.memory_space<vmem>>, vector<8x512xf32>,
    %c0_224 = arith.constant 0 : index
    %c0_225 = arith.constant 0 : index
    %c0_226 = arith.constant 0 : index
    %224 = vector.load %arg1[%c0_224, %c0_225, %c0_226] : memref<1x8x864xf32, #tpu.memory_space<vmem>>, vector<1x8x864xf32>
    %225 = vector.shape_cast %224 : vector<1x8x864xf32> to vector<8x864xf32>
    %226 = vector.extract_strided_slice %225 {offsets = [0, 161], sizes = [8, 512], strides = [1, 1]} : vector<8x864xf32> to vector<8x512xf32>
    %c448 = arith.constant 448 : index
    %c0_227 = arith.constant 0 : index
    %227 = vector.load %arg5[%c448, %c0_227] : memref<968x512xf32, #tpu.memory_space<vmem>>, vector<8x512xf32>
    tpu.vector_store %arg5[%c448, %c0_227], %226 {strides = array<i32>} : memref<968x512xf32, #tpu.memory_space<vmem>>, vector<8x512xf32>,
    %c0_228 = arith.constant 0 : index
    %c0_229 = arith.constant 0 : index
    %c0_230 = arith.constant 0 : index
    %228 = vector.load %arg1[%c0_228, %c0_229, %c0_230] : memref<1x8x864xf32, #tpu.memory_space<vmem>>, vector<1x8x864xf32>
    %229 = vector.shape_cast %228 : vector<1x8x864xf32> to vector<8x864xf32>
    %230 = vector.extract_strided_slice %229 {offsets = [0, 162], sizes = [8, 512], strides = [1, 1]} : vector<8x864xf32> to vector<8x512xf32>
    %c456 = arith.constant 456 : index
    %c0_231 = arith.constant 0 : index
    %231 = vector.load %arg5[%c456, %c0_231] : memref<968x512xf32, #tpu.memory_space<vmem>>, vector<8x512xf32>
    tpu.vector_store %arg5[%c456, %c0_231], %230 {strides = array<i32>} : memref<968x512xf32, #tpu.memory_space<vmem>>, vector<8x512xf32>,
    %c0_232 = arith.constant 0 : index
    %c0_233 = arith.constant 0 : index
    %c0_234 = arith.constant 0 : index
    %232 = vector.load %arg1[%c0_232, %c0_233, %c0_234] : memref<1x8x864xf32, #tpu.memory_space<vmem>>, vector<1x8x864xf32>
    %233 = vector.shape_cast %232 : vector<1x8x864xf32> to vector<8x864xf32>
    %234 = vector.extract_strided_slice %233 {offsets = [0, 163], sizes = [8, 512], strides = [1, 1]} : vector<8x864xf32> to vector<8x512xf32>
    %c464 = arith.constant 464 : index
    %c0_235 = arith.constant 0 : index
    %235 = vector.load %arg5[%c464, %c0_235] : memref<968x512xf32, #tpu.memory_space<vmem>>, vector<8x512xf32>
    tpu.vector_store %arg5[%c464, %c0_235], %234 {strides = array<i32>} : memref<968x512xf32, #tpu.memory_space<vmem>>, vector<8x512xf32>,
    %c0_236 = arith.constant 0 : index
    %c0_237 = arith.constant 0 : index
    %c0_238 = arith.constant 0 : index
    %236 = vector.load %arg1[%c0_236, %c0_237, %c0_238] : memref<1x8x864xf32, #tpu.memory_space<vmem>>, vector<1x8x864xf32>
    %237 = vector.shape_cast %236 : vector<1x8x864xf32> to vector<8x864xf32>
    %238 = vector.extract_strided_slice %237 {offsets = [0, 164], sizes = [8, 512], strides = [1, 1]} : vector<8x864xf32> to vector<8x512xf32>
    %c472 = arith.constant 472 : index
    %c0_239 = arith.constant 0 : index
    %239 = vector.load %arg5[%c472, %c0_239] : memref<968x512xf32, #tpu.memory_space<vmem>>, vector<8x512xf32>
    tpu.vector_store %arg5[%c472, %c0_239], %238 {strides = array<i32>} : memref<968x512xf32, #tpu.memory_space<vmem>>, vector<8x512xf32>,
    %c0_240 = arith.constant 0 : index
    %c0_241 = arith.constant 0 : index
    %c0_242 = arith.constant 0 : index
    %240 = vector.load %arg1[%c0_240, %c0_241, %c0_242] : memref<1x8x864xf32, #tpu.memory_space<vmem>>, vector<1x8x864xf32>
    %241 = vector.shape_cast %240 : vector<1x8x864xf32> to vector<8x864xf32>
    %242 = vector.extract_strided_slice %241 {offsets = [0, 165], sizes = [8, 512], strides = [1, 1]} : vector<8x864xf32> to vector<8x512xf32>
    %c480 = arith.constant 480 : index
    %c0_243 = arith.constant 0 : index
    %243 = vector.load %arg5[%c480, %c0_243] : memref<968x512xf32, #tpu.memory_space<vmem>>, vector<8x512xf32>
    tpu.vector_store %arg5[%c480, %c0_243], %242 {strides = array<i32>} : memref<968x512xf32, #tpu.memory_space<vmem>>, vector<8x512xf32>,
    %c0_244 = arith.constant 0 : index
    %c0_245 = arith.constant 0 : index
    %c0_246 = arith.constant 0 : index
    %244 = vector.load %arg1[%c0_244, %c0_245, %c0_246] : memref<1x8x864xf32, #tpu.memory_space<vmem>>, vector<1x8x864xf32>
    %245 = vector.shape_cast %244 : vector<1x8x864xf32> to vector<8x864xf32>
    %246 = vector.extract_strided_slice %245 {offsets = [0, 166], sizes = [8, 512], strides = [1, 1]} : vector<8x864xf32> to vector<8x512xf32>
    %c488 = arith.constant 488 : index
    %c0_247 = arith.constant 0 : index
    %247 = vector.load %arg5[%c488, %c0_247] : memref<968x512xf32, #tpu.memory_space<vmem>>, vector<8x512xf32>
    tpu.vector_store %arg5[%c488, %c0_247], %246 {strides = array<i32>} : memref<968x512xf32, #tpu.memory_space<vmem>>, vector<8x512xf32>,
    %c0_248 = arith.constant 0 : index
    %c0_249 = arith.constant 0 : index
    %c0_250 = arith.constant 0 : index
    %248 = vector.load %arg1[%c0_248, %c0_249, %c0_250] : memref<1x8x864xf32, #tpu.memory_space<vmem>>, vector<1x8x864xf32>
    %249 = vector.shape_cast %248 : vector<1x8x864xf32> to vector<8x864xf32>
    %250 = vector.extract_strided_slice %249 {offsets = [0, 167], sizes = [8, 512], strides = [1, 1]} : vector<8x864xf32> to vector<8x512xf32>
    %c496 = arith.constant 496 : index
    %c0_251 = arith.constant 0 : index
    %251 = vector.load %arg5[%c496, %c0_251] : memref<968x512xf32, #tpu.memory_space<vmem>>, vector<8x512xf32>
    tpu.vector_store %arg5[%c496, %c0_251], %250 {strides = array<i32>} : memref<968x512xf32, #tpu.memory_space<vmem>>, vector<8x512xf32>,
    %c0_252 = arith.constant 0 : index
    %c0_253 = arith.constant 0 : index
    %c0_254 = arith.constant 0 : index
    %252 = vector.load %arg1[%c0_252, %c0_253, %c0_254] : memref<1x8x864xf32, #tpu.memory_space<vmem>>, vector<1x8x864xf32>
    %253 = vector.shape_cast %252 : vector<1x8x864xf32> to vector<8x864xf32>
    %254 = vector.extract_strided_slice %253 {offsets = [0, 168], sizes = [8, 512], strides = [1, 1]} : vector<8x864xf32> to vector<8x512xf32>
    %c504 = arith.constant 504 : index
    %c0_255 = arith.constant 0 : index
    %255 = vector.load %arg5[%c504, %c0_255] : memref<968x512xf32, #tpu.memory_space<vmem>>, vector<8x512xf32>
    tpu.vector_store %arg5[%c504, %c0_255], %254 {strides = array<i32>} : memref<968x512xf32, #tpu.memory_space<vmem>>, vector<8x512xf32>,
    %c0_256 = arith.constant 0 : index
    %c0_257 = arith.constant 0 : index
    %c0_258 = arith.constant 0 : index
    %256 = vector.load %arg1[%c0_256, %c0_257, %c0_258] : memref<1x8x864xf32, #tpu.memory_space<vmem>>, vector<1x8x864xf32>
    %257 = vector.shape_cast %256 : vector<1x8x864xf32> to vector<8x864xf32>
    %258 = vector.extract_strided_slice %257 {offsets = [0, 169], sizes = [8, 512], strides = [1, 1]} : vector<8x864xf32> to vector<8x512xf32>
    %c512 = arith.constant 512 : index
    %c0_259 = arith.constant 0 : index
    %259 = vector.load %arg5[%c512, %c0_259] : memref<968x512xf32, #tpu.memory_space<vmem>>, vector<8x512xf32>
    tpu.vector_store %arg5[%c512, %c0_259], %258 {strides = array<i32>} : memref<968x512xf32, #tpu.memory_space<vmem>>, vector<8x512xf32>,
    %c0_260 = arith.constant 0 : index
    %c0_261 = arith.constant 0 : index
    %c0_262 = arith.constant 0 : index
    %260 = vector.load %arg1[%c0_260, %c0_261, %c0_262] : memref<1x8x864xf32, #tpu.memory_space<vmem>>, vector<1x8x864xf32>
    %261 = vector.shape_cast %260 : vector<1x8x864xf32> to vector<8x864xf32>
    %262 = vector.extract_strided_slice %261 {offsets = [0, 170], sizes = [8, 512], strides = [1, 1]} : vector<8x864xf32> to vector<8x512xf32>
    %c520 = arith.constant 520 : index
    %c0_263 = arith.constant 0 : index
    %263 = vector.load %arg5[%c520, %c0_263] : memref<968x512xf32, #tpu.memory_space<vmem>>, vector<8x512xf32>
    tpu.vector_store %arg5[%c520, %c0_263], %262 {strides = array<i32>} : memref<968x512xf32, #tpu.memory_space<vmem>>, vector<8x512xf32>,
    %c0_264 = arith.constant 0 : index
    %c0_265 = arith.constant 0 : index
    %c0_266 = arith.constant 0 : index
    %264 = vector.load %arg1[%c0_264, %c0_265, %c0_266] : memref<1x8x864xf32, #tpu.memory_space<vmem>>, vector<1x8x864xf32>
    %265 = vector.shape_cast %264 : vector<1x8x864xf32> to vector<8x864xf32>
    %266 = vector.extract_strided_slice %265 {offsets = [0, 192], sizes = [8, 512], strides = [1, 1]} : vector<8x864xf32> to vector<8x512xf32>
    %c528 = arith.constant 528 : index
    %c0_267 = arith.constant 0 : index
    %267 = vector.load %arg5[%c528, %c0_267] : memref<968x512xf32, #tpu.memory_space<vmem>>, vector<8x512xf32>
    tpu.vector_store %arg5[%c528, %c0_267], %266 {strides = array<i32>} : memref<968x512xf32, #tpu.memory_space<vmem>>, vector<8x512xf32>,
    %c0_268 = arith.constant 0 : index
    %c0_269 = arith.constant 0 : index
    %c0_270 = arith.constant 0 : index
    %268 = vector.load %arg1[%c0_268, %c0_269, %c0_270] : memref<1x8x864xf32, #tpu.memory_space<vmem>>, vector<1x8x864xf32>
    %269 = vector.shape_cast %268 : vector<1x8x864xf32> to vector<8x864xf32>
    %270 = vector.extract_strided_slice %269 {offsets = [0, 193], sizes = [8, 512], strides = [1, 1]} : vector<8x864xf32> to vector<8x512xf32>
    %c536 = arith.constant 536 : index
    %c0_271 = arith.constant 0 : index
    %271 = vector.load %arg5[%c536, %c0_271] : memref<968x512xf32, #tpu.memory_space<vmem>>, vector<8x512xf32>
    tpu.vector_store %arg5[%c536, %c0_271], %270 {strides = array<i32>} : memref<968x512xf32, #tpu.memory_space<vmem>>, vector<8x512xf32>,
    %c0_272 = arith.constant 0 : index
    %c0_273 = arith.constant 0 : index
    %c0_274 = arith.constant 0 : index
    %272 = vector.load %arg1[%c0_272, %c0_273, %c0_274] : memref<1x8x864xf32, #tpu.memory_space<vmem>>, vector<1x8x864xf32>
    %273 = vector.shape_cast %272 : vector<1x8x864xf32> to vector<8x864xf32>
    %274 = vector.extract_strided_slice %273 {offsets = [0, 194], sizes = [8, 512], strides = [1, 1]} : vector<8x864xf32> to vector<8x512xf32>
    %c544 = arith.constant 544 : index
    %c0_275 = arith.constant 0 : index
    %275 = vector.load %arg5[%c544, %c0_275] : memref<968x512xf32, #tpu.memory_space<vmem>>, vector<8x512xf32>
    tpu.vector_store %arg5[%c544, %c0_275], %274 {strides = array<i32>} : memref<968x512xf32, #tpu.memory_space<vmem>>, vector<8x512xf32>,
    %c0_276 = arith.constant 0 : index
    %c0_277 = arith.constant 0 : index
    %c0_278 = arith.constant 0 : index
    %276 = vector.load %arg1[%c0_276, %c0_277, %c0_278] : memref<1x8x864xf32, #tpu.memory_space<vmem>>, vector<1x8x864xf32>
    %277 = vector.shape_cast %276 : vector<1x8x864xf32> to vector<8x864xf32>
    %278 = vector.extract_strided_slice %277 {offsets = [0, 195], sizes = [8, 512], strides = [1, 1]} : vector<8x864xf32> to vector<8x512xf32>
    %c552 = arith.constant 552 : index
    %c0_279 = arith.constant 0 : index
    %279 = vector.load %arg5[%c552, %c0_279] : memref<968x512xf32, #tpu.memory_space<vmem>>, vector<8x512xf32>
    tpu.vector_store %arg5[%c552, %c0_279], %278 {strides = array<i32>} : memref<968x512xf32, #tpu.memory_space<vmem>>, vector<8x512xf32>,
    %c0_280 = arith.constant 0 : index
    %c0_281 = arith.constant 0 : index
    %c0_282 = arith.constant 0 : index
    %280 = vector.load %arg1[%c0_280, %c0_281, %c0_282] : memref<1x8x864xf32, #tpu.memory_space<vmem>>, vector<1x8x864xf32>
    %281 = vector.shape_cast %280 : vector<1x8x864xf32> to vector<8x864xf32>
    %282 = vector.extract_strided_slice %281 {offsets = [0, 196], sizes = [8, 512], strides = [1, 1]} : vector<8x864xf32> to vector<8x512xf32>
    %c560 = arith.constant 560 : index
    %c0_283 = arith.constant 0 : index
    %283 = vector.load %arg5[%c560, %c0_283] : memref<968x512xf32, #tpu.memory_space<vmem>>, vector<8x512xf32>
    tpu.vector_store %arg5[%c560, %c0_283], %282 {strides = array<i32>} : memref<968x512xf32, #tpu.memory_space<vmem>>, vector<8x512xf32>,
    %c0_284 = arith.constant 0 : index
    %c0_285 = arith.constant 0 : index
    %c0_286 = arith.constant 0 : index
    %284 = vector.load %arg1[%c0_284, %c0_285, %c0_286] : memref<1x8x864xf32, #tpu.memory_space<vmem>>, vector<1x8x864xf32>
    %285 = vector.shape_cast %284 : vector<1x8x864xf32> to vector<8x864xf32>
    %286 = vector.extract_strided_slice %285 {offsets = [0, 197], sizes = [8, 512], strides = [1, 1]} : vector<8x864xf32> to vector<8x512xf32>
    %c568 = arith.constant 568 : index
    %c0_287 = arith.constant 0 : index
    %287 = vector.load %arg5[%c568, %c0_287] : memref<968x512xf32, #tpu.memory_space<vmem>>, vector<8x512xf32>
    tpu.vector_store %arg5[%c568, %c0_287], %286 {strides = array<i32>} : memref<968x512xf32, #tpu.memory_space<vmem>>, vector<8x512xf32>,
    %c0_288 = arith.constant 0 : index
    %c0_289 = arith.constant 0 : index
    %c0_290 = arith.constant 0 : index
    %288 = vector.load %arg1[%c0_288, %c0_289, %c0_290] : memref<1x8x864xf32, #tpu.memory_space<vmem>>, vector<1x8x864xf32>
    %289 = vector.shape_cast %288 : vector<1x8x864xf32> to vector<8x864xf32>
    %290 = vector.extract_strided_slice %289 {offsets = [0, 198], sizes = [8, 512], strides = [1, 1]} : vector<8x864xf32> to vector<8x512xf32>
    %c576 = arith.constant 576 : index
    %c0_291 = arith.constant 0 : index
    %291 = vector.load %arg5[%c576, %c0_291] : memref<968x512xf32, #tpu.memory_space<vmem>>, vector<8x512xf32>
    tpu.vector_store %arg5[%c576, %c0_291], %290 {strides = array<i32>} : memref<968x512xf32, #tpu.memory_space<vmem>>, vector<8x512xf32>,
    %c0_292 = arith.constant 0 : index
    %c0_293 = arith.constant 0 : index
    %c0_294 = arith.constant 0 : index
    %292 = vector.load %arg1[%c0_292, %c0_293, %c0_294] : memref<1x8x864xf32, #tpu.memory_space<vmem>>, vector<1x8x864xf32>
    %293 = vector.shape_cast %292 : vector<1x8x864xf32> to vector<8x864xf32>
    %294 = vector.extract_strided_slice %293 {offsets = [0, 199], sizes = [8, 512], strides = [1, 1]} : vector<8x864xf32> to vector<8x512xf32>
    %c584 = arith.constant 584 : index
    %c0_295 = arith.constant 0 : index
    %295 = vector.load %arg5[%c584, %c0_295] : memref<968x512xf32, #tpu.memory_space<vmem>>, vector<8x512xf32>
    tpu.vector_store %arg5[%c584, %c0_295], %294 {strides = array<i32>} : memref<968x512xf32, #tpu.memory_space<vmem>>, vector<8x512xf32>,
    %c0_296 = arith.constant 0 : index
    %c0_297 = arith.constant 0 : index
    %c0_298 = arith.constant 0 : index
    %296 = vector.load %arg1[%c0_296, %c0_297, %c0_298] : memref<1x8x864xf32, #tpu.memory_space<vmem>>, vector<1x8x864xf32>
    %297 = vector.shape_cast %296 : vector<1x8x864xf32> to vector<8x864xf32>
    %298 = vector.extract_strided_slice %297 {offsets = [0, 200], sizes = [8, 512], strides = [1, 1]} : vector<8x864xf32> to vector<8x512xf32>
    %c592 = arith.constant 592 : index
    %c0_299 = arith.constant 0 : index
    %299 = vector.load %arg5[%c592, %c0_299] : memref<968x512xf32, #tpu.memory_space<vmem>>, vector<8x512xf32>
    tpu.vector_store %arg5[%c592, %c0_299], %298 {strides = array<i32>} : memref<968x512xf32, #tpu.memory_space<vmem>>, vector<8x512xf32>,
    %c0_300 = arith.constant 0 : index
    %c0_301 = arith.constant 0 : index
    %c0_302 = arith.constant 0 : index
    %300 = vector.load %arg1[%c0_300, %c0_301, %c0_302] : memref<1x8x864xf32, #tpu.memory_space<vmem>>, vector<1x8x864xf32>
    %301 = vector.shape_cast %300 : vector<1x8x864xf32> to vector<8x864xf32>
    %302 = vector.extract_strided_slice %301 {offsets = [0, 201], sizes = [8, 512], strides = [1, 1]} : vector<8x864xf32> to vector<8x512xf32>
    %c600 = arith.constant 600 : index
    %c0_303 = arith.constant 0 : index
    %303 = vector.load %arg5[%c600, %c0_303] : memref<968x512xf32, #tpu.memory_space<vmem>>, vector<8x512xf32>
    tpu.vector_store %arg5[%c600, %c0_303], %302 {strides = array<i32>} : memref<968x512xf32, #tpu.memory_space<vmem>>, vector<8x512xf32>,
    %c0_304 = arith.constant 0 : index
    %c0_305 = arith.constant 0 : index
    %c0_306 = arith.constant 0 : index
    %304 = vector.load %arg1[%c0_304, %c0_305, %c0_306] : memref<1x8x864xf32, #tpu.memory_space<vmem>>, vector<1x8x864xf32>
    %305 = vector.shape_cast %304 : vector<1x8x864xf32> to vector<8x864xf32>
    %306 = vector.extract_strided_slice %305 {offsets = [0, 202], sizes = [8, 512], strides = [1, 1]} : vector<8x864xf32> to vector<8x512xf32>
    %c608 = arith.constant 608 : index
    %c0_307 = arith.constant 0 : index
    %307 = vector.load %arg5[%c608, %c0_307] : memref<968x512xf32, #tpu.memory_space<vmem>>, vector<8x512xf32>
    tpu.vector_store %arg5[%c608, %c0_307], %306 {strides = array<i32>} : memref<968x512xf32, #tpu.memory_space<vmem>>, vector<8x512xf32>,
    %c0_308 = arith.constant 0 : index
    %c0_309 = arith.constant 0 : index
    %c0_310 = arith.constant 0 : index
    %308 = vector.load %arg1[%c0_308, %c0_309, %c0_310] : memref<1x8x864xf32, #tpu.memory_space<vmem>>, vector<1x8x864xf32>
    %309 = vector.shape_cast %308 : vector<1x8x864xf32> to vector<8x864xf32>
    %310 = vector.extract_strided_slice %309 {offsets = [0, 224], sizes = [8, 512], strides = [1, 1]} : vector<8x864xf32> to vector<8x512xf32>
    %c616 = arith.constant 616 : index
    %c0_311 = arith.constant 0 : index
    %311 = vector.load %arg5[%c616, %c0_311] : memref<968x512xf32, #tpu.memory_space<vmem>>, vector<8x512xf32>
    tpu.vector_store %arg5[%c616, %c0_311], %310 {strides = array<i32>} : memref<968x512xf32, #tpu.memory_space<vmem>>, vector<8x512xf32>,
    %c0_312 = arith.constant 0 : index
    %c0_313 = arith.constant 0 : index
    %c0_314 = arith.constant 0 : index
    %312 = vector.load %arg1[%c0_312, %c0_313, %c0_314] : memref<1x8x864xf32, #tpu.memory_space<vmem>>, vector<1x8x864xf32>
    %313 = vector.shape_cast %312 : vector<1x8x864xf32> to vector<8x864xf32>
    %314 = vector.extract_strided_slice %313 {offsets = [0, 225], sizes = [8, 512], strides = [1, 1]} : vector<8x864xf32> to vector<8x512xf32>
    %c624 = arith.constant 624 : index
    %c0_315 = arith.constant 0 : index
    %315 = vector.load %arg5[%c624, %c0_315] : memref<968x512xf32, #tpu.memory_space<vmem>>, vector<8x512xf32>
    tpu.vector_store %arg5[%c624, %c0_315], %314 {strides = array<i32>} : memref<968x512xf32, #tpu.memory_space<vmem>>, vector<8x512xf32>,
    %c0_316 = arith.constant 0 : index
    %c0_317 = arith.constant 0 : index
    %c0_318 = arith.constant 0 : index
    %316 = vector.load %arg1[%c0_316, %c0_317, %c0_318] : memref<1x8x864xf32, #tpu.memory_space<vmem>>, vector<1x8x864xf32>
    %317 = vector.shape_cast %316 : vector<1x8x864xf32> to vector<8x864xf32>
    %318 = vector.extract_strided_slice %317 {offsets = [0, 226], sizes = [8, 512], strides = [1, 1]} : vector<8x864xf32> to vector<8x512xf32>
    %c632 = arith.constant 632 : index
    %c0_319 = arith.constant 0 : index
    %319 = vector.load %arg5[%c632, %c0_319] : memref<968x512xf32, #tpu.memory_space<vmem>>, vector<8x512xf32>
    tpu.vector_store %arg5[%c632, %c0_319], %318 {strides = array<i32>} : memref<968x512xf32, #tpu.memory_space<vmem>>, vector<8x512xf32>,
    %c0_320 = arith.constant 0 : index
    %c0_321 = arith.constant 0 : index
    %c0_322 = arith.constant 0 : index
    %320 = vector.load %arg1[%c0_320, %c0_321, %c0_322] : memref<1x8x864xf32, #tpu.memory_space<vmem>>, vector<1x8x864xf32>
    %321 = vector.shape_cast %320 : vector<1x8x864xf32> to vector<8x864xf32>
    %322 = vector.extract_strided_slice %321 {offsets = [0, 227], sizes = [8, 512], strides = [1, 1]} : vector<8x864xf32> to vector<8x512xf32>
    %c640 = arith.constant 640 : index
    %c0_323 = arith.constant 0 : index
    %323 = vector.load %arg5[%c640, %c0_323] : memref<968x512xf32, #tpu.memory_space<vmem>>, vector<8x512xf32>
    tpu.vector_store %arg5[%c640, %c0_323], %322 {strides = array<i32>} : memref<968x512xf32, #tpu.memory_space<vmem>>, vector<8x512xf32>,
    %c0_324 = arith.constant 0 : index
    %c0_325 = arith.constant 0 : index
    %c0_326 = arith.constant 0 : index
    %324 = vector.load %arg1[%c0_324, %c0_325, %c0_326] : memref<1x8x864xf32, #tpu.memory_space<vmem>>, vector<1x8x864xf32>
    %325 = vector.shape_cast %324 : vector<1x8x864xf32> to vector<8x864xf32>
    %326 = vector.extract_strided_slice %325 {offsets = [0, 228], sizes = [8, 512], strides = [1, 1]} : vector<8x864xf32> to vector<8x512xf32>
    %c648 = arith.constant 648 : index
    %c0_327 = arith.constant 0 : index
    %327 = vector.load %arg5[%c648, %c0_327] : memref<968x512xf32, #tpu.memory_space<vmem>>, vector<8x512xf32>
    tpu.vector_store %arg5[%c648, %c0_327], %326 {strides = array<i32>} : memref<968x512xf32, #tpu.memory_space<vmem>>, vector<8x512xf32>,
    %c0_328 = arith.constant 0 : index
    %c0_329 = arith.constant 0 : index
    %c0_330 = arith.constant 0 : index
    %328 = vector.load %arg1[%c0_328, %c0_329, %c0_330] : memref<1x8x864xf32, #tpu.memory_space<vmem>>, vector<1x8x864xf32>
    %329 = vector.shape_cast %328 : vector<1x8x864xf32> to vector<8x864xf32>
    %330 = vector.extract_strided_slice %329 {offsets = [0, 229], sizes = [8, 512], strides = [1, 1]} : vector<8x864xf32> to vector<8x512xf32>
    %c656 = arith.constant 656 : index
    %c0_331 = arith.constant 0 : index
    %331 = vector.load %arg5[%c656, %c0_331] : memref<968x512xf32, #tpu.memory_space<vmem>>, vector<8x512xf32>
    tpu.vector_store %arg5[%c656, %c0_331], %330 {strides = array<i32>} : memref<968x512xf32, #tpu.memory_space<vmem>>, vector<8x512xf32>,
    %c0_332 = arith.constant 0 : index
    %c0_333 = arith.constant 0 : index
    %c0_334 = arith.constant 0 : index
    %332 = vector.load %arg1[%c0_332, %c0_333, %c0_334] : memref<1x8x864xf32, #tpu.memory_space<vmem>>, vector<1x8x864xf32>
    %333 = vector.shape_cast %332 : vector<1x8x864xf32> to vector<8x864xf32>
    %334 = vector.extract_strided_slice %333 {offsets = [0, 230], sizes = [8, 512], strides = [1, 1]} : vector<8x864xf32> to vector<8x512xf32>
    %c664 = arith.constant 664 : index
    %c0_335 = arith.constant 0 : index
    %335 = vector.load %arg5[%c664, %c0_335] : memref<968x512xf32, #tpu.memory_space<vmem>>, vector<8x512xf32>
    tpu.vector_store %arg5[%c664, %c0_335], %334 {strides = array<i32>} : memref<968x512xf32, #tpu.memory_space<vmem>>, vector<8x512xf32>,
    %c0_336 = arith.constant 0 : index
    %c0_337 = arith.constant 0 : index
    %c0_338 = arith.constant 0 : index
    %336 = vector.load %arg1[%c0_336, %c0_337, %c0_338] : memref<1x8x864xf32, #tpu.memory_space<vmem>>, vector<1x8x864xf32>
    %337 = vector.shape_cast %336 : vector<1x8x864xf32> to vector<8x864xf32>
    %338 = vector.extract_strided_slice %337 {offsets = [0, 231], sizes = [8, 512], strides = [1, 1]} : vector<8x864xf32> to vector<8x512xf32>
    %c672 = arith.constant 672 : index
    %c0_339 = arith.constant 0 : index
    %339 = vector.load %arg5[%c672, %c0_339] : memref<968x512xf32, #tpu.memory_space<vmem>>, vector<8x512xf32>
    tpu.vector_store %arg5[%c672, %c0_339], %338 {strides = array<i32>} : memref<968x512xf32, #tpu.memory_space<vmem>>, vector<8x512xf32>,
    %c0_340 = arith.constant 0 : index
    %c0_341 = arith.constant 0 : index
    %c0_342 = arith.constant 0 : index
    %340 = vector.load %arg1[%c0_340, %c0_341, %c0_342] : memref<1x8x864xf32, #tpu.memory_space<vmem>>, vector<1x8x864xf32>
    %341 = vector.shape_cast %340 : vector<1x8x864xf32> to vector<8x864xf32>
    %342 = vector.extract_strided_slice %341 {offsets = [0, 232], sizes = [8, 512], strides = [1, 1]} : vector<8x864xf32> to vector<8x512xf32>
    %c680 = arith.constant 680 : index
    %c0_343 = arith.constant 0 : index
    %343 = vector.load %arg5[%c680, %c0_343] : memref<968x512xf32, #tpu.memory_space<vmem>>, vector<8x512xf32>
    tpu.vector_store %arg5[%c680, %c0_343], %342 {strides = array<i32>} : memref<968x512xf32, #tpu.memory_space<vmem>>, vector<8x512xf32>,
    %c0_344 = arith.constant 0 : index
    %c0_345 = arith.constant 0 : index
    %c0_346 = arith.constant 0 : index
    %344 = vector.load %arg1[%c0_344, %c0_345, %c0_346] : memref<1x8x864xf32, #tpu.memory_space<vmem>>, vector<1x8x864xf32>
    %345 = vector.shape_cast %344 : vector<1x8x864xf32> to vector<8x864xf32>
    %346 = vector.extract_strided_slice %345 {offsets = [0, 233], sizes = [8, 512], strides = [1, 1]} : vector<8x864xf32> to vector<8x512xf32>
    %c688 = arith.constant 688 : index
    %c0_347 = arith.constant 0 : index
    %347 = vector.load %arg5[%c688, %c0_347] : memref<968x512xf32, #tpu.memory_space<vmem>>, vector<8x512xf32>
    tpu.vector_store %arg5[%c688, %c0_347], %346 {strides = array<i32>} : memref<968x512xf32, #tpu.memory_space<vmem>>, vector<8x512xf32>,
    %c0_348 = arith.constant 0 : index
    %c0_349 = arith.constant 0 : index
    %c0_350 = arith.constant 0 : index
    %348 = vector.load %arg1[%c0_348, %c0_349, %c0_350] : memref<1x8x864xf32, #tpu.memory_space<vmem>>, vector<1x8x864xf32>
    %349 = vector.shape_cast %348 : vector<1x8x864xf32> to vector<8x864xf32>
    %350 = vector.extract_strided_slice %349 {offsets = [0, 234], sizes = [8, 512], strides = [1, 1]} : vector<8x864xf32> to vector<8x512xf32>
    %c696 = arith.constant 696 : index
    %c0_351 = arith.constant 0 : index
    %351 = vector.load %arg5[%c696, %c0_351] : memref<968x512xf32, #tpu.memory_space<vmem>>, vector<8x512xf32>
    tpu.vector_store %arg5[%c696, %c0_351], %350 {strides = array<i32>} : memref<968x512xf32, #tpu.memory_space<vmem>>, vector<8x512xf32>,
    %c0_352 = arith.constant 0 : index
    %c0_353 = arith.constant 0 : index
    %c0_354 = arith.constant 0 : index
    %352 = vector.load %arg1[%c0_352, %c0_353, %c0_354] : memref<1x8x864xf32, #tpu.memory_space<vmem>>, vector<1x8x864xf32>
    %353 = vector.shape_cast %352 : vector<1x8x864xf32> to vector<8x864xf32>
    %354 = vector.extract_strided_slice %353 {offsets = [0, 256], sizes = [8, 512], strides = [1, 1]} : vector<8x864xf32> to vector<8x512xf32>
    %c704 = arith.constant 704 : index
    %c0_355 = arith.constant 0 : index
    %355 = vector.load %arg5[%c704, %c0_355] : memref<968x512xf32, #tpu.memory_space<vmem>>, vector<8x512xf32>
    tpu.vector_store %arg5[%c704, %c0_355], %354 {strides = array<i32>} : memref<968x512xf32, #tpu.memory_space<vmem>>, vector<8x512xf32>,
    %c0_356 = arith.constant 0 : index
    %c0_357 = arith.constant 0 : index
    %c0_358 = arith.constant 0 : index
    %356 = vector.load %arg1[%c0_356, %c0_357, %c0_358] : memref<1x8x864xf32, #tpu.memory_space<vmem>>, vector<1x8x864xf32>
    %357 = vector.shape_cast %356 : vector<1x8x864xf32> to vector<8x864xf32>
    %358 = vector.extract_strided_slice %357 {offsets = [0, 257], sizes = [8, 512], strides = [1, 1]} : vector<8x864xf32> to vector<8x512xf32>
    %c712 = arith.constant 712 : index
    %c0_359 = arith.constant 0 : index
    %359 = vector.load %arg5[%c712, %c0_359] : memref<968x512xf32, #tpu.memory_space<vmem>>, vector<8x512xf32>
    tpu.vector_store %arg5[%c712, %c0_359], %358 {strides = array<i32>} : memref<968x512xf32, #tpu.memory_space<vmem>>, vector<8x512xf32>,
    %c0_360 = arith.constant 0 : index
    %c0_361 = arith.constant 0 : index
    %c0_362 = arith.constant 0 : index
    %360 = vector.load %arg1[%c0_360, %c0_361, %c0_362] : memref<1x8x864xf32, #tpu.memory_space<vmem>>, vector<1x8x864xf32>
    %361 = vector.shape_cast %360 : vector<1x8x864xf32> to vector<8x864xf32>
    %362 = vector.extract_strided_slice %361 {offsets = [0, 258], sizes = [8, 512], strides = [1, 1]} : vector<8x864xf32> to vector<8x512xf32>
    %c720 = arith.constant 720 : index
    %c0_363 = arith.constant 0 : index
    %363 = vector.load %arg5[%c720, %c0_363] : memref<968x512xf32, #tpu.memory_space<vmem>>, vector<8x512xf32>
    tpu.vector_store %arg5[%c720, %c0_363], %362 {strides = array<i32>} : memref<968x512xf32, #tpu.memory_space<vmem>>, vector<8x512xf32>,
    %c0_364 = arith.constant 0 : index
    %c0_365 = arith.constant 0 : index
    %c0_366 = arith.constant 0 : index
    %364 = vector.load %arg1[%c0_364, %c0_365, %c0_366] : memref<1x8x864xf32, #tpu.memory_space<vmem>>, vector<1x8x864xf32>
    %365 = vector.shape_cast %364 : vector<1x8x864xf32> to vector<8x864xf32>
    %366 = vector.extract_strided_slice %365 {offsets = [0, 259], sizes = [8, 512], strides = [1, 1]} : vector<8x864xf32> to vector<8x512xf32>
    %c728 = arith.constant 728 : index
    %c0_367 = arith.constant 0 : index
    %367 = vector.load %arg5[%c728, %c0_367] : memref<968x512xf32, #tpu.memory_space<vmem>>, vector<8x512xf32>
    tpu.vector_store %arg5[%c728, %c0_367], %366 {strides = array<i32>} : memref<968x512xf32, #tpu.memory_space<vmem>>, vector<8x512xf32>,
    %c0_368 = arith.constant 0 : index
    %c0_369 = arith.constant 0 : index
    %c0_370 = arith.constant 0 : index
    %368 = vector.load %arg1[%c0_368, %c0_369, %c0_370] : memref<1x8x864xf32, #tpu.memory_space<vmem>>, vector<1x8x864xf32>
    %369 = vector.shape_cast %368 : vector<1x8x864xf32> to vector<8x864xf32>
    %370 = vector.extract_strided_slice %369 {offsets = [0, 260], sizes = [8, 512], strides = [1, 1]} : vector<8x864xf32> to vector<8x512xf32>
    %c736 = arith.constant 736 : index
    %c0_371 = arith.constant 0 : index
    %371 = vector.load %arg5[%c736, %c0_371] : memref<968x512xf32, #tpu.memory_space<vmem>>, vector<8x512xf32>
    tpu.vector_store %arg5[%c736, %c0_371], %370 {strides = array<i32>} : memref<968x512xf32, #tpu.memory_space<vmem>>, vector<8x512xf32>,
    %c0_372 = arith.constant 0 : index
    %c0_373 = arith.constant 0 : index
    %c0_374 = arith.constant 0 : index
    %372 = vector.load %arg1[%c0_372, %c0_373, %c0_374] : memref<1x8x864xf32, #tpu.memory_space<vmem>>, vector<1x8x864xf32>
    %373 = vector.shape_cast %372 : vector<1x8x864xf32> to vector<8x864xf32>
    %374 = vector.extract_strided_slice %373 {offsets = [0, 261], sizes = [8, 512], strides = [1, 1]} : vector<8x864xf32> to vector<8x512xf32>
    %c744 = arith.constant 744 : index
    %c0_375 = arith.constant 0 : index
    %375 = vector.load %arg5[%c744, %c0_375] : memref<968x512xf32, #tpu.memory_space<vmem>>, vector<8x512xf32>
    tpu.vector_store %arg5[%c744, %c0_375], %374 {strides = array<i32>} : memref<968x512xf32, #tpu.memory_space<vmem>>, vector<8x512xf32>,
    %c0_376 = arith.constant 0 : index
    %c0_377 = arith.constant 0 : index
    %c0_378 = arith.constant 0 : index
    %376 = vector.load %arg1[%c0_376, %c0_377, %c0_378] : memref<1x8x864xf32, #tpu.memory_space<vmem>>, vector<1x8x864xf32>
    %377 = vector.shape_cast %376 : vector<1x8x864xf32> to vector<8x864xf32>
    %378 = vector.extract_strided_slice %377 {offsets = [0, 262], sizes = [8, 512], strides = [1, 1]} : vector<8x864xf32> to vector<8x512xf32>
    %c752 = arith.constant 752 : index
    %c0_379 = arith.constant 0 : index
    %379 = vector.load %arg5[%c752, %c0_379] : memref<968x512xf32, #tpu.memory_space<vmem>>, vector<8x512xf32>
    tpu.vector_store %arg5[%c752, %c0_379], %378 {strides = array<i32>} : memref<968x512xf32, #tpu.memory_space<vmem>>, vector<8x512xf32>,
    %c0_380 = arith.constant 0 : index
    %c0_381 = arith.constant 0 : index
    %c0_382 = arith.constant 0 : index
    %380 = vector.load %arg1[%c0_380, %c0_381, %c0_382] : memref<1x8x864xf32, #tpu.memory_space<vmem>>, vector<1x8x864xf32>
    %381 = vector.shape_cast %380 : vector<1x8x864xf32> to vector<8x864xf32>
    %382 = vector.extract_strided_slice %381 {offsets = [0, 263], sizes = [8, 512], strides = [1, 1]} : vector<8x864xf32> to vector<8x512xf32>
    %c760 = arith.constant 760 : index
    %c0_383 = arith.constant 0 : index
    %383 = vector.load %arg5[%c760, %c0_383] : memref<968x512xf32, #tpu.memory_space<vmem>>, vector<8x512xf32>
    tpu.vector_store %arg5[%c760, %c0_383], %382 {strides = array<i32>} : memref<968x512xf32, #tpu.memory_space<vmem>>, vector<8x512xf32>,
    %c0_384 = arith.constant 0 : index
    %c0_385 = arith.constant 0 : index
    %c0_386 = arith.constant 0 : index
    %384 = vector.load %arg1[%c0_384, %c0_385, %c0_386] : memref<1x8x864xf32, #tpu.memory_space<vmem>>, vector<1x8x864xf32>
    %385 = vector.shape_cast %384 : vector<1x8x864xf32> to vector<8x864xf32>
    %386 = vector.extract_strided_slice %385 {offsets = [0, 264], sizes = [8, 512], strides = [1, 1]} : vector<8x864xf32> to vector<8x512xf32>
    %c768 = arith.constant 768 : index
    %c0_387 = arith.constant 0 : index
    %387 = vector.load %arg5[%c768, %c0_387] : memref<968x512xf32, #tpu.memory_space<vmem>>, vector<8x512xf32>
    tpu.vector_store %arg5[%c768, %c0_387], %386 {strides = array<i32>} : memref<968x512xf32, #tpu.memory_space<vmem>>, vector<8x512xf32>,
    %c0_388 = arith.constant 0 : index
    %c0_389 = arith.constant 0 : index
    %c0_390 = arith.constant 0 : index
    %388 = vector.load %arg1[%c0_388, %c0_389, %c0_390] : memref<1x8x864xf32, #tpu.memory_space<vmem>>, vector<1x8x864xf32>
    %389 = vector.shape_cast %388 : vector<1x8x864xf32> to vector<8x864xf32>
    %390 = vector.extract_strided_slice %389 {offsets = [0, 265], sizes = [8, 512], strides = [1, 1]} : vector<8x864xf32> to vector<8x512xf32>
    %c776 = arith.constant 776 : index
    %c0_391 = arith.constant 0 : index
    %391 = vector.load %arg5[%c776, %c0_391] : memref<968x512xf32, #tpu.memory_space<vmem>>, vector<8x512xf32>
    tpu.vector_store %arg5[%c776, %c0_391], %390 {strides = array<i32>} : memref<968x512xf32, #tpu.memory_space<vmem>>, vector<8x512xf32>,
    %c0_392 = arith.constant 0 : index
    %c0_393 = arith.constant 0 : index
    %c0_394 = arith.constant 0 : index
    %392 = vector.load %arg1[%c0_392, %c0_393, %c0_394] : memref<1x8x864xf32, #tpu.memory_space<vmem>>, vector<1x8x864xf32>
    %393 = vector.shape_cast %392 : vector<1x8x864xf32> to vector<8x864xf32>
    %394 = vector.extract_strided_slice %393 {offsets = [0, 266], sizes = [8, 512], strides = [1, 1]} : vector<8x864xf32> to vector<8x512xf32>
    %c784 = arith.constant 784 : index
    %c0_395 = arith.constant 0 : index
    %395 = vector.load %arg5[%c784, %c0_395] : memref<968x512xf32, #tpu.memory_space<vmem>>, vector<8x512xf32>
    tpu.vector_store %arg5[%c784, %c0_395], %394 {strides = array<i32>} : memref<968x512xf32, #tpu.memory_space<vmem>>, vector<8x512xf32>,
    %c0_396 = arith.constant 0 : index
    %c0_397 = arith.constant 0 : index
    %c0_398 = arith.constant 0 : index
    %396 = vector.load %arg1[%c0_396, %c0_397, %c0_398] : memref<1x8x864xf32, #tpu.memory_space<vmem>>, vector<1x8x864xf32>
    %397 = vector.shape_cast %396 : vector<1x8x864xf32> to vector<8x864xf32>
    %398 = vector.extract_strided_slice %397 {offsets = [0, 288], sizes = [8, 512], strides = [1, 1]} : vector<8x864xf32> to vector<8x512xf32>
    %c792 = arith.constant 792 : index
    %c0_399 = arith.constant 0 : index
    %399 = vector.load %arg5[%c792, %c0_399] : memref<968x512xf32, #tpu.memory_space<vmem>>, vector<8x512xf32>
    tpu.vector_store %arg5[%c792, %c0_399], %398 {strides = array<i32>} : memref<968x512xf32, #tpu.memory_space<vmem>>, vector<8x512xf32>,
    %c0_400 = arith.constant 0 : index
    %c0_401 = arith.constant 0 : index
    %c0_402 = arith.constant 0 : index
    %400 = vector.load %arg1[%c0_400, %c0_401, %c0_402] : memref<1x8x864xf32, #tpu.memory_space<vmem>>, vector<1x8x864xf32>
    %401 = vector.shape_cast %400 : vector<1x8x864xf32> to vector<8x864xf32>
    %402 = vector.extract_strided_slice %401 {offsets = [0, 289], sizes = [8, 512], strides = [1, 1]} : vector<8x864xf32> to vector<8x512xf32>
    %c800 = arith.constant 800 : index
    %c0_403 = arith.constant 0 : index
    %403 = vector.load %arg5[%c800, %c0_403] : memref<968x512xf32, #tpu.memory_space<vmem>>, vector<8x512xf32>
    tpu.vector_store %arg5[%c800, %c0_403], %402 {strides = array<i32>} : memref<968x512xf32, #tpu.memory_space<vmem>>, vector<8x512xf32>,
    %c0_404 = arith.constant 0 : index
    %c0_405 = arith.constant 0 : index
    %c0_406 = arith.constant 0 : index
    %404 = vector.load %arg1[%c0_404, %c0_405, %c0_406] : memref<1x8x864xf32, #tpu.memory_space<vmem>>, vector<1x8x864xf32>
    %405 = vector.shape_cast %404 : vector<1x8x864xf32> to vector<8x864xf32>
    %406 = vector.extract_strided_slice %405 {offsets = [0, 290], sizes = [8, 512], strides = [1, 1]} : vector<8x864xf32> to vector<8x512xf32>
    %c808 = arith.constant 808 : index
    %c0_407 = arith.constant 0 : index
    %407 = vector.load %arg5[%c808, %c0_407] : memref<968x512xf32, #tpu.memory_space<vmem>>, vector<8x512xf32>
    tpu.vector_store %arg5[%c808, %c0_407], %406 {strides = array<i32>} : memref<968x512xf32, #tpu.memory_space<vmem>>, vector<8x512xf32>,
    %c0_408 = arith.constant 0 : index
    %c0_409 = arith.constant 0 : index
    %c0_410 = arith.constant 0 : index
    %408 = vector.load %arg1[%c0_408, %c0_409, %c0_410] : memref<1x8x864xf32, #tpu.memory_space<vmem>>, vector<1x8x864xf32>
    %409 = vector.shape_cast %408 : vector<1x8x864xf32> to vector<8x864xf32>
    %410 = vector.extract_strided_slice %409 {offsets = [0, 291], sizes = [8, 512], strides = [1, 1]} : vector<8x864xf32> to vector<8x512xf32>
    %c816 = arith.constant 816 : index
    %c0_411 = arith.constant 0 : index
    %411 = vector.load %arg5[%c816, %c0_411] : memref<968x512xf32, #tpu.memory_space<vmem>>, vector<8x512xf32>
    tpu.vector_store %arg5[%c816, %c0_411], %410 {strides = array<i32>} : memref<968x512xf32, #tpu.memory_space<vmem>>, vector<8x512xf32>,
    %c0_412 = arith.constant 0 : index
    %c0_413 = arith.constant 0 : index
    %c0_414 = arith.constant 0 : index
    %412 = vector.load %arg1[%c0_412, %c0_413, %c0_414] : memref<1x8x864xf32, #tpu.memory_space<vmem>>, vector<1x8x864xf32>
    %413 = vector.shape_cast %412 : vector<1x8x864xf32> to vector<8x864xf32>
    %414 = vector.extract_strided_slice %413 {offsets = [0, 292], sizes = [8, 512], strides = [1, 1]} : vector<8x864xf32> to vector<8x512xf32>
    %c824 = arith.constant 824 : index
    %c0_415 = arith.constant 0 : index
    %415 = vector.load %arg5[%c824, %c0_415] : memref<968x512xf32, #tpu.memory_space<vmem>>, vector<8x512xf32>
    tpu.vector_store %arg5[%c824, %c0_415], %414 {strides = array<i32>} : memref<968x512xf32, #tpu.memory_space<vmem>>, vector<8x512xf32>,
    %c0_416 = arith.constant 0 : index
    %c0_417 = arith.constant 0 : index
    %c0_418 = arith.constant 0 : index
    %416 = vector.load %arg1[%c0_416, %c0_417, %c0_418] : memref<1x8x864xf32, #tpu.memory_space<vmem>>, vector<1x8x864xf32>
    %417 = vector.shape_cast %416 : vector<1x8x864xf32> to vector<8x864xf32>
    %418 = vector.extract_strided_slice %417 {offsets = [0, 293], sizes = [8, 512], strides = [1, 1]} : vector<8x864xf32> to vector<8x512xf32>
    %c832 = arith.constant 832 : index
    %c0_419 = arith.constant 0 : index
    %419 = vector.load %arg5[%c832, %c0_419] : memref<968x512xf32, #tpu.memory_space<vmem>>, vector<8x512xf32>
    tpu.vector_store %arg5[%c832, %c0_419], %418 {strides = array<i32>} : memref<968x512xf32, #tpu.memory_space<vmem>>, vector<8x512xf32>,
    %c0_420 = arith.constant 0 : index
    %c0_421 = arith.constant 0 : index
    %c0_422 = arith.constant 0 : index
    %420 = vector.load %arg1[%c0_420, %c0_421, %c0_422] : memref<1x8x864xf32, #tpu.memory_space<vmem>>, vector<1x8x864xf32>
    %421 = vector.shape_cast %420 : vector<1x8x864xf32> to vector<8x864xf32>
    %422 = vector.extract_strided_slice %421 {offsets = [0, 294], sizes = [8, 512], strides = [1, 1]} : vector<8x864xf32> to vector<8x512xf32>
    %c840 = arith.constant 840 : index
    %c0_423 = arith.constant 0 : index
    %423 = vector.load %arg5[%c840, %c0_423] : memref<968x512xf32, #tpu.memory_space<vmem>>, vector<8x512xf32>
    tpu.vector_store %arg5[%c840, %c0_423], %422 {strides = array<i32>} : memref<968x512xf32, #tpu.memory_space<vmem>>, vector<8x512xf32>,
    %c0_424 = arith.constant 0 : index
    %c0_425 = arith.constant 0 : index
    %c0_426 = arith.constant 0 : index
    %424 = vector.load %arg1[%c0_424, %c0_425, %c0_426] : memref<1x8x864xf32, #tpu.memory_space<vmem>>, vector<1x8x864xf32>
    %425 = vector.shape_cast %424 : vector<1x8x864xf32> to vector<8x864xf32>
    %426 = vector.extract_strided_slice %425 {offsets = [0, 295], sizes = [8, 512], strides = [1, 1]} : vector<8x864xf32> to vector<8x512xf32>
    %c848 = arith.constant 848 : index
    %c0_427 = arith.constant 0 : index
    %427 = vector.load %arg5[%c848, %c0_427] : memref<968x512xf32, #tpu.memory_space<vmem>>, vector<8x512xf32>
    tpu.vector_store %arg5[%c848, %c0_427], %426 {strides = array<i32>} : memref<968x512xf32, #tpu.memory_space<vmem>>, vector<8x512xf32>,
    %c0_428 = arith.constant 0 : index
    %c0_429 = arith.constant 0 : index
    %c0_430 = arith.constant 0 : index
    %428 = vector.load %arg1[%c0_428, %c0_429, %c0_430] : memref<1x8x864xf32, #tpu.memory_space<vmem>>, vector<1x8x864xf32>
    %429 = vector.shape_cast %428 : vector<1x8x864xf32> to vector<8x864xf32>
    %430 = vector.extract_strided_slice %429 {offsets = [0, 296], sizes = [8, 512], strides = [1, 1]} : vector<8x864xf32> to vector<8x512xf32>
    %c856 = arith.constant 856 : index
    %c0_431 = arith.constant 0 : index
    %431 = vector.load %arg5[%c856, %c0_431] : memref<968x512xf32, #tpu.memory_space<vmem>>, vector<8x512xf32>
    tpu.vector_store %arg5[%c856, %c0_431], %430 {strides = array<i32>} : memref<968x512xf32, #tpu.memory_space<vmem>>, vector<8x512xf32>,
    %c0_432 = arith.constant 0 : index
    %c0_433 = arith.constant 0 : index
    %c0_434 = arith.constant 0 : index
    %432 = vector.load %arg1[%c0_432, %c0_433, %c0_434] : memref<1x8x864xf32, #tpu.memory_space<vmem>>, vector<1x8x864xf32>
    %433 = vector.shape_cast %432 : vector<1x8x864xf32> to vector<8x864xf32>
    %434 = vector.extract_strided_slice %433 {offsets = [0, 297], sizes = [8, 512], strides = [1, 1]} : vector<8x864xf32> to vector<8x512xf32>
    %c864 = arith.constant 864 : index
    %c0_435 = arith.constant 0 : index
    %435 = vector.load %arg5[%c864, %c0_435] : memref<968x512xf32, #tpu.memory_space<vmem>>, vector<8x512xf32>
    tpu.vector_store %arg5[%c864, %c0_435], %434 {strides = array<i32>} : memref<968x512xf32, #tpu.memory_space<vmem>>, vector<8x512xf32>,
    %c0_436 = arith.constant 0 : index
    %c0_437 = arith.constant 0 : index
    %c0_438 = arith.constant 0 : index
    %436 = vector.load %arg1[%c0_436, %c0_437, %c0_438] : memref<1x8x864xf32, #tpu.memory_space<vmem>>, vector<1x8x864xf32>
    %437 = vector.shape_cast %436 : vector<1x8x864xf32> to vector<8x864xf32>
    %438 = vector.extract_strided_slice %437 {offsets = [0, 298], sizes = [8, 512], strides = [1, 1]} : vector<8x864xf32> to vector<8x512xf32>
    %c872 = arith.constant 872 : index
    %c0_439 = arith.constant 0 : index
    %439 = vector.load %arg5[%c872, %c0_439] : memref<968x512xf32, #tpu.memory_space<vmem>>, vector<8x512xf32>
    tpu.vector_store %arg5[%c872, %c0_439], %438 {strides = array<i32>} : memref<968x512xf32, #tpu.memory_space<vmem>>, vector<8x512xf32>,
    %c0_440 = arith.constant 0 : index
    %c0_441 = arith.constant 0 : index
    %c0_442 = arith.constant 0 : index
    %440 = vector.load %arg1[%c0_440, %c0_441, %c0_442] : memref<1x8x864xf32, #tpu.memory_space<vmem>>, vector<1x8x864xf32>
    %441 = vector.shape_cast %440 : vector<1x8x864xf32> to vector<8x864xf32>
    %442 = vector.extract_strided_slice %441 {offsets = [0, 320], sizes = [8, 512], strides = [1, 1]} : vector<8x864xf32> to vector<8x512xf32>
    %c880 = arith.constant 880 : index
    %c0_443 = arith.constant 0 : index
    %443 = vector.load %arg5[%c880, %c0_443] : memref<968x512xf32, #tpu.memory_space<vmem>>, vector<8x512xf32>
    tpu.vector_store %arg5[%c880, %c0_443], %442 {strides = array<i32>} : memref<968x512xf32, #tpu.memory_space<vmem>>, vector<8x512xf32>,
    %c0_444 = arith.constant 0 : index
    %c0_445 = arith.constant 0 : index
    %c0_446 = arith.constant 0 : index
    %444 = vector.load %arg1[%c0_444, %c0_445, %c0_446] : memref<1x8x864xf32, #tpu.memory_space<vmem>>, vector<1x8x864xf32>
    %445 = vector.shape_cast %444 : vector<1x8x864xf32> to vector<8x864xf32>
    %446 = vector.extract_strided_slice %445 {offsets = [0, 321], sizes = [8, 512], strides = [1, 1]} : vector<8x864xf32> to vector<8x512xf32>
    %c888 = arith.constant 888 : index
    %c0_447 = arith.constant 0 : index
    %447 = vector.load %arg5[%c888, %c0_447] : memref<968x512xf32, #tpu.memory_space<vmem>>, vector<8x512xf32>
    tpu.vector_store %arg5[%c888, %c0_447], %446 {strides = array<i32>} : memref<968x512xf32, #tpu.memory_space<vmem>>, vector<8x512xf32>,
    %c0_448 = arith.constant 0 : index
    %c0_449 = arith.constant 0 : index
    %c0_450 = arith.constant 0 : index
    %448 = vector.load %arg1[%c0_448, %c0_449, %c0_450] : memref<1x8x864xf32, #tpu.memory_space<vmem>>, vector<1x8x864xf32>
    %449 = vector.shape_cast %448 : vector<1x8x864xf32> to vector<8x864xf32>
    %450 = vector.extract_strided_slice %449 {offsets = [0, 322], sizes = [8, 512], strides = [1, 1]} : vector<8x864xf32> to vector<8x512xf32>
    %c896 = arith.constant 896 : index
    %c0_451 = arith.constant 0 : index
    %451 = vector.load %arg5[%c896, %c0_451] : memref<968x512xf32, #tpu.memory_space<vmem>>, vector<8x512xf32>
    tpu.vector_store %arg5[%c896, %c0_451], %450 {strides = array<i32>} : memref<968x512xf32, #tpu.memory_space<vmem>>, vector<8x512xf32>,
    %c0_452 = arith.constant 0 : index
    %c0_453 = arith.constant 0 : index
    %c0_454 = arith.constant 0 : index
    %452 = vector.load %arg1[%c0_452, %c0_453, %c0_454] : memref<1x8x864xf32, #tpu.memory_space<vmem>>, vector<1x8x864xf32>
    %453 = vector.shape_cast %452 : vector<1x8x864xf32> to vector<8x864xf32>
    %454 = vector.extract_strided_slice %453 {offsets = [0, 323], sizes = [8, 512], strides = [1, 1]} : vector<8x864xf32> to vector<8x512xf32>
    %c904 = arith.constant 904 : index
    %c0_455 = arith.constant 0 : index
    %455 = vector.load %arg5[%c904, %c0_455] : memref<968x512xf32, #tpu.memory_space<vmem>>, vector<8x512xf32>
    tpu.vector_store %arg5[%c904, %c0_455], %454 {strides = array<i32>} : memref<968x512xf32, #tpu.memory_space<vmem>>, vector<8x512xf32>,
    %c0_456 = arith.constant 0 : index
    %c0_457 = arith.constant 0 : index
    %c0_458 = arith.constant 0 : index
    %456 = vector.load %arg1[%c0_456, %c0_457, %c0_458] : memref<1x8x864xf32, #tpu.memory_space<vmem>>, vector<1x8x864xf32>
    %457 = vector.shape_cast %456 : vector<1x8x864xf32> to vector<8x864xf32>
    %458 = vector.extract_strided_slice %457 {offsets = [0, 324], sizes = [8, 512], strides = [1, 1]} : vector<8x864xf32> to vector<8x512xf32>
    %c912 = arith.constant 912 : index
    %c0_459 = arith.constant 0 : index
    %459 = vector.load %arg5[%c912, %c0_459] : memref<968x512xf32, #tpu.memory_space<vmem>>, vector<8x512xf32>
    tpu.vector_store %arg5[%c912, %c0_459], %458 {strides = array<i32>} : memref<968x512xf32, #tpu.memory_space<vmem>>, vector<8x512xf32>,
    %c0_460 = arith.constant 0 : index
    %c0_461 = arith.constant 0 : index
    %c0_462 = arith.constant 0 : index
    %460 = vector.load %arg1[%c0_460, %c0_461, %c0_462] : memref<1x8x864xf32, #tpu.memory_space<vmem>>, vector<1x8x864xf32>
    %461 = vector.shape_cast %460 : vector<1x8x864xf32> to vector<8x864xf32>
    %462 = vector.extract_strided_slice %461 {offsets = [0, 325], sizes = [8, 512], strides = [1, 1]} : vector<8x864xf32> to vector<8x512xf32>
    %c920 = arith.constant 920 : index
    %c0_463 = arith.constant 0 : index
    %463 = vector.load %arg5[%c920, %c0_463] : memref<968x512xf32, #tpu.memory_space<vmem>>, vector<8x512xf32>
    tpu.vector_store %arg5[%c920, %c0_463], %462 {strides = array<i32>} : memref<968x512xf32, #tpu.memory_space<vmem>>, vector<8x512xf32>,
    %c0_464 = arith.constant 0 : index
    %c0_465 = arith.constant 0 : index
    %c0_466 = arith.constant 0 : index
    %464 = vector.load %arg1[%c0_464, %c0_465, %c0_466] : memref<1x8x864xf32, #tpu.memory_space<vmem>>, vector<1x8x864xf32>
    %465 = vector.shape_cast %464 : vector<1x8x864xf32> to vector<8x864xf32>
    %466 = vector.extract_strided_slice %465 {offsets = [0, 326], sizes = [8, 512], strides = [1, 1]} : vector<8x864xf32> to vector<8x512xf32>
    %c928 = arith.constant 928 : index
    %c0_467 = arith.constant 0 : index
    %467 = vector.load %arg5[%c928, %c0_467] : memref<968x512xf32, #tpu.memory_space<vmem>>, vector<8x512xf32>
    tpu.vector_store %arg5[%c928, %c0_467], %466 {strides = array<i32>} : memref<968x512xf32, #tpu.memory_space<vmem>>, vector<8x512xf32>,
    %c0_468 = arith.constant 0 : index
    %c0_469 = arith.constant 0 : index
    %c0_470 = arith.constant 0 : index
    %468 = vector.load %arg1[%c0_468, %c0_469, %c0_470] : memref<1x8x864xf32, #tpu.memory_space<vmem>>, vector<1x8x864xf32>
    %469 = vector.shape_cast %468 : vector<1x8x864xf32> to vector<8x864xf32>
    %470 = vector.extract_strided_slice %469 {offsets = [0, 327], sizes = [8, 512], strides = [1, 1]} : vector<8x864xf32> to vector<8x512xf32>
    %c936 = arith.constant 936 : index
    %c0_471 = arith.constant 0 : index
    %471 = vector.load %arg5[%c936, %c0_471] : memref<968x512xf32, #tpu.memory_space<vmem>>, vector<8x512xf32>
    tpu.vector_store %arg5[%c936, %c0_471], %470 {strides = array<i32>} : memref<968x512xf32, #tpu.memory_space<vmem>>, vector<8x512xf32>,
    %c0_472 = arith.constant 0 : index
    %c0_473 = arith.constant 0 : index
    %c0_474 = arith.constant 0 : index
    %472 = vector.load %arg1[%c0_472, %c0_473, %c0_474] : memref<1x8x864xf32, #tpu.memory_space<vmem>>, vector<1x8x864xf32>
    %473 = vector.shape_cast %472 : vector<1x8x864xf32> to vector<8x864xf32>
    %474 = vector.extract_strided_slice %473 {offsets = [0, 328], sizes = [8, 512], strides = [1, 1]} : vector<8x864xf32> to vector<8x512xf32>
    %c944 = arith.constant 944 : index
    %c0_475 = arith.constant 0 : index
    %475 = vector.load %arg5[%c944, %c0_475] : memref<968x512xf32, #tpu.memory_space<vmem>>, vector<8x512xf32>
    tpu.vector_store %arg5[%c944, %c0_475], %474 {strides = array<i32>} : memref<968x512xf32, #tpu.memory_space<vmem>>, vector<8x512xf32>,
    %c0_476 = arith.constant 0 : index
    %c0_477 = arith.constant 0 : index
    %c0_478 = arith.constant 0 : index
    %476 = vector.load %arg1[%c0_476, %c0_477, %c0_478] : memref<1x8x864xf32, #tpu.memory_space<vmem>>, vector<1x8x864xf32>
    %477 = vector.shape_cast %476 : vector<1x8x864xf32> to vector<8x864xf32>
    %478 = vector.extract_strided_slice %477 {offsets = [0, 329], sizes = [8, 512], strides = [1, 1]} : vector<8x864xf32> to vector<8x512xf32>
    %c952 = arith.constant 952 : index
    %c0_479 = arith.constant 0 : index
    %479 = vector.load %arg5[%c952, %c0_479] : memref<968x512xf32, #tpu.memory_space<vmem>>, vector<8x512xf32>
    tpu.vector_store %arg5[%c952, %c0_479], %478 {strides = array<i32>} : memref<968x512xf32, #tpu.memory_space<vmem>>, vector<8x512xf32>,
    %c0_480 = arith.constant 0 : index
    %c0_481 = arith.constant 0 : index
    %c0_482 = arith.constant 0 : index
    %480 = vector.load %arg1[%c0_480, %c0_481, %c0_482] : memref<1x8x864xf32, #tpu.memory_space<vmem>>, vector<1x8x864xf32>
    %481 = vector.shape_cast %480 : vector<1x8x864xf32> to vector<8x864xf32>
    %482 = vector.extract_strided_slice %481 {offsets = [0, 330], sizes = [8, 512], strides = [1, 1]} : vector<8x864xf32> to vector<8x512xf32>
    %c960 = arith.constant 960 : index
    %c0_483 = arith.constant 0 : index
    %483 = vector.load %arg5[%c960, %c0_483] : memref<968x512xf32, #tpu.memory_space<vmem>>, vector<8x512xf32>
    tpu.vector_store %arg5[%c960, %c0_483], %482 {strides = array<i32>} : memref<968x512xf32, #tpu.memory_space<vmem>>, vector<8x512xf32>,
    %c0_484 = arith.constant 0 : index
    %c0_485 = arith.constant 0 : index
    %484 = vector.load %arg2[%c0_484, %c0_485] : memref<8x968xf32, #tpu.memory_space<vmem>>, vector<8x968xf32>
    %c0_486 = arith.constant 0 : index
    %c0_487 = arith.constant 0 : index
    %485 = vector.load %arg5[%c0_486, %c0_487] : memref<968x512xf32, #tpu.memory_space<vmem>>, vector<968x512xf32>
    %cst = arith.constant dense<0.000000e+00> : vector<8x512xf32>
    %486 = tpu.matmul %484, %485, %cst {dimension_numbers = #tpu.dot_dimension_numbers<[1], [0], [0], [1], [0, 0, 1, 1], [], []>} : vector<8x968xf32>, vector<968x512xf32>, vector<8x512xf32> -> vector<8x512xf32>
    %c0_488 = arith.constant 0 : index
    %c0_489 = arith.constant 0 : index
    %487 = vector.load %arg3[%c0_488, %c0_489] : memref<8x1xf32, #tpu.memory_space<vmem>>, vector<8x1xf32>
    %488 = vector.broadcast %487 : vector<8x1xf32> to vector<8x512xf32>
    %489 = arith.addf %486, %488 : vector<8x512xf32>
    %c0_490 = arith.constant 0 : index
    %c0_491 = arith.constant 0 : index
    %c0_492 = arith.constant 0 : index
    %490 = vector.load %arg4[%c0_490, %c0_491, %c0_492] : memref<1x8x512xf32, #tpu.memory_space<vmem>>, vector<1x8x512xf32>
    %491 = vector.shape_cast %490 : vector<1x8x512xf32> to vector<8x512xf32>
    %492 = vector.shape_cast %489 : vector<8x512xf32> to vector<1x8x512xf32>
    tpu.vector_store %arg4[%c0_490, %c0_491, %c0_492], %492 {strides = array<i32>} : memref<1x8x512xf32, #tpu.memory_space<vmem>>, vector<1x8x512xf32>,
    return
  }
  func.func @transform_0(%arg0: i32) -> (i32, i32, i32) {
    %c0_i32 = arith.constant 0 : i32
    %c0_i32_0 = arith.constant 0 : i32
    %c0_i32_1 = arith.constant 0 : i32
    return %arg0, %c0_i32, %c0_i32_0 : i32, i32, i32
  }
  func.func @transform_1(%arg0: i32) -> (i32, i32) {
    %c0_i32 = arith.constant 0 : i32
    %c0_i32_0 = arith.constant 0 : i32
    %c0_i32_1 = arith.constant 0 : i32
    return %c0_i32, %c0_i32_0 : i32, i32
  }
  func.func @transform_2(%arg0: i32) -> (i32, i32) {
    %c0_i32 = arith.constant 0 : i32
    %c0_i32_0 = arith.constant 0 : i32
    %c0_i32_1 = arith.constant 0 : i32
    return %c0_i32, %c0_i32_0 : i32, i32
  }
  func.func @transform_3(%arg0: i32) -> (i32, i32, i32) {
    %c0_i32 = arith.constant 0 : i32
    %c0_i32_0 = arith.constant 0 : i32
    %c0_i32_1 = arith.constant 0 : i32
    return %arg0, %c0_i32, %c0_i32_0 : i32, i32, i32
  }
}

</mosaic_0001>

<bundles_post_ra>
// kernel: inception_block_v1.1
= control target key start
LH: loop header
LB: loop body
LE: loop exit
PB: predicated region body
PF: predicated region fallthrough
CT: control target
= control target key end

     0   :  { %s5289_s12 = smov 0   ;;  %s8652_s0 = inlined_call_operand.vmem [shape: f32[2,8,864], index: 0, kind: input, shape index: {}]   ;;  %s8653_s1 = inlined_call_operand.vmem [shape: f32[8,968], index: 1, kind: input, shape index: {}]   ;;  %s8654_s2 = inlined_call_operand.vmem [shape: f32[8,1], index: 2, kind: input, shape index: {}]   ;;  %s8655_s3 = inlined_call_operand.vmem [shape: f32[2,8,512], index: 3, kind: output, shape index: {}]  }
   0x1   :  { %8938 = sst [smem:[#allocation222_spill]] %s8652_s0 }
   0x2   :  { %8939 = sst [smem:[#allocation223_spill]] %s8654_s2 }
   0x3   :  { %8940 = sst [smem:[#allocation224_spill]] %s8655_s3 }
   0x4 LB: > { %8941 = sst [smem:[#allocation3_spill]] %s5223_s12  ;;  %s5143_s13 = sadd.s32 4294967295, %s5223_s12   ;;  %s5223_s12 = sphi %s5289_s12, %s13_s12  }
   0x5   : > { %p5147_p0 = scmp.ge.s32.totalorder %s5223_s12, 1  ;;  %p137_p1 = scmp.lt.s32.totalorder %s5223_s12, 3 }
   0x7   : > { %p138_p2 = pnand %p5147_p0, %p137_p1 }
   0x9   : > { %141 = sbr.rel (%p138_p2) target bundleno = 1529 (0x5f9), region = 32 }
   0xe   : > { %p161_p3 = scmp.lt.s32.totalorder %s5143_s13, 1  ;;  %s8943_s0 = sld [smem:[#allocation222_spill]]  ;;  %vm661_vm0 = vcmask 752640   ;;  %vm628_vm1 = vcmask 760832   ;;  %vm595_vm2 = vcmask 769024   ;;  %vm562_vm3 = vcmask 777216  }
   0xf   : > { %s8803_s18 = smov 127   ;;  %s8808_s19 = smov 126   ;;  %vm8925_vm4 = vcmask 785408   ;;  %vm8854_vm5 = vcmask 965632   ;;  %vm8853_vm6 = vcmask 973824   ;;  %vm8855_vm7 = vcmask 982016  }
  0x10   : > { %s9703_s13 = smov (!%p161_p3, %s5143_s13), 1  ;;  %s8814_s20 = smov 125   ;;  %vm8787_vm8 = vcmask 990208   ;;  %vm8739_vm9 = vcmask 998400   ;;  %vm8737_vm10 = vcmask 1006592   ;;  %vm8730_vm11 = vcmask 1014784  }
  0x11   : > { %8942 = sst [smem:[#allocation4_spill]] %s9703_s13  ;;  %s5156_s14 = smul.u32 56, %s9703_s13  ;;  %vm8780_vm12 = vcmask 1022976   ;;  %vm8781_vm13 = vcmask 1031168   ;;  %vm8782_vm14 = vcmask 1039360   ;;  %vm8741_vm15 = vcmask 449536  }
  0x12   : > { %s8820_s21 = smov 124   ;;  %s8826_s22 = smov 123  }
  0x13   : > { %s8833_s23 = smov 122   ;;  %s8838_s24 = smov 121  }
  0x14   : > { %s5303_s17 = scalar_lea.vmem %s8943_s0, %s5156_s14  ;;  %s8843_s25 = smov 120  }
  0x15   : > { %v5306_v0 = vld [vmem:[%s5303_s17 + $0x10] sm:$0xff]  ;;  %v5309_v1 = vld [vmem:[%s5303_s17] sm:$0xff]  ;;  %v5316_v2 = vld [vmem:[%s5303_s17 + $0x18] sm:$0xff]  ;;  %s8845_s26 = smov 119   ;;  %s8847_s27 = smov 118  }
  0x16   : > { %193 = vrot.lane.b32.xlu1 %v5306_v0, %s8803_s18  ;;  %189 = vrot.lane.b32.xlu0 %v5309_v1, %s8803_s18  ;;  %v5319_v3 = vld [vmem:[%s5303_s17 + $0x8] sm:$0xff]  ;;  %v5326_v4 = vld [vmem:[%s5303_s17 + $0x20] sm:$0xff]  ;;  %s8849_s28 = smov 96   ;;  %s8851_s29 = smov 95  }
  0x17   : > { %s8873_s30 = smov 94   ;;  %s8868_s4 = smov 93  }
  0x18   : > { %s8877_s5 = smov 92   ;;  %s8881_s6 = smov 91  }
  0x19   : > { %s8888_s7 = smov 90   ;;  %s8893_s8 = smov 89  }
  0x1a   : > { %195 = vrot.lane.b32.xlu1 %v5316_v2, %s8803_s18  ;;  %191 = vrot.lane.b32.xlu0 %v5319_v3, %s8803_s18  ;;  %s8897_s9 = smov 88   ;;  %s8901_s10 = smov 87  }
  0x1b   : > { %s8904_s11 = smov 86   ;;  %s8906_s14 = smov 64  }
  0x1c   : > { %s8659_s15 = smov 63   ;;  %s8663_s16 = smov 62  }
  0x1d   : > { %s9212_s0 = smov 127   ;;  %s9213_s3 = smov 22  }
  0x1e   : > { %222 = vrot.lane.b32.xlu1 %v5309_v1, %s8808_s19  ;;  %197 = vrot.lane.b32.xlu0 %v5326_v4, %s8803_s18  ;;  %s9217_s12 = smov 23   ;;  %s9220_s13 = smov 24  }
  0x1f   : > { %s9225_s2 = smov 25  }
  0x22   : > { %226 = vrot.lane.b32.xlu1 %v5306_v0, %s8808_s19  ;;  %224 = vrot.lane.b32.xlu0 %v5319_v3, %s8808_s19 }
  0x26   : > { %230 = vrot.lane.b32.xlu1 %v5326_v4, %s8808_s19  ;;  %228 = vrot.lane.b32.xlu0 %v5316_v2, %s8808_s19 }
  0x2a   : > { %257 = vrot.lane.b32.xlu1 %v5319_v3, %s8814_s20  ;;  %255 = vrot.lane.b32.xlu0 %v5309_v1, %s8814_s20 }
  0x2e   : > { %261 = vrot.lane.b32.xlu1 %v5316_v2, %s8814_s20  ;;  %259 = vrot.lane.b32.xlu0 %v5306_v0, %s8814_s20 }
  0x32   : > { %288 = vrot.lane.b32.xlu1 %v5309_v1, %s8820_s21  ;;  %263 = vrot.lane.b32.xlu0 %v5326_v4, %s8814_s20 }
  0x36   : > { %292 = vrot.lane.b32.xlu1 %v5306_v0, %s8820_s21  ;;  %290 = vrot.lane.b32.xlu0 %v5319_v3, %s8820_s21 }
  0x3a   : > { %296 = vrot.lane.b32.xlu1 %v5326_v4, %s8820_s21  ;;  %294 = vrot.lane.b32.xlu0 %v5316_v2, %s8820_s21 }
  0x3e   : > { %323 = vrot.lane.b32.xlu1 %v5319_v3, %s8826_s22  ;;  %321 = vrot.lane.b32.xlu0 %v5309_v1, %s8826_s22 }
  0x42   : > { %327 = vrot.lane.b32.xlu1 %v5316_v2, %s8826_s22  ;;  %325 = vrot.lane.b32.xlu0 %v5306_v0, %s8826_s22 }
  0x46   : > { %354 = vrot.lane.b32.xlu1 %v5309_v1, %s8833_s23  ;;  %329 = vrot.lane.b32.xlu0 %v5326_v4, %s8826_s22 }
  0x4a   : > { %358 = vrot.lane.b32.xlu1 %v5306_v0, %s8833_s23  ;;  %356 = vrot.lane.b32.xlu0 %v5319_v3, %s8833_s23 }
  0x4e   : > { %362 = vrot.lane.b32.xlu1 %v5326_v4, %s8833_s23  ;;  %360 = vrot.lane.b32.xlu0 %v5316_v2, %s8833_s23 }
  0x52   : > { %389 = vrot.lane.b32.xlu1 %v5319_v3, %s8838_s24  ;;  %387 = vrot.lane.b32.xlu0 %v5309_v1, %s8838_s24 }
  0x56   : > { %393 = vrot.lane.b32.xlu1 %v5316_v2, %s8838_s24  ;;  %391 = vrot.lane.b32.xlu0 %v5306_v0, %s8838_s24 }
  0x5a   : > { %420 = vrot.lane.b32.xlu1 %v5309_v1, %s8843_s25  ;;  %395 = vrot.lane.b32.xlu0 %v5326_v4, %s8838_s24 }
  0x5e   : > { %424 = vrot.lane.b32.xlu1 %v5306_v0, %s8843_s25  ;;  %422 = vrot.lane.b32.xlu0 %v5319_v3, %s8843_s25 }
  0x62   : > { %428 = vrot.lane.b32.xlu1 %v5326_v4, %s8843_s25  ;;  %426 = vrot.lane.b32.xlu0 %v5316_v2, %s8843_s25 }
  0x66   : > { %455 = vrot.lane.b32.xlu1 %v5319_v3, %s8845_s26  ;;  %453 = vrot.lane.b32.xlu0 %v5309_v1, %s8845_s26 }
  0x6a   : > { %459 = vrot.lane.b32.xlu1 %v5316_v2, %s8845_s26  ;;  %457 = vrot.lane.b32.xlu0 %v5306_v0, %s8845_s26 }
  0x6e   : > { %486 = vrot.lane.b32.xlu1 %v5309_v1, %s8847_s27  ;;  %461 = vrot.lane.b32.xlu0 %v5326_v4, %s8845_s26 }
  0x72   : > { %490 = vrot.lane.b32.xlu1 %v5306_v0, %s8847_s27  ;;  %488 = vrot.lane.b32.xlu0 %v5319_v3, %s8847_s27 }
  0x76   : > { %494 = vrot.lane.b32.xlu1 %v5326_v4, %s8847_s27  ;;  %492 = vrot.lane.b32.xlu0 %v5316_v2, %s8847_s27 }
  0x7a   : > { %521 = vrot.lane.b32.xlu1 %v5319_v3, %s8849_s28  ;;  %519 = vrot.lane.b32.xlu0 %v5309_v1, %s8849_s28 }
  0x7e   : > { %525 = vrot.lane.b32.xlu1 %v5316_v2, %s8849_s28  ;;  %523 = vrot.lane.b32.xlu0 %v5306_v0, %s8849_s28 }
  0x82   : > { %552 = vrot.lane.b32.xlu1 %v5309_v1, %s8851_s29  ;;  %527 = vrot.lane.b32.xlu0 %v5326_v4, %s8849_s28 }
  0x86   : > { %556 = vrot.lane.b32.xlu1 %v5306_v0, %s8851_s29  ;;  %554 = vrot.lane.b32.xlu0 %v5319_v3, %s8851_s29 }
  0x88   : > { %v5436_v5 = vpop.permute.xlu1 %193  ;;  %v5438_v6 = vpop.permute.xlu0 %189 }
  0x89   : > { %8944 = vst [vmem:[#allocation5_spill] sm:$0xff] %v5436_v5 }
  0x8a   : > { %560 = vrot.lane.b32.xlu1 %v5326_v4, %s8851_s29  ;;  %558 = vrot.lane.b32.xlu0 %v5316_v2, %s8851_s29 }
  0x8c   : > { %v5444_v7 = vpop.permute.xlu1 %195  ;;  %v5446_v8 = vpop.permute.xlu0 %191 }
  0x8d   : > { %8945 = vst [vmem:[#allocation6_spill] sm:$0xff] %v5444_v7 }
  0x8e   : > { %587 = vrot.lane.b32.xlu1 %v5319_v3, %s8873_s30  ;;  %585 = vrot.lane.b32.xlu0 %v5309_v1, %s8873_s30 }
  0x90   : > { %v5452_v9 = vpop.permute.xlu1 %222  ;;  %v5454_v10 = vpop.permute.xlu0 %197 }
  0x91   : > { %8946 = vst [vmem:[#allocation7_spill] sm:$0xff] %v5454_v10 }
  0x92   : > { %591 = vrot.lane.b32.xlu1 %v5316_v2, %s8873_s30  ;;  %589 = vrot.lane.b32.xlu0 %v5306_v0, %s8873_s30 }
  0x94   : > { %v5460_v11 = vpop.permute.xlu1 %226  ;;  %v5462_v12 = vpop.permute.xlu0 %224 }
  0x95   : > { %8947 = vst [vmem:[#allocation8_spill] sm:$0xff] %v5460_v11 }
  0x96   : > { %618 = vrot.lane.b32.xlu1 %v5309_v1, %s8868_s4  ;;  %593 = vrot.lane.b32.xlu0 %v5326_v4, %s8873_s30 }
  0x98   : > { %v5468_v13 = vpop.permute.xlu1 %230  ;;  %v5470_v14 = vpop.permute.xlu0 %228 }
  0x99   : > { %8948 = vst [vmem:[#allocation9_spill] sm:$0xff] %v5468_v13  ;;  %8949 = vst [vmem:[#allocation10_spill] sm:$0xff] %v5470_v14 }
  0x9a   : > { %622 = vrot.lane.b32.xlu1 %v5306_v0, %s8868_s4  ;;  %620 = vrot.lane.b32.xlu0 %v5319_v3, %s8868_s4 }
  0x9c   : > { %v5476_v15 = vpop.permute.xlu1 %257  ;;  %v5478_v16 = vpop.permute.xlu0 %255 }
  0x9e   : > { %626 = vrot.lane.b32.xlu1 %v5326_v4, %s8868_s4  ;;  %624 = vrot.lane.b32.xlu0 %v5316_v2, %s8868_s4 }
  0xa0   : > { %v5484_v17 = vpop.permute.xlu1 %261  ;;  %v5486_v18 = vpop.permute.xlu0 %259 }
  0xa1   : > { %8950 = vst [vmem:[#allocation11_spill] sm:$0xff] %v5484_v17  ;;  %8951 = vst [vmem:[#allocation12_spill] sm:$0xff] %v5486_v18 }
  0xa2   : > { %653 = vrot.lane.b32.xlu1 %v5319_v3, %s8877_s5  ;;  %651 = vrot.lane.b32.xlu0 %v5309_v1, %s8877_s5 }
  0xa4   : > { %v5492_v19 = vpop.permute.xlu1 %288  ;;  %v5494_v20 = vpop.permute.xlu0 %263 }
  0xa5   : > { %8952 = vst [vmem:[#allocation13_spill] sm:$0xff] %v5494_v20 }
  0xa6   : > { %657 = vrot.lane.b32.xlu1 %v5316_v2, %s8877_s5  ;;  %655 = vrot.lane.b32.xlu0 %v5306_v0, %s8877_s5 }
  0xa8   : > { %v5500_v21 = vpop.permute.xlu1 %292  ;;  %v5502_v22 = vpop.permute.xlu0 %290 }
  0xa9   : > { %8953 = vst [vmem:[#allocation14_spill] sm:$0xff] %v5500_v21 }
  0xaa   : > { %684 = vrot.lane.b32.xlu1 %v5309_v1, %s8881_s6  ;;  %659 = vrot.lane.b32.xlu0 %v5326_v4, %s8877_s5 }
  0xac   : > { %v5508_v23 = vpop.permute.xlu1 %296  ;;  %v5510_v24 = vpop.permute.xlu0 %294 }
  0xad   : > { %8954 = vst [vmem:[#allocation15_spill] sm:$0xff] %v5508_v23  ;;  %8955 = vst [vmem:[#allocation16_spill] sm:$0xff] %v5510_v24 }
  0xae   : > { %688 = vrot.lane.b32.xlu1 %v5306_v0, %s8881_s6  ;;  %686 = vrot.lane.b32.xlu0 %v5319_v3, %s8881_s6 }
  0xb0   : > { %v5516_v25 = vpop.permute.xlu1 %323  ;;  %v5518_v26 = vpop.permute.xlu0 %321 }
  0xb2   : > { %692 = vrot.lane.b32.xlu1 %v5326_v4, %s8881_s6  ;;  %690 = vrot.lane.b32.xlu0 %v5316_v2, %s8881_s6 }
  0xb4   : > { %v5524_v27 = vpop.permute.xlu1 %327  ;;  %v5526_v28 = vpop.permute.xlu0 %325 }
  0xb5   : > { %8956 = vst [vmem:[#allocation17_spill] sm:$0xff] %v5524_v27  ;;  %8957 = vst [vmem:[#allocation18_spill] sm:$0xff] %v5526_v28 }
  0xb6   : > { %719 = vrot.lane.b32.xlu1 %v5319_v3, %s8888_s7  ;;  %717 = vrot.lane.b32.xlu0 %v5309_v1, %s8888_s7 }
  0xb8   : > { %v5532_v29 = vpop.permute.xlu1 %354  ;;  %v5534_v30 = vpop.permute.xlu0 %329 }
  0xb9   : > { %8958 = vst [vmem:[#allocation19_spill] sm:$0xff] %v5534_v30 }
  0xba   : > { %723 = vrot.lane.b32.xlu1 %v5316_v2, %s8888_s7  ;;  %721 = vrot.lane.b32.xlu0 %v5306_v0, %s8888_s7 }
  0xbc   : > { %v5540_v31 = vpop.permute.xlu1 %358  ;;  %v5542_v32 = vpop.permute.xlu0 %356 }
  0xbd   : > { %8959 = vst [vmem:[#allocation20_spill] sm:$0xff] %v5540_v31 }
  0xbe   : > { %750 = vrot.lane.b32.xlu1 %v5309_v1, %s8893_s8  ;;  %725 = vrot.lane.b32.xlu0 %v5326_v4, %s8888_s7 }
  0xc0   : > { %v5548_v33 = vpop.permute.xlu1 %362  ;;  %v5550_v34 = vpop.permute.xlu0 %360 }
  0xc1   : > { %8960 = vst [vmem:[#allocation21_spill] sm:$0xff] %v5548_v33  ;;  %8961 = vst [vmem:[#allocation22_spill] sm:$0xff] %v5550_v34 }
  0xc2   : > { %754 = vrot.lane.b32.xlu1 %v5306_v0, %s8893_s8  ;;  %752 = vrot.lane.b32.xlu0 %v5319_v3, %s8893_s8 }
  0xc4   : > { %v5556_v35 = vpop.permute.xlu1 %389  ;;  %v5558_v36 = vpop.permute.xlu0 %387 }
  0xc6   : > { %758 = vrot.lane.b32.xlu1 %v5326_v4, %s8893_s8  ;;  %756 = vrot.lane.b32.xlu0 %v5316_v2, %s8893_s8 }
  0xc8   : > { %v5564_v37 = vpop.permute.xlu1 %393  ;;  %v5566_v38 = vpop.permute.xlu0 %391 }
  0xc9   : > { %8962 = vst [vmem:[#allocation23_spill] sm:$0xff] %v5564_v37  ;;  %8963 = vst [vmem:[#allocation24_spill] sm:$0xff] %v5566_v38 }
  0xca   : > { %785 = vrot.lane.b32.xlu1 %v5319_v3, %s8897_s9  ;;  %783 = vrot.lane.b32.xlu0 %v5309_v1, %s8897_s9 }
  0xcc   : > { %v5572_v39 = vpop.permute.xlu1 %420  ;;  %v5574_v40 = vpop.permute.xlu0 %395 }
  0xcd   : > { %8964 = vst [vmem:[#allocation25_spill] sm:$0xff] %v5574_v40 }
  0xce   : > { %789 = vrot.lane.b32.xlu1 %v5316_v2, %s8897_s9  ;;  %787 = vrot.lane.b32.xlu0 %v5306_v0, %s8897_s9 }
  0xd0   : > { %v5580_v41 = vpop.permute.xlu1 %424  ;;  %v5582_v42 = vpop.permute.xlu0 %422 }
  0xd1   : > { %8965 = vst [vmem:[#allocation26_spill] sm:$0xff] %v5580_v41 }
  0xd2   : > { %816 = vrot.lane.b32.xlu1 %v5309_v1, %s8901_s10  ;;  %791 = vrot.lane.b32.xlu0 %v5326_v4, %s8897_s9 }
  0xd4   : > { %v5588_v43 = vpop.permute.xlu1 %428  ;;  %v5590_v44 = vpop.permute.xlu0 %426 }
  0xd5   : > { %8966 = vst [vmem:[#allocation27_spill] sm:$0xff] %v5588_v43  ;;  %8967 = vst [vmem:[#allocation28_spill] sm:$0xff] %v5590_v44 }
  0xd6   : > { %820 = vrot.lane.b32.xlu1 %v5306_v0, %s8901_s10  ;;  %818 = vrot.lane.b32.xlu0 %v5319_v3, %s8901_s10 }
  0xd8   : > { %v5596_v45 = vpop.permute.xlu1 %455  ;;  %v5598_v46 = vpop.permute.xlu0 %453 }
  0xda   : > { %824 = vrot.lane.b32.xlu1 %v5326_v4, %s8901_s10  ;;  %822 = vrot.lane.b32.xlu0 %v5316_v2, %s8901_s10 }
  0xdc   : > { %v5604_v47 = vpop.permute.xlu1 %459  ;;  %v5606_v48 = vpop.permute.xlu0 %457 }
  0xdd   : > { %8968 = vst [vmem:[#allocation29_spill] sm:$0xff] %v5604_v47  ;;  %8969 = vst [vmem:[#allocation30_spill] sm:$0xff] %v5606_v48 }
  0xde   : > { %851 = vrot.lane.b32.xlu1 %v5319_v3, %s8904_s11  ;;  %849 = vrot.lane.b32.xlu0 %v5309_v1, %s8904_s11 }
  0xe0   : > { %v5612_v49 = vpop.permute.xlu1 %486  ;;  %v5614_v50 = vpop.permute.xlu0 %461 }
  0xe1   : > { %8970 = vst [vmem:[#allocation31_spill] sm:$0xff] %v5614_v50 }
  0xe2   : > { %855 = vrot.lane.b32.xlu1 %v5316_v2, %s8904_s11  ;;  %853 = vrot.lane.b32.xlu0 %v5306_v0, %s8904_s11 }
  0xe4   : > { %v5620_v51 = vpop.permute.xlu1 %490  ;;  %v5622_v52 = vpop.permute.xlu0 %488 }
  0xe5   : > { %8971 = vst [vmem:[#allocation32_spill] sm:$0xff] %v5620_v51 }
  0xe6   : > { %882 = vrot.lane.b32.xlu1 %v5309_v1, %s8906_s14  ;;  %857 = vrot.lane.b32.xlu0 %v5326_v4, %s8904_s11 }
  0xe8   : > { %v5628_v53 = vpop.permute.xlu1 %494  ;;  %v5630_v54 = vpop.permute.xlu0 %492 }
  0xe9   : > { %8972 = vst [vmem:[#allocation33_spill] sm:$0xff] %v5628_v53  ;;  %8973 = vst [vmem:[#allocation34_spill] sm:$0xff] %v5630_v54 }
  0xea   : > { %886 = vrot.lane.b32.xlu1 %v5306_v0, %s8906_s14  ;;  %884 = vrot.lane.b32.xlu0 %v5319_v3, %s8906_s14 }
  0xec   : > { %v5636_v55 = vpop.permute.xlu1 %521  ;;  %v5638_v56 = vpop.permute.xlu0 %519 }
  0xee   : > { %890 = vrot.lane.b32.xlu1 %v5326_v4, %s8906_s14  ;;  %888 = vrot.lane.b32.xlu0 %v5316_v2, %s8906_s14 }
  0xf0   : > { %v5644_v57 = vpop.permute.xlu1 %525  ;;  %v5646_v58 = vpop.permute.xlu0 %523 }
  0xf1   : > { %8974 = vst [vmem:[#allocation35_spill] sm:$0xff] %v5644_v57  ;;  %8975 = vst [vmem:[#allocation36_spill] sm:$0xff] %v5646_v58 }
  0xf2   : > { %917 = vrot.lane.b32.xlu1 %v5319_v3, %s8659_s15  ;;  %915 = vrot.lane.b32.xlu0 %v5309_v1, %s8659_s15 }
  0xf4   : > { %v5652_v59 = vpop.permute.xlu1 %552  ;;  %v5654_v60 = vpop.permute.xlu0 %527 }
  0xf5   : > { %8976 = vst [vmem:[#allocation37_spill] sm:$0xff] %v5654_v60 }
  0xf6   : > { %921 = vrot.lane.b32.xlu1 %v5316_v2, %s8659_s15  ;;  %919 = vrot.lane.b32.xlu0 %v5306_v0, %s8659_s15 }
  0xf8   : > { %v5660_v61 = vpop.permute.xlu1 %556  ;;  %v5662_v62 = vpop.permute.xlu0 %554 }
  0xf9   : > { %8977 = vst [vmem:[#allocation38_spill] sm:$0xff] %v5660_v61 }
  0xfa   : > { %948 = vrot.lane.b32.xlu1 %v5309_v1, %s8663_s16  ;;  %923 = vrot.lane.b32.xlu0 %v5326_v4, %s8659_s15  ;;  %s8668_s15 = smov 61  }
  0xfc   : > { %v5668_v63 = vpop.permute.xlu1 %560  ;;  %v5670_v7 = vpop.permute.xlu0 %558 }
  0xfd   : > { %8978 = vst [vmem:[#allocation39_spill] sm:$0xff] %v5668_v63  ;;  %8979 = vst [vmem:[#allocation40_spill] sm:$0xff] %v5670_v7 }
  0xfe   : > { %952 = vrot.lane.b32.xlu1 %v5306_v0, %s8663_s16  ;;  %950 = vrot.lane.b32.xlu0 %v5319_v3, %s8663_s16 }
 0x100   : > { %v588_v10 = vpop.permute.xlu1 %587  ;;  %v586_v14 = vpop.permute.xlu0 %585 }
 0x102   : > { %956 = vrot.lane.b32.xlu1 %v5326_v4, %s8663_s16  ;;  %954 = vrot.lane.b32.xlu0 %v5316_v2, %s8663_s16  ;;  %s8673_s16 = smov 60  }
 0x104   : > { %v5680_v13 = vpop.permute.xlu1 %591  ;;  %v5682_v17 = vpop.permute.xlu0 %589 }
 0x105   : > { %8980 = vst [vmem:[#allocation41_spill] sm:$0xff] %v5680_v13  ;;  %8981 = vst [vmem:[#allocation42_spill] sm:$0xff] %v5682_v17 }
 0x106   : > { %983 = vrot.lane.b32.xlu1 %v5319_v3, %s8668_s15  ;;  %981 = vrot.lane.b32.xlu0 %v5309_v1, %s8668_s15 }
 0x108   : > { %v619_v20 = vpop.permute.xlu1 %618  ;;  %v5688_v24 = vpop.permute.xlu0 %593 }
 0x109   : > { %8982 = vst [vmem:[#allocation43_spill] sm:$0xff] %v5688_v24 }
 0x10a   : > { %987 = vrot.lane.b32.xlu1 %v5316_v2, %s8668_s15  ;;  %985 = vrot.lane.b32.xlu0 %v5306_v0, %s8668_s15 }
 0x10c   : > { %v5694_v23 = vpop.permute.xlu1 %622  ;;  %v621_v27 = vpop.permute.xlu0 %620 }
 0x10d   : > { %8983 = vst [vmem:[#allocation44_spill] sm:$0xff] %v5694_v23  ;;  %v630_v54 = vsel %vm628_vm1, %v621_v27, %v5694_v23  ;;  %v629_v57 = vsel %vm628_vm1, %v619_v20, %v621_v27  ;;  %v564_v20 = vsel %vm562_vm3, %v5662_v62, %v5660_v61 }
 0x10e   : > { %1014 = vrot.lane.b32.xlu1 %v5309_v1, %s8673_s16  ;;  %989 = vrot.lane.b32.xlu0 %v5326_v4, %s8668_s15  ;;  %s8677_s15 = smov 59  }
 0x110   : > { %v5700_v30 = vpop.permute.xlu1 %626  ;;  %v5702_v34 = vpop.permute.xlu0 %624 }
 0x112   : > { %1018 = vrot.lane.b32.xlu1 %v5306_v0, %s8673_s16  ;;  %1016 = vrot.lane.b32.xlu0 %v5319_v3, %s8673_s16 }
 0x114   : > { %v654_v33 = vpop.permute.xlu1 %653  ;;  %v652_v37 = vpop.permute.xlu0 %651 }
 0x115   : > { %v662_v47 = vsel %vm661_vm0, %v652_v37, %v654_v33  ;;  %v596_v37 = vsel %vm595_vm2, %v586_v14, %v588_v10  ;;  %v530_v14 = vsel %vm8925_vm4, %v5638_v56, %v5636_v55  ;;  %v464_v56 = vsel %vm8853_vm6, %v5598_v46, %v5596_v45 }
 0x116   : > { %1022 = vrot.lane.b32.xlu1 %v5326_v4, %s8673_s16  ;;  %1020 = vrot.lane.b32.xlu0 %v5316_v2, %s8673_s16  ;;  %s8675_s16 = smov 58   ;;  %v398_v46 = vsel %vm8787_vm8, %v5558_v36, %v5556_v35  ;;  %v332_v36 = vsel %vm8737_vm10, %v5518_v26, %v5516_v25  ;;  %v266_v26 = vsel %vm8780_vm12, %v5478_v16, %v5476_v15 }
 0x117   : > { %v200_v16 = vsel %vm8782_vm14, %v5438_v6, %v5446_v8 }
 0x118   : > { %v5712_v40 = vpop.permute.xlu1 %657  ;;  %v5714_v44 = vpop.permute.xlu0 %655 }
 0x119   : > { %v663_v43 = vsel %vm661_vm0, %v654_v33, %v5714_v44  ;;  %v597_v33 = vsel %vm595_vm2, %v588_v10, %v5682_v17  ;;  %v531_v10 = vsel %vm8925_vm4, %v5636_v55, %v5646_v58  ;;  %v465_v55 = vsel %vm8853_vm6, %v5596_v45, %v5606_v48 }
 0x11a   : > { %1049 = vrot.lane.b32.xlu1 %v5319_v3, %s8677_s15  ;;  %1047 = vrot.lane.b32.xlu0 %v5309_v1, %s8677_s15  ;;  %v399_v45 = vsel %vm8787_vm8, %v5556_v35, %v5566_v38  ;;  %v333_v35 = vsel %vm8737_vm10, %v5516_v25, %v5526_v28  ;;  %v267_v25 = vsel %vm8780_vm12, %v5476_v15, %v5486_v18  ;;  %vm8743_vm10 = vcmask 465920  }
 0x11b   : > { %4516 = vmatprep.subr.mxu0 %v663_v43  ;;  %v201_v15 = vsel %vm8782_vm14, %v5446_v8, %v5436_v5  ;;  %vm8790_vm8 = vcmask 236544  }
 0x11c   : > { %4517 = vmatpush1.msra.mxu0 %v662_v47  ;;  %v5723_v50 = vpop.permute.xlu1 %684  ;;  %v5727_v53 = vpop.permute.xlu0 %659  ;;  %v563_v47 = vsel %vm562_vm3, %v5652_v59, %v5662_v62  ;;  %v497_v62 = vsel %vm8854_vm5, %v5612_v49, %v5622_v52  ;;  %v432_v49 = vsel %vm8855_vm7, %v5582_v42, %v5580_v41 }
 0x11d   : > { %4518 = vmatprep.subr.mxu0 %v630_v54 }
 0x11e   : > { %4519 = vmatpush1.msra.mxu0 %v629_v57  ;;  %1053 = vrot.lane.b32.xlu1 %v5316_v2, %s8677_s15  ;;  %v498_v57 = vsel %vm8854_vm5, %v5622_v52, %v5620_v51 }
 0x11f   : > { %1051 = vrot.lane.b32.xlu0 %v5306_v0, %s8677_s15  ;;  %4520 = vmatprep.subr.mxu0 %v597_v33 }
 0x120   : > { %4521 = vmatpush1.msra.mxu0 %v596_v37  ;;  %v5737_v43 = vpop.permute.xlu1 %688  ;;  %v5742_v27 = vpop.permute.xlu0 %686  ;;  %v431_v37 = vsel %vm8855_vm7, %v5572_v39, %v5582_v42  ;;  %v366_v39 = vsel %vm8739_vm9, %v5542_v32, %v5540_v31 }
 0x121   : > { %8984 = vst [vmem:[#allocation45_spill] sm:$0xff] %v5737_v43  ;;  %4522 = vmatprep.subr.mxu0 %v564_v20 }
 0x122   : > { %4523 = vmatpush1.msra.mxu0 %v563_v47  ;;  %1080 = vrot.lane.b32.xlu1 %v5309_v1, %s8675_s16  ;;  %v365_v47 = vsel %vm8739_vm9, %v5532_v29, %v5542_v32  ;;  %v300_v32 = vsel %vm8730_vm11, %v5502_v22, %v5500_v21  ;;  %vm8742_vm9 = vcmask 474112  }
 0x123   : > { %1055 = vrot.lane.b32.xlu0 %v5326_v4, %s8677_s15  ;;  %4524 = vmatprep.subr.mxu0 %v531_v10  ;;  %s8681_s15 = smov 56  }
 0x124   : > { %4525 = vmatpush1.msra.mxu0 %v530_v14  ;;  %v5757_v54 = vpop.permute.xlu1 %692  ;;  %v5762_v59 = vpop.permute.xlu0 %690  ;;  %v299_v14 = vsel %vm8730_vm11, %v5492_v19, %v5502_v22  ;;  %v234_v22 = vsel %vm8781_vm13, %v5462_v12, %v5460_v11  ;;  %vm8740_vm11 = vcmask 457728  }
 0x125   : > { %8985 = vst [vmem:[#allocation46_spill] sm:$0xff] %v5757_v54  ;;  %8986 = vst [vmem:[#allocation47_spill] sm:$0xff] %v5762_v59  ;;  %4526 = vmatprep.subr.mxu0 %v498_v57 }
 0x126   : > { %4527 = vmatpush1.msra.mxu0 %v497_v62  ;;  %1084 = vrot.lane.b32.xlu1 %v5306_v0, %s8675_s16  ;;  %v233_v62 = vsel %vm8781_vm13, %v5452_v9, %v5462_v12  ;;  %v5862_v12 = vld [vmem:[%s5303_s17 + $0x8] sm:$0xff] }
 0x127   : > { %1082 = vrot.lane.b32.xlu0 %v5319_v3, %s8675_s16  ;;  %4528 = vmatprep.subr.mxu0 %v465_v55 }
 0x128   : > { %4529 = vmatpush1.msra.mxu0 %v464_v56  ;;  %v5777_v33 = vpop.permute.xlu1 %719  ;;  %v5782_v52 = vpop.permute.xlu0 %717  ;;  %v5865_v56 = vld [vmem:[%s5303_s17] sm:$0xff] }
 0x129   : > { %4530 = vmatprep.subr.mxu0 %v432_v49 }
 0x12a   : > { %4531 = vmatpush1.msra.mxu0 %v431_v37  ;;  %1088 = vrot.lane.b32.xlu1 %v5326_v4, %s8675_s16 }
 0x12b   : > { %1086 = vrot.lane.b32.xlu0 %v5316_v2, %s8675_s16  ;;  %4532 = vmatprep.subr.mxu0 %v399_v45  ;;  %s8679_s16 = smov 57  }
 0x12c   : > { %4533 = vmatpush1.msra.mxu0 %v398_v46  ;;  %v5797_v20 = vpop.permute.xlu1 %723  ;;  %v5802_v42 = vpop.permute.xlu0 %721 }
 0x12d   : > { %8987 = vst [vmem:[#allocation48_spill] sm:$0xff] %v5797_v20  ;;  %8988 = vst [vmem:[#allocation49_spill] sm:$0xff] %v5802_v42  ;;  %4534 = vmatprep.subr.mxu0 %v366_v39 }
 0x12e   : > { %4535 = vmatpush1.msra.mxu0 %v365_v47  ;;  %1115 = vrot.lane.b32.xlu1 %v5319_v3, %s8679_s16 }
 0x12f   : > { %1113 = vrot.lane.b32.xlu0 %v5309_v1, %s8679_s16  ;;  %4536 = vmatprep.subr.mxu0 %v333_v35 }
 0x130   : > { %4537 = vmatpush1.msra.mxu0 %v332_v36  ;;  %v5817_v29 = vpop.permute.xlu1 %750  ;;  %v5822_v10 = vpop.permute.xlu0 %725 }
 0x131   : > { %8989 = vst [vmem:[#allocation50_spill] sm:$0xff] %v5822_v10  ;;  %4538 = vmatprep.subr.mxu0 %v300_v32  ;;  %v5924_v32 = vld [vmem:[%s5303_s17 + $0x18] sm:$0xff] }
 0x132   : > { %4539 = vmatpush1.msra.mxu0 %v299_v14  ;;  %1119 = vrot.lane.b32.xlu1 %v5316_v2, %s8679_s16 }
 0x133   : > { %1117 = vrot.lane.b32.xlu0 %v5306_v0, %s8679_s16  ;;  %4540 = vmatprep.subr.mxu0 %v267_v25 }
 0x134   : > { %4541 = vmatpush1.msra.mxu0 %v266_v26  ;;  %v5837_v19 = vpop.permute.xlu1 %754  ;;  %v5842_v57 = vpop.permute.xlu0 %752 }
 0x135   : > { %8990 = vst [vmem:[#allocation51_spill] sm:$0xff] %v5837_v19  ;;  %4542 = vmatprep.subr.mxu0 %v234_v22 }
 0x136   : > { %4543 = vmatpush1.msra.mxu0 %v233_v62  ;;  %1146 = vrot.lane.b32.xlu1 %v5309_v1, %s8681_s15 }
 0x137   : > { %1121 = vrot.lane.b32.xlu0 %v5326_v4, %s8679_s16  ;;  %4544 = vmatprep.subr.mxu0 %v201_v15  ;;  %s8683_s16 = smov 55  }
 0x138   : > { %4545 = vmatpush1.msra.mxu0 %v200_v16  ;;  %v5857_v55 = vpop.permute.xlu1 %758  ;;  %v5859_v9 = vpop.permute.xlu0 %756 }
 0x139   : > { %8991 = vst [vmem:[#allocation52_spill] sm:$0xff] %v5857_v55  ;;  %8992 = vst [vmem:[#allocation53_spill] sm:$0xff] %v5859_v9  ;;  %4546 = vmatprep.subr.mxu0 %v5862_v12 }
 0x13a   : > { %1150 = vrot.lane.b32.xlu1 %v5306_v0, %s8681_s15  ;;  %4547 = vmatpush1.msra.mxu0 %v5865_v56 }
 0x13b   : > { %1148 = vrot.lane.b32.xlu0 %v5319_v3, %s8681_s15 }
 0x13c   : > { %v5873_v6 = vpop.permute.xlu1 %785  ;;  %v5875_v8 = vpop.permute.xlu0 %783 }
 0x13e   : > { %1154 = vrot.lane.b32.xlu1 %v5326_v4, %s8681_s15 }
 0x13f   : > { %1152 = vrot.lane.b32.xlu0 %v5316_v2, %s8681_s15  ;;  %s8685_s15 = smov 54  }
 0x140   : > { %v5881_v49 = vpop.permute.xlu1 %789  ;;  %v5883_v37 = vpop.permute.xlu0 %787 }
 0x141   : > { %8993 = vst [vmem:[#allocation54_spill] sm:$0xff] %v5881_v49  ;;  %8994 = vst [vmem:[#allocation55_spill] sm:$0xff] %v5883_v37 }
 0x142   : > { %1181 = vrot.lane.b32.xlu1 %v5319_v3, %s8683_s16  ;;  %v5906_v3 = vld [vmem:[%s5303_s17 + $0x10] sm:$0xff] }
 0x143   : > { %1179 = vrot.lane.b32.xlu0 %v5309_v1, %s8683_s16 }
 0x144   : > { %v5889_v45 = vpop.permute.xlu1 %816  ;;  %v5891_v46 = vpop.permute.xlu0 %791 }
 0x145   : > { %8995 = vst [vmem:[#allocation56_spill] sm:$0xff] %v5891_v46 }
 0x146   : > { %1185 = vrot.lane.b32.xlu1 %v5316_v2, %s8683_s16 }
 0x147   : > { %1183 = vrot.lane.b32.xlu0 %v5306_v0, %s8683_s16  ;;  %v5917_v0 = vld [vmem:[%s5303_s17 + $0x20] sm:$0xff] }
 0x148   : > { %v5897_v39 = vpop.permute.xlu1 %820  ;;  %v5899_v47 = vpop.permute.xlu0 %818 }
 0x149   : > { %8996 = vst [vmem:[#allocation57_spill] sm:$0xff] %v5897_v39 }
 0x14a   : > { %1212 = vrot.lane.b32.xlu1 %v5309_v1, %s8685_s15 }
 0x14b   : > { %1187 = vrot.lane.b32.xlu0 %v5326_v4, %s8683_s16  ;;  %s8689_s16 = smov 32  }
 0x14c   : > { %v5908_v35 = vpop.permute.xlu1 %824  ;;  %v5910_v36 = vpop.permute.xlu0 %822 }
 0x14d   : > { %8997 = vst [vmem:[#allocation58_spill] sm:$0xff] %v5908_v35  ;;  %8998 = vst [vmem:[#allocation59_spill] sm:$0xff] %v5910_v36 }
 0x14e   : > { %1216 = vrot.lane.b32.xlu1 %v5906_v3, %s8685_s15 }
 0x14f   : > { %1214 = vrot.lane.b32.xlu0 %v5862_v12, %s8685_s15 }
 0x150   : > { %v5919_v2 = vpop.permute.xlu1 %851  ;;  %v5921_v1 = vpop.permute.xlu0 %849 }
 0x152   : > { %1220 = vrot.lane.b32.xlu1 %v5917_v0, %s8685_s15 }
 0x153   : > { %1218 = vrot.lane.b32.xlu0 %v5924_v32, %s8685_s15  ;;  %s8693_s15 = smov 31  }
 0x154   : > { %v5930_v4 = vpop.permute.xlu1 %855  ;;  %v5932_v14 = vpop.permute.xlu0 %853 }
 0x155   : > { %8999 = vst [vmem:[#allocation60_spill] sm:$0xff] %v5930_v4  ;;  %9000 = vst [vmem:[#allocation61_spill] sm:$0xff] %v5932_v14 }
 0x156   : > { %1247 = vrot.lane.b32.xlu1 %v5862_v12, %s8689_s16 }
 0x157   : > { %1245 = vrot.lane.b32.xlu0 %v5865_v56, %s8689_s16 }
 0x158   : > { %v5938_v25 = vpop.permute.xlu1 %882  ;;  %v5940_v26 = vpop.permute.xlu0 %857 }
 0x159   : > { %9001 = vst [vmem:[#allocation62_spill] sm:$0xff] %v5940_v26 }
 0x15a   : > { %1251 = vrot.lane.b32.xlu1 %v5924_v32, %s8689_s16 }
 0x15b   : > { %1249 = vrot.lane.b32.xlu0 %v5906_v3, %s8689_s16 }
 0x15c   : > { %v5946_v22 = vpop.permute.xlu1 %886  ;;  %v5948_v62 = vpop.permute.xlu0 %884 }
 0x15d   : > { %9002 = vst [vmem:[#allocation63_spill] sm:$0xff] %v5946_v22 }
 0x15e   : > { %1278 = vrot.lane.b32.xlu1 %v5865_v56, %s8693_s15 }
 0x15f   : > { %1253 = vrot.lane.b32.xlu0 %v5917_v0, %s8689_s16  ;;  %s8698_s16 = smov 30  }
 0x160   : > { %v5954_v15 = vpop.permute.xlu1 %890  ;;  %v5956_v16 = vpop.permute.xlu0 %888 }
 0x161   : > { %9003 = vst [vmem:[#allocation64_spill] sm:$0xff] %v5954_v15  ;;  %9004 = vst [vmem:[#allocation65_spill] sm:$0xff] %v5956_v16 }
 0x162   : > { %1282 = vrot.lane.b32.xlu1 %v5906_v3, %s8693_s15 }
 0x163   : > { %1280 = vrot.lane.b32.xlu0 %v5862_v12, %s8693_s15 }
 0x164   : > { %v5962_v59 = vpop.permute.xlu1 %917  ;;  %v5964_v54 = vpop.permute.xlu0 %915 }
 0x166   : > { %1286 = vrot.lane.b32.xlu1 %v5917_v0, %s8693_s15 }
 0x167   : > { %1284 = vrot.lane.b32.xlu0 %v5924_v32, %s8693_s15  ;;  %s8702_s15 = smov 29  }
 0x168   : > { %v5970_v20 = vpop.permute.xlu1 %921  ;;  %v5972_v10 = vpop.permute.xlu0 %919 }
 0x169   : > { %9005 = vst [vmem:[#allocation66_spill] sm:$0xff] %v5970_v20  ;;  %9006 = vst [vmem:[#allocation67_spill] sm:$0xff] %v5972_v10 }
 0x16a   : > { %1313 = vrot.lane.b32.xlu1 %v5862_v12, %s8698_s16 }
 0x16b   : > { %1311 = vrot.lane.b32.xlu0 %v5865_v56, %s8698_s16 }
 0x16c   : > { %v5978_v9 = vpop.permute.xlu1 %948  ;;  %v5980_v55 = vpop.permute.xlu0 %923 }
 0x16d   : > { %9007 = vst [vmem:[#allocation68_spill] sm:$0xff] %v5980_v55 }
 0x16e   : > { %1317 = vrot.lane.b32.xlu1 %v5924_v32, %s8698_s16 }
 0x16f   : > { %1315 = vrot.lane.b32.xlu0 %v5906_v3, %s8698_s16 }
 0x170   : > { %v5986_v49 = vpop.permute.xlu1 %952  ;;  %v5988_v46 = vpop.permute.xlu0 %950 }
 0x171   : > { %9008 = vst [vmem:[#allocation69_spill] sm:$0xff] %v5986_v49 }
 0x172   : > { %1344 = vrot.lane.b32.xlu1 %v5865_v56, %s8702_s15 }
 0x173   : > { %1319 = vrot.lane.b32.xlu0 %v5917_v0, %s8698_s16  ;;  %s8708_s16 = smov 28  }
 0x174   : > { %v5994_v36 = vpop.permute.xlu1 %956  ;;  %v5996_v35 = vpop.permute.xlu0 %954 }
 0x175   : > { %9009 = vst [vmem:[#allocation70_spill] sm:$0xff] %v5994_v36  ;;  %9010 = vst [vmem:[#allocation71_spill] sm:$0xff] %v5996_v35 }
 0x176   : > { %1348 = vrot.lane.b32.xlu1 %v5906_v3, %s8702_s15 }
 0x177   : > { %1346 = vrot.lane.b32.xlu0 %v5862_v12, %s8702_s15 }
 0x178   : > { %v6002_v4 = vpop.permute.xlu1 %983  ;;  %v6004_v26 = vpop.permute.xlu0 %981 }
 0x17a   : > { %1352 = vrot.lane.b32.xlu1 %v5917_v0, %s8702_s15 }
 0x17b   : > { %1350 = vrot.lane.b32.xlu0 %v5924_v32, %s8702_s15  ;;  %s8714_s15 = smov 27  }
 0x17c   : > { %v6010_v16 = vpop.permute.xlu1 %987  ;;  %v6012_v15 = vpop.permute.xlu0 %985 }
 0x17d   : > { %9011 = vst [vmem:[#allocation72_spill] sm:$0xff] %v6010_v16  ;;  %9012 = vst [vmem:[#allocation73_spill] sm:$0xff] %v6012_v15 }
 0x17e   : > { %1379 = vrot.lane.b32.xlu1 %v5862_v12, %s8708_s16 }
 0x17f   : > { %1377 = vrot.lane.b32.xlu0 %v5865_v56, %s8708_s16 }
 0x180   : > { %v6018_v20 = vpop.permute.xlu1 %1014  ;;  %v6020_v55 = vpop.permute.xlu0 %989 }
 0x181   : > { %9013 = vst [vmem:[#allocation74_spill] sm:$0xff] %v6020_v55 }
 0x182   : > { %1383 = vrot.lane.b32.xlu1 %v5924_v32, %s8708_s16 }
 0x183   : > { %1381 = vrot.lane.b32.xlu0 %v5906_v3, %s8708_s16 }
 0x184   : > { %v6026_v35 = vpop.permute.xlu1 %1018  ;;  %v6028_v36 = vpop.permute.xlu0 %1016 }
 0x185   : > { %9014 = vst [vmem:[#allocation75_spill] sm:$0xff] %v6026_v35 }
 0x186   : > { %1410 = vrot.lane.b32.xlu1 %v5865_v56, %s8714_s15 }
 0x187   : > { %1385 = vrot.lane.b32.xlu0 %v5917_v0, %s8708_s16  ;;  %s8721_s16 = smov 26  }
 0x188   : > { %v6034_v16 = vpop.permute.xlu1 %1022  ;;  %v6036_v55 = vpop.permute.xlu0 %1020 }
 0x189   : > { %9015 = vst [vmem:[#allocation76_spill] sm:$0xff] %v6034_v16  ;;  %9016 = vst [vmem:[#allocation77_spill] sm:$0xff] %v6036_v55 }
 0x18a   : > { %1414 = vrot.lane.b32.xlu1 %v5906_v3, %s8714_s15 }
 0x18b   : > { %1412 = vrot.lane.b32.xlu0 %v5862_v12, %s8714_s15 }
 0x18c   : > { %v6042_v5 = vpop.permute.xlu1 %1049  ;;  %v6044_v11 = vpop.permute.xlu0 %1047 }
 0x18e   : > { %1418 = vrot.lane.b32.xlu1 %v5917_v0, %s8714_s15 }
 0x18f   : > { %1416 = vrot.lane.b32.xlu0 %v5924_v32, %s8714_s15  ;;  %s8726_s15 = smov 25  }
 0x190   : > { %v6050_v18 = vpop.permute.xlu1 %1053 }
 0x191   : > { %9017 = vst [vmem:[#allocation78_spill] sm:$0xff] %v6050_v18  ;;  %v6052_v16 = vpop.permute.xlu0 %1051 }
 0x192   : > { %9018 = vst [vmem:[#allocation79_spill] sm:$0xff] %v6052_v16  ;;  %1445 = vrot.lane.b32.xlu1 %v5862_v12, %s8721_s16 }
 0x193   : > { %1443 = vrot.lane.b32.xlu0 %v5865_v56, %s8721_s16 }
 0x194   : > { %v6058_v55 = vpop.permute.xlu1 %1080 }
 0x195   : > { %v6060_v21 = vpop.permute.xlu0 %1055 }
 0x196   : > { %9019 = vst [vmem:[#allocation80_spill] sm:$0xff] %v6060_v21  ;;  %1449 = vrot.lane.b32.xlu1 %v5924_v32, %s8721_s16 }
 0x197   : > { %1447 = vrot.lane.b32.xlu0 %v5906_v3, %s8721_s16 }
 0x198   : > { %v6066_v18 = vpop.permute.xlu1 %1084 }
 0x199   : > { %9020 = vst [vmem:[#allocation81_spill] sm:$0xff] %v6066_v18  ;;  %v6068_v28 = vpop.permute.xlu0 %1082 }
 0x19a   : > { %1476 = vrot.lane.b32.xlu1 %v5865_v56, %s8726_s15 }
 0x19b   : > { %1451 = vrot.lane.b32.xlu0 %v5917_v0, %s8721_s16  ;;  %s8731_s16 = smov 24  }
 0x19c   : > { %v6074_v31 = vpop.permute.xlu1 %1088 }
 0x19d   : > { %9021 = vst [vmem:[#allocation82_spill] sm:$0xff] %v6074_v31  ;;  %v6076_v21 = vpop.permute.xlu0 %1086 }
 0x19e   : > { %9022 = vst [vmem:[#allocation83_spill] sm:$0xff] %v6076_v21  ;;  %1480 = vrot.lane.b32.xlu1 %v5906_v3, %s8726_s15 }
 0x19f   : > { %1478 = vrot.lane.b32.xlu0 %v5862_v12, %s8726_s15 }
 0x1a0   : > { %v1116_v38 = vpop.permute.xlu1 %1115 }
 0x1a1   : > { %v1114_v41 = vpop.permute.xlu0 %1113 }
 0x1a2   : > { %1484 = vrot.lane.b32.xlu1 %v5917_v0, %s8726_s15 }
 0x1a3   : > { %1482 = vrot.lane.b32.xlu0 %v5924_v32, %s8726_s15  ;;  %s8794_s15 = smov 23  }
 0x1a4   : > { %v6086_v48 = vpop.permute.xlu1 %1119 }
 0x1a5   : > { %9023 = vst [vmem:[#allocation84_spill] sm:$0xff] %v6086_v48  ;;  %v6088_v51 = vpop.permute.xlu0 %1117 }
 0x1a6   : > { %9024 = vst [vmem:[#allocation85_spill] sm:$0xff] %v6088_v51  ;;  %1511 = vrot.lane.b32.xlu1 %v5862_v12, %s8731_s16 }
 0x1a7   : > { %1509 = vrot.lane.b32.xlu0 %v5865_v56, %s8731_s16 }
 0x1a8   : > { %v1147_v21 = vpop.permute.xlu1 %1146 }
 0x1a9   : > { %v6094_v31 = vpop.permute.xlu0 %1121 }
 0x1aa   : > { %9025 = vst [vmem:[#allocation86_spill] sm:$0xff] %v6094_v31  ;;  %1515 = vrot.lane.b32.xlu1 %v5924_v32, %s8731_s16 }
 0x1ab   : > { %1513 = vrot.lane.b32.xlu0 %v5906_v3, %s8731_s16 }
 0x1ac   : > { %v6100_v58 = vpop.permute.xlu1 %1150 }
 0x1ad   : > { %9026 = vst [vmem:[#allocation87_spill] sm:$0xff] %v6100_v58  ;;  %v1149_v48 = vpop.permute.xlu0 %1148 }
 0x1ae   : > { %1542 = vrot.lane.b32.xlu1 %v5865_v56, %s8794_s15  ;;  %v1157_v23 = vsel %vm8740_vm11, %v1147_v21, %v1149_v48  ;;  %v1092_v21 = vsel %vm8742_vm9, %v6068_v28, %v6066_v18 }
 0x1af   : > { %1517 = vrot.lane.b32.xlu0 %v5917_v0, %s8731_s16  ;;  %s8799_s16 = smov 22  }
 0x1b0   : > { %v6106_v60 = vpop.permute.xlu1 %1154 }
 0x1b1   : > { %9027 = vst [vmem:[#allocation88_spill] sm:$0xff] %v6106_v60  ;;  %v6108_v61 = vpop.permute.xlu0 %1152 }
 0x1b2   : > { %9028 = vst [vmem:[#allocation89_spill] sm:$0xff] %v6108_v61  ;;  %1546 = vrot.lane.b32.xlu1 %v5906_v3, %s8794_s15 }
 0x1b3   : > { %1544 = vrot.lane.b32.xlu0 %v5862_v12, %s8794_s15 }
 0x1b4   : > { %v1182_v31 = vpop.permute.xlu1 %1181 }
 0x1b5   : > { %v1180_v7 = vpop.permute.xlu0 %1179 }
 0x1b6   : > { %1550 = vrot.lane.b32.xlu1 %v5917_v0, %s8794_s15  ;;  %v1190_v17 = vsel %vm8741_vm15, %v1180_v7, %v1182_v31  ;;  %v1125_v7 = vsel %vm8743_vm10, %v1116_v38, %v6088_v51 }
 0x1b7   : > { %1548 = vrot.lane.b32.xlu0 %v5924_v32, %s8794_s15  ;;  %s9099_s15 = smov 63  }
 0x1b8   : > { %v6118_v63 = vpop.permute.xlu1 %1185 }
 0x1b9   : > { %9029 = vst [vmem:[#allocation90_spill] sm:$0xff] %v6118_v63  ;;  %v6120_v60 = vpop.permute.xlu0 %1183  ;;  %v1158_v63 = vsel %vm8740_vm11, %v1149_v48, %v6100_v58  ;;  %vm8745_vm11 = vcmask 482304   ;;  %v1091_v48 = vsel %vm8742_vm9, %v6058_v55, %v6068_v28  ;;  %vm8747_vm9 = vcmask 498688  }
 0x1ba   : > { %9030 = vst [vmem:[#allocation91_spill] sm:$0xff] %v6120_v60  ;;  %1577 = vrot.lane.b32.xlu1 %v5862_v12, %s8799_s16  ;;  %v1191_v61 = vsel %vm8741_vm15, %v1182_v31, %v6120_v60  ;;  %vm8744_vm15 = vcmask 490496  }
 0x1bb   : > { %1575 = vrot.lane.b32.xlu0 %v5865_v56, %s8799_s16  ;;  %4548 = vmatprep.subr.mxu0 %v1191_v61  ;;  %v1026_v61 = vsel %vm8744_vm15, %v6028_v36, %v6026_v35  ;;  %v1025_v55 = vsel %vm8744_vm15, %v6018_v20, %v6028_v36  ;;  %v6184_v56 = vld [vmem:[%s5303_s17 + $0x28] sm:$0xff]  ;;  %vm8749_vm15 = vcmask 515072  }
 0x1bc   : > { %4549 = vmatpush2.msra.mxu0 %v1190_v17  ;;  %v6129_v13 = vpop.permute.xlu1 %1212  ;;  %v1124_v17 = vsel %vm8743_vm10, %v1114_v41, %v1116_v38  ;;  %v1059_v38 = vsel %vm8745_vm11, %v6042_v5, %v6052_v16  ;;  %v1058_v41 = vsel %vm8745_vm11, %v6044_v11, %v6042_v5  ;;  %vm8746_vm10 = vcmask 506880  }
 0x1bd   : > { %v6133_v24 = vpop.permute.xlu0 %1187  ;;  %4550 = vmatprep.subr.mxu0 %v1158_v63  ;;  %v993_v5 = vsel %vm8747_vm9, %v6002_v4, %v6012_v15  ;;  %v992_v11 = vsel %vm8747_vm9, %v6004_v26, %v6002_v4  ;;  %v960_v36 = vsel %vm8746_vm10, %v5988_v46, %v5986_v49  ;;  %vm8748_vm11 = vcmask 523264  }
 0x1be   : > { %9031 = vst [vmem:[#allocation92_spill] sm:$0xff] %v6133_v24  ;;  %4551 = vmatpush2.msra.mxu0 %v1157_v23  ;;  %1581 = vrot.lane.b32.xlu1 %v5924_v32, %s8799_s16  ;;  %v927_v4 = vsel %vm8749_vm15, %v5962_v59, %v5972_v10  ;;  %v926_v26 = vsel %vm8749_vm15, %v5964_v54, %v5962_v59  ;;  %vm8750_vm9 = vcmask 711680   ;;  %vm760_vm15 = vcmask 728064  }
 0x1bf   : > { %1579 = vrot.lane.b32.xlu0 %v5906_v3, %s8799_s16  ;;  %4552 = vmatprep.subr.mxu0 %v1125_v7 }
 0x1c0   : > { %4553 = vmatpush2.msra.mxu0 %v1124_v17  ;;  %v6143_v31 = vpop.permute.xlu1 %1216  ;;  %v959_v17 = vsel %vm8746_vm10, %v5978_v9, %v5988_v46  ;;  %v894_v9 = vsel %vm8748_vm11, %v5948_v62, %v5946_v22  ;;  %vm8751_vm10 = vcmask 703488  }
 0x1c1   : > { %9032 = vst [vmem:[#allocation93_spill] sm:$0xff] %v6143_v31  ;;  %v6148_v23 = vpop.permute.xlu0 %1214  ;;  %4554 = vmatprep.subr.mxu0 %v1092_v21  ;;  %v861_v54 = vsel %vm8751_vm10, %v5919_v2, %v5932_v14  ;;  %v860_v59 = vsel %vm8751_vm10, %v5921_v1, %v5919_v2  ;;  %vm694_vm10 = vcmask 744448  }
 0x1c2   : > { %4555 = vmatpush2.msra.mxu0 %v1091_v48  ;;  %1616 = vrot.lane.b32.xlu1 %v5862_v12, %s8803_s18  ;;  %v893_v48 = vsel %vm8748_vm11, %v5938_v25, %v5948_v62  ;;  %v828_v25 = vsel %vm8750_vm9, %v5899_v47, %v5897_v39  ;;  %vm793_vm11 = vcmask 719872  }
 0x1c3   : > { %1583 = vrot.lane.b32.xlu0 %v5917_v0, %s8799_s16  ;;  %4556 = vmatprep.subr.mxu0 %v1059_v38  ;;  %v795_v2 = vsel %vm793_vm11, %v5873_v6, %v5883_v37  ;;  %v794_v1 = vsel %vm793_vm11, %v5875_v8, %v5873_v6  ;;  %s9104_s16 = smov 62  }
 0x1c4   : > { %4557 = vmatpush2.msra.mxu0 %v1058_v41  ;;  %v6163_v28 = vpop.permute.xlu1 %1220  ;;  %v827_v41 = vsel %vm8750_vm9, %v5889_v45, %v5899_v47  ;;  %v762_v45 = vsel %vm760_vm15, %v5842_v57, %v5837_v19  ;;  %vm727_vm9 = vcmask 736256  }
 0x1c5   : > { %9033 = vst [vmem:[#allocation94_spill] sm:$0xff] %v6163_v28  ;;  %v6168_v63 = vpop.permute.xlu0 %1218  ;;  %4558 = vmatprep.subr.mxu0 %v1026_v61  ;;  %v729_v6 = vsel %vm727_vm9, %v5777_v33, %v5802_v42  ;;  %v728_v8 = vsel %vm727_vm9, %v5782_v52, %v5777_v33 }
 0x1c6   : > { %9034 = vst [vmem:[#allocation95_spill] sm:$0xff] %v6168_v63  ;;  %4559 = vmatpush2.msra.mxu0 %v1025_v55  ;;  %1620 = vrot.lane.b32.xlu1 %v5924_v32, %s8803_s18  ;;  %v761_v55 = vsel %vm760_vm15, %v5817_v29, %v5842_v57  ;;  %v696_v29 = vsel %vm694_vm10, %v5742_v27, %v5737_v43 }
 0x1c7   : > { %1618 = vrot.lane.b32.xlu0 %v5906_v3, %s8803_s18  ;;  %4560 = vmatprep.subr.mxu0 %v993_v5 }
 0x1c8   : > { %4561 = vmatpush2.msra.mxu0 %v992_v11  ;;  %v6186_v20 = vpop.permute.xlu1 %1247  ;;  %v695_v11 = vsel %vm694_vm10, %v5723_v50, %v5742_v27 }
 0x1c9   : > { %v6191_v7 = vpop.permute.xlu0 %1245  ;;  %4562 = vmatprep.subr.mxu0 %v960_v36 }
 0x1ca   : > { %4563 = vmatpush2.msra.mxu0 %v959_v17  ;;  %1624 = vrot.lane.b32.xlu1 %v6184_v56, %s8803_s18 }
 0x1cb   : > { %1622 = vrot.lane.b32.xlu0 %v5917_v0, %s8803_s18  ;;  %4564 = vmatprep.subr.mxu0 %v927_v4  ;;  %s9107_s18 = smov 61  }
 0x1cc   : > { %4565 = vmatpush2.msra.mxu0 %v926_v26  ;;  %v6206_v21 = vpop.permute.xlu1 %1251 }
 0x1cd   : > { %9035 = vst [vmem:[#allocation96_spill] sm:$0xff] %v6206_v21  ;;  %v6211_v46 = vpop.permute.xlu0 %1249  ;;  %4566 = vmatprep.subr.mxu0 %v894_v9 }
 0x1ce   : > { %9036 = vst [vmem:[#allocation97_spill] sm:$0xff] %v6211_v46  ;;  %4567 = vmatpush2.msra.mxu0 %v893_v48  ;;  %1650 = vrot.lane.b32.xlu1 %v5906_v3, %s8808_s19 }
 0x1cf   : > { %1648 = vrot.lane.b32.xlu0 %v5862_v12, %s8808_s19  ;;  %4568 = vmatprep.subr.mxu0 %v861_v54 }
 0x1d0   : > { %4569 = vmatpush2.msra.mxu0 %v860_v59  ;;  %v6226_v38 = vpop.permute.xlu1 %1278 }
 0x1d1   : > { %v6231_v62 = vpop.permute.xlu0 %1253  ;;  %4570 = vmatprep.subr.mxu0 %v828_v25 }
 0x1d2   : > { %9037 = vst [vmem:[#allocation98_spill] sm:$0xff] %v6231_v62  ;;  %4571 = vmatpush2.msra.mxu0 %v827_v41  ;;  %1654 = vrot.lane.b32.xlu1 %v5917_v0, %s8808_s19 }
 0x1d3   : > { %1652 = vrot.lane.b32.xlu0 %v5924_v32, %s8808_s19  ;;  %4572 = vmatprep.subr.mxu0 %v795_v2 }
 0x1d4   : > { %4573 = vmatpush2.msra.mxu0 %v794_v1  ;;  %v6246_v61 = vpop.permute.xlu1 %1282 }
 0x1d5   : > { %9038 = vst [vmem:[#allocation99_spill] sm:$0xff] %v6246_v61  ;;  %v6251_v47 = vpop.permute.xlu0 %1280  ;;  %4574 = vmatprep.subr.mxu0 %v762_v45 }
 0x1d6   : > { %4575 = vmatpush2.msra.mxu0 %v761_v55  ;;  %1680 = vrot.lane.b32.xlu1 %v5862_v12, %s8814_s20 }
 0x1d7   : > { %1656 = vrot.lane.b32.xlu0 %v6184_v56, %s8808_s19  ;;  %4576 = vmatprep.subr.mxu0 %v729_v6  ;;  %s9112_s19 = smov 60  }
 0x1d8   : > { %4577 = vmatpush2.msra.mxu0 %v728_v8  ;;  %v6266_v5 = vpop.permute.xlu1 %1286 }
 0x1d9   : > { %9039 = vst [vmem:[#allocation100_spill] sm:$0xff] %v6266_v5  ;;  %v6271_v57 = vpop.permute.xlu0 %1284  ;;  %4578 = vmatprep.subr.mxu0 %v696_v29 }
 0x1da   : > { %9040 = vst [vmem:[#allocation101_spill] sm:$0xff] %v6271_v57  ;;  %4579 = vmatpush2.msra.mxu0 %v695_v11  ;;  %1684 = vrot.lane.b32.xlu1 %v5924_v32, %s8814_s20 }
 0x1db   : > { %1682 = vrot.lane.b32.xlu0 %v5906_v3, %s8814_s20 }
 0x1dc   : > { %v6280_v33 = vpop.permute.xlu1 %1313 }
 0x1dd   : > { %v6282_v52 = vpop.permute.xlu0 %1311 }
 0x1de   : > { %1688 = vrot.lane.b32.xlu1 %v6184_v56, %s8814_s20 }
 0x1df   : > { %1686 = vrot.lane.b32.xlu0 %v5917_v0, %s8814_s20  ;;  %s9115_s20 = smov 59  }
 0x1e0   : > { %v6288_v36 = vpop.permute.xlu1 %1317 }
 0x1e1   : > { %9041 = vst [vmem:[#allocation102_spill] sm:$0xff] %v6288_v36  ;;  %v6290_v50 = vpop.permute.xlu0 %1315 }
 0x1e2   : > { %9042 = vst [vmem:[#allocation103_spill] sm:$0xff] %v6290_v50  ;;  %1714 = vrot.lane.b32.xlu1 %v5906_v3, %s8820_s21 }
 0x1e3   : > { %1712 = vrot.lane.b32.xlu0 %v5862_v12, %s8820_s21 }
 0x1e4   : > { %v6296_v27 = vpop.permute.xlu1 %1344 }
 0x1e5   : > { %v6298_v17 = vpop.permute.xlu0 %1319 }
 0x1e6   : > { %9043 = vst [vmem:[#allocation104_spill] sm:$0xff] %v6298_v17  ;;  %1718 = vrot.lane.b32.xlu1 %v5917_v0, %s8820_s21 }
 0x1e7   : > { %1716 = vrot.lane.b32.xlu0 %v5924_v32, %s8820_s21 }
 0x1e8   : > { %v6304_v4 = vpop.permute.xlu1 %1348 }
 0x1e9   : > { %9044 = vst [vmem:[#allocation105_spill] sm:$0xff] %v6304_v4  ;;  %v6306_v26 = vpop.permute.xlu0 %1346 }
 0x1ea   : > { %1744 = vrot.lane.b32.xlu1 %v5862_v12, %s8826_s22 }
 0x1eb   : > { %1720 = vrot.lane.b32.xlu0 %v6184_v56, %s8820_s21  ;;  %s9120_s21 = smov 58  }
 0x1ec   : > { %v6312_v9 = vpop.permute.xlu1 %1352 }
 0x1ed   : > { %9045 = vst [vmem:[#allocation106_spill] sm:$0xff] %v6312_v9  ;;  %v6314_v48 = vpop.permute.xlu0 %1350 }
 0x1ee   : > { %9046 = vst [vmem:[#allocation107_spill] sm:$0xff] %v6314_v48  ;;  %1748 = vrot.lane.b32.xlu1 %v5924_v32, %s8826_s22 }
 0x1ef   : > { %1746 = vrot.lane.b32.xlu0 %v5906_v3, %s8826_s22 }
 0x1f0   : > { %v6320_v54 = vpop.permute.xlu1 %1379 }
 0x1f1   : > { %v6322_v59 = vpop.permute.xlu0 %1377 }
 0x1f2   : > { %1752 = vrot.lane.b32.xlu1 %v6184_v56, %s8826_s22 }
 0x1f3   : > { %1750 = vrot.lane.b32.xlu0 %v5917_v0, %s8826_s22  ;;  %s9123_s22 = smov 57  }
 0x1f4   : > { %v6328_v25 = vpop.permute.xlu1 %1383 }
 0x1f5   : > { %9047 = vst [vmem:[#allocation108_spill] sm:$0xff] %v6328_v25  ;;  %v6330_v41 = vpop.permute.xlu0 %1381 }
 0x1f6   : > { %9048 = vst [vmem:[#allocation109_spill] sm:$0xff] %v6330_v41  ;;  %1778 = vrot.lane.b32.xlu1 %v5906_v3, %s8833_s23 }
 0x1f7   : > { %1776 = vrot.lane.b32.xlu0 %v5862_v12, %s8833_s23 }
 0x1f8   : > { %v6336_v2 = vpop.permute.xlu1 %1410 }
 0x1f9   : > { %v6338_v1 = vpop.permute.xlu0 %1385 }
 0x1fa   : > { %9049 = vst [vmem:[#allocation110_spill] sm:$0xff] %v6338_v1  ;;  %1782 = vrot.lane.b32.xlu1 %v5917_v0, %s8833_s23 }
 0x1fb   : > { %1780 = vrot.lane.b32.xlu0 %v5924_v32, %s8833_s23 }
 0x1fc   : > { %v6344_v45 = vpop.permute.xlu1 %1414 }
 0x1fd   : > { %9050 = vst [vmem:[#allocation111_spill] sm:$0xff] %v6344_v45  ;;  %v6346_v55 = vpop.permute.xlu0 %1412 }
 0x1fe   : > { %1808 = vrot.lane.b32.xlu1 %v5862_v12, %s8838_s24 }
 0x1ff   : > { %1784 = vrot.lane.b32.xlu0 %v6184_v56, %s8833_s23  ;;  %s9128_s23 = smov 56  }
 0x200   : > { %v6352_v6 = vpop.permute.xlu1 %1418 }
 0x201   : > { %9051 = vst [vmem:[#allocation112_spill] sm:$0xff] %v6352_v6  ;;  %v6354_v8 = vpop.permute.xlu0 %1416 }
 0x202   : > { %9052 = vst [vmem:[#allocation113_spill] sm:$0xff] %v6354_v8  ;;  %1812 = vrot.lane.b32.xlu1 %v5924_v32, %s8838_s24 }
 0x203   : > { %1810 = vrot.lane.b32.xlu0 %v5906_v3, %s8838_s24 }
 0x204   : > { %v6360_v29 = vpop.permute.xlu1 %1445 }
 0x205   : > { %v6362_v11 = vpop.permute.xlu0 %1443 }
 0x206   : > { %1816 = vrot.lane.b32.xlu1 %v6184_v56, %s8838_s24 }
 0x207   : > { %1814 = vrot.lane.b32.xlu0 %v5917_v0, %s8838_s24  ;;  %s9131_s24 = smov 55  }
 0x208   : > { %v6368_v63 = vpop.permute.xlu1 %1449 }
 0x209   : > { %9053 = vst [vmem:[#allocation114_spill] sm:$0xff] %v6368_v63  ;;  %v6370_v28 = vpop.permute.xlu0 %1447 }
 0x20a   : > { %9054 = vst [vmem:[#allocation115_spill] sm:$0xff] %v6370_v28  ;;  %1842 = vrot.lane.b32.xlu1 %v5906_v3, %s8843_s25 }
 0x20b   : > { %1840 = vrot.lane.b32.xlu0 %v5862_v12, %s8843_s25 }
 0x20c   : > { %v6376_v21 = vpop.permute.xlu1 %1476 }
 0x20d   : > { %v6378_v62 = vpop.permute.xlu0 %1451 }
 0x20e   : > { %9055 = vst [vmem:[#allocation116_spill] sm:$0xff] %v6378_v62  ;;  %1846 = vrot.lane.b32.xlu1 %v5917_v0, %s8843_s25 }
 0x20f   : > { %1844 = vrot.lane.b32.xlu0 %v5924_v32, %s8843_s25 }
 0x210   : > { %v6384_v57 = vpop.permute.xlu1 %1480 }
 0x211   : > { %9056 = vst [vmem:[#allocation117_spill] sm:$0xff] %v6384_v57  ;;  %v6386_v5 = vpop.permute.xlu0 %1478 }
 0x212   : > { %1872 = vrot.lane.b32.xlu1 %v5862_v12, %s8845_s26 }
 0x213   : > { %1848 = vrot.lane.b32.xlu0 %v6184_v56, %s8843_s25  ;;  %s9165_s25 = smov 95  }
 0x214   : > { %v6392_v36 = vpop.permute.xlu1 %1484 }
 0x215   : > { %9057 = vst [vmem:[#allocation118_spill] sm:$0xff] %v6392_v36  ;;  %v6394_v17 = vpop.permute.xlu0 %1482 }
 0x216   : > { %9058 = vst [vmem:[#allocation119_spill] sm:$0xff] %v6394_v17  ;;  %1876 = vrot.lane.b32.xlu1 %v5924_v32, %s8845_s26 }
 0x217   : > { %1874 = vrot.lane.b32.xlu0 %v5906_v3, %s8845_s26 }
 0x218   : > { %v6400_v48 = vpop.permute.xlu1 %1511 }
 0x219   : > { %v6402_v9 = vpop.permute.xlu0 %1509 }
 0x21a   : > { %1880 = vrot.lane.b32.xlu1 %v6184_v56, %s8845_s26 }
 0x21b   : > { %1878 = vrot.lane.b32.xlu0 %v5917_v0, %s8845_s26  ;;  %s9150_s26 = smov 31  }
 0x21c   : > { %v6408_v25 = vpop.permute.xlu1 %1515 }
 0x21d   : > { %9059 = vst [vmem:[#allocation120_spill] sm:$0xff] %v6408_v25  ;;  %v6410_v1 = vpop.permute.xlu0 %1513 }
 0x21e   : > { %9060 = vst [vmem:[#allocation121_spill] sm:$0xff] %v6410_v1  ;;  %1906 = vrot.lane.b32.xlu1 %v5906_v3, %s8847_s27 }
 0x21f   : > { %1904 = vrot.lane.b32.xlu0 %v5862_v12, %s8847_s27 }
 0x220   : > { %v6416_v8 = vpop.permute.xlu1 %1542 }
 0x221   : > { %v6418_v6 = vpop.permute.xlu0 %1517 }
 0x222   : > { %9061 = vst [vmem:[#allocation122_spill] sm:$0xff] %v6418_v6  ;;  %1910 = vrot.lane.b32.xlu1 %v5917_v0, %s8847_s27 }
 0x223   : > { %1908 = vrot.lane.b32.xlu0 %v5924_v32, %s8847_s27 }
 0x224   : > { %v6424_v63 = vpop.permute.xlu1 %1546 }
 0x225   : > { %9062 = vst [vmem:[#allocation123_spill] sm:$0xff] %v6424_v63  ;;  %v6426_v62 = vpop.permute.xlu0 %1544 }
 0x226   : > { %1936 = vrot.lane.b32.xlu1 %v5862_v12, %s8849_s28 }
 0x227   : > { %1912 = vrot.lane.b32.xlu0 %v6184_v56, %s8847_s27  ;;  %s9135_s27 = smov 54  }
 0x228   : > { %v6432_v43 = vpop.permute.xlu1 %1550 }
 0x229   : > { %9063 = vst [vmem:[#allocation124_spill] sm:$0xff] %v6432_v43  ;;  %v6434_v17 = vpop.permute.xlu0 %1548 }
 0x22a   : > { %9064 = vst [vmem:[#allocation125_spill] sm:$0xff] %v6434_v17  ;;  %1940 = vrot.lane.b32.xlu1 %v5924_v32, %s8849_s28 }
 0x22b   : > { %1938 = vrot.lane.b32.xlu0 %v5906_v3, %s8849_s28 }
 0x22c   : > { %v6440_v36 = vpop.permute.xlu1 %1577 }
 0x22d   : > { %v1576_v42 = vpop.permute.xlu0 %1575 }
 0x22e   : > { %1944 = vrot.lane.b32.xlu1 %v6184_v56, %s8849_s28 }
 0x22f   : > { %1942 = vrot.lane.b32.xlu0 %v5917_v0, %s8849_s28  ;;  %s9139_s28 = smov 30  }
 0x230   : > { %v6446_v25 = vpop.permute.xlu1 %1581 }
 0x231   : > { %9065 = vst [vmem:[#allocation126_spill] sm:$0xff] %v6446_v25  ;;  %v6448_v6 = vpop.permute.xlu0 %1579 }
 0x232   : > { %9066 = vst [vmem:[#allocation127_spill] sm:$0xff] %v6448_v6  ;;  %1970 = vrot.lane.b32.xlu1 %v5906_v3, %s8851_s29 }
 0x233   : > { %1968 = vrot.lane.b32.xlu0 %v5862_v12, %s8851_s29 }
 0x234   : > { %v1617_v19 = vpop.permute.xlu1 %1616 }
 0x235   : > { %v6454_v17 = vpop.permute.xlu0 %1583 }
 0x236   : > { %9067 = vst [vmem:[#allocation128_spill] sm:$0xff] %v6454_v17  ;;  %1974 = vrot.lane.b32.xlu1 %v5917_v0, %s8851_s29 }
 0x237   : > { %1972 = vrot.lane.b32.xlu0 %v5924_v32, %s8851_s29 }
 0x238   : > { %v6460_v43 = vpop.permute.xlu1 %1620 }
 0x239   : > { %9068 = vst [vmem:[#allocation129_spill] sm:$0xff] %v6460_v43  ;;  %v1619_v37 = vpop.permute.xlu0 %1618 }
 0x23a   : > { %2000 = vrot.lane.b32.xlu1 %v5862_v12, %s8873_s30 }
 0x23b   : > { %1976 = vrot.lane.b32.xlu0 %v6184_v56, %s8851_s29  ;;  %s9153_s29 = smov 32  }
 0x23c   : > { %v6466_v25 = vpop.permute.xlu1 %1624 }
 0x23d   : > { %9069 = vst [vmem:[#allocation130_spill] sm:$0xff] %v6466_v25  ;;  %v6468_v39 = vpop.permute.xlu0 %1622 }
 0x23e   : > { %9070 = vst [vmem:[#allocation131_spill] sm:$0xff] %v6468_v39  ;;  %2004 = vrot.lane.b32.xlu1 %v5924_v32, %s8873_s30 }
 0x23f   : > { %2002 = vrot.lane.b32.xlu0 %v5906_v3, %s8873_s30 }
 0x240   : > { %v1651_v17 = vpop.permute.xlu1 %1650 }
 0x241   : > { %v1649_v14 = vpop.permute.xlu0 %1648 }
 0x242   : > { %2008 = vrot.lane.b32.xlu1 %v6184_v56, %s8873_s30  ;;  %v1658_v51 = vsel %vm8781_vm13, %v1649_v14, %v1651_v17  ;;  %v6539_v14 = vld [vmem:[%s5303_s17 + $0x8] sm:$0xff] }
 0x243   : > { %2006 = vrot.lane.b32.xlu0 %v5917_v0, %s8873_s30 }
 0x244   : > { %v6478_v22 = vpop.permute.xlu1 %1654 }
 0x245   : > { %9071 = vst [vmem:[#allocation132_spill] sm:$0xff] %v6478_v22  ;;  %v6480_v10 = vpop.permute.xlu0 %1652 }
 0x246   : > { %9072 = vst [vmem:[#allocation133_spill] sm:$0xff] %v6480_v10  ;;  %2034 = vrot.lane.b32.xlu1 %v5906_v3, %s8868_s4  ;;  %v1659_v16 = vsel %vm8781_vm13, %v1651_v17, %v6480_v10  ;;  %vm8784_vm13 = vcmask 187392  }
 0x247   : > { %2032 = vrot.lane.b32.xlu0 %v5862_v12, %s8868_s4 }
 0x248   : > { %v1681_v39 = vpop.permute.xlu1 %1680 }
 0x249   : > { %v6486_v25 = vpop.permute.xlu0 %1656 }
 0x24a   : > { %9073 = vst [vmem:[#allocation134_spill] sm:$0xff] %v6486_v25  ;;  %2038 = vrot.lane.b32.xlu1 %v5917_v0, %s8868_s4 }
 0x24b   : > { %2036 = vrot.lane.b32.xlu0 %v5924_v32, %s8868_s4 }
 0x24c   : > { %v6492_v49 = vpop.permute.xlu1 %1684 }
 0x24d   : > { %9074 = vst [vmem:[#allocation135_spill] sm:$0xff] %v6492_v49  ;;  %v1683_v22 = vpop.permute.xlu0 %1682 }
 0x24e   : > { %2064 = vrot.lane.b32.xlu1 %v5862_v12, %s8877_s5  ;;  %v1691_v15 = vsel %vm8780_vm12, %v1683_v22, %v6492_v49  ;;  %v1690_v35 = vsel %vm8780_vm12, %v1681_v39, %v1683_v22  ;;  %v1627_v39 = vsel %vm8782_vm14, %v1619_v37, %v6460_v43  ;;  %vm8783_vm12 = vcmask 179200  }
 0x24f   : > { %2040 = vrot.lane.b32.xlu0 %v6184_v56, %s8868_s4  ;;  %4587 = vmatprep.subr.mxu1 %v1691_v15 }
 0x250   : > { %4588 = vmatpush1.msra.mxu1 %v1690_v35  ;;  %v6501_v25 = vpop.permute.xlu1 %1688  ;;  %v1626_v35 = vsel %vm8782_vm14, %v1617_v19, %v1619_v37  ;;  %v1586_v19 = vsel %vm8783_vm12, %v1576_v42, %v6440_v36  ;;  %v6531_v37 = vld [vmem:[%s5303_s17 + $0x10] sm:$0xff]  ;;  %vm8785_vm14 = vcmask 195584   ;;  %v1553_v42 = vsel %vm8784_vm13, %v6416_v8, %v6426_v62  ;;  %v6565_v8 = vld [vmem:[%s5303_s17 + $0x18] sm:$0xff] }
 0x251   : > { %9075 = vst [vmem:[#allocation136_spill] sm:$0xff] %v6501_v25  ;;  %4589 = vmatprep.subr.mxu1 %v1659_v16  ;;  %v6505_v18 = vpop.permute.xlu0 %1686  ;;  %v1521_v15 = vsel %vm8785_vm14, %v6400_v48, %v6410_v1  ;;  %v1520_v16 = vsel %vm8785_vm14, %v6402_v9, %v6400_v48  ;;  %vm8788_vm14 = vcmask 220160  }
 0x252   : > { %9076 = vst [vmem:[#allocation137_spill] sm:$0xff] %v6505_v18  ;;  %4590 = vmatpush1.msra.mxu1 %v1658_v51  ;;  %2068 = vrot.lane.b32.xlu1 %v5924_v32, %s8877_s5  ;;  %v1587_v32 = vsel %vm8783_vm12, %v6440_v36, %v6448_v6  ;;  %vm8786_vm12 = vcmask 203776   ;;  %v6557_v36 = vld [vmem:[%s5303_s17 + $0x20] sm:$0xff] }
 0x253   : > { %2066 = vrot.lane.b32.xlu0 %v5906_v3, %s8877_s5  ;;  %4591 = vmatprep.subr.mxu1 %v1627_v39  ;;  %v1488_v17 = vsel %vm8786_vm12, %v6386_v5, %v6384_v57 }
 0x254   : > { %4592 = vmatpush1.msra.mxu1 %v1626_v35  ;;  %v6515_v22 = vpop.permute.xlu1 %1714  ;;  %v1487_v35 = vsel %vm8786_vm12, %v6376_v21, %v6386_v5  ;;  %v1422_v21 = vsel %vm8788_vm14, %v6346_v55, %v6344_v45  ;;  %vm8791_vm12 = vcmask 228352  }
 0x255   : > { %4593 = vmatprep.subr.mxu1 %v5906_v3  ;;  %v6518_v51 = vpop.permute.xlu0 %1712 }
 0x256   : > { %4594 = vmatpush1.msra.mxu1 %v5862_v12  ;;  %2072 = vrot.lane.b32.xlu1 %v6184_v56, %s8877_s5  ;;  %v1554_v12 = vsel %vm8784_vm13, %v6426_v62, %v6424_v63  ;;  %vm8789_vm13 = vcmask 211968  }
 0x257   : > { %2070 = vrot.lane.b32.xlu0 %v5917_v0, %s8877_s5  ;;  %4595 = vmatprep.subr.mxu1 %v1587_v32  ;;  %v1455_v9 = vsel %vm8789_vm13, %v6360_v29, %v6370_v28  ;;  %v1454_v48 = vsel %vm8789_vm13, %v6362_v11, %v6360_v29  ;;  %v1389_v29 = vsel %vm8791_vm12, %v6320_v54, %v6330_v41  ;;  %vm1288_vm13 = vcmask 252928  }
 0x258   : > { %4596 = vmatpush1.msra.mxu1 %v1586_v19  ;;  %v6533_v3 = vpop.permute.xlu1 %1718  ;;  %v1421_v19 = vsel %vm8788_vm14, %v6336_v2, %v6346_v55  ;;  %v1388_v11 = vsel %vm8791_vm12, %v6322_v59, %v6320_v54  ;;  %v1356_v2 = vsel %vm8790_vm8, %v6306_v26, %v6304_v4  ;;  %vm1321_vm14 = vcmask 244736  }
 0x259   : > { %9077 = vst [vmem:[#allocation138_spill] sm:$0xff] %v6533_v3  ;;  %4597 = vmatprep.subr.mxu1 %v1554_v12  ;;  %v6541_v0 = vpop.permute.xlu0 %1716  ;;  %v1323_v54 = vsel %vm1321_vm14, %v6280_v33, %v6290_v50  ;;  %v1322_v59 = vsel %vm1321_vm14, %v6282_v52, %v6280_v33  ;;  %vm1222_vm12 = vcmask 441344  }
 0x25a   : > { %9078 = vst [vmem:[#allocation139_spill] sm:$0xff] %v6541_v0  ;;  %4598 = vmatpush1.msra.mxu1 %v1553_v42  ;;  %2098 = vrot.lane.b32.xlu1 %v6531_v37, %s8881_s6  ;;  %v1355_v42 = vsel %vm8790_vm8, %v6296_v27, %v6306_v26  ;;  %v1290_v27 = vsel %vm1288_vm13, %v6251_v47, %v6246_v61  ;;  %vm8903_vm8 = vcmask 261120  }
 0x25b   : > { %2096 = vrot.lane.b32.xlu0 %v6539_v14, %s8881_s6  ;;  %4599 = vmatprep.subr.mxu1 %v1521_v15  ;;  %v1257_v33 = vsel %vm8903_vm8, %v6186_v20, %v6211_v46  ;;  %v1256_v52 = vsel %vm8903_vm8, %v6191_v7, %v6186_v20 }
 0x25c   : > { %4600 = vmatpush1.msra.mxu1 %v1520_v16  ;;  %v6559_v62 = vpop.permute.xlu1 %1744  ;;  %v1289_v16 = vsel %vm1288_vm13, %v6226_v38, %v6251_v47  ;;  %v1224_v38 = vsel %vm1222_vm12, %v6148_v23, %v6143_v31 }
 0x25d   : > { %4601 = vmatprep.subr.mxu1 %v1488_v17  ;;  %v6567_v39 = vpop.permute.xlu0 %1720 }
 0x25e   : > { %9079 = vst [vmem:[#allocation140_spill] sm:$0xff] %v6567_v39  ;;  %4602 = vmatpush1.msra.mxu1 %v1487_v35  ;;  %2102 = vrot.lane.b32.xlu1 %v6557_v36, %s8881_s6  ;;  %v1223_v35 = vsel %vm1222_vm12, %v6129_v13, %v6148_v23 }
 0x25f   : > { %2100 = vrot.lane.b32.xlu0 %v6565_v8, %s8881_s6  ;;  %4603 = vmatprep.subr.mxu1 %v1455_v9 }
 0x260   : > { %4604 = vmatpush1.msra.mxu1 %v1454_v48  ;;  %v6582_v32 = vpop.permute.xlu1 %1748 }
 0x261   : > { %9080 = vst [vmem:[#allocation141_spill] sm:$0xff] %v6582_v32  ;;  %4605 = vmatprep.subr.mxu1 %v1422_v21  ;;  %v6587_v5 = vpop.permute.xlu0 %1746 }
 0x262   : > { %4606 = vmatpush1.msra.mxu1 %v1421_v19  ;;  %2128 = vrot.lane.b32.xlu1 %v6539_v14, %s8888_s7 }
 0x263   : > { %2104 = vrot.lane.b32.xlu0 %v6184_v56, %s8881_s6  ;;  %4607 = vmatprep.subr.mxu1 %v1389_v29 }
 0x264   : > { %4608 = vmatpush1.msra.mxu1 %v1388_v11  ;;  %v6602_v12 = vpop.permute.xlu1 %1752 }
 0x265   : > { %9081 = vst [vmem:[#allocation142_spill] sm:$0xff] %v6602_v12  ;;  %4609 = vmatprep.subr.mxu1 %v1356_v2  ;;  %v6607_v55 = vpop.permute.xlu0 %1750 }
 0x266   : > { %9082 = vst [vmem:[#allocation143_spill] sm:$0xff] %v6607_v55  ;;  %4610 = vmatpush1.msra.mxu1 %v1355_v42  ;;  %2132 = vrot.lane.b32.xlu1 %v6565_v8, %s8888_s7 }
 0x267   : > { %2130 = vrot.lane.b32.xlu0 %v6531_v37, %s8888_s7  ;;  %4611 = vmatprep.subr.mxu1 %v1323_v54 }
 0x268   : > { %4612 = vmatpush1.msra.mxu1 %v1322_v59  ;;  %v6622_v15 = vpop.permute.xlu1 %1778 }
 0x269   : > { %4613 = vmatprep.subr.mxu1 %v1290_v27  ;;  %v6627_v26 = vpop.permute.xlu0 %1776 }
 0x26a   : > { %4614 = vmatpush1.msra.mxu1 %v1289_v16  ;;  %2136 = vrot.lane.b32.xlu1 %v6184_v56, %s8888_s7 }
 0x26b   : > { %2134 = vrot.lane.b32.xlu0 %v6557_v36, %s8888_s7  ;;  %4615 = vmatprep.subr.mxu1 %v1257_v33 }
 0x26c   : > { %4616 = vmatpush1.msra.mxu1 %v1256_v52  ;;  %v6642_v17 = vpop.permute.xlu1 %1782 }
 0x26d   : > { %9083 = vst [vmem:[#allocation144_spill] sm:$0xff] %v6642_v17  ;;  %4617 = vmatprep.subr.mxu1 %v1224_v38  ;;  %v6647_v47 = vpop.permute.xlu0 %1780 }
 0x26e   : > { %9084 = vst [vmem:[#allocation145_spill] sm:$0xff] %v6647_v47  ;;  %4618 = vmatpush1.msra.mxu1 %v1223_v35  ;;  %2162 = vrot.lane.b32.xlu1 %v6531_v37, %s8893_s8 }
 0x26f   : > { %2160 = vrot.lane.b32.xlu0 %v6539_v14, %s8893_s8 }
 0x270   : > { %v6656_v20 = vpop.permute.xlu1 %1808 }
 0x271   : > { %v6658_v7 = vpop.permute.xlu0 %1784 }
 0x272   : > { %9085 = vst [vmem:[#allocation146_spill] sm:$0xff] %v6658_v7  ;;  %2166 = vrot.lane.b32.xlu1 %v6557_v36, %s8893_s8 }
 0x273   : > { %2164 = vrot.lane.b32.xlu0 %v6565_v8, %s8893_s8 }
 0x274   : > { %v6664_v9 = vpop.permute.xlu1 %1812 }
 0x275   : > { %9086 = vst [vmem:[#allocation147_spill] sm:$0xff] %v6664_v9  ;;  %v6666_v13 = vpop.permute.xlu0 %1810 }
 0x276   : > { %2192 = vrot.lane.b32.xlu1 %v6539_v14, %s8897_s9 }
 0x277   : > { %2168 = vrot.lane.b32.xlu0 %v6184_v56, %s8893_s8 }
 0x278   : > { %v6672_v23 = vpop.permute.xlu1 %1816 }
 0x279   : > { %9087 = vst [vmem:[#allocation148_spill] sm:$0xff] %v6672_v23  ;;  %v6674_v48 = vpop.permute.xlu0 %1814 }
 0x27a   : > { %9088 = vst [vmem:[#allocation149_spill] sm:$0xff] %v6674_v48  ;;  %2196 = vrot.lane.b32.xlu1 %v6565_v8, %s8897_s9 }
 0x27b   : > { %2194 = vrot.lane.b32.xlu0 %v6531_v37, %s8897_s9 }
 0x27c   : > { %v6680_v21 = vpop.permute.xlu1 %1842 }
 0x27d   : > { %v6682_v19 = vpop.permute.xlu0 %1840 }
 0x27e   : > { %2200 = vrot.lane.b32.xlu1 %v6184_v56, %s8897_s9 }
 0x27f   : > { %2198 = vrot.lane.b32.xlu0 %v6557_v36, %s8897_s9 }
 0x280   : > { %v6688_v29 = vpop.permute.xlu1 %1846 }
 0x281   : > { %9089 = vst [vmem:[#allocation150_spill] sm:$0xff] %v6688_v29  ;;  %v6690_v11 = vpop.permute.xlu0 %1844 }
 0x282   : > { %9090 = vst [vmem:[#allocation151_spill] sm:$0xff] %v6690_v11  ;;  %2226 = vrot.lane.b32.xlu1 %v6531_v37, %s8901_s10 }
 0x283   : > { %2224 = vrot.lane.b32.xlu0 %v6539_v14, %s8901_s10 }
 0x284   : > { %v6696_v2 = vpop.permute.xlu1 %1872 }
 0x285   : > { %v6698_v42 = vpop.permute.xlu0 %1848 }
 0x286   : > { %9091 = vst [vmem:[#allocation152_spill] sm:$0xff] %v6698_v42  ;;  %2230 = vrot.lane.b32.xlu1 %v6557_v36, %s8901_s10 }
 0x287   : > { %2228 = vrot.lane.b32.xlu0 %v6565_v8, %s8901_s10 }
 0x288   : > { %v6704_v54 = vpop.permute.xlu1 %1876 }
 0x289   : > { %9092 = vst [vmem:[#allocation153_spill] sm:$0xff] %v6704_v54  ;;  %v6706_v59 = vpop.permute.xlu0 %1874 }
 0x28a   : > { %2256 = vrot.lane.b32.xlu1 %v6539_v14, %s8904_s11 }
 0x28b   : > { %2232 = vrot.lane.b32.xlu0 %v6184_v56, %s8901_s10 }
 0x28c   : > { %v6712_v27 = vpop.permute.xlu1 %1880 }
 0x28d   : > { %9093 = vst [vmem:[#allocation154_spill] sm:$0xff] %v6712_v27  ;;  %v6714_v16 = vpop.permute.xlu0 %1878 }
 0x28e   : > { %9094 = vst [vmem:[#allocation155_spill] sm:$0xff] %v6714_v16  ;;  %2260 = vrot.lane.b32.xlu1 %v6565_v8, %s8904_s11 }
 0x28f   : > { %2258 = vrot.lane.b32.xlu0 %v6531_v37, %s8904_s11 }
 0x290   : > { %v6720_v33 = vpop.permute.xlu1 %1906 }
 0x291   : > { %v6722_v52 = vpop.permute.xlu0 %1904 }
 0x292   : > { %2264 = vrot.lane.b32.xlu1 %v6184_v56, %s8904_s11 }
 0x293   : > { %2262 = vrot.lane.b32.xlu0 %v6557_v36, %s8904_s11 }
 0x294   : > { %v6728_v38 = vpop.permute.xlu1 %1910 }
 0x295   : > { %9095 = vst [vmem:[#allocation156_spill] sm:$0xff] %v6728_v38  ;;  %v6730_v35 = vpop.permute.xlu0 %1908 }
 0x296   : > { %9096 = vst [vmem:[#allocation157_spill] sm:$0xff] %v6730_v35  ;;  %2290 = vrot.lane.b32.xlu1 %v6531_v37, %s8906_s14 }
 0x297   : > { %2288 = vrot.lane.b32.xlu0 %v6539_v14, %s8906_s14 }
 0x298   : > { %v6736_v3 = vpop.permute.xlu1 %1936 }
 0x299   : > { %v6738_v39 = vpop.permute.xlu0 %1912 }
 0x29a   : > { %9097 = vst [vmem:[#allocation158_spill] sm:$0xff] %v6738_v39  ;;  %2294 = vrot.lane.b32.xlu1 %v6557_v36, %s8906_s14 }
 0x29b   : > { %2292 = vrot.lane.b32.xlu0 %v6565_v8, %s8906_s14 }
 0x29c   : > { %v6744_v55 = vpop.permute.xlu1 %1940 }
 0x29d   : > { %9098 = vst [vmem:[#allocation159_spill] sm:$0xff] %v6744_v55  ;;  %v6746_v12 = vpop.permute.xlu0 %1938 }
 0x29e   : > { %2320 = vrot.lane.b32.xlu1 %v6539_v14, %s9099_s15 }
 0x29f   : > { %2296 = vrot.lane.b32.xlu0 %v6184_v56, %s8906_s14 }
 0x2a0   : > { %v6752_v17 = vpop.permute.xlu1 %1944 }
 0x2a1   : > { %9100 = vst [vmem:[#allocation160_spill] sm:$0xff] %v6752_v17  ;;  %v6754_v7 = vpop.permute.xlu0 %1942 }
 0x2a2   : > { %9101 = vst [vmem:[#allocation161_spill] sm:$0xff] %v6754_v7  ;;  %2324 = vrot.lane.b32.xlu1 %v6565_v8, %s9099_s15 }
 0x2a3   : > { %2322 = vrot.lane.b32.xlu0 %v6531_v37, %s9099_s15 }
 0x2a4   : > { %v6760_v48 = vpop.permute.xlu1 %1970 }
 0x2a5   : > { %v6762_v23 = vpop.permute.xlu0 %1968 }
 0x2a6   : > { %2328 = vrot.lane.b32.xlu1 %v6184_v56, %s9099_s15 }
 0x2a7   : > { %2326 = vrot.lane.b32.xlu0 %v6557_v36, %s9099_s15 }
 0x2a8   : > { %v6768_v29 = vpop.permute.xlu1 %1974 }
 0x2a9   : > { %9102 = vst [vmem:[#allocation162_spill] sm:$0xff] %v6768_v29  ;;  %v6770_v42 = vpop.permute.xlu0 %1972 }
 0x2aa   : > { %9103 = vst [vmem:[#allocation163_spill] sm:$0xff] %v6770_v42  ;;  %2354 = vrot.lane.b32.xlu1 %v6531_v37, %s9104_s16 }
 0x2ab   : > { %2352 = vrot.lane.b32.xlu0 %v6539_v14, %s9104_s16 }
 0x2ac   : > { %v6776_v16 = vpop.permute.xlu1 %2000 }
 0x2ad   : > { %v6778_v27 = vpop.permute.xlu0 %1976 }
 0x2ae   : > { %9105 = vst [vmem:[#allocation164_spill] sm:$0xff] %v6778_v27  ;;  %2358 = vrot.lane.b32.xlu1 %v6557_v36, %s9104_s16 }
 0x2af   : > { %2356 = vrot.lane.b32.xlu0 %v6565_v8, %s9104_s16 }
 0x2b0   : > { %v6784_v38 = vpop.permute.xlu1 %2004 }
 0x2b1   : > { %9106 = vst [vmem:[#allocation165_spill] sm:$0xff] %v6784_v38  ;;  %v6786_v39 = vpop.permute.xlu0 %2002 }
 0x2b2   : > { %2384 = vrot.lane.b32.xlu1 %v6539_v14, %s9107_s18 }
 0x2b3   : > { %2360 = vrot.lane.b32.xlu0 %v6184_v56, %s9104_s16 }
 0x2b4   : > { %v6792_v7 = vpop.permute.xlu1 %2008 }
 0x2b5   : > { %9108 = vst [vmem:[#allocation166_spill] sm:$0xff] %v6792_v7  ;;  %v6794_v17 = vpop.permute.xlu0 %2006 }
 0x2b6   : > { %9109 = vst [vmem:[#allocation167_spill] sm:$0xff] %v6794_v17  ;;  %2388 = vrot.lane.b32.xlu1 %v6565_v8, %s9107_s18 }
 0x2b7   : > { %2386 = vrot.lane.b32.xlu0 %v6531_v37, %s9107_s18 }
 0x2b8   : > { %v6800_v29 = vpop.permute.xlu1 %2034 }
 0x2b9   : > { %v6802_v27 = vpop.permute.xlu0 %2032 }
 0x2ba   : > { %2392 = vrot.lane.b32.xlu1 %v6184_v56, %s9107_s18 }
 0x2bb   : > { %2390 = vrot.lane.b32.xlu0 %v6557_v36, %s9107_s18 }
 0x2bc   : > { %v6808_v31 = vpop.permute.xlu1 %2038 }
 0x2bd   : > { %9110 = vst [vmem:[#allocation168_spill] sm:$0xff] %v6808_v31  ;;  %v6810_v7 = vpop.permute.xlu0 %2036 }
 0x2be   : > { %9111 = vst [vmem:[#allocation169_spill] sm:$0xff] %v6810_v7  ;;  %2418 = vrot.lane.b32.xlu1 %v6531_v37, %s9112_s19 }
 0x2bf   : > { %2416 = vrot.lane.b32.xlu0 %v6539_v14, %s9112_s19 }
 0x2c0   : > { %v6816_v17 = vpop.permute.xlu1 %2064 }
 0x2c1   : > { %v6818_v46 = vpop.permute.xlu0 %2040 }
 0x2c2   : > { %9113 = vst [vmem:[#allocation170_spill] sm:$0xff] %v6818_v46  ;;  %2422 = vrot.lane.b32.xlu1 %v6557_v36, %s9112_s19 }
 0x2c3   : > { %2420 = vrot.lane.b32.xlu0 %v6565_v8, %s9112_s19 }
 0x2c4   : > { %v6824_v61 = vpop.permute.xlu1 %2068 }
 0x2c5   : > { %9114 = vst [vmem:[#allocation171_spill] sm:$0xff] %v6824_v61  ;;  %v6826_v31 = vpop.permute.xlu0 %2066 }
 0x2c6   : > { %2448 = vrot.lane.b32.xlu1 %v6539_v14, %s9115_s20 }
 0x2c7   : > { %2424 = vrot.lane.b32.xlu0 %v6184_v56, %s9112_s19 }
 0x2c8   : > { %v6832_v50 = vpop.permute.xlu1 %2072 }
 0x2c9   : > { %9116 = vst [vmem:[#allocation172_spill] sm:$0xff] %v6832_v50  ;;  %v6834_v4 = vpop.permute.xlu0 %2070 }
 0x2ca   : > { %9117 = vst [vmem:[#allocation173_spill] sm:$0xff] %v6834_v4  ;;  %2452 = vrot.lane.b32.xlu1 %v6565_v8, %s9115_s20 }
 0x2cb   : > { %2450 = vrot.lane.b32.xlu0 %v6531_v37, %s9115_s20 }
 0x2cc   : > { %v2099_v46 = vpop.permute.xlu1 %2098 }
 0x2cd   : > { %v2097_v41 = vpop.permute.xlu0 %2096 }
 0x2ce   : > { %2456 = vrot.lane.b32.xlu1 %v6184_v56, %s9115_s20 }
 0x2cf   : > { %2454 = vrot.lane.b32.xlu0 %v6557_v36, %s9115_s20 }
 0x2d0   : > { %v6844_v45 = vpop.permute.xlu1 %2102 }
 0x2d1   : > { %9118 = vst [vmem:[#allocation174_spill] sm:$0xff] %v6844_v45  ;;  %v6846_v50 = vpop.permute.xlu0 %2100  ;;  %v2474_v45 = vld [vmem:[%s5303_s17 + $0x28] sm:$0xff] }
 0x2d2   : > { %9119 = vst [vmem:[#allocation175_spill] sm:$0xff] %v6846_v50  ;;  %2482 = vrot.lane.b32.xlu1 %v6531_v37, %s9120_s21 }
 0x2d3   : > { %2480 = vrot.lane.b32.xlu0 %v6539_v14, %s9120_s21 }
 0x2d4   : > { %v2129_v4 = vpop.permute.xlu1 %2128 }
 0x2d5   : > { %v6852_v28 = vpop.permute.xlu0 %2104 }
 0x2d6   : > { %9121 = vst [vmem:[#allocation176_spill] sm:$0xff] %v6852_v28  ;;  %2486 = vrot.lane.b32.xlu1 %v6557_v36, %s9120_s21 }
 0x2d7   : > { %2484 = vrot.lane.b32.xlu0 %v6565_v8, %s9120_s21 }
 0x2d8   : > { %v6858_v56 = vpop.permute.xlu1 %2132 }
 0x2d9   : > { %9122 = vst [vmem:[#allocation177_spill] sm:$0xff] %v6858_v56  ;;  %v2131_v57 = vpop.permute.xlu0 %2130 }
 0x2da   : > { %2512 = vrot.lane.b32.xlu1 %v6539_v14, %s9123_s22 }
 0x2db   : > { %2488 = vrot.lane.b32.xlu0 %v2474_v45, %s9120_s21 }
 0x2dc   : > { %v6864_v1 = vpop.permute.xlu1 %2136 }
 0x2dd   : > { %9124 = vst [vmem:[#allocation178_spill] sm:$0xff] %v6864_v1  ;;  %v6866_v63 = vpop.permute.xlu0 %2134 }
 0x2de   : > { %9125 = vst [vmem:[#allocation179_spill] sm:$0xff] %v6866_v63  ;;  %2516 = vrot.lane.b32.xlu1 %v6565_v8, %s9123_s22 }
 0x2df   : > { %2514 = vrot.lane.b32.xlu0 %v6531_v37, %s9123_s22 }
 0x2e0   : > { %v2163_v28 = vpop.permute.xlu1 %2162 }
 0x2e1   : > { %v2161_v6 = vpop.permute.xlu0 %2160 }
 0x2e2   : > { %2520 = vrot.lane.b32.xlu1 %v2474_v45, %s9123_s22  ;;  %v2170_v24 = vsel %vm760_vm15, %v2161_v6, %v2163_v28  ;;  %v4017_v6 = vld [vmem:[%s8653_s1 + $0x18] sm:$0xff] }
 0x2e3   : > { %2518 = vrot.lane.b32.xlu0 %v6557_v36, %s9123_s22  ;;  %4651 = vmatprep.mubr.f32.mxu1 %v4017_v6 }
 0x2e4   : > { %v6875_v43 = vpop.permute.xlu1 %2166 }
 0x2e5   : > { %9126 = vst [vmem:[#allocation180_spill] sm:$0xff] %v6875_v43  ;;  %v6877_v10 = vpop.permute.xlu0 %2164 }
 0x2e6   : > { %9127 = vst [vmem:[#allocation181_spill] sm:$0xff] %v6877_v10  ;;  %2546 = vrot.lane.b32.xlu1 %v6531_v37, %s9128_s23  ;;  %v2171_v58 = vsel %vm760_vm15, %v2163_v28, %v6877_v10  ;;  %v2106_v28 = vsel %vm694_vm10, %v2097_v41, %v2099_v46 }
 0x2e7   : > { %2544 = vrot.lane.b32.xlu0 %v6539_v14, %s9128_s23 }
 0x2e8   : > { %v2193_v63 = vpop.permute.xlu1 %2192 }
 0x2e9   : > { %v6883_v1 = vpop.permute.xlu0 %2168 }
 0x2ea   : > { %9129 = vst [vmem:[#allocation182_spill] sm:$0xff] %v6883_v1  ;;  %2550 = vrot.lane.b32.xlu1 %v6557_v36, %s9128_s23 }
 0x2eb   : > { %2548 = vrot.lane.b32.xlu0 %v6565_v8, %s9128_s23 }
 0x2ec   : > { %v6889_v49 = vpop.permute.xlu1 %2196 }
 0x2ed   : > { %9130 = vst [vmem:[#allocation183_spill] sm:$0xff] %v6889_v49  ;;  %v2195_v43 = vpop.permute.xlu0 %2194 }
 0x2ee   : > { %2576 = vrot.lane.b32.xlu1 %v6539_v14, %s9131_s24  ;;  %v2203_v18 = vsel %vm793_vm11, %v2195_v43, %v6889_v49  ;;  %v2202_v25 = vsel %vm793_vm11, %v2193_v63, %v2195_v43  ;;  %v2139_v43 = vsel %vm727_vm9, %v2131_v57, %v6858_v56  ;;  %v7246_v56 = vld [vmem:[%s5303_s17 + $0x18] sm:$0xff] }
 0x2ef   : > { %2552 = vrot.lane.b32.xlu0 %v2474_v45, %s9128_s23  ;;  %4619 = vmatprep.subr.mxu1 %v2203_v18  ;;  %v2138_v18 = vsel %vm727_vm9, %v2129_v4, %v2131_v57  ;;  %v2074_v57 = vsel %vm661_vm0, %v6816_v17, %v6826_v31  ;;  %v2010_v17 = vsel %vm595_vm2, %v6776_v16, %v6786_v39 }
 0x2f0   : > { %4620 = vmatpush2.msra.mxu1 %v2202_v25  ;;  %v6897_v1 = vpop.permute.xlu1 %2200  ;;  %v2075_v25 = vsel %vm661_vm0, %v6826_v31, %v6824_v61  ;;  %v2011_v31 = vsel %vm595_vm2, %v6786_v39, %v6784_v38  ;;  %v1947_v39 = vsel %vm8925_vm4, %v6746_v12, %v6744_v55  ;;  %v1946_v16 = vsel %vm8925_vm4, %v6736_v3, %v6746_v12  ;;  %v4014_v12 = vld [vmem:[%s8653_s1] sm:$0xff] }
 0x2f1   : > { %9132 = vst [vmem:[#allocation184_spill] sm:$0xff] %v6897_v1  ;;  %4621 = vmatprep.subr.mxu1 %v2171_v58  ;;  %v6901_v60 = vpop.permute.xlu0 %2198  ;;  %v2107_v58 = vsel %vm694_vm10, %v2099_v46, %v6846_v50  ;;  %v2043_v46 = vsel %vm628_vm1, %v6800_v29, %v6810_v7  ;;  %v1883_v3 = vsel %vm8853_vm6, %v6706_v59, %v6704_v54 }
 0x2f2   : > { %9133 = vst [vmem:[#allocation185_spill] sm:$0xff] %v6901_v60  ;;  %4622 = vmatpush2.msra.mxu1 %v2170_v24  ;;  %2580 = vrot.lane.b32.xlu1 %v6565_v8, %s9131_s24 }
 0x2f3   : > { %2578 = vrot.lane.b32.xlu0 %v6531_v37, %s9131_s24  ;;  %4623 = vmatprep.subr.mxu1 %v2139_v43 }
 0x2f4   : > { %4624 = vmatpush2.msra.mxu1 %v2138_v18  ;;  %v6911_v63 = vpop.permute.xlu1 %2226  ;;  %v1978_v18 = vsel %vm562_vm3, %v6762_v23, %v6760_v48  ;;  %v1915_v23 = vsel %vm8854_vm5, %v6720_v33, %v6730_v35 }
 0x2f5   : > { %4625 = vmatprep.subr.mxu1 %v2107_v58  ;;  %v6915_v24 = vpop.permute.xlu0 %2224 }
 0x2f6   : > { %4626 = vmatpush2.msra.mxu1 %v2106_v28  ;;  %2584 = vrot.lane.b32.xlu1 %v2474_v45, %s9131_s24  ;;  %v2042_v45 = vsel %vm628_vm1, %v6802_v27, %v6800_v29  ;;  %v1979_v27 = vsel %vm562_vm3, %v6760_v48, %v6770_v42  ;;  %v1914_v28 = vsel %vm8854_vm5, %v6722_v52, %v6720_v33 }
 0x2f7   : > { %2582 = vrot.lane.b32.xlu0 %v6557_v36, %s9131_s24  ;;  %4627 = vmatprep.subr.mxu1 %v2075_v25  ;;  %v4015_v25 = vld [vmem:[%s8653_s1 + $0x8] sm:$0xff]  ;;  %v1882_v33 = vsel %vm8853_vm6, %v6696_v2, %v6706_v59  ;;  %vm9140_vm6 = vcmask 990208  }
 0x2f8   : > { %4628 = vmatpush2.msra.mxu1 %v2074_v57  ;;  %v6927_v4 = vpop.permute.xlu1 %2230  ;;  %v1851_v57 = vsel %vm8855_vm7, %v6680_v21, %v6690_v11  ;;  %4580 = vmatprep.mubr.f32.mxu0 %v4015_v25  ;;  %v1819_v2 = vsel %vm9140_vm6, %v6666_v13, %v6664_v9  ;;  %vm9141_vm5 = vmmov %vm9140_vm6 }
 0x2f9   : > { %9134 = vst [vmem:[#allocation186_spill] sm:$0xff] %v6927_v4  ;;  %4629 = vmatprep.subr.mxu1 %v2043_v46  ;;  %v6932_v41 = vpop.permute.xlu0 %2228  ;;  %4581 = vmatmul.mubr.f32.vlgmr.msra.gmra.mxu0 %v4014_v12  ;;  %v1818_v59 = vsel %vm9141_vm5, %v6656_v20, %v6666_v13  ;;  %vm9144_vm5 = vcmask 1006592  }
 0x2fa   : > { %4630 = vmatpush2.msra.mxu1 %v2042_v45  ;;  %2610 = vrot.lane.b32.xlu1 %v6531_v37, %s9135_s27  ;;  %v1850_v45 = vsel %vm8855_vm7, %v6682_v19, %v6680_v21  ;;  %vm9142_vm7 = vcmask 998400   ;;  %v1755_v20 = vsel %vm9144_vm5, %v6587_v5, %v6582_v32 }
 0x2fb   : > { %2608 = vrot.lane.b32.xlu0 %v6539_v14, %s9135_s27  ;;  %4631 = vmatprep.subr.mxu1 %v2011_v31  ;;  %v1787_v21 = vsel %vm9142_vm7, %v6622_v15, %v6647_v47  ;;  %vm9143_vm6 = vmmov %vm9142_vm7 }
 0x2fc   : > { %4632 = vmatpush2.msra.mxu1 %v2010_v17  ;;  %v6950_v29 = vpop.permute.xlu1 %2256  ;;  %v1786_v31 = vsel %vm9143_vm6, %v6627_v26, %v6622_v15  ;;  %vm9145_vm7 = vmmov %vm9144_vm5  ;;  %vm9147_vm6 = vcmask 1014784   ;;  %v4016_v26 = vld [vmem:[%s8653_s1 + $0x10] sm:$0xff] }
 0x2fd   : > { %4633 = vmatprep.subr.mxu1 %v1979_v27  ;;  %v6955_v43 = vpop.permute.xlu0 %2232  ;;  %v1754_v13 = vsel %vm9145_vm7, %v6559_v62, %v6587_v5  ;;  %v1723_v15 = vsel %vm9147_vm6, %v6515_v22, %v6541_v0  ;;  %vm9148_vm5 = vmmov %vm9147_vm6  ;;  %vm9171_vm7 = vcmask 515072  }
 0x2fe   : > { %9136 = vst [vmem:[#allocation187_spill] sm:$0xff] %v6955_v43  ;;  %4634 = vmatpush2.msra.mxu1 %v1978_v18  ;;  %2614 = vrot.lane.b32.xlu1 %v6557_v36, %s9135_s27  ;;  %v1722_v18 = vsel %vm9148_vm5, %v6518_v51, %v6515_v22  ;;  %vm9172_vm6 = vmmov %vm9171_vm7  ;;  %vm9175_vm5 = vcmask 523264  }
 0x2ff   : > { %2612 = vrot.lane.b32.xlu0 %v6565_v8, %s9135_s27  ;;  %4635 = vmatprep.subr.mxu1 %v1947_v39 }
 0x300   : > { %4636 = vmatpush2.msra.mxu1 %v1946_v16  ;;  %v6970_v58 = vpop.permute.xlu1 %2260 }
 0x301   : > { %4637 = vmatprep.subr.mxu1 %v1915_v23  ;;  %v6975_v48 = vpop.permute.xlu0 %2258 }
 0x302   : > { %4638 = vmatpush2.msra.mxu1 %v1914_v28  ;;  %3708 = vrot.lane.b32.xlu1 %v6557_v36, %s9099_s15 }
 0x303   : > { %3706 = vrot.lane.b32.xlu0 %v6565_v8, %s9099_s15  ;;  %4639 = vmatprep.subr.mxu1 %v1883_v3 }
 0x304   : > { %4640 = vmatpush2.msra.mxu1 %v1882_v33  ;;  %v6996_v52 = vpop.permute.xlu1 %2264 }
 0x305   : > { %9137 = vst [vmem:[#allocation188_spill] sm:$0xff] %v6996_v52  ;;  %4641 = vmatprep.subr.mxu1 %v1851_v57  ;;  %v7001_v46 = vpop.permute.xlu0 %2262 }
 0x306   : > { %9138 = vst [vmem:[#allocation189_spill] sm:$0xff] %v7001_v46  ;;  %4642 = vmatpush2.msra.mxu1 %v1850_v45  ;;  %2706 = vrot.lane.b32.xlu1 %v6531_v37, %s9139_s28 }
 0x307   : > { %3704 = vrot.lane.b32.xlu0 %v6531_v37, %s9099_s15  ;;  %4643 = vmatprep.subr.mxu1 %v1819_v2 }
 0x308   : > { %4644 = vmatpush2.msra.mxu1 %v1818_v59  ;;  %v7016_v6 = vpop.permute.xlu1 %2290 }
 0x309   : > { %4645 = vmatprep.subr.mxu1 %v1787_v21  ;;  %v7021_v19 = vpop.permute.xlu0 %2288 }
 0x30a   : > { %4646 = vmatpush2.msra.mxu1 %v1786_v31  ;;  %3674 = vrot.lane.b32.xlu1 %v6565_v8, %s8906_s14 }
 0x30b   : > { %2708 = vrot.lane.b32.xlu0 %v6565_v8, %s9139_s28  ;;  %4647 = vmatprep.subr.mxu1 %v1755_v20 }
 0x30c   : > { %4648 = vmatpush2.msra.mxu1 %v1754_v13  ;;  %v7036_v17 = vpop.permute.xlu1 %2294 }
 0x30d   : > { %9146 = vst [vmem:[#allocation190_spill] sm:$0xff] %v7036_v17  ;;  %4649 = vmatprep.subr.mxu1 %v1723_v15  ;;  %v7044_v27 = vpop.permute.xlu0 %2292 }
 0x30e   : > { %4650 = vmatpush2.msra.mxu1 %v1722_v18  ;;  %2704 = vrot.lane.b32.xlu1 %v6539_v14, %s9139_s28 }
 0x30f   : > { %3676 = vrot.lane.b32.xlu0 %v6557_v36, %s8906_s14  ;;  %4652 = vmatmul.mubr.f32.vlgmr.msra.gmra.mxu1 %v4016_v26 }
 0x310   : > { %v7053_v62 = vpop.permute.xlu1 %2320 }
 0x311   : > { %v7055_v5 = vpop.permute.xlu0 %2296 }
 0x312   : > { %9149 = vst [vmem:[#allocation191_spill] sm:$0xff] %v7055_v5  ;;  %2674 = vrot.lane.b32.xlu1 %v6531_v37, %s9150_s26 }
 0x313   : > { %3672 = vrot.lane.b32.xlu0 %v6531_v37, %s8906_s14  ;;  %s9211_s14 = smov 126  }
 0x314   : > { %v7061_v39 = vpop.permute.xlu1 %2324 }
 0x315   : > { %v7063_v22 = vpop.permute.xlu0 %2322 }
 0x316   : > { %3642 = vrot.lane.b32.xlu1 %v6565_v8, %s8904_s11 }
 0x317   : > { %2676 = vrot.lane.b32.xlu0 %v6565_v8, %s9150_s26 }
 0x318   : > { %v7069_v51 = vpop.permute.xlu1 %2328 }
 0x319   : > { %9151 = vst [vmem:[#allocation192_spill] sm:$0xff] %v7069_v51  ;;  %v7071_v16 = vpop.permute.xlu0 %2326  ;;  %v7224_v51 = vld [vmem:[%s5303_s17 + $0x10] sm:$0xff] }
 0x31a   : > { %9152 = vst [vmem:[#allocation193_spill] sm:$0xff] %v7071_v16  ;;  %2672 = vrot.lane.b32.xlu1 %v6539_v14, %s9150_s26 }
 0x31b   : > { %3644 = vrot.lane.b32.xlu0 %v6557_v36, %s8904_s11 }
 0x31c   : > { %v7077_v23 = vpop.permute.xlu1 %2354 }
 0x31d   : > { %v7079_v28 = vpop.permute.xlu0 %2352 }
 0x31e   : > { %2642 = vrot.lane.b32.xlu1 %v6531_v37, %s9153_s29 }
 0x31f   : > { %3640 = vrot.lane.b32.xlu0 %v6531_v37, %s8904_s11  ;;  %s9199_s11 = smov 125  }
 0x320   : > { %v7085_v25 = vpop.permute.xlu1 %2358 }
 0x321   : > { %9154 = vst [vmem:[#allocation194_spill] sm:$0xff] %v7085_v25  ;;  %v7087_v3 = vpop.permute.xlu0 %2356  ;;  %v7235_v25 = vld [vmem:[%s5303_s17 + $0x20] sm:$0xff] }
 0x322   : > { %3610 = vrot.lane.b32.xlu1 %v6565_v8, %s8901_s10 }
 0x323   : > { %2644 = vrot.lane.b32.xlu0 %v6565_v8, %s9153_s29 }
 0x324   : > { %v7093_v12 = vpop.permute.xlu1 %2384 }
 0x325   : > { %v7095_v33 = vpop.permute.xlu0 %2360 }
 0x326   : > { %9155 = vst [vmem:[#allocation195_spill] sm:$0xff] %v7095_v33  ;;  %2640 = vrot.lane.b32.xlu1 %v6539_v14, %s9153_s29 }
 0x327   : > { %3612 = vrot.lane.b32.xlu0 %v6557_v36, %s8901_s10 }
 0x328   : > { %v7101_v57 = vpop.permute.xlu1 %2388 }
 0x329   : > { %v7103_v45 = vpop.permute.xlu0 %2386 }
 0x32a   : > { %3578 = vrot.lane.b32.xlu1 %v6565_v8, %s8897_s9 }
 0x32b   : > { %3608 = vrot.lane.b32.xlu0 %v6531_v37, %s8901_s10  ;;  %s9186_s10 = smov 124  }
 0x32c   : > { %v7109_v2 = vpop.permute.xlu1 %2392 }
 0x32d   : > { %9156 = vst [vmem:[#allocation196_spill] sm:$0xff] %v7109_v2  ;;  %v7111_v59 = vpop.permute.xlu0 %2390 }
 0x32e   : > { %9157 = vst [vmem:[#allocation197_spill] sm:$0xff] %v7111_v59  ;;  %3576 = vrot.lane.b32.xlu1 %v6531_v37, %s8897_s9 }
 0x32f   : > { %3580 = vrot.lane.b32.xlu0 %v6557_v36, %s8897_s9  ;;  %s9181_s9 = smov 123  }
 0x330   : > { %v7117_v14 = vpop.permute.xlu1 %2418 }
 0x331   : > { %v7119_v21 = vpop.permute.xlu0 %2416 }
 0x332   : > { %3548 = vrot.lane.b32.xlu1 %v6557_v36, %s8893_s8 }
 0x333   : > { %3546 = vrot.lane.b32.xlu0 %v6565_v8, %s8893_s8 }
 0x334   : > { %v7125_v31 = vpop.permute.xlu1 %2422 }
 0x335   : > { %9158 = vst [vmem:[#allocation198_spill] sm:$0xff] %v7125_v31  ;;  %v7127_v20 = vpop.permute.xlu0 %2420 }
 0x336   : > { %3514 = vrot.lane.b32.xlu1 %v6565_v8, %s8888_s7 }
 0x337   : > { %3544 = vrot.lane.b32.xlu0 %v6531_v37, %s8893_s8  ;;  %s9177_s8 = smov 122  }
 0x338   : > { %v7133_v13 = vpop.permute.xlu1 %2448 }
 0x339   : > { %v7135_v15 = vpop.permute.xlu0 %2424 }
 0x33a   : > { %9159 = vst [vmem:[#allocation199_spill] sm:$0xff] %v7135_v15  ;;  %3512 = vrot.lane.b32.xlu1 %v6531_v37, %s8888_s7 }
 0x33b   : > { %3516 = vrot.lane.b32.xlu0 %v6557_v36, %s8888_s7  ;;  %s9173_s7 = smov 121  }
 0x33c   : > { %v7141_v26 = vpop.permute.xlu1 %2452 }
 0x33d   : > { %v7143_v18 = vpop.permute.xlu0 %2450 }
 0x33e   : > { %3484 = vrot.lane.b32.xlu1 %v6557_v36, %s8881_s6 }
 0x33f   : > { %3482 = vrot.lane.b32.xlu0 %v6565_v8, %s8881_s6 }
 0x340   : > { %v7149_v0 = vpop.permute.xlu1 %2456 }
 0x341   : > { %9160 = vst [vmem:[#allocation200_spill] sm:$0xff] %v7149_v0  ;;  %v7151_v32 = vpop.permute.xlu0 %2454 }
 0x342   : > { %9161 = vst [vmem:[#allocation201_spill] sm:$0xff] %v7151_v32  ;;  %3450 = vrot.lane.b32.xlu1 %v6565_v8, %s8877_s5 }
 0x343   : > { %3480 = vrot.lane.b32.xlu0 %v6531_v37, %s8881_s6  ;;  %s9169_s6 = smov 120  }
 0x344   : > { %v7157_v47 = vpop.permute.xlu1 %2482 }
 0x345   : > { %v7159_v9 = vpop.permute.xlu0 %2480 }
 0x346   : > { %3448 = vrot.lane.b32.xlu1 %v6531_v37, %s8877_s5 }
 0x347   : > { %3452 = vrot.lane.b32.xlu0 %v6557_v36, %s8877_s5  ;;  %s9168_s5 = smov 119  }
 0x348   : > { %v7165_v11 = vpop.permute.xlu1 %2486 }
 0x349   : > { %9162 = vst [vmem:[#allocation202_spill] sm:$0xff] %v7165_v11  ;;  %v7167_v54 = vpop.permute.xlu0 %2484 }
 0x34a   : > { %3420 = vrot.lane.b32.xlu1 %v6557_v36, %s8868_s4 }
 0x34b   : > { %3418 = vrot.lane.b32.xlu0 %v6565_v8, %s8868_s4 }
 0x34c   : > { %v7173_v35 = vpop.permute.xlu1 %2512 }
 0x34d   : > { %v7175_v55 = vpop.permute.xlu0 %2488 }
 0x34e   : > { %9163 = vst [vmem:[#allocation203_spill] sm:$0xff] %v7175_v55  ;;  %3386 = vrot.lane.b32.xlu1 %v6565_v8, %s8873_s30 }
 0x34f   : > { %3416 = vrot.lane.b32.xlu0 %v6531_v37, %s8868_s4  ;;  %s9166_s4 = smov 96  }
 0x350   : > { %v7181_v42 = vpop.permute.xlu1 %2516 }
 0x351   : > { %v7183_v4 = vpop.permute.xlu0 %2514 }
 0x352   : > { %3384 = vrot.lane.b32.xlu1 %v6531_v37, %s8873_s30 }
 0x353   : > { %3388 = vrot.lane.b32.xlu0 %v6557_v36, %s8873_s30  ;;  %s9167_s30 = smov 118  }
 0x354   : > { %v7189_v43 = vpop.permute.xlu1 %2520 }
 0x355   : > { %v7191_v38 = vpop.permute.xlu0 %2518 }
 0x356   : > { %9164 = vst [vmem:[#allocation204_spill] sm:$0xff] %v7191_v38  ;;  %3356 = vrot.lane.b32.xlu1 %v6557_v36, %s9165_s25 }
 0x357   : > { %3354 = vrot.lane.b32.xlu0 %v6565_v8, %s9165_s25 }
 0x358   : > { %v7197_v46 = vpop.permute.xlu1 %2546 }
 0x359   : > { %v7199_v52 = vpop.permute.xlu0 %2544 }
 0x35a   : > { %3322 = vrot.lane.b32.xlu1 %v6565_v8, %s9166_s4 }
 0x35b   : > { %3352 = vrot.lane.b32.xlu0 %v6531_v37, %s9165_s25 }
 0x35c   : > { %v7205_v7 = vpop.permute.xlu1 %2550 }
 0x35d   : > { %v7207_v17 = vpop.permute.xlu0 %2548 }
 0x35e   : > { %3320 = vrot.lane.b32.xlu1 %v6531_v37, %s9166_s4 }
 0x35f   : > { %3324 = vrot.lane.b32.xlu0 %v6557_v36, %s9166_s4 }
 0x360   : > { %v7213_v5 = vpop.permute.xlu1 %2576 }
 0x361   : > { %v7215_v61 = vpop.permute.xlu0 %2552 }
 0x362   : > { %3292 = vrot.lane.b32.xlu1 %v6557_v36, %s9167_s30 }
 0x363   : > { %3290 = vrot.lane.b32.xlu0 %v6565_v8, %s9167_s30 }
 0x364   : > { %v7221_v16 = vpop.permute.xlu1 %2580 }
 0x365   : > { %v7226_v50 = vpop.permute.xlu0 %2578 }
 0x366   : > { %3258 = vrot.lane.b32.xlu1 %v6565_v8, %s9168_s5 }
 0x367   : > { %3288 = vrot.lane.b32.xlu0 %v7224_v51, %s9167_s30 }
 0x368   : > { %v7232_v37 = vpop.permute.xlu1 %2584 }
 0x369   : > { %v7237_v36 = vpop.permute.xlu0 %2582 }
 0x36a   : > { %3256 = vrot.lane.b32.xlu1 %v7224_v51, %s9168_s5 }
 0x36b   : > { %3260 = vrot.lane.b32.xlu0 %v7235_v25, %s9168_s5 }
 0x36c   : > { %v7243_v33 = vpop.permute.xlu1 %2610 }
 0x36d   : > { %v7248_v8 = vpop.permute.xlu0 %2608 }
 0x36e   : > { %3228 = vrot.lane.b32.xlu1 %v7235_v25, %s9169_s6 }
 0x36f   : > { %3226 = vrot.lane.b32.xlu0 %v7246_v56, %s9169_s6 }
 0x370   : > { %v7254_v59 = vpop.permute.xlu1 %2614 }
 0x371   : > { %v7256_v2 = vpop.permute.xlu0 %2612 }
 0x372   : > { %3994 = vrot.lane.b32.xlu1 %v7246_v56, %s9135_s27 }
 0x373   : > { %3224 = vrot.lane.b32.xlu0 %v7224_v51, %s9169_s6 }
 0x374   : > { %v7262_v10 = vpop.permute.xlu1 %3708 }
 0x375   : > { %9170 = vst [vmem:[#allocation205_spill] sm:$0xff] %v7262_v10  ;;  %v3707_v31 = vpop.permute.xlu0 %3706 }
 0x376   : > { %3992 = vrot.lane.b32.xlu1 %v7224_v51, %s9135_s27  ;;  %v3715_v15 = vsel %vm9171_vm7, %v3707_v31, %v7262_v10  ;;  %vm9176_vm7 = vmmov %vm9175_vm5 }
 0x377   : > { %3996 = vrot.lane.b32.xlu0 %v7235_v25, %s9135_s27  ;;  %4729 = vmatprep.subr.mxu1 %v3715_v15 }
 0x378   : > { %v2707_v49 = vpop.permute.xlu1 %2706 }
 0x379   : > { %v3705_v32 = vpop.permute.xlu0 %3704 }
 0x37a   : > { %v3714_v0 = vsel %vm9172_vm6, %v3705_v32, %v3707_v31  ;;  %3196 = vrot.lane.b32.xlu1 %v7235_v25, %s9173_s7  ;;  %vm9179_vm6 = vcmask 703488  }
 0x37b   : > { %3194 = vrot.lane.b32.xlu0 %v7246_v56, %s9173_s7  ;;  %4730 = vmatpush1.msra.mxu1 %v3714_v0 }
 0x37c   : > { %v3675_v60 = vpop.permute.xlu1 %3674 }
 0x37d   : > { %v7275_v1 = vpop.permute.xlu0 %2708 }
 0x37e   : > { %3964 = vrot.lane.b32.xlu1 %v7235_v25, %s9131_s24  ;;  %v2715_v15 = vsel %vm1321_vm14, %v2707_v49, %v7275_v1 }
 0x37f   : > { %3962 = vrot.lane.b32.xlu0 %v7246_v56, %s9131_s24  ;;  %4658 = vmatprep.subr.mxu0 %v2715_v15 }
 0x380   : > { %v2705_v32 = vpop.permute.xlu1 %2704 }
 0x381   : > { %v2714_v31 = vsel %vm1321_vm14, %v2705_v32, %v2707_v49  ;;  %v7284_v10 = vpop.permute.xlu0 %3676 }
 0x382   : > { %9174 = vst [vmem:[#allocation206_spill] sm:$0xff] %v7284_v10  ;;  %3960 = vrot.lane.b32.xlu1 %v7224_v51, %s9131_s24  ;;  %4659 = vmatpush1.msra.mxu0 %v2714_v31  ;;  %v3683_v0 = vsel %vm9175_vm5, %v3675_v60, %v7284_v10  ;;  %vm9180_vm5 = vmmov %vm9179_vm6 }
 0x383   : > { %3192 = vrot.lane.b32.xlu0 %v7224_v51, %s9173_s7  ;;  %4731 = vmatprep.subr.mxu1 %v3683_v0 }
 0x384   : > { %v2675_v11 = vpop.permute.xlu1 %2674 }
 0x385   : > { %v3673_v55 = vpop.permute.xlu0 %3672 }
 0x386   : > { %v3682_v15 = vsel %vm9176_vm7, %v3673_v55, %v3675_v60  ;;  %3164 = vrot.lane.b32.xlu1 %v7235_v25, %s9177_s8  ;;  %vm9183_vm7 = vcmask 711680  }
 0x387   : > { %3162 = vrot.lane.b32.xlu0 %v7246_v56, %s9177_s8  ;;  %4732 = vmatpush1.msra.mxu1 %v3682_v15 }
 0x388   : > { %v3643_v49 = vpop.permute.xlu1 %3642 }
 0x389   : > { %v7297_v32 = vpop.permute.xlu0 %2676 }
 0x38a   : > { %3932 = vrot.lane.b32.xlu1 %v7235_v25, %s9128_s23  ;;  %v2683_v31 = vsel %vm1288_vm13, %v2675_v11, %v7297_v32 }
 0x38b   : > { %3930 = vrot.lane.b32.xlu0 %v7246_v56, %s9128_s23  ;;  %4660 = vmatprep.subr.mxu0 %v2683_v31 }
 0x38c   : > { %v2673_v60 = vpop.permute.xlu1 %2672 }
 0x38d   : > { %v2682_v55 = vsel %vm1288_vm13, %v2673_v60, %v2675_v11  ;;  %v7306_v0 = vpop.permute.xlu0 %3644 }
 0x38e   : > { %9178 = vst [vmem:[#allocation207_spill] sm:$0xff] %v7306_v0  ;;  %3928 = vrot.lane.b32.xlu1 %v7224_v51, %s9128_s23  ;;  %4661 = vmatpush1.msra.mxu0 %v2682_v55  ;;  %v3651_v15 = vsel %vm9179_vm6, %v3643_v49, %v7306_v0  ;;  %vm9184_vm6 = vcmask 449536  }
 0x38f   : > { %3160 = vrot.lane.b32.xlu0 %v7224_v51, %s9177_s8  ;;  %4733 = vmatprep.subr.mxu1 %v3651_v15 }
 0x390   : > { %v2643_v10 = vpop.permute.xlu1 %2642 }
 0x391   : > { %v3641_v38 = vpop.permute.xlu0 %3640 }
 0x392   : > { %v3650_v31 = vsel %vm9180_vm5, %v3641_v38, %v3643_v49  ;;  %3132 = vrot.lane.b32.xlu1 %v7235_v25, %s9181_s9  ;;  %vm9185_vm5 = vmmov %vm9183_vm7 }
 0x393   : > { %3130 = vrot.lane.b32.xlu0 %v7246_v56, %s9181_s9  ;;  %4734 = vmatpush1.msra.mxu1 %v3650_v31 }
 0x394   : > { %v3611_v11 = vpop.permute.xlu1 %3610 }
 0x395   : > { %v7319_v60 = vpop.permute.xlu0 %2644 }
 0x396   : > { %3900 = vrot.lane.b32.xlu1 %v7235_v25, %s9123_s22  ;;  %v2651_v55 = vsel %vm8903_vm8, %v2643_v10, %v7319_v60 }
 0x397   : > { %3898 = vrot.lane.b32.xlu0 %v7246_v56, %s9123_s22  ;;  %4662 = vmatprep.subr.mxu0 %v2651_v55  ;;  %v2619_v55 = vsel %vm1222_vm12, %v7243_v33, %v7256_v2 }
 0x398   : > { %v2641_v38 = vpop.permute.xlu1 %2640 }
 0x399   : > { %v2650_v49 = vsel %vm8903_vm8, %v2641_v38, %v2643_v10  ;;  %v7328_v15 = vpop.permute.xlu0 %3612  ;;  %v2618_v10 = vsel %vm1222_vm12, %v7248_v8, %v7243_v33  ;;  %vm9188_vm8 = vcmask 457728  }
 0x39a   : > { %9182 = vst [vmem:[#allocation208_spill] sm:$0xff] %v7328_v15  ;;  %3896 = vrot.lane.b32.xlu1 %v7224_v51, %s9123_s22  ;;  %4663 = vmatpush1.msra.mxu0 %v2650_v49  ;;  %v3619_v31 = vsel %vm9183_vm7, %v3611_v11, %v7328_v15  ;;  %v2587_v49 = vsel %vm9184_vm6, %v7226_v50, %v7221_v16  ;;  %vm9187_vm7 = vmmov %vm9184_vm6 }
 0x39b   : > { %3128 = vrot.lane.b32.xlu0 %v7224_v51, %s9181_s9  ;;  %4735 = vmatprep.subr.mxu1 %v3619_v31  ;;  %v2586_v31 = vsel %vm9187_vm7, %v7213_v5, %v7226_v50  ;;  %v2555_v33 = vsel %vm9188_vm8, %v7197_v46, %v7207_v17  ;;  %vm9189_vm6 = vmmov %vm9188_vm8  ;;  %vm9192_vm7 = vcmask 474112  }
 0x39c   : > { %4664 = vmatprep.subr.mxu0 %v2619_v55  ;;  %v3579_v38 = vpop.permute.xlu1 %3578  ;;  %v2554_v8 = vsel %vm9189_vm6, %v7199_v52, %v7197_v46  ;;  %vm9193_vm6 = vmmov %vm9192_vm7 }
 0x39d   : > { %v3609_v0 = vpop.permute.xlu0 %3608  ;;  %4665 = vmatpush1.msra.mxu0 %v2618_v10  ;;  %v2490_v55 = vsel %vm9193_vm6, %v7159_v9, %v7157_v47 }
 0x39e   : > { %v3618_v15 = vsel %vm9185_vm5, %v3609_v0, %v3611_v11  ;;  %4666 = vmatprep.subr.mxu0 %v2587_v49  ;;  %3100 = vrot.lane.b32.xlu1 %v7235_v25, %s9186_s10  ;;  %vm9190_vm5 = vcmask 465920  }
 0x39f   : > { %3098 = vrot.lane.b32.xlu0 %v7246_v56, %s9186_s10  ;;  %4667 = vmatpush1.msra.mxu0 %v2586_v31  ;;  %v2523_v50 = vsel %vm9190_vm5, %v7183_v4, %v7181_v42  ;;  %vm9191_vm8 = vmmov %vm9190_vm5  ;;  %vm9194_vm5 = vcmask 482304  }
 0x3a0   : > { %4736 = vmatpush1.msra.mxu1 %v3618_v15  ;;  %4668 = vmatprep.subr.mxu0 %v2555_v33  ;;  %v3577_v0 = vpop.permute.xlu1 %3576  ;;  %v2522_v52 = vsel %vm9191_vm8, %v7173_v35, %v7183_v4  ;;  %v2491_v15 = vsel %vm9192_vm7, %v7157_v47, %v7167_v54  ;;  %v2459_v4 = vsel %vm9194_vm5, %v7143_v18, %v7141_v26  ;;  %vm9195_vm8 = vmmov %vm9194_vm5  ;;  %vm9196_vm7 = vcmask 490496  }
 0x3a1   : > { %v7359_v11 = vpop.permute.xlu0 %3580  ;;  %4669 = vmatpush1.msra.mxu0 %v2554_v8  ;;  %v3586_v5 = vsel %vm793_vm11, %v3577_v0, %v3579_v38  ;;  %v2427_v9 = vsel %vm9196_vm7, %v7117_v14, %v7127_v20  ;;  %vm9197_vm6 = vmmov %vm9196_vm7  ;;  %vm9198_vm5 = vcmask 498688   ;;  %vm9201_vm7 = vcmask 506880  }
 0x3a2   : > { %4670 = vmatprep.subr.mxu0 %v2523_v50  ;;  %3868 = vrot.lane.b32.xlu1 %v7235_v25, %s9120_s21  ;;  %v3587_v46 = vsel %vm793_vm11, %v3579_v38, %v7359_v11  ;;  %v2458_v38 = vsel %vm9195_vm8, %v7133_v13, %v7143_v18  ;;  %v2426_v49 = vsel %vm9197_vm6, %v7119_v21, %v7117_v14  ;;  %vm9200_vm8 = vmmov %vm9198_vm5 }
 0x3a3   : > { %3866 = vrot.lane.b32.xlu0 %v7246_v56, %s9120_s21  ;;  %4671 = vmatpush1.msra.mxu0 %v2522_v52  ;;  %v2395_v13 = vsel %vm9198_vm5, %v7103_v45, %v7101_v57  ;;  %v2394_v8 = vsel %vm9200_vm8, %v7093_v12, %v7103_v45  ;;  %v2363_v14 = vsel %vm9201_vm7, %v7077_v23, %v7087_v3  ;;  %vm9202_vm6 = vmmov %vm9201_vm7  ;;  %vm9203_vm5 = vcmask 515072  }
 0x3a4   : > { %4737 = vmatprep.subr.mxu1 %v3587_v46  ;;  %4672 = vmatprep.subr.mxu0 %v2491_v15  ;;  %v7380_v10 = vpop.permute.xlu1 %3548  ;;  %v2362_v21 = vsel %vm9202_vm6, %v7079_v28, %v7077_v23  ;;  %v2331_v12 = vsel %vm9203_vm5, %v7063_v22, %v7061_v39  ;;  %vm9204_vm8 = vmmov %vm9203_vm5  ;;  %vm9205_vm7 = vcmask 523264   ;;  %vm9207_vm5 = vcmask 703488  }
 0x3a5   : > { %4738 = vmatpush1.msra.mxu1 %v3586_v5  ;;  %v3547_v35 = vpop.permute.xlu0 %3546  ;;  %4673 = vmatpush1.msra.mxu0 %v2490_v55  ;;  %v2330_v23 = vsel %vm9204_vm8, %v7053_v62, %v7063_v22  ;;  %v2299_v5 = vsel %vm9205_vm7, %v7016_v6, %v7044_v27  ;;  %vm9206_vm6 = vmmov %vm9205_vm7  ;;  %v2267_v22 = vsel %vm9207_vm5, %v6975_v48, %v6970_v58  ;;  %vm9209_vm7 = vcmask 711680  }
 0x3a6   : > { %4674 = vmatprep.subr.mxu0 %v2459_v4  ;;  %3864 = vrot.lane.b32.xlu1 %v7224_v51, %s9120_s21  ;;  %v3555_v47 = vsel %vm760_vm15, %v3547_v35, %v7380_v10  ;;  %v2298_v52 = vsel %vm9206_vm6, %v7021_v19, %v7016_v6  ;;  %vm9208_vm8 = vmmov %vm9207_vm5  ;;  %v2235_v19 = vsel %vm9209_vm7, %v6911_v63, %v6932_v41  ;;  %vm8922_vm5 = vcmask 588800   ;;  %s9245_s21 = smov 64  }
 0x3a7   : > { %3096 = vrot.lane.b32.xlu0 %v7224_v51, %s9186_s10  ;;  %4675 = vmatpush1.msra.mxu0 %v2458_v38  ;;  %v2266_v15 = vsel %vm9208_vm8, %v6950_v29, %v6975_v48  ;;  %vm9210_vm6 = vmmov %vm9209_vm7  ;;  %vm9215_vm8 = vcmask 965632  }
 0x3a8   : > { %4739 = vmatprep.subr.mxu1 %v3555_v47  ;;  %4676 = vmatprep.subr.mxu0 %v2427_v9  ;;  %v3515_v31 = vpop.permute.xlu1 %3514  ;;  %v2234_v55 = vsel %vm9210_vm6, %v6915_v24, %v6911_v63  ;;  %vm9216_vm7 = vmmov %vm9215_vm8  ;;  %vm9218_vm6 = vcmask 973824  }
 0x3a9   : > { %v3545_v33 = vpop.permute.xlu0 %3544  ;;  %4677 = vmatpush1.msra.mxu0 %v2426_v49 }
 0x3aa   : > { %v3554_v18 = vsel %vm760_vm15, %v3545_v33, %v3547_v35  ;;  %4678 = vmatprep.subr.mxu0 %v2395_v13  ;;  %3068 = vrot.lane.b32.xlu1 %v7235_v25, %s9199_s11 }
 0x3ab   : > { %3066 = vrot.lane.b32.xlu0 %v7246_v56, %s9199_s11  ;;  %4679 = vmatpush1.msra.mxu0 %v2394_v8 }
 0x3ac   : > { %4740 = vmatpush1.msra.mxu1 %v3554_v18  ;;  %4680 = vmatprep.subr.mxu0 %v2363_v14  ;;  %v3513_v0 = vpop.permute.xlu1 %3512 }
 0x3ad   : > { %v7417_v50 = vpop.permute.xlu0 %3516  ;;  %4681 = vmatpush1.msra.mxu0 %v2362_v21  ;;  %v3522_v45 = vsel %vm727_vm9, %v3513_v0, %v3515_v31  ;;  %v4021_v0 = vld [vmem:[%s8653_s1 + $0x38] sm:$0xff] }
 0x3ae   : > { %4682 = vmatprep.subr.mxu0 %v2331_v12  ;;  %3836 = vrot.lane.b32.xlu1 %v7235_v25, %s9115_s20  ;;  %v3523_v28 = vsel %vm727_vm9, %v3515_v31, %v7417_v50 }
 0x3af   : > { %3834 = vrot.lane.b32.xlu0 %v7246_v56, %s9115_s20  ;;  %4683 = vmatpush1.msra.mxu0 %v2330_v23 }
 0x3b0   : > { %4741 = vmatprep.subr.mxu1 %v3523_v28  ;;  %4684 = vmatprep.subr.mxu0 %v2299_v5  ;;  %v7438_v46 = vpop.permute.xlu1 %3484 }
 0x3b1   : > { %4742 = vmatpush1.msra.mxu1 %v3522_v45  ;;  %v3483_v62 = vpop.permute.xlu0 %3482  ;;  %4685 = vmatpush1.msra.mxu0 %v2298_v52 }
 0x3b2   : > { %4686 = vmatprep.subr.mxu0 %v2267_v22  ;;  %3832 = vrot.lane.b32.xlu1 %v7224_v51, %s9115_s20  ;;  %v3491_v6 = vsel %vm694_vm10, %v3483_v62, %v7438_v46  ;;  %s9236_s20 = smov 29  }
 0x3b3   : > { %3064 = vrot.lane.b32.xlu0 %v7224_v51, %s9199_s11  ;;  %4687 = vmatpush1.msra.mxu0 %v2266_v15 }
 0x3b4   : > { %4743 = vmatprep.subr.mxu1 %v3491_v6  ;;  %4688 = vmatprep.subr.mxu0 %v2235_v19  ;;  %v3451_v35 = vpop.permute.xlu1 %3450  ;;  %v7521_v19 = vld [vmem:[%s5303_s17 + $0x8] sm:$0xff] }
 0x3b5   : > { %v3481_v4 = vpop.permute.xlu0 %3480  ;;  %4689 = vmatpush1.msra.mxu0 %v2234_v55  ;;  %5151 = vmatprep.mubr.msk.f32.mxu1 %vm8922_vm5, %v4021_v0  ;;  %vm9299_vm5 = vcmask 195584  }
 0x3b6   : > { %v3490_v29 = vsel %vm694_vm10, %v3481_v4, %v3483_v62  ;;  %3036 = vrot.lane.b32.xlu1 %v7235_v25, %s9211_s14 }
 0x3b7   : > { %3034 = vrot.lane.b32.xlu0 %v7246_v56, %s9211_s14  ;;  %4744 = vmatpush1.msra.mxu1 %v3490_v29 }
 0x3b8   : > { %v3449_v48 = vpop.permute.xlu1 %3448 }
 0x3b9   : > { %v3458_v38 = vsel %vm661_vm0, %v3449_v48, %v3451_v35  ;;  %v7464_v47 = vpop.permute.xlu0 %3452 }
 0x3ba   : > { %3804 = vrot.lane.b32.xlu1 %v7235_v25, %s9112_s19  ;;  %v3459_v63 = vsel %vm661_vm0, %v3451_v35, %v7464_v47 }
 0x3bb   : > { %3802 = vrot.lane.b32.xlu0 %v7246_v56, %s9112_s19  ;;  %4745 = vmatprep.subr.mxu1 %v3459_v63 }
 0x3bc   : > { %4746 = vmatpush1.msra.mxu1 %v3458_v38  ;;  %v7472_v24 = vpop.permute.xlu1 %3420 }
 0x3bd   : > { %v3419_v9 = vpop.permute.xlu0 %3418 }
 0x3be   : > { %3800 = vrot.lane.b32.xlu1 %v7224_v51, %s9112_s19  ;;  %v3427_v49 = vsel %vm628_vm1, %v3419_v9, %v7472_v24  ;;  %s9233_s19 = smov 28  }
 0x3bf   : > { %3032 = vrot.lane.b32.xlu0 %v7224_v51, %s9211_s14  ;;  %4747 = vmatprep.subr.mxu1 %v3427_v49 }
 0x3c0   : > { %v3387_v31 = vpop.permute.xlu1 %3386 }
 0x3c1   : > { %v3417_v33 = vpop.permute.xlu0 %3416 }
 0x3c2   : > { %v3426_v13 = vsel %vm628_vm1, %v3417_v33, %v3419_v9  ;;  %3004 = vrot.lane.b32.xlu1 %v7235_v25, %s9212_s0 }
 0x3c3   : > { %3002 = vrot.lane.b32.xlu0 %v7246_v56, %s9212_s0  ;;  %4748 = vmatpush1.msra.mxu1 %v3426_v13 }
 0x3c4   : > { %v3385_v18 = vpop.permute.xlu1 %3384 }
 0x3c5   : > { %v3394_v8 = vsel %vm595_vm2, %v3385_v18, %v3387_v31  ;;  %v7486_v14 = vpop.permute.xlu0 %3388 }
 0x3c6   : > { %3772 = vrot.lane.b32.xlu1 %v7235_v25, %s9107_s18  ;;  %v3395_v21 = vsel %vm595_vm2, %v3387_v31, %v7486_v14 }
 0x3c7   : > { %3770 = vrot.lane.b32.xlu0 %v7246_v56, %s9107_s18  ;;  %4749 = vmatprep.subr.mxu1 %v3395_v21 }
 0x3c8   : > { %4750 = vmatpush1.msra.mxu1 %v3394_v8  ;;  %v7497_v12 = vpop.permute.xlu1 %3356 }
 0x3c9   : > { %v3355_v45 = vpop.permute.xlu0 %3354 }
 0x3ca   : > { %3768 = vrot.lane.b32.xlu1 %v7224_v51, %s9107_s18  ;;  %v3363_v23 = vsel %vm562_vm3, %v3355_v45, %v7497_v12  ;;  %s9230_s18 = smov 27  }
 0x3cb   : > { %3000 = vrot.lane.b32.xlu0 %v7224_v51, %s9212_s0  ;;  %4751 = vmatprep.subr.mxu1 %v3363_v23 }
 0x3cc   : > { %v3323_v28 = vpop.permute.xlu1 %3322 }
 0x3cd   : > { %v3353_v5 = vpop.permute.xlu0 %3352 }
 0x3ce   : > { %v3362_v52 = vsel %vm562_vm3, %v3353_v5, %v3355_v45  ;;  %3740 = vrot.lane.b32.xlu1 %v7235_v25, %s9104_s16 }
 0x3cf   : > { %3738 = vrot.lane.b32.xlu0 %v7246_v56, %s9104_s16  ;;  %4752 = vmatpush1.msra.mxu1 %v3362_v52 }
 0x3d0   : > { %v3321_v62 = vpop.permute.xlu1 %3320 }
 0x3d1   : > { %v3330_v22 = vsel %vm8925_vm4, %v3321_v62, %v3323_v28  ;;  %v7512_v15 = vpop.permute.xlu0 %3324 }
 0x3d2   : > { %2962 = vrot.lane.b32.xlu1 %v7224_v51, %s9213_s3  ;;  %v3331_v6 = vsel %vm8925_vm4, %v3323_v28, %v7512_v15 }
 0x3d3   : > { %3736 = vrot.lane.b32.xlu0 %v7224_v51, %s9104_s16  ;;  %4753 = vmatprep.subr.mxu1 %v3331_v6  ;;  %s9227_s16 = smov 26  }
 0x3d4   : > { %4754 = vmatpush1.msra.mxu1 %v3330_v22  ;;  %v7523_v55 = vpop.permute.xlu1 %3292 }
 0x3d5   : > { %9214 = vst [vmem:[#allocation209_spill] sm:$0xff] %v7523_v55  ;;  %v3291_v35 = vpop.permute.xlu0 %3290 }
 0x3d6   : > { %2960 = vrot.lane.b32.xlu1 %v7521_v19, %s9213_s3  ;;  %v3299_v4 = vsel %vm9215_vm8, %v3291_v35, %v7523_v55  ;;  %vm9221_vm8 = vmmov %vm9218_vm6  ;;  %v9458_v55 = vld [vmem:[#allocation119_spill] sm:$0xff] }
 0x3d7   : > { %2964 = vrot.lane.b32.xlu0 %v7246_v56, %s9213_s3  ;;  %4755 = vmatprep.subr.mxu1 %v3299_v4 }
 0x3d8   : > { %v3259_v29 = vpop.permute.xlu1 %3258 }
 0x3d9   : > { %v3289_v48 = vpop.permute.xlu0 %3288 }
 0x3da   : > { %v3298_v38 = vsel %vm9216_vm7, %v3289_v48, %v3291_v35  ;;  %2932 = vrot.lane.b32.xlu1 %v7246_v56, %s9217_s12  ;;  %vm9223_vm7 = vcmask 982016  }
 0x3db   : > { %2930 = vrot.lane.b32.xlu0 %v7224_v51, %s9217_s12  ;;  %4756 = vmatpush1.msra.mxu1 %v3298_v38 }
 0x3dc   : > { %v3257_v63 = vpop.permute.xlu1 %3256 }
 0x3dd   : > { %v3266_v9 = vsel %vm9218_vm6, %v3257_v63, %v3259_v29  ;;  %v7537_v49 = vpop.permute.xlu0 %3260  ;;  %vm9224_vm6 = vmmov %vm9223_vm7 }
 0x3de   : > { %9219 = vst [vmem:[#allocation210_spill] sm:$0xff] %v7537_v49  ;;  %2898 = vrot.lane.b32.xlu1 %v7224_v51, %s9220_s13  ;;  %v3267_v31 = vsel %vm9221_vm8, %v3259_v29, %v7537_v49  ;;  %vm9228_vm8 = vcmask 990208  }
 0x3df   : > { %2928 = vrot.lane.b32.xlu0 %v7521_v19, %s9217_s12  ;;  %4757 = vmatprep.subr.mxu1 %v3267_v31 }
 0x3e0   : > { %4758 = vmatpush1.msra.mxu1 %v3266_v9  ;;  %v7545_v33 = vpop.permute.xlu1 %3228  ;;  %v4019_v9 = vld [vmem:[%s8653_s1 + $0x28] sm:$0xff] }
 0x3e1   : > { %9222 = vst [vmem:[#allocation211_spill] sm:$0xff] %v7545_v33  ;;  %v3227_v13 = vpop.permute.xlu0 %3226  ;;  %4722 = vmatprep.mubr.f32.mxu0 %v4019_v9 }
 0x3e2   : > { %2896 = vrot.lane.b32.xlu1 %v7521_v19, %s9220_s13  ;;  %v3235_v18 = vsel %vm9223_vm7, %v3227_v13, %v7545_v33  ;;  %vm9231_vm7 = vcmask 449536  }
 0x3e3   : > { %2900 = vrot.lane.b32.xlu0 %v7246_v56, %s9220_s13  ;;  %4759 = vmatprep.subr.mxu1 %v3235_v18 }
 0x3e4   : > { %v3995_v8 = vpop.permute.xlu1 %3994 }
 0x3e5   : > { %v3225_v21 = vpop.permute.xlu0 %3224 }
 0x3e6   : > { %v3234_v0 = vsel %vm9224_vm6, %v3225_v21, %v3227_v13  ;;  %2868 = vrot.lane.b32.xlu1 %v7246_v56, %s9225_s2  ;;  %vm9232_vm6 = vmmov %vm9231_vm7 }
 0x3e7   : > { %2866 = vrot.lane.b32.xlu0 %v7224_v51, %s9225_s2  ;;  %4760 = vmatpush1.msra.mxu1 %v3234_v0 }
 0x3e8   : > { %v3993_v45 = vpop.permute.xlu1 %3992 }
 0x3e9   : > { %v4002_v23 = vsel %vm1222_vm12, %v3993_v45, %v3995_v8  ;;  %v7559_v28 = vpop.permute.xlu0 %3996 }
 0x3ea   : > { %9226 = vst [vmem:[#allocation212_spill] sm:$0xff] %v7559_v28  ;;  %2834 = vrot.lane.b32.xlu1 %v7224_v51, %s9227_s16  ;;  %v4003_v5 = vsel %vm1222_vm12, %v3995_v8, %v7559_v28 }
 0x3eb   : > { %2864 = vrot.lane.b32.xlu0 %v7521_v19, %s9225_s2  ;;  %4775 = vmatprep.subr.mxu1 %v4003_v5 }
 0x3ec   : > { %4776 = vmatpush2.msra.mxu1 %v4002_v23  ;;  %v7567_v52 = vpop.permute.xlu1 %3196 }
 0x3ed   : > { %v3195_v62 = vpop.permute.xlu0 %3194 }
 0x3ee   : > { %2832 = vrot.lane.b32.xlu1 %v7521_v19, %s9227_s16  ;;  %v3203_v22 = vsel %vm9228_vm8, %v3195_v62, %v7567_v52 }
 0x3ef   : > { %2836 = vrot.lane.b32.xlu0 %v7246_v56, %s9227_s16  ;;  %4690 = vmatprep.subr.mxu0 %v3203_v22  ;;  %v7617_v22 = vld [vmem:[%s5303_s17 + $0x28] sm:$0xff] }
 0x3f0   : > { %v7575_v6 = vpop.permute.xlu1 %3964 }
 0x3f1   : > { %9229 = vst [vmem:[#allocation213_spill] sm:$0xff] %v7575_v6  ;;  %v3963_v35 = vpop.permute.xlu0 %3962 }
 0x3f2   : > { %2804 = vrot.lane.b32.xlu1 %v7246_v56, %s9230_s18  ;;  %v3971_v4 = vsel %vm9231_vm7, %v3963_v35, %v7575_v6  ;;  %vm9234_vm7 = vcmask 998400  }
 0x3f3   : > { %2802 = vrot.lane.b32.xlu0 %v7224_v51, %s9230_s18  ;;  %4777 = vmatprep.subr.mxu1 %v3971_v4 }
 0x3f4   : > { %v3961_v29 = vpop.permute.xlu1 %3960 }
 0x3f5   : > { %v3970_v48 = vsel %vm9232_vm6, %v3961_v29, %v3963_v35  ;;  %v3193_v38 = vpop.permute.xlu0 %3192  ;;  %vm9237_vm6 = vcmask 457728  }
 0x3f6   : > { %v3202_v63 = vsel %vm9228_vm8, %v3193_v38, %v3195_v62  ;;  %2770 = vrot.lane.b32.xlu1 %v7224_v51, %s9233_s19  ;;  %4778 = vmatpush2.msra.mxu1 %v3970_v48  ;;  %vm9238_vm8 = vmmov %vm9237_vm6 }
 0x3f7   : > { %2800 = vrot.lane.b32.xlu0 %v7521_v19, %s9230_s18  ;;  %4691 = vmatpush2.msra.mxu0 %v3202_v63 }
 0x3f8   : > { %v7592_v31 = vpop.permute.xlu1 %3164 }
 0x3f9   : > { %v3163_v13 = vpop.permute.xlu0 %3162 }
 0x3fa   : > { %2768 = vrot.lane.b32.xlu1 %v7521_v19, %s9233_s19  ;;  %v3171_v18 = vsel %vm9234_vm7, %v3163_v13, %v7592_v31 }
 0x3fb   : > { %2772 = vrot.lane.b32.xlu0 %v7246_v56, %s9233_s19  ;;  %4692 = vmatprep.subr.mxu0 %v3171_v18 }
 0x3fc   : > { %v7600_v8 = vpop.permute.xlu1 %3932 }
 0x3fd   : > { %9235 = vst [vmem:[#allocation214_spill] sm:$0xff] %v7600_v8  ;;  %v3931_v21 = vpop.permute.xlu0 %3930 }
 0x3fe   : > { %2740 = vrot.lane.b32.xlu1 %v7246_v56, %s9236_s20  ;;  %v3939_v0 = vsel %vm9237_vm6, %v3931_v21, %v7600_v8  ;;  %vm9239_vm6 = vcmask 1006592   ;;  %v9289_v8 = vld [vmem:[#allocation34_spill] sm:$0xff] }
 0x3ff   : > { %2738 = vrot.lane.b32.xlu0 %v7224_v51, %s9236_s20  ;;  %4779 = vmatprep.subr.mxu1 %v3939_v0 }
 0x400   : > { %v3929_v45 = vpop.permute.xlu1 %3928 }
 0x401   : > { %v3938_v23 = vsel %vm9238_vm8, %v3929_v45, %v3931_v21  ;;  %v3161_v5 = vpop.permute.xlu0 %3160  ;;  %vm9241_vm8 = vcmask 465920  }
 0x402   : > { %v3170_v62 = vsel %vm9234_vm7, %v3161_v5, %v3163_v13  ;;  %2710 = vrot.lane.b32.xlu1 %v7235_v25, %s9139_s28  ;;  %4780 = vmatpush2.msra.mxu1 %v3938_v23  ;;  %vm9242_vm7 = vmmov %vm9241_vm8 }
 0x403   : > { %2736 = vrot.lane.b32.xlu0 %v7521_v19, %s9236_s20  ;;  %4693 = vmatpush2.msra.mxu0 %v3170_v62 }
 0x404   : > { %v7614_v56 = vpop.permute.xlu1 %3132 }
 0x405   : > { %v3131_v51 = vpop.permute.xlu0 %3130 }
 0x406   : > { %2678 = vrot.lane.b32.xlu1 %v7235_v25, %s9150_s26  ;;  %v3139_v35 = vsel %vm9239_vm6, %v3131_v51, %v7614_v56 }
 0x407   : > { %2712 = vrot.lane.b32.xlu0 %v7617_v22, %s9139_s28  ;;  %4694 = vmatprep.subr.mxu0 %v3139_v35  ;;  %s9249_s28 = smov 87  }
 0x408   : > { %v7625_v4 = vpop.permute.xlu1 %3900 }
 0x409   : > { %9240 = vst [vmem:[#allocation215_spill] sm:$0xff] %v7625_v4  ;;  %v3899_v19 = vpop.permute.xlu0 %3898 }
 0x40a   : > { %2646 = vrot.lane.b32.xlu1 %v7235_v25, %s9153_s29  ;;  %v3907_v29 = vsel %vm9241_vm8, %v3899_v19, %v7625_v4  ;;  %v7640_v25 = vld [vmem:[%s5303_s17 + $0x30] sm:$0xff]  ;;  %vm9243_vm8 = vcmask 1014784   ;;  %v9288_v4 = vld [vmem:[#allocation33_spill] sm:$0xff] }
 0x40b   : > { %2680 = vrot.lane.b32.xlu0 %v7617_v22, %s9150_s26  ;;  %4781 = vmatprep.subr.mxu1 %v3907_v29  ;;  %s9252_s26 = smov 88  }
 0x40c   : > { %v3897_v48 = vpop.permute.xlu1 %3896 }
 0x40d   : > { %v3906_v38 = vsel %vm9242_vm7, %v3897_v48, %v3899_v19  ;;  %v3129_v63 = vpop.permute.xlu0 %3128  ;;  %vm9246_vm7 = vcmask 474112  }
 0x40e   : > { %v3138_v9 = vsel %vm9239_vm6, %v3129_v63, %v3131_v51  ;;  %2616 = vrot.lane.b32.xlu1 %v7617_v22, %s9135_s27  ;;  %4782 = vmatpush2.msra.mxu1 %v3906_v38  ;;  %vm9247_vm6 = vmmov %vm9246_vm7 }
 0x40f   : > { %2648 = vrot.lane.b32.xlu0 %v7617_v22, %s9153_s29  ;;  %4695 = vmatpush2.msra.mxu0 %v3138_v9  ;;  %s9255_s29 = smov 89  }
 0x410   : > { %v7642_v13 = vpop.permute.xlu1 %3100 }
 0x411   : > { %v3099_v18 = vpop.permute.xlu0 %3098 }
 0x412   : > { %3712 = vrot.lane.b32.xlu1 %v7640_v25, %s9099_s15  ;;  %v3107_v21 = vsel %vm9243_vm8, %v3099_v18, %v7642_v13 }
 0x413   : > { %3710 = vrot.lane.b32.xlu0 %v7617_v22, %s9099_s15  ;;  %4696 = vmatprep.subr.mxu0 %v3107_v21  ;;  %s9248_s15 = smov 86  }
 0x414   : > { %v7650_v0 = vpop.permute.xlu1 %3868 }
 0x415   : > { %9244 = vst [vmem:[#allocation216_spill] sm:$0xff] %v7650_v0  ;;  %v3867_v45 = vpop.permute.xlu0 %3866 }
 0x416   : > { %3680 = vrot.lane.b32.xlu1 %v7640_v25, %s9245_s21  ;;  %v3875_v23 = vsel %vm9246_vm7, %v3867_v45, %v7650_v0  ;;  %vm9250_vm7 = vcmask 1022976  }
 0x417   : > { %3678 = vrot.lane.b32.xlu0 %v7617_v22, %s9245_s21  ;;  %4783 = vmatprep.subr.mxu1 %v3875_v23  ;;  %s9256_s21 = smov 90  }
 0x418   : > { %v3865_v5 = vpop.permute.xlu1 %3864 }
 0x419   : > { %v3874_v62 = vsel %vm9247_vm6, %v3865_v5, %v3867_v45  ;;  %v3097_v51 = vpop.permute.xlu0 %3096  ;;  %vm9253_vm6 = vcmask 482304  }
 0x41a   : > { %v3106_v35 = vsel %vm9243_vm8, %v3097_v51, %v3099_v18  ;;  %3648 = vrot.lane.b32.xlu1 %v7640_v25, %s9248_s15  ;;  %4784 = vmatpush2.msra.mxu1 %v3874_v62  ;;  %vm9254_vm8 = vmmov %vm9253_vm6 }
 0x41b   : > { %3646 = vrot.lane.b32.xlu0 %v7617_v22, %s9248_s15  ;;  %4697 = vmatpush2.msra.mxu0 %v3106_v35  ;;  %s9259_s15 = smov 91  }
 0x41c   : > { %v7664_v19 = vpop.permute.xlu1 %3068 }
 0x41d   : > { %v3067_v29 = vpop.permute.xlu0 %3066 }
 0x41e   : > { %3616 = vrot.lane.b32.xlu1 %v7640_v25, %s9249_s28  ;;  %v3075_v48 = vsel %vm9250_vm7, %v3067_v29, %v7664_v19 }
 0x41f   : > { %3614 = vrot.lane.b32.xlu0 %v7617_v22, %s9249_s28  ;;  %4698 = vmatprep.subr.mxu0 %v3075_v48  ;;  %s9262_s28 = smov 92  }
 0x420   : > { %v7672_v38 = vpop.permute.xlu1 %3836 }
 0x421   : > { %9251 = vst [vmem:[#allocation217_spill] sm:$0xff] %v7672_v38  ;;  %v3835_v63 = vpop.permute.xlu0 %3834 }
 0x422   : > { %3584 = vrot.lane.b32.xlu1 %v7640_v25, %s9252_s26  ;;  %v3843_v9 = vsel %vm9253_vm6, %v3835_v63, %v7672_v38  ;;  %vm9257_vm6 = vcmask 1031168   ;;  %v9281_v38 = vld [vmem:[#allocation40_spill] sm:$0xff] }
 0x423   : > { %3582 = vrot.lane.b32.xlu0 %v7617_v22, %s9252_s26  ;;  %4785 = vmatprep.subr.mxu1 %v3843_v9  ;;  %s9700_s26 = sld [smem:[#allocation224_spill]] }
 0x424   : > { %v3833_v18 = vpop.permute.xlu1 %3832 }
 0x425   : > { %v3842_v21 = vsel %vm9254_vm8, %v3833_v18, %v3835_v63  ;;  %v3065_v45 = vpop.permute.xlu0 %3064  ;;  %vm9260_vm8 = vcmask 490496  }
 0x426   : > { %v3074_v23 = vsel %vm9250_vm7, %v3065_v45, %v3067_v29  ;;  %3552 = vrot.lane.b32.xlu1 %v7640_v25, %s9255_s29  ;;  %4786 = vmatpush2.msra.mxu1 %v3842_v21  ;;  %vm9261_vm7 = vmmov %vm9260_vm8 }
 0x427   : > { %3550 = vrot.lane.b32.xlu0 %v7617_v22, %s9255_s29  ;;  %4699 = vmatpush2.msra.mxu0 %v3074_v23  ;;  %s9271_s29 = smov 94  }
 0x428   : > { %v7686_v5 = vpop.permute.xlu1 %3036 }
 0x429   : > { %v3035_v62 = vpop.permute.xlu0 %3034 }
 0x42a   : > { %3520 = vrot.lane.b32.xlu1 %v7640_v25, %s9256_s21  ;;  %v3043_v51 = vsel %vm9257_vm6, %v3035_v62, %v7686_v5 }
 0x42b   : > { %3518 = vrot.lane.b32.xlu0 %v7617_v22, %s9256_s21  ;;  %4700 = vmatprep.subr.mxu0 %v3043_v51 }
 0x42c   : > { %v7694_v35 = vpop.permute.xlu1 %3804 }
 0x42d   : > { %9258 = vst [vmem:[#allocation218_spill] sm:$0xff] %v7694_v35  ;;  %v3803_v29 = vpop.permute.xlu0 %3802 }
 0x42e   : > { %3488 = vrot.lane.b32.xlu1 %v7640_v25, %s9259_s15  ;;  %v3811_v48 = vsel %vm9260_vm8, %v3803_v29, %v7694_v35  ;;  %vm9263_vm8 = vcmask 1039360   ;;  %v7732_v35 = vld [vmem:[%s5303_s17 + $0x10] sm:$0xff] }
 0x42f   : > { %3486 = vrot.lane.b32.xlu0 %v7617_v22, %s9259_s15  ;;  %4787 = vmatprep.subr.mxu1 %v3811_v48 }
 0x430   : > { %v3801_v63 = vpop.permute.xlu1 %3800 }
 0x431   : > { %v3810_v9 = vsel %vm9261_vm7, %v3801_v63, %v3803_v29  ;;  %v3033_v18 = vpop.permute.xlu0 %3032  ;;  %vm9265_vm7 = vcmask 498688  }
 0x432   : > { %v3042_v21 = vsel %vm9257_vm6, %v3033_v18, %v3035_v62  ;;  %3200 = vrot.lane.b32.xlu1 %v7640_v25, %s9173_s7  ;;  %4788 = vmatpush2.msra.mxu1 %v3810_v9  ;;  %vm9266_vm6 = vmmov %vm9265_vm7 }
 0x433   : > { %3198 = vrot.lane.b32.xlu0 %v7617_v22, %s9173_s7  ;;  %4701 = vmatpush2.msra.mxu0 %v3042_v21  ;;  %v7726_v21 = vld [vmem:[%s5303_s17 + $0x18] sm:$0xff]  ;;  %s9267_s7 = smov 93  }
 0x434   : > { %v7708_v45 = vpop.permute.xlu1 %3004 }
 0x435   : > { %v3003_v23 = vpop.permute.xlu0 %3002 }
 0x436   : > { %3456 = vrot.lane.b32.xlu1 %v7640_v25, %s9262_s28  ;;  %v3011_v51 = vsel %vm9263_vm8, %v3003_v23, %v7708_v45 }
 0x437   : > { %3454 = vrot.lane.b32.xlu0 %v7617_v22, %s9262_s28  ;;  %4702 = vmatprep.subr.mxu0 %v3011_v51 }
 0x438   : > { %v7716_v62 = vpop.permute.xlu1 %3772 }
 0x439   : > { %9264 = vst [vmem:[#allocation219_spill] sm:$0xff] %v7716_v62  ;;  %v3771_v29 = vpop.permute.xlu0 %3770 }
 0x43a   : > { %3168 = vrot.lane.b32.xlu1 %v7640_v25, %s9177_s8  ;;  %v3779_v48 = vsel %vm9265_vm7, %v3771_v29, %v7716_v62  ;;  %vm9269_vm7 = vcmask 506880  }
 0x43b   : > { %3166 = vrot.lane.b32.xlu0 %v7617_v22, %s9177_s8  ;;  %4789 = vmatprep.subr.mxu1 %v3779_v48  ;;  %v5268_v48 = vmov 0  }
 0x43c   : > { %v3769_v63 = vpop.permute.xlu1 %3768  ;;  %5209 = vset.pattern.permute.xlu0 %v5268_v48  ;;  %v665_v48 = vsel %vm661_vm0, %v5712_v40, %v5727_v53  ;;  %v5210_v53 = vld [vmem:[%s8653_s1 + $0x8] sm:$0xff] }
 0x43d   : > { %v3778_v9 = vsel %vm9266_vm6, %v3769_v63, %v3771_v29  ;;  %v3001_v18 = vpop.permute.xlu0 %3000  ;;  %vm9270_vm6 = vmmov %vm9269_vm7 }
 0x43e   : > { %v3010_v51 = vsel %vm9263_vm8, %v3001_v18, %v3003_v23  ;;  %3424 = vrot.lane.b32.xlu1 %v7640_v25, %s9267_s7  ;;  %4790 = vmatpush2.msra.mxu1 %v3778_v9  ;;  %v4020_v18 = vld [vmem:[%s8653_s1 + $0x30] sm:$0xff]  ;;  %vm9272_vm8 = vcmask 179200  }
 0x43f   : > { %3422 = vrot.lane.b32.xlu0 %v7617_v22, %s9267_s7  ;;  %4703 = vmatpush2.msra.mxu0 %v3010_v51 }
 0x440   : > { %v7736_v62 = vpop.permute.xlu1 %3740  ;;  %4704 = vmatprep.subr.mxu0 %v7726_v21 }
 0x441   : > { %9268 = vst [vmem:[#allocation220_spill] sm:$0xff] %v7736_v62  ;;  %v3739_v29 = vpop.permute.xlu0 %3738  ;;  %4705 = vmatpush2.msra.mxu0 %v7732_v35 }
 0x442   : > { %3136 = vrot.lane.b32.xlu1 %v7640_v25, %s9181_s9  ;;  %v3747_v23 = vsel %vm9269_vm7, %v3739_v29, %v7736_v62  ;;  %v664_v62 = vsel %vm661_vm0, %v5714_v44, %v5712_v40  ;;  %vm9274_vm7 = vmmov %vm9272_vm8  ;;  %v9275_v44 = vld [vmem:[#allocation44_spill] sm:$0xff] }
 0x443   : > { %3134 = vrot.lane.b32.xlu0 %v7617_v22, %s9181_s9  ;;  %4791 = vmatprep.subr.mxu1 %v3747_v23 }
 0x444   : > { %v2963_v63 = vpop.permute.xlu1 %2962 }
 0x445   : > { %v3737_v9 = vpop.permute.xlu0 %3736 }
 0x446   : > { %v3746_v51 = vsel %vm9270_vm6, %v3737_v9, %v3739_v29  ;;  %3392 = vrot.lane.b32.xlu1 %v7640_v25, %s9271_s29  ;;  %vm9282_vm6 = vcmask 187392  }
 0x447   : > { %3390 = vrot.lane.b32.xlu0 %v7617_v22, %s9271_s29  ;;  %4792 = vmatpush2.msra.mxu1 %v3746_v51  ;;  %v632_v51 = vsel %vm628_vm1, %v5702_v34, %v5700_v30  ;;  %v631_v30 = vsel %vm628_vm1, %v9275_v44, %v5702_v34 }
 0x448   : > { %4800 = vmatprep.subr.mxu1 %v665_v48  ;;  %v2961_v23 = vpop.permute.xlu1 %2960  ;;  %4794 = vmatmul.mubr.f32.vlgmr.msra.gmra.mxu1 %v4020_v18  ;;  %v9277_v18 = vld [vmem:[#allocation41_spill] sm:$0xff] }
 0x449   : > { %v2970_v29 = vsel %vm9272_vm8, %v2961_v23, %v2963_v63  ;;  %4801 = vmatpush1.msra.mxu1 %v664_v62  ;;  %v7761_v9 = vpop.permute.xlu0 %2964  ;;  %4864 = vmatprep.mubr.f32.mxu1 %v5210_v53  ;;  %v9276_v62 = vld [vmem:[#allocation43_spill] sm:$0xff]  ;;  %vm9287_vm8 = vmmov %vm9282_vm6 }
 0x44a   : > { %9273 = vst [vmem:[#allocation221_spill] sm:$0xff] %v7761_v9  ;;  %4802 = vmatprep.subr.mxu1 %v632_v51  ;;  %3104 = vrot.lane.b32.xlu1 %v7640_v25, %s9186_s10  ;;  %v2971_v40 = vsel %vm9274_vm7, %v2963_v63, %v7761_v9  ;;  %v599_v48 = vsel %vm595_vm2, %v9277_v18, %v9276_v62  ;;  %v9279_v51 = vld [vmem:[#allocation42_spill] sm:$0xff]  ;;  %v9285_v62 = vld [vmem:[#allocation35_spill] sm:$0xff]  ;;  %vm9290_vm7 = vcmask 965632   ;;  %v9440_v9 = vld [vmem:[#allocation53_spill] sm:$0xff] }
 0x44b   : > { %3102 = vrot.lane.b32.xlu0 %v7617_v22, %s9186_s10  ;;  %4706 = vmatprep.subr.mxu0 %v2971_v40  ;;  %v598_v63 = vsel %vm595_vm2, %v9279_v51, %v9277_v18  ;;  %v9280_v40 = vld [vmem:[#allocation39_spill] sm:$0xff]  ;;  %v9286_v51 = vld [vmem:[#allocation36_spill] sm:$0xff] }
 0x44c   : > { %4803 = vmatpush1.msra.mxu1 %v631_v30  ;;  %4707 = vmatpush2.msra.mxu0 %v2970_v29  ;;  %v7781_v23 = vpop.permute.xlu1 %2932  ;;  %v566_v0 = vsel %vm562_vm3, %v9281_v38, %v9280_v40  ;;  %v9283_v29 = vld [vmem:[#allocation38_spill] sm:$0xff]  ;;  %v9284_v30 = vld [vmem:[#allocation37_spill] sm:$0xff] }
 0x44d   : > { %9278 = vst [vmem:[#allocation44_spill] sm:$0xff] %v7781_v23  ;;  %4804 = vmatprep.subr.mxu1 %v599_v48  ;;  %v2931_v53 = vpop.permute.xlu0 %2930  ;;  %v565_v44 = vsel %vm562_vm3, %v9283_v29, %v9281_v38  ;;  %v533_v18 = vsel %vm8925_vm4, %v9285_v62, %v9284_v30  ;;  %v500_v38 = vsel %vm9290_vm7, %v9289_v8, %v9288_v4  ;;  %v9294_v30 = vld [vmem:[#allocation29_spill] sm:$0xff]  ;;  %v9296_v4 = vld [vmem:[#allocation30_spill] sm:$0xff] }
 0x44e   : > { %4805 = vmatpush1.msra.mxu1 %v598_v63  ;;  %3360 = vrot.lane.b32.xlu1 %v7640_v25, %s9165_s25  ;;  %v2939_v34 = vsel %vm9282_vm6, %v2931_v53, %v7781_v23  ;;  %v532_v63 = vsel %vm8925_vm4, %v9286_v51, %v9285_v62  ;;  %vm9292_vm6 = vmmov %vm9290_vm7  ;;  %vm9325_vm4 = vcmask 1014784   ;;  %v9426_v23 = vld [vmem:[#allocation58_spill] sm:$0xff] }
 0x44f   : > { %4806 = vmatprep.subr.mxu1 %v566_v0  ;;  %3358 = vrot.lane.b32.xlu0 %v7617_v22, %s9165_s25 }
 0x450   : > { %4708 = vmatprep.subr.mxu0 %v2939_v34  ;;  %4807 = vmatpush1.msra.mxu1 %v565_v44  ;;  %v2899_v48 = vpop.permute.xlu1 %2898  ;;  %v9291_v34 = vld [vmem:[#allocation32_spill] sm:$0xff]  ;;  %v9293_v44 = vld [vmem:[#allocation31_spill] sm:$0xff] }
 0x451   : > { %4808 = vmatprep.subr.mxu1 %v533_v18  ;;  %v2929_v0 = vpop.permute.xlu0 %2928  ;;  %v499_v29 = vsel %vm9292_vm6, %v9291_v34, %v9289_v8  ;;  %vm9302_vm6 = vcmask 982016   ;;  %v9304_v34 = vld [vmem:[#allocation26_spill] sm:$0xff] }
 0x452   : > { %4809 = vmatpush1.msra.mxu1 %v532_v63  ;;  %v2938_v40 = vsel %vm9287_vm8, %v2929_v0, %v2931_v53  ;;  %3072 = vrot.lane.b32.xlu1 %v7640_v25, %s9199_s11  ;;  %vm9295_vm8 = vcmask 973824   ;;  %v9300_v0 = vld [vmem:[#allocation27_spill] sm:$0xff] }
 0x453   : > { %4810 = vmatprep.subr.mxu1 %v500_v38  ;;  %3070 = vrot.lane.b32.xlu0 %v7617_v22, %s9199_s11  ;;  %v467_v53 = vsel %vm9295_vm8, %v9294_v30, %v9293_v44  ;;  %vm9297_vm7 = vmmov %vm9295_vm8  ;;  %v9301_v38 = vld [vmem:[#allocation28_spill] sm:$0xff]  ;;  %v9306_v44 = vld [vmem:[#allocation25_spill] sm:$0xff] }
 0x454   : > { %4709 = vmatpush2.msra.mxu0 %v2938_v40  ;;  %4811 = vmatpush1.msra.mxu1 %v499_v29  ;;  %v2897_v62 = vpop.permute.xlu1 %2896  ;;  %v466_v18 = vsel %vm9297_vm7, %v9296_v4, %v9294_v30  ;;  %v434_v8 = vsel %vm9302_vm6, %v9301_v38, %v9300_v0  ;;  %vm9303_vm8 = vmmov %vm9299_vm5  ;;  %v9307_v30 = vld [vmem:[#allocation23_spill] sm:$0xff]  ;;  %v9312_v0 = vld [vmem:[#allocation21_spill] sm:$0xff] }
 0x455   : > { %4812 = vmatprep.subr.mxu1 %v467_v53  ;;  %v7821_v51 = vpop.permute.xlu0 %2900  ;;  %v2906_v63 = vsel %vm9299_vm5, %v2897_v62, %v2899_v48  ;;  %vm9305_vm7 = vmmov %vm9302_vm6  ;;  %vm9308_vm5 = vcmask 990208  }
 0x456   : > { %9298 = vst [vmem:[#allocation43_spill] sm:$0xff] %v7821_v51  ;;  %4813 = vmatpush1.msra.mxu1 %v466_v18  ;;  %3328 = vrot.lane.b32.xlu1 %v7640_v25, %s9166_s4  ;;  %v2907_v40 = vsel %vm9303_vm8, %v2899_v48, %v7821_v51  ;;  %v433_v29 = vsel %vm9305_vm7, %v9304_v34, %v9301_v38  ;;  %v9310_v48 = vld [vmem:[#allocation24_spill] sm:$0xff]  ;;  %vm9311_vm6 = vmmov %vm9308_vm5  ;;  %vm9314_vm8 = vcmask 998400   ;;  %vm9315_vm7 = vcmask 203776  }
 0x457   : > { %4814 = vmatprep.subr.mxu1 %v434_v8  ;;  %3326 = vrot.lane.b32.xlu0 %v7617_v22, %s9166_s4  ;;  %v401_v53 = vsel %vm9308_vm5, %v9307_v30, %v9306_v44  ;;  %v400_v4 = vsel %vm9311_vm6, %v9310_v48, %v9307_v30  ;;  %v9313_v8 = vld [vmem:[#allocation22_spill] sm:$0xff]  ;;  %vm9317_vm5 = vmmov %vm9314_vm8  ;;  %v9319_v44 = vld [vmem:[#allocation17_spill] sm:$0xff]  ;;  %vm9320_vm6 = vcmask 1006592   ;;  %s9602_s4 = sld [smem:[#allocation223_spill]] }
 0x458   : > { %4710 = vmatprep.subr.mxu0 %v2907_v40  ;;  %4815 = vmatpush1.msra.mxu1 %v433_v29  ;;  %v7839_v62 = vpop.permute.xlu1 %2868  ;;  %v368_v38 = vsel %vm9314_vm8, %v9313_v8, %v9312_v0  ;;  %v9318_v29 = vld [vmem:[#allocation19_spill] sm:$0xff]  ;;  %v9321_v48 = vld [vmem:[#allocation18_spill] sm:$0xff]  ;;  %vm9322_vm8 = vmmov %vm9320_vm6 }
 0x459   : > { %9309 = vst [vmem:[#allocation41_spill] sm:$0xff] %v7839_v62  ;;  %4711 = vmatpush2.msra.mxu0 %v2906_v63  ;;  %4816 = vmatprep.subr.mxu1 %v401_v53  ;;  %v2867_v18 = vpop.permute.xlu0 %2866  ;;  %v9316_v63 = vld [vmem:[#allocation20_spill] sm:$0xff]  ;;  %v335_v30 = vsel %vm9320_vm6, %v9319_v44, %v9318_v29  ;;  %v9329_v29 = vld [vmem:[#allocation11_spill] sm:$0xff]  ;;  %vm9330_vm6 = vcmask 1022976  }
 0x45a   : > { %4817 = vmatpush1.msra.mxu1 %v400_v4  ;;  %3040 = vrot.lane.b32.xlu1 %v7640_v25, %s9211_s14  ;;  %v2875_v40 = vsel %vm9315_vm7, %v2867_v18, %v7839_v62  ;;  %v367_v34 = vsel %vm9317_vm5, %v9316_v63, %v9313_v8  ;;  %v334_v4 = vsel %vm9322_vm8, %v9321_v48, %v9319_v44  ;;  %v9323_v62 = vld [vmem:[#allocation15_spill] sm:$0xff]  ;;  %v9324_v51 = vld [vmem:[#allocation16_spill] sm:$0xff]  ;;  %vm9327_vm5 = vmmov %vm9325_vm4  ;;  %vm9334_vm8 = vcmask 211968  }
 0x45b   : > { %4818 = vmatprep.subr.mxu1 %v368_v38  ;;  %3038 = vrot.lane.b32.xlu0 %v7617_v22, %s9211_s14  ;;  %v302_v8 = vsel %vm9325_vm4, %v9324_v51, %v9323_v62  ;;  %v9331_v62 = vld [vmem:[#allocation12_spill] sm:$0xff]  ;;  %vm9332_vm4 = vmmov %vm9330_vm6 }
 0x45c   : > { %4712 = vmatprep.subr.mxu0 %v2875_v40  ;;  %4819 = vmatpush1.msra.mxu1 %v367_v34  ;;  %v2835_v53 = vpop.permute.xlu1 %2834  ;;  %v9326_v40 = vld [vmem:[#allocation14_spill] sm:$0xff]  ;;  %v9328_v34 = vld [vmem:[#allocation13_spill] sm:$0xff] }
 0x45d   : > { %4820 = vmatprep.subr.mxu1 %v335_v30  ;;  %v2865_v0 = vpop.permute.xlu0 %2864  ;;  %v301_v63 = vsel %vm9327_vm5, %v9326_v40, %v9324_v51  ;;  %v268_v30 = vsel %vm9332_vm4, %v9331_v62, %v9329_v29  ;;  %vm9338_vm5 = vmmov %vm9334_vm8  ;;  %v9339_v40 = vld [vmem:[#allocation8_spill] sm:$0xff]  ;;  %vm9343_vm4 = vcmask 1039360  }
 0x45e   : > { %4821 = vmatpush1.msra.mxu1 %v334_v4  ;;  %v2874_v38 = vsel %vm9315_vm7, %v2865_v0, %v2867_v18  ;;  %3296 = vrot.lane.b32.xlu1 %v7640_v25, %s9167_s30  ;;  %v269_v18 = vsel %vm9330_vm6, %v9329_v29, %v9328_v34  ;;  %v9335_v0 = vld [vmem:[#allocation9_spill] sm:$0xff]  ;;  %vm9337_vm7 = vcmask 1031168   ;;  %v9341_v34 = vld [vmem:[#allocation7_spill] sm:$0xff]  ;;  %v9342_v29 = vld [vmem:[#allocation6_spill] sm:$0xff] }
 0x45f   : > { %4822 = vmatprep.subr.mxu1 %v302_v8  ;;  %3294 = vrot.lane.b32.xlu0 %v7617_v22, %s9167_s30  ;;  %v9336_v8 = vld [vmem:[#allocation10_spill] sm:$0xff]  ;;  %vm9340_vm6 = vmmov %vm9337_vm7 }
 0x460   : > { %4713 = vmatpush2.msra.mxu0 %v2874_v38  ;;  %4823 = vmatpush1.msra.mxu1 %v301_v63  ;;  %v2833_v44 = vpop.permute.xlu1 %2832  ;;  %v236_v51 = vsel %vm9337_vm7, %v9336_v8, %v9335_v0  ;;  %v235_v63 = vsel %vm9340_vm6, %v9339_v40, %v9336_v8  ;;  %vm9347_vm7 = vcmask 220160   ;;  %v9349_v8 = vld [vmem:[#allocation90_spill] sm:$0xff] }
 0x461   : > { %4824 = vmatprep.subr.mxu1 %v269_v18  ;;  %v7879_v48 = vpop.permute.xlu0 %2836  ;;  %v2842_v4 = vsel %vm9334_vm8, %v2833_v44, %v2835_v53  ;;  %v203_v18 = vsel %vm9343_vm4, %v9342_v29, %v9341_v34  ;;  %vm9346_vm8 = vmmov %vm9343_vm4 }
 0x462   : > { %9333 = vst [vmem:[#allocation42_spill] sm:$0xff] %v7879_v48  ;;  %4825 = vmatpush1.msra.mxu1 %v268_v30  ;;  %3008 = vrot.lane.b32.xlu1 %v7640_v25, %s9212_s0  ;;  %v2843_v38 = vsel %vm9338_vm5, %v2835_v53, %v7879_v48  ;;  %v9345_v53 = vld [vmem:[#allocation5_spill] sm:$0xff]  ;;  %vm9350_vm5 = vcmask 449536   ;;  %vm9353_vm4 = vmmov %vm9347_vm7  ;;  %v9391_v48 = vld [vmem:[#allocation71_spill] sm:$0xff] }
 0x463   : > { %4826 = vmatprep.subr.mxu1 %v236_v51  ;;  %3006 = vrot.lane.b32.xlu0 %v7617_v22, %s9212_s0  ;;  %v202_v62 = vsel %vm9346_vm8, %v9345_v53, %v9342_v29  ;;  %vm9352_vm6 = vmmov %vm9350_vm5  ;;  %v9355_v53 = vld [vmem:[#allocation89_spill] sm:$0xff]  ;;  %vm9356_vm8 = vcmask 457728  }
 0x464   : > { %4714 = vmatprep.subr.mxu0 %v2843_v38  ;;  %4827 = vmatpush1.msra.mxu1 %v235_v63  ;;  %v7897_v44 = vpop.permute.xlu1 %2804  ;;  %v9351_v63 = vld [vmem:[#allocation91_spill] sm:$0xff] }
 0x465   : > { %9344 = vst [vmem:[#allocation39_spill] sm:$0xff] %v7897_v44  ;;  %4715 = vmatpush2.msra.mxu0 %v2842_v4  ;;  %4828 = vmatprep.subr.mxu1 %v203_v18  ;;  %v2803_v30 = vpop.permute.xlu0 %2802  ;;  %v9348_v4 = vld [vmem:[#allocation92_spill] sm:$0xff]  ;;  %v1192_v34 = vsel %vm9352_vm6, %v9351_v63, %v9349_v8 }
 0x466   : > { %4829 = vmatpush1.msra.mxu1 %v202_v62  ;;  %3264 = vrot.lane.b32.xlu1 %v7640_v25, %s9168_s5  ;;  %v2811_v0 = vsel %vm9347_vm7, %v2803_v30, %v7897_v44  ;;  %v1193_v51 = vsel %vm9350_vm5, %v9349_v8, %v9348_v4  ;;  %v9354_v18 = vld [vmem:[#allocation88_spill] sm:$0xff]  ;;  %vm9358_vm7 = vmmov %vm9356_vm8  ;;  %v9359_v4 = vld [vmem:[#allocation86_spill] sm:$0xff]  ;;  %vm9361_vm5 = vcmask 465920  }
 0x467   : > { %4830 = vmatprep.subr.mxu1 %v7726_v21  ;;  %3262 = vrot.lane.b32.xlu0 %v7617_v22, %s9168_s5  ;;  %v1160_v62 = vsel %vm9356_vm8, %v9355_v53, %v9354_v18  ;;  %vm9364_vm6 = vmmov %vm9361_vm5  ;;  %vm9368_vm8 = vcmask 474112   ;;  %v9379_v44 = vld [vmem:[#allocation77_spill] sm:$0xff] }
 0x468   : > { %4716 = vmatprep.subr.mxu0 %v2811_v0  ;;  %4831 = vmatpush1.msra.mxu1 %v7732_v35  ;;  %v2771_v38 = vpop.permute.xlu1 %2770  ;;  %v9357_v35 = vld [vmem:[#allocation87_spill] sm:$0xff] }
 0x469   : > { %4832 = vmatprep.subr.mxu1 %v1193_v51  ;;  %v2801_v40 = vpop.permute.xlu0 %2800  ;;  %v1159_v0 = vsel %vm9358_vm7, %v9357_v35, %v9355_v53  ;;  %v9366_v53 = vld [vmem:[#allocation82_spill] sm:$0xff] }
 0x46a   : > { %v2810_v29 = vsel %vm9353_vm4, %v2801_v40, %v2803_v30  ;;  %4833 = vmatpush2.msra.mxu1 %v1192_v34  ;;  %3232 = vrot.lane.b32.xlu1 %v7640_v25, %s9169_s6  ;;  %v9360_v30 = vld [vmem:[#allocation84_spill] sm:$0xff]  ;;  %v7931_v40 = vld [vmem:[%s5303_s17 + $0x20] sm:$0xff]  ;;  %vm9365_vm4 = vcmask 228352  }
 0x46b   : > { %4834 = vmatprep.subr.mxu1 %v1160_v62  ;;  %3230 = vrot.lane.b32.xlu0 %v7617_v22, %s9169_s6  ;;  %v1127_v8 = vsel %vm9361_vm5, %v9360_v30, %v9359_v4  ;;  %v9363_v34 = vld [vmem:[#allocation85_spill] sm:$0xff]  ;;  %vm9369_vm7 = vmmov %vm9365_vm4 }
 0x46c   : > { %4717 = vmatpush2.msra.mxu0 %v2810_v29  ;;  %4835 = vmatpush2.msra.mxu1 %v1159_v0  ;;  %v2769_v51 = vpop.permute.xlu1 %2768  ;;  %v1126_v18 = vsel %vm9364_vm6, %v9363_v34, %v9360_v30  ;;  %v9367_v29 = vld [vmem:[#allocation83_spill] sm:$0xff]  ;;  %v9370_v4 = vld [vmem:[#allocation81_spill] sm:$0xff]  ;;  %vm9371_vm5 = vmmov %vm9368_vm8  ;;  %vm9374_vm6 = vcmask 482304  }
 0x46d   : > { %4836 = vmatprep.subr.mxu1 %v1127_v8  ;;  %v7933_v63 = vpop.permute.xlu0 %2772  ;;  %v2778_v62 = vsel %vm9365_vm4, %v2769_v51, %v2771_v38  ;;  %v1094_v35 = vsel %vm9368_vm8, %v9367_v29, %v9366_v53  ;;  %v1093_v30 = vsel %vm9371_vm5, %v9370_v4, %v9367_v29  ;;  %v9372_v8 = vld [vmem:[#allocation80_spill] sm:$0xff]  ;;  %v9373_v51 = vld [vmem:[#allocation78_spill] sm:$0xff]  ;;  %vm9377_vm4 = vmmov %vm9374_vm6  ;;  %vm9380_vm8 = vcmask 490496  }
 0x46e   : > { %9362 = vst [vmem:[#allocation40_spill] sm:$0xff] %v7933_v63  ;;  %4837 = vmatpush2.msra.mxu1 %v1126_v18  ;;  %2968 = vrot.lane.b32.xlu1 %v7617_v22, %s9213_s3  ;;  %v2779_v0 = vsel %vm9369_vm7, %v2771_v38, %v7933_v63  ;;  %v1061_v34 = vsel %vm9374_vm6, %v9373_v51, %v9372_v8  ;;  %v9376_v38 = vld [vmem:[#allocation79_spill] sm:$0xff]  ;;  %v9378_v63 = vld [vmem:[#allocation76_spill] sm:$0xff]  ;;  %vm9381_vm7 = vcmask 236544   ;;  %vm9383_vm5 = vmmov %vm9380_vm8  ;;  %vm9386_vm6 = vcmask 498688  }
 0x46f   : > { %4838 = vmatprep.subr.mxu1 %v1094_v35  ;;  %2966 = vrot.lane.b32.xlu0 %v7931_v40, %s9213_s3  ;;  %v1060_v35 = vsel %vm9377_vm4, %v9376_v38, %v9373_v51  ;;  %v1028_v29 = vsel %vm9380_vm8, %v9379_v44, %v9378_v63  ;;  %v9385_v8 = vld [vmem:[#allocation72_spill] sm:$0xff]  ;;  %v9387_v38 = vld [vmem:[#allocation73_spill] sm:$0xff]  ;;  %vm9388_vm4 = vmmov %vm9386_vm6 }
 0x470   : > { %4718 = vmatprep.subr.mxu0 %v2779_v0  ;;  %4839 = vmatpush2.msra.mxu1 %v1093_v30  ;;  %v7954_v18 = vpop.permute.xlu1 %2740  ;;  %v9384_v30 = vld [vmem:[#allocation74_spill] sm:$0xff]  ;;  %vm9389_vm8 = vmmov %vm9381_vm7 }
 0x471   : > { %9375 = vst [vmem:[#allocation38_spill] sm:$0xff] %v7954_v18  ;;  %4719 = vmatpush2.msra.mxu0 %v2778_v62  ;;  %4840 = vmatprep.subr.mxu1 %v1061_v34  ;;  %v2739_v53 = vpop.permute.xlu0 %2738  ;;  %v9382_v62 = vld [vmem:[#allocation75_spill] sm:$0xff]  ;;  %v995_v63 = vsel %vm9386_vm6, %v9385_v8, %v9384_v30  ;;  %vm9398_vm6 = vcmask 515072  }
 0x472   : > { %4841 = vmatpush2.msra.mxu1 %v1060_v35  ;;  %4000 = vrot.lane.b32.xlu1 %v7640_v25, %s9135_s27  ;;  %v2747_v0 = vsel %vm9381_vm7, %v2739_v53, %v7954_v18  ;;  %v1027_v4 = vsel %vm9383_vm5, %v9382_v62, %v9379_v44  ;;  %v994_v35 = vsel %vm9388_vm4, %v9387_v38, %v9385_v8  ;;  %v9390_v18 = vld [vmem:[#allocation70_spill] sm:$0xff]  ;;  %vm9392_vm7 = vcmask 506880   ;;  %v9394_v62 = vld [vmem:[#allocation69_spill] sm:$0xff] }
 0x473   : > { %4842 = vmatprep.subr.mxu1 %v1028_v29  ;;  %3998 = vrot.lane.b32.xlu0 %v7617_v22, %s9135_s27  ;;  %v962_v44 = vsel %vm9392_vm7, %v9391_v48, %v9390_v18  ;;  %vm9395_vm5 = vmmov %vm9392_vm7  ;;  %v9397_v18 = vld [vmem:[#allocation66_spill] sm:$0xff]  ;;  %vm9401_vm4 = vcmask 1022976  }
 0x474   : > { %4720 = vmatprep.subr.mxu0 %v2747_v0  ;;  %4843 = vmatpush2.msra.mxu1 %v1027_v4  ;;  %v7974_v51 = vpop.permute.xlu1 %2710  ;;  %v7988_v0 = vld [vmem:[%s8653_s1 + $0x20] sm:$0xff]  ;;  %v9396_v4 = vld [vmem:[#allocation68_spill] sm:$0xff]  ;;  %vm9405_vm7 = vmmov %vm9401_vm4 }
 0x475   : > { %4844 = vmatprep.subr.mxu1 %v995_v63  ;;  %v2737_v34 = vpop.permute.xlu0 %2736  ;;  %9393 = vst [vmem:[#allocation37_spill] sm:$0xff] %v7988_v0  ;;  %v929_v30 = vsel %vm9398_vm6, %v9397_v18, %v9396_v4  ;;  %v9399_v63 = vld [vmem:[#allocation136_spill] sm:$0xff]  ;;  %v9407_v4 = vld [vmem:[#allocation65_spill] sm:$0xff] }
 0x476   : > { %v2746_v29 = vsel %vm9389_vm8, %v2737_v34, %v2739_v53  ;;  %4845 = vmatpush2.msra.mxu1 %v994_v35  ;;  %2936 = vrot.lane.b32.xlu1 %v7617_v22, %s9217_s12  ;;  %v961_v53 = vsel %vm9395_vm5, %v9394_v62, %v9391_v48  ;;  %v9400_v34 = vld [vmem:[#allocation137_spill] sm:$0xff]  ;;  %vm9403_vm8 = vmmov %vm9398_vm6  ;;  %vm9408_vm5 = vcmask 523264   ;;  %vm9411_vm6 = vcmask 1031168  }
 0x477   : > { %4846 = vmatprep.subr.mxu1 %v962_v44  ;;  %2934 = vrot.lane.b32.xlu0 %v7931_v40, %s9217_s12  ;;  %v1693_v38 = vsel %vm9401_vm4, %v9400_v34, %v9399_v63  ;;  %v9402_v44 = vld [vmem:[#allocation67_spill] sm:$0xff]  ;;  %v9410_v63 = vld [vmem:[#allocation132_spill] sm:$0xff]  ;;  %vm9413_vm4 = vmmov %vm9408_vm5  ;;  %s9699_s12 = sld [smem:[#allocation4_spill]] }
 0x478   : > { %4721 = vmatpush2.msra.mxu0 %v2746_v29  ;;  %4847 = vmatpush2.msra.mxu1 %v961_v53  ;;  %v7998_v8 = vpop.permute.xlu1 %2678  ;;  %v928_v48 = vsel %vm9403_vm8, %v9402_v44, %v9397_v18  ;;  %v9404_v29 = vld [vmem:[#allocation135_spill] sm:$0xff]  ;;  %v9406_v53 = vld [vmem:[#allocation64_spill] sm:$0xff]  ;;  %vm9415_vm8 = vmmov %vm9411_vm6 }
 0x479   : > { %4723 = vmatmul.mubr.f32.vlgmr.msra.gmra.mxu0 %v7988_v0  ;;  %4848 = vmatprep.subr.mxu1 %v929_v30  ;;  %v8004_v35 = vpop.permute.xlu0 %2712  ;;  %v1692_v62 = vsel %vm9405_vm7, %v9404_v29, %v9400_v34  ;;  %v896_v30 = vsel %vm9408_vm5, %v9407_v4, %v9406_v53  ;;  %v9409_v0 = vld [vmem:[#allocation134_spill] sm:$0xff]  ;;  %v9412_v18 = vld [vmem:[#allocation63_spill] sm:$0xff]  ;;  %v9414_v34 = vld [vmem:[#allocation133_spill] sm:$0xff]  ;;  %vm9418_vm7 = vcmask 703488   ;;  %vm9421_vm5 = vcmask 1039360  }
 0x47a   : > { %4871 = vmatprep.subr.mxu0 %v1693_v38  ;;  %4849 = vmatpush2.msra.mxu1 %v928_v48  ;;  %v1661_v6 = vsel %vm9411_vm6, %v9410_v63, %v9409_v0  ;;  %v895_v38 = vsel %vm9413_vm4, %v9412_v18, %v9407_v4  ;;  %v1660_v48 = vsel %vm9415_vm8, %v9414_v34, %v9410_v63  ;;  %v9416_v29 = vld [vmem:[#allocation62_spill] sm:$0xff]  ;;  %v9417_v0 = vld [vmem:[#allocation60_spill] sm:$0xff]  ;;  %v9420_v4 = vld [vmem:[#allocation131_spill] sm:$0xff]  ;;  %vm9428_vm8 = vcmask 711680  }
 0x47b   : > { %4872 = vmatpush1.msra.mxu0 %v1692_v62  ;;  %4850 = vmatprep.subr.mxu1 %v896_v30  ;;  %v9419_v53 = vld [vmem:[#allocation130_spill] sm:$0xff]  ;;  %v9422_v18 = vld [vmem:[#allocation61_spill] sm:$0xff]  ;;  %vm9423_vm6 = vmmov %vm9418_vm7 }
 0x47c   : > { %4873 = vmatprep.subr.mxu0 %v1661_v6  ;;  %3968 = vrot.lane.b32.xlu1 %v7640_v25, %s9131_s24  ;;  %v8023_v44 = vpop.permute.xlu1 %2646  ;;  %v863_v6 = vsel %vm9418_vm7, %v9417_v0, %v9416_v29  ;;  %v1629_v30 = vsel %vm9421_vm5, %v9420_v4, %v9419_v53  ;;  %v9424_v63 = vld [vmem:[#allocation129_spill] sm:$0xff]  ;;  %vm9425_vm4 = vmmov %vm9421_vm5  ;;  %v9427_v29 = vld [vmem:[#allocation59_spill] sm:$0xff]  ;;  %vm9435_vm5 = vcmask 179200  }
 0x47d   : > { %3966 = vrot.lane.b32.xlu0 %v7617_v22, %s9131_s24  ;;  %4851 = vmatpush2.msra.mxu1 %v895_v38  ;;  %v8033_v62 = vpop.permute.xlu0 %2680  ;;  %v862_v38 = vsel %vm9423_vm6, %v9422_v18, %v9417_v0  ;;  %v1628_v34 = vsel %vm9425_vm4, %v9424_v63, %v9420_v4  ;;  %v830_v28 = vsel %vm9428_vm8, %v9427_v29, %v9426_v23  ;;  %v9429_v0 = vld [vmem:[#allocation57_spill] sm:$0xff]  ;;  %vm9430_vm7 = vmmov %vm9428_vm8  ;;  %v9431_v23 = vld [vmem:[#allocation56_spill] sm:$0xff]  ;;  %vm9443_vm4 = vcmask 187392   ;;  %s5155_s28 = sshll.u32 %s9699_s12, 5 }
 0x47e   : > { %4874 = vmatpush1.msra.mxu0 %v1660_v48  ;;  %4852 = vmatprep.subr.mxu1 %v863_v6  ;;  %v829_v6 = vsel %vm9430_vm7, %v9429_v0, %v9427_v29  ;;  %v9432_v4 = vld [vmem:[#allocation54_spill] sm:$0xff]  ;;  %v9436_v63 = vld [vmem:[#allocation55_spill] sm:$0xff]  ;;  %vm9438_vm6 = vmmov %vm9435_vm5  ;;  %vm9451_vm7 = vcmask 195584   ;;  %s170_s29 = scalar_lea.vmem %s9700_s26, %s5155_s28 }
 0x47f   : > { %4875 = vmatprep.subr.mxu0 %v1629_v30  ;;  %4853 = vmatpush2.msra.mxu1 %v862_v38  ;;  %v9433_v30 = vld [vmem:[#allocation128_spill] sm:$0xff]  ;;  %v9434_v18 = vld [vmem:[#allocation126_spill] sm:$0xff]  ;;  %v9437_v29 = vld [vmem:[#allocation127_spill] sm:$0xff] }
 0x480   : > { %4876 = vmatpush1.msra.mxu0 %v1628_v34  ;;  %4854 = vmatprep.subr.mxu1 %v830_v28  ;;  %v8047_v48 = vpop.permute.xlu1 %2616  ;;  %v797_v28 = vsel %vm793_vm11, %v9432_v4, %v9431_v23  ;;  %v1589_v38 = vsel %vm9435_vm5, %v9434_v18, %v9433_v30  ;;  %v796_v34 = vsel %vm793_vm11, %v9436_v63, %v9432_v4  ;;  %v9442_v30 = vld [vmem:[#allocation125_spill] sm:$0xff]  ;;  %v9444_v4 = vld [vmem:[#allocation51_spill] sm:$0xff]  ;;  %vm9446_vm8 = vmmov %vm9443_vm4 }
 0x481   : > { %4877 = vmatprep.subr.mxu0 %v7931_v40  ;;  %2904 = vrot.lane.b32.xlu1 %v7617_v22, %s9220_s13  ;;  %v8055_v53 = vpop.permute.xlu0 %2648  ;;  %v1588_v0 = vsel %vm9438_vm6, %v9437_v29, %v9434_v18  ;;  %v763_v18 = vsel %vm760_vm15, %v9444_v4, %v9440_v9  ;;  %v9448_v29 = vld [vmem:[#allocation48_spill] sm:$0xff]  ;;  %vm9454_vm5 = vmmov %vm9451_vm7  ;;  %vm9459_vm6 = vcmask 203776  }
 0x482   : > { %2902 = vrot.lane.b32.xlu0 %v7931_v40, %s9220_s13  ;;  %4855 = vmatpush2.msra.mxu1 %v829_v6  ;;  %v9439_v6 = vld [vmem:[#allocation52_spill] sm:$0xff] }
 0x483   : > { %4878 = vmatpush1.msra.mxu0 %v7726_v21  ;;  %4856 = vmatprep.subr.mxu1 %v797_v28  ;;  %v764_v23 = vsel %vm760_vm15, %v9440_v9, %v9439_v6  ;;  %v9441_v28 = vld [vmem:[#allocation124_spill] sm:$0xff]  ;;  %v9452_v9 = vld [vmem:[#allocation49_spill] sm:$0xff] }
 0x484   : > { %4879 = vmatprep.subr.mxu0 %v1589_v38  ;;  %4857 = vmatpush2.msra.mxu1 %v796_v34  ;;  %v8075_v21 = vpop.permute.xlu1 %3712  ;;  %v1556_v33 = vsel %vm9443_vm4, %v9442_v30, %v9441_v28  ;;  %v9445_v38 = vld [vmem:[#allocation123_spill] sm:$0xff]  ;;  %v9447_v34 = vld [vmem:[#allocation50_spill] sm:$0xff]  ;;  %v9450_v6 = vld [vmem:[#allocation120_spill] sm:$0xff]  ;;  %v730_v28 = vsel %vm727_vm9, %v9452_v9, %v9448_v29 }
 0x485   : > { %4880 = vmatpush1.msra.mxu0 %v1588_v0  ;;  %4858 = vmatprep.subr.mxu1 %v764_v23  ;;  %v8080_v49 = vpop.permute.xlu0 %3710  ;;  %v1555_v63 = vsel %vm9446_vm8, %v9445_v38, %v9442_v30  ;;  %v731_v0 = vsel %vm727_vm9, %v9448_v29, %v9447_v34  ;;  %v9453_v30 = vld [vmem:[#allocation121_spill] sm:$0xff]  ;;  %v9455_v38 = vld [vmem:[#allocation46_spill] sm:$0xff]  ;;  %v9456_v34 = vld [vmem:[#allocation47_spill] sm:$0xff]  ;;  %vm9465_vm8 = vcmask 211968  }
 0x486   : > { %4881 = vmatprep.subr.mxu0 %v1556_v33  ;;  %3936 = vrot.lane.b32.xlu1 %v7640_v25, %s9128_s23  ;;  %v9449_v33 = vld [vmem:[#allocation122_spill] sm:$0xff]  ;;  %v9461_v9 = vld [vmem:[#allocation117_spill] sm:$0xff]  ;;  %vm9462_vm4 = vmmov %vm9459_vm6 }
 0x487   : > { %3934 = vrot.lane.b32.xlu0 %v7617_v22, %s9128_s23  ;;  %4859 = vmatpush2.msra.mxu1 %v763_v18  ;;  %v1523_v23 = vsel %vm9451_vm7, %v9450_v6, %v9449_v33  ;;  %v1522_v18 = vsel %vm9454_vm5, %v9453_v30, %v9450_v6  ;;  %v9457_v33 = vld [vmem:[#allocation118_spill] sm:$0xff]  ;;  %v2717_v30 = vsel %vm1321_vm14, %v7974_v51, %v8004_v35  ;;  %v9466_v35 = vld [vmem:[#allocation115_spill] sm:$0xff]  ;;  %vm9467_vm7 = vmmov %vm9465_vm8  ;;  %vm9470_vm5 = vcmask 220160   ;;  %s9593_s23 = smov 62  }
 0x488   : > { %4882 = vmatpush1.msra.mxu0 %v1555_v63  ;;  %4860 = vmatprep.subr.mxu1 %v731_v0  ;;  %v8101_v4 = vpop.permute.xlu1 %3680  ;;  %v698_v63 = vsel %vm694_vm10, %v9456_v34, %v9455_v38  ;;  %v1490_v29 = vsel %vm9459_vm6, %v9458_v55, %v9457_v33  ;;  %v9463_v38 = vld [vmem:[#allocation116_spill] sm:$0xff]  ;;  %vm9472_vm6 = vmmov %vm9470_vm5 }
 0x489   : > { %4883 = vmatprep.subr.mxu0 %v1523_v23  ;;  %4861 = vmatpush2.msra.mxu1 %v730_v28  ;;  %v8109_v0 = vpop.permute.xlu0 %3678  ;;  %v9460_v23 = vld [vmem:[#allocation45_spill] sm:$0xff]  ;;  %v1489_v28 = vsel %vm9462_vm4, %v9461_v9, %v9458_v55  ;;  %vm9475_vm4 = vcmask 228352  }
 0x48a   : > { %4884 = vmatpush1.msra.mxu0 %v1522_v18  ;;  %4862 = vmatprep.subr.mxu1 %v698_v63  ;;  %v697_v6 = vsel %vm694_vm10, %v9460_v23, %v9456_v34  ;;  %v9464_v63 = vld [vmem:[#allocation114_spill] sm:$0xff]  ;;  %v5211_v55 = vld [vmem:[%s8653_s1] sm:$0xff] }
 0x48b   : > { %4885 = vmatprep.subr.mxu0 %v1490_v29  ;;  %2872 = vrot.lane.b32.xlu1 %v7617_v22, %s9225_s2  ;;  %v1457_v33 = vsel %vm9465_vm8, %v9464_v63, %v9463_v38  ;;  %v2716_v29 = vsel %vm1321_vm14, %v7275_v1, %v7974_v51  ;;  %v1456_v23 = vsel %vm9467_vm7, %v9466_v35, %v9464_v63  ;;  %v9469_v9 = vld [vmem:[#allocation113_spill] sm:$0xff]  ;;  %v9471_v38 = vld [vmem:[#allocation111_spill] sm:$0xff]  ;;  %vm9476_vm8 = vcmask 261120  }
 0x48c   : > { %2870 = vrot.lane.b32.xlu0 %v7931_v40, %s9225_s2  ;;  %4863 = vmatpush2.msra.mxu1 %v697_v6  ;;  %v8127_v18 = vpop.permute.xlu1 %3648  ;;  %v9468_v6 = vld [vmem:[#allocation112_spill] sm:$0xff]  ;;  %v2685_v1 = vsel %vm1288_vm13, %v7998_v8, %v8033_v62  ;;  %v1423_v63 = vsel %vm9472_vm6, %v9471_v38, %v9469_v9  ;;  %v9473_v62 = vld [vmem:[#allocation110_spill] sm:$0xff]  ;;  %vm9477_vm7 = vmmov %vm9476_vm8  ;;  %vm9482_vm6 = vcmask 236544  }
 0x48d   : > { %4886 = vmatpush1.msra.mxu0 %v1489_v28  ;;  %4942 = vmatprep.subr.mxu1 %v2717_v30  ;;  %v8132_v34 = vpop.permute.xlu0 %3646  ;;  %v1424_v28 = vsel %vm9470_vm5, %v9469_v9, %v9468_v6  ;;  %v2684_v30 = vsel %vm1288_vm13, %v7297_v32, %v7998_v8  ;;  %v2653_v32 = vsel %vm9476_vm8, %v8023_v44, %v8055_v53  ;;  %v9478_v35 = vld [vmem:[#allocation109_spill] sm:$0xff]  ;;  %vm9479_vm5 = vmmov %vm9475_vm4  ;;  %v9480_v6 = vld [vmem:[#allocation106_spill] sm:$0xff]  ;;  %vm9487_vm8 = vcmask 449536  }
 0x48e   : > { %4887 = vmatprep.subr.mxu0 %v1457_v33  ;;  %4865 = vmatmul.mubr.f32.vlgmr.msra.gmra.mxu1 %v5211_v55  ;;  %v2652_v8 = vsel %vm9477_vm7, %v7319_v60, %v8023_v44  ;;  %v9481_v9 = vld [vmem:[#allocation107_spill] sm:$0xff]  ;;  %v2621_v53 = vsel %vm1222_vm12, %v7254_v59, %v8047_v48  ;;  %v9483_v44 = vld [vmem:[#allocation105_spill] sm:$0xff]  ;;  %v2620_v48 = vsel %vm1222_vm12, %v7256_v2, %v7254_v59  ;;  %v9485_v38 = vld [vmem:[#allocation104_spill] sm:$0xff] }
 0x48f   : > { %4888 = vmatpush1.msra.mxu0 %v1456_v23  ;;  %4943 = vmatpush1.msra.mxu1 %v2716_v29  ;;  %v9474_v29 = vld [vmem:[#allocation108_spill] sm:$0xff]  ;;  %vm9489_vm7 = vmmov %vm9487_vm8 }
 0x490   : > { %4889 = vmatprep.subr.mxu0 %v1424_v28  ;;  %4944 = vmatprep.subr.mxu1 %v2685_v1  ;;  %v8149_v51 = vpop.permute.xlu1 %3616  ;;  %v1391_v55 = vsel %vm9475_vm4, %v9474_v29, %v9473_v62  ;;  %v1390_v23 = vsel %vm9479_vm5, %v9478_v35, %v9474_v29  ;;  %v1358_v28 = vsel %vm9482_vm6, %v9481_v9, %v9480_v6  ;;  %vm9484_vm4 = vmmov %vm9482_vm6  ;;  %v9491_v35 = vld [vmem:[#allocation101_spill] sm:$0xff]  ;;  %vm9492_vm5 = vcmask 457728  }
 0x491   : > { %3904 = vrot.lane.b32.xlu1 %v7640_v25, %s9123_s22  ;;  %3902 = vrot.lane.b32.xlu0 %v7617_v22, %s9123_s22  ;;  %v8161_v33 = vpop.permute.xlu0 %3614  ;;  %v2589_v29 = vsel %vm9487_vm8, %v7237_v36, %v7232_v37  ;;  %v2588_v2 = vsel %vm9489_vm7, %v7221_v16, %v7237_v36  ;;  %v2557_v37 = vsel %vm9492_vm5, %v7205_v7, %v7215_v61  ;;  %s9493_s22 = smov 58   ;;  %v9494_v16 = vld [vmem:[#allocation99_spill] sm:$0xff]  ;;  %v9496_v61 = vld [vmem:[#allocation98_spill] sm:$0xff]  ;;  %vm9498_vm6 = vcmask 261120  }
 0x492   : > { %4890 = vmatpush1.msra.mxu0 %v1423_v63  ;;  %4945 = vmatpush1.msra.mxu1 %v2684_v30  ;;  %v1357_v30 = vsel %vm9484_vm4, %v9483_v44, %v9481_v9  ;;  %v9486_v63 = vld [vmem:[#allocation102_spill] sm:$0xff]  ;;  %v1291_v36 = vsel %vm1288_vm13, %v9494_v16, %v9491_v35  ;;  %v9499_v44 = vld [vmem:[#allocation204_spill] sm:$0xff]  ;;  %vm9500_vm4 = vcmask 465920   ;;  %vm9508_vm7 = vcmask 474112  }
 0x493   : > { %4891 = vmatprep.subr.mxu0 %v1391_v55  ;;  %4946 = vmatprep.subr.mxu1 %v2653_v32  ;;  %v1325_v62 = vsel %vm1321_vm14, %v9486_v63, %v9485_v38  ;;  %v9488_v55 = vld [vmem:[#allocation103_spill] sm:$0xff]  ;;  %vm9503_vm8 = vmmov %vm9500_vm4 }
 0x494   : > { %4892 = vmatpush1.msra.mxu0 %v1390_v23  ;;  %4947 = vmatpush1.msra.mxu1 %v2652_v8  ;;  %v8181_v1 = vpop.permute.xlu1 %3584  ;;  %v1324_v32 = vsel %vm1321_vm14, %v9488_v55, %v9486_v63  ;;  %v9490_v8 = vld [vmem:[#allocation100_spill] sm:$0xff]  ;;  %vm9495_vm14 = vmmov %vm9492_vm5  ;;  %v9504_v63 = vld [vmem:[#allocation94_spill] sm:$0xff] }
 0x495   : > { %4893 = vmatprep.subr.mxu0 %v1358_v28  ;;  %4948 = vmatprep.subr.mxu1 %v2621_v53  ;;  %v8183_v60 = vpop.permute.xlu0 %3582  ;;  %v1292_v23 = vsel %vm1288_vm13, %v9491_v35, %v9490_v8  ;;  %v2556_v9 = vsel %vm9495_vm14, %v7207_v17, %v7205_v7  ;;  %v9497_v28 = vld [vmem:[#allocation96_spill] sm:$0xff]  ;;  %vm9502_vm13 = vmmov %vm9498_vm6  ;;  %v2524_v7 = vsel %vm9503_vm8, %v7181_v42, %v9499_v44  ;;  %v8242_v17 = vld [vmem:[%s5303_s17 + $0x28] sm:$0xff]  ;;  %vm9515_vm14 = vcmask 482304  }
 0x496   : > { %2840 = vrot.lane.b32.xlu1 %v7617_v22, %s9227_s16  ;;  %2838 = vrot.lane.b32.xlu0 %v7931_v40, %s9227_s16  ;;  %v1259_v53 = vsel %vm9498_vm6, %v9497_v28, %v9496_v61  ;;  %v9507_v55 = vld [vmem:[#allocation202_spill] sm:$0xff]  ;;  %v9509_v42 = vld [vmem:[#allocation93_spill] sm:$0xff]  ;;  %vm9510_vm5 = vmmov %vm9508_vm7  ;;  %vm9530_vm8 = vcmask 498688  }
 0x497   : > { %4894 = vmatpush1.msra.mxu0 %v1357_v30  ;;  %4949 = vmatpush1.msra.mxu1 %v2620_v48  ;;  %v2492_v8 = vsel %vm9510_vm5, %v7167_v54, %v9507_v55  ;;  %vm9517_vm6 = vmmov %vm9515_vm14  ;;  %vm9537_vm5 = vcmask 506880  }
 0x498   : > { %4895 = vmatprep.subr.mxu0 %v1325_v62  ;;  %4950 = vmatprep.subr.mxu1 %v2589_v29  ;;  %v8207_v59 = vpop.permute.xlu1 %3552  ;;  %v9506_v29 = vld [vmem:[#allocation203_spill] sm:$0xff] }
 0x499   : > { %4896 = vmatpush1.msra.mxu0 %v1324_v32  ;;  %4951 = vmatpush1.msra.mxu1 %v2588_v2  ;;  %v8215_v6 = vpop.permute.xlu0 %3550  ;;  %v2493_v32 = vsel %vm9508_vm7, %v9507_v55, %v9506_v29  ;;  %vm9532_vm7 = vmmov %vm9530_vm8 }
 0x49a   : > { %4897 = vmatprep.subr.mxu0 %v1292_v23  ;;  %4952 = vmatprep.subr.mxu1 %v2557_v37  ;;  %v9511_v23 = vld [vmem:[#allocation184_spill] sm:$0xff]  ;;  %v9512_v37 = vld [vmem:[#allocation185_spill] sm:$0xff] }
 0x49b   : > { %3872 = vrot.lane.b32.xlu1 %v7640_v25, %s9493_s22  ;;  %3870 = vrot.lane.b32.xlu0 %v7617_v22, %s9493_s22  ;;  %v2525_v25 = vsel %vm9500_vm4, %v9499_v44, %v7189_v43  ;;  %v9501_v22 = vld [vmem:[#allocation97_spill] sm:$0xff]  ;;  %v9505_v43 = vld [vmem:[#allocation95_spill] sm:$0xff]  ;;  %v2205_v16 = vsel %vm793_vm11, %v9512_v37, %v9511_v23  ;;  %vm9522_vm4 = vcmask 490496  }
 0x49c   : > { %4898 = vmatpush1.msra.mxu0 %v1291_v36  ;;  %4953 = vmatpush1.msra.mxu1 %v2556_v9  ;;  %v8233_v30 = vpop.permute.xlu1 %3520  ;;  %v1258_v48 = vsel %vm9502_vm13, %v9501_v22, %v9497_v28  ;;  %v1226_v62 = vsel %vm1222_vm12, %v9505_v43, %v9504_v63  ;;  %v1225_v2 = vsel %vm1222_vm12, %v9509_v42, %v9505_v43  ;;  %v9513_v36 = vld [vmem:[#allocation200_spill] sm:$0xff]  ;;  %v9514_v9 = vld [vmem:[#allocation201_spill] sm:$0xff]  ;;  %v9518_v22 = vld [vmem:[#allocation182_spill] sm:$0xff] }
 0x49d   : > { %4899 = vmatprep.subr.mxu0 %v1259_v53  ;;  %4954 = vmatprep.subr.mxu1 %v2525_v25  ;;  %v8244_v38 = vpop.permute.xlu0 %3518  ;;  %v2461_v61 = vsel %vm9515_vm14, %v9514_v9, %v9513_v36  ;;  %v9516_v53 = vld [vmem:[#allocation183_spill] sm:$0xff]  ;;  %v2460_v44 = vsel %vm9517_vm6, %v7141_v26, %v9514_v9  ;;  %v9521_v43 = vld [vmem:[#allocation198_spill] sm:$0xff]  ;;  %v9524_v26 = vld [vmem:[#allocation181_spill] sm:$0xff]  ;;  %vm9544_vm6 = vcmask 515072  }
 0x49e   : > { %4900 = vmatpush1.msra.mxu0 %v1258_v48  ;;  %4955 = vmatpush1.msra.mxu1 %v2524_v7  ;;  %v2204_v54 = vsel %vm793_vm11, %v9516_v53, %v9512_v37  ;;  %v8279_v25 = vld [vmem:[%s5303_s17 + $0x30] sm:$0xff]  ;;  %v9519_v48 = vld [vmem:[#allocation180_spill] sm:$0xff]  ;;  %vm9525_vm13 = vmmov %vm9522_vm4  ;;  %s9552_s17 = smov 60  }
 0x49f   : > { %4901 = vmatprep.subr.mxu0 %v1226_v62  ;;  %4956 = vmatprep.subr.mxu1 %v2493_v32  ;;  %v2173_v7 = vsel %vm760_vm15, %v9519_v48, %v9518_v22  ;;  %v9520_v63 = vld [vmem:[#allocation199_spill] sm:$0xff]  ;;  %v2172_v55 = vsel %vm760_vm15, %v9524_v26, %v9519_v48  ;;  %v2428_v32 = vsel %vm9525_vm13, %v7127_v20, %v9521_v43  ;;  %v9528_v37 = vld [vmem:[#allocation196_spill] sm:$0xff]  ;;  %v9531_v9 = vld [vmem:[#allocation177_spill] sm:$0xff]  ;;  %vm9551_vm13 = vcmask 523264  }
 0x4a0   : > { %2808 = vrot.lane.b32.xlu1 %v8242_v17, %s9230_s18  ;;  %2806 = vrot.lane.b32.xlu0 %v7931_v40, %s9230_s18  ;;  %v8262_v35 = vpop.permute.xlu1 %3488  ;;  %v2429_v62 = vsel %vm9522_vm4, %v9521_v43, %v9520_v63  ;;  %s9523_s18 = smov 59   ;;  %v9533_v53 = vld [vmem:[#allocation176_spill] sm:$0xff]  ;;  %v9535_v22 = vld [vmem:[#allocation195_spill] sm:$0xff]  ;;  %v9536_v48 = vld [vmem:[#allocation194_spill] sm:$0xff] }
 0x4a1   : > { %4902 = vmatpush1.msra.mxu0 %v1225_v2  ;;  %4957 = vmatpush1.msra.mxu1 %v2492_v8  ;;  %v8270_v28 = vpop.permute.xlu0 %3486  ;;  %v9526_v2 = vld [vmem:[#allocation178_spill] sm:$0xff]  ;;  %v9527_v8 = vld [vmem:[#allocation179_spill] sm:$0xff]  ;;  %vm9539_vm14 = vmmov %vm9537_vm5 }
 0x4a2   : > { %4903 = vmatprep.subr.mxu0 %v2205_v16  ;;  %4958 = vmatprep.subr.mxu1 %v2461_v61  ;;  %v2141_v23 = vsel %vm727_vm9, %v9527_v8, %v9526_v2  ;;  %v9529_v16 = vld [vmem:[#allocation197_spill] sm:$0xff]  ;;  %v2140_v61 = vsel %vm727_vm9, %v9531_v9, %v9527_v8  ;;  %v2364_v26 = vsel %vm9539_vm14, %v7087_v3, %v9536_v48  ;;  %v9542_v8 = vld [vmem:[#allocation192_spill] sm:$0xff]  ;;  %vm9546_vm4 = vmmov %vm9544_vm6  ;;  %vm9566_vm14 = vcmask 711680  }
 0x4a3   : > { %4904 = vmatpush2.msra.mxu0 %v2204_v54  ;;  %4959 = vmatpush1.msra.mxu1 %v2460_v44  ;;  %v2397_v36 = vsel %vm9530_vm8, %v9529_v16, %v9528_v37  ;;  %v2396_v20 = vsel %vm9532_vm7, %v7101_v57, %v9529_v16  ;;  %v9534_v54 = vld [vmem:[#allocation174_spill] sm:$0xff]  ;;  %v9538_v57 = vld [vmem:[#allocation175_spill] sm:$0xff]  ;;  %vm9554_vm8 = vmmov %vm9551_vm13  ;;  %vm9559_vm7 = vcmask 703488  }
 0x4a4   : > { %4905 = vmatprep.subr.mxu0 %v2173_v7  ;;  %4960 = vmatprep.subr.mxu1 %v2429_v62  ;;  %v8287_v29 = vpop.permute.xlu1 %3200  ;;  %v2109_v44 = vsel %vm694_vm10, %v9534_v54, %v9533_v53  ;;  %v2365_v7 = vsel %vm9537_vm5, %v9536_v48, %v9535_v22  ;;  %v2108_v62 = vsel %vm694_vm10, %v9538_v57, %v9534_v54  ;;  %v9545_v16 = vld [vmem:[#allocation171_spill] sm:$0xff]  ;;  %vm9561_vm5 = vmmov %vm9559_vm7 }
 0x4a5   : > { %3840 = vrot.lane.b32.xlu1 %v8279_v25, %s9523_s18  ;;  %3838 = vrot.lane.b32.xlu0 %v8242_v17, %s9523_s18  ;;  %v8299_v42 = vpop.permute.xlu0 %3198  ;;  %v9549_v54 = vld [vmem:[#allocation191_spill] sm:$0xff] }
 0x4a6   : > { %4906 = vmatpush2.msra.mxu0 %v2172_v55  ;;  %4961 = vmatpush1.msra.mxu1 %v2428_v32  ;;  %v9540_v55 = vld [vmem:[#allocation172_spill] sm:$0xff]  ;;  %v9541_v32 = vld [vmem:[#allocation173_spill] sm:$0xff] }
 0x4a7   : > { %4907 = vmatprep.subr.mxu0 %v2141_v23  ;;  %4962 = vmatprep.subr.mxu1 %v2397_v36  ;;  %v2077_v2 = vsel %vm661_vm0, %v9541_v32, %v9540_v55  ;;  %v9543_v23 = vld [vmem:[#allocation193_spill] sm:$0xff]  ;;  %v2076_v36 = vsel %vm661_vm0, %v9545_v16, %v9541_v32  ;;  %v9557_v32 = vld [vmem:[#allocation188_spill] sm:$0xff] }
 0x4a8   : > { %4908 = vmatpush2.msra.mxu0 %v2140_v61  ;;  %4963 = vmatpush1.msra.mxu1 %v2396_v20  ;;  %v8319_v63 = vpop.permute.xlu1 %3456  ;;  %v2333_v37 = vsel %vm9544_vm6, %v9543_v23, %v9542_v8  ;;  %v2332_v3 = vsel %vm9546_vm4, %v7061_v39, %v9543_v23  ;;  %v9547_v61 = vld [vmem:[#allocation170_spill] sm:$0xff]  ;;  %v9548_v20 = vld [vmem:[#allocation168_spill] sm:$0xff]  ;;  %v9553_v39 = vld [vmem:[#allocation169_spill] sm:$0xff]  ;;  %vm9567_vm6 = vcmask 990208  }
 0x4a9   : > { %4909 = vmatprep.subr.mxu0 %v2109_v44  ;;  %4964 = vmatprep.subr.mxu1 %v2365_v7  ;;  %v8321_v43 = vpop.permute.xlu0 %3454  ;;  %v2045_v53 = vsel %vm628_vm1, %v9548_v20, %v9547_v61  ;;  %v9550_v44 = vld [vmem:[#allocation190_spill] sm:$0xff]  ;;  %v2044_v7 = vsel %vm628_vm1, %v9553_v39, %v9548_v20  ;;  %vm9569_vm4 = vmmov %vm9566_vm14 }
 0x4aa   : > { %2776 = vrot.lane.b32.xlu1 %v8242_v17, %s9233_s19  ;;  %2774 = vrot.lane.b32.xlu0 %v7931_v40, %s9233_s19  ;;  %v2301_v22 = vsel %vm9551_vm13, %v9550_v44, %v9549_v54  ;;  %v2300_v57 = vsel %vm9554_vm8, %v7044_v27, %v9550_v44  ;;  %v9563_v61 = vld [vmem:[#allocation162_spill] sm:$0xff]  ;;  %vm9572_vm13 = vcmask 785408   ;;  %vm9573_vm8 = vmmov %vm9567_vm6  ;;  %s9580_s19 = smov 61  }
 0x4ab   : > { %4910 = vmatpush2.msra.mxu0 %v2108_v62  ;;  %4965 = vmatpush1.msra.mxu1 %v2364_v26  ;;  %v9555_v62 = vld [vmem:[#allocation166_spill] sm:$0xff]  ;;  %v9556_v26 = vld [vmem:[#allocation167_spill] sm:$0xff] }
 0x4ac   : > { %4911 = vmatprep.subr.mxu0 %v2077_v2  ;;  %4966 = vmatprep.subr.mxu1 %v2333_v37  ;;  %v3169_v9 = vpop.permute.xlu1 %3168  ;;  %v2013_v55 = vsel %vm595_vm2, %v9556_v26, %v9555_v62  ;;  %v9558_v2 = vld [vmem:[#allocation189_spill] sm:$0xff]  ;;  %v9565_v54 = vld [vmem:[#allocation186_spill] sm:$0xff]  ;;  %v9570_v62 = vld [vmem:[#allocation160_spill] sm:$0xff] }
 0x4ad   : > { %4912 = vmatpush2.msra.mxu0 %v2076_v36  ;;  %4967 = vmatpush1.msra.mxu1 %v2332_v3  ;;  %v3167_v48 = vpop.permute.xlu0 %3166  ;;  %v2269_v8 = vsel %vm9559_vm7, %v9558_v2, %v9557_v32  ;;  %v9560_v37 = vld [vmem:[#allocation165_spill] sm:$0xff]  ;;  %v2268_v27 = vsel %vm9561_vm5, %v6970_v58, %v9558_v2  ;;  %v9562_v3 = vld [vmem:[#allocation164_spill] sm:$0xff]  ;;  %v9568_v58 = vld [vmem:[#allocation163_spill] sm:$0xff]  ;;  %v3204_v32 = vsel %vm9573_vm8, %v7567_v52, %v8299_v42  ;;  %vm9578_vm5 = vcmask 965632  }
 0x4ae   : > { %4913 = vmatprep.subr.mxu0 %v2045_v53  ;;  %4968 = vmatprep.subr.mxu1 %v2301_v22  ;;  %v2012_v16 = vsel %vm595_vm2, %v9560_v37, %v9556_v26  ;;  %v1981_v20 = vsel %vm562_vm3, %v9563_v61, %v9562_v3  ;;  %v9564_v53 = vld [vmem:[#allocation187_spill] sm:$0xff]  ;;  %v3205_v22 = vsel %vm9567_vm6, %v8299_v42, %v8287_v29  ;;  %v9571_v26 = vld [vmem:[#allocation161_spill] sm:$0xff]  ;;  %vm9575_vm7 = vmmov %vm9572_vm13 }
 0x4af   : > { %3808 = vrot.lane.b32.xlu1 %v8279_v25, %s9552_s17  ;;  %3806 = vrot.lane.b32.xlu0 %v8242_v17, %s9552_s17  ;;  %v2237_v44 = vsel %vm9566_vm14, %v9565_v54, %v9564_v53  ;;  %v1980_v39 = vsel %vm562_vm3, %v9568_v58, %v9563_v61  ;;  %v1949_v29 = vsel %vm9572_vm13, %v9571_v26, %v9570_v62  ;;  %v9574_v2 = vld [vmem:[#allocation159_spill] sm:$0xff]  ;;  %v9577_v37 = vld [vmem:[#allocation156_spill] sm:$0xff]  ;;  %vm9579_vm14 = vcmask 998400   ;;  %v9581_v52 = vld [vmem:[#allocation157_spill] sm:$0xff] }
 0x4b0   : > { %4914 = vmatpush2.msra.mxu0 %v2044_v7  ;;  %4969 = vmatpush1.msra.mxu1 %v2300_v57  ;;  %v8367_v23 = vpop.permute.xlu1 %3424  ;;  %v2236_v7 = vsel %vm9569_vm4, %v6932_v41, %v9565_v54  ;;  %v9576_v41 = vld [vmem:[#allocation158_spill] sm:$0xff]  ;;  %vm9582_vm6 = vmmov %vm9578_vm5  ;;  %v9585_v53 = vld [vmem:[#allocation155_spill] sm:$0xff]  ;;  %vm9586_vm13 = vcmask 973824  }
 0x4b1   : > { %4915 = vmatprep.subr.mxu0 %v2013_v55  ;;  %4970 = vmatprep.subr.mxu1 %v2269_v8  ;;  %v8375_v36 = vpop.permute.xlu0 %3422  ;;  %v1948_v8 = vsel %vm9575_vm7, %v9574_v2, %v9571_v26  ;;  %v1916_v42 = vsel %vm9582_vm6, %v9581_v52, %v9577_v37  ;;  %vm9583_vm4 = vmmov %vm9579_vm14  ;;  %vm9591_vm7 = vcmask 982016   ;;  %vm9598_vm6 = vcmask 990208  }
 0x4b2   : > { %4916 = vmatpush2.msra.mxu0 %v2012_v16  ;;  %4971 = vmatpush1.msra.mxu1 %v2268_v27  ;;  %v1917_v16 = vsel %vm9578_vm5, %v9577_v37, %v9576_v41  ;;  %v3173_v27 = vsel %vm9579_vm14, %v3167_v48, %v3169_v9  ;;  %v3172_v3 = vsel %vm9583_vm4, %v7592_v31, %v3167_v48  ;;  %vm9588_vm8 = vmmov %vm9586_vm13  ;;  %v9589_v31 = vld [vmem:[#allocation152_spill] sm:$0xff]  ;;  %v9590_v48 = vld [vmem:[#allocation150_spill] sm:$0xff]  ;;  %vm9592_vm5 = vcmask 1006592  }
 0x4b3   : > { %4917 = vmatprep.subr.mxu0 %v1981_v20  ;;  %4972 = vmatprep.subr.mxu1 %v2237_v44  ;;  %v9584_v20 = vld [vmem:[#allocation154_spill] sm:$0xff]  ;;  %v9587_v44 = vld [vmem:[#allocation153_spill] sm:$0xff]  ;;  %v1853_v58 = vsel %vm9591_vm7, %v9590_v48, %v9589_v31  ;;  %vm9595_vm14 = vmmov %vm9591_vm7  ;;  %vm9606_vm7 = vcmask 1014784  }
 0x4b4   : > { %2744 = vrot.lane.b32.xlu1 %v8242_v17, %s9236_s20  ;;  %2742 = vrot.lane.b32.xlu0 %v7931_v40, %s9236_s20  ;;  %v3137_v57 = vpop.permute.xlu1 %3136  ;;  %v1885_v9 = vsel %vm9586_vm13, %v9585_v53, %v9584_v20  ;;  %vm9599_vm4 = vmmov %vm9592_vm5  ;;  %v4506_v37 = vld [vmem:[%s9602_s4] sm:$0xff] }
 0x4b5   : > { %4918 = vmatpush2.msra.mxu0 %v1980_v39  ;;  %4973 = vmatpush1.msra.mxu1 %v2236_v7  ;;  %v3135_v55 = vpop.permute.xlu0 %3134  ;;  %v9594_v7 = vld [vmem:[#allocation151_spill] sm:$0xff]  ;;  %vm9601_vm13 = vmmov %vm9598_vm6 }
 0x4b6   : > { %4919 = vmatprep.subr.mxu0 %v1949_v29  ;;  %4974 = vmatprep.subr.mxu1 %v3205_v22  ;;  %v1884_v22 = vsel %vm9588_vm8, %v9587_v44, %v9585_v53  ;;  %v3141_v39 = vsel %vm9592_vm5, %v3135_v55, %v3137_v57  ;;  %v1852_v62 = vsel %vm9595_vm14, %v9594_v7, %v9590_v48  ;;  %v9596_v29 = vld [vmem:[#allocation148_spill] sm:$0xff]  ;;  %vm9605_vm8 = vcmask 998400   ;;  %vm9609_vm14 = vmmov %vm9606_vm7  ;;  %v9611_v44 = vld [vmem:[#allocation143_spill] sm:$0xff] }
 0x4b7   : > { %4920 = vmatpush2.msra.mxu0 %v1948_v8  ;;  %4975 = vmatpush2.msra.mxu1 %v3204_v32  ;;  %v9597_v32 = vld [vmem:[#allocation149_spill] sm:$0xff]  ;;  %v3140_v57 = vsel %vm9599_vm4, %v7614_v56, %v3135_v55  ;;  %v5212_v56 = vld [vmem:[%s8653_s1 + $0x18] sm:$0xff]  ;;  %vm9608_vm5 = vmmov %vm9605_vm8 }
 0x4b8   : > { %4921 = vmatprep.subr.mxu0 %v1917_v16  ;;  %3776 = vrot.lane.b32.xlu1 %v8279_v25, %s9580_s19  ;;  %v8416_v61 = vpop.permute.xlu1 %3392  ;;  %v1821_v2 = vsel %vm9598_vm6, %v9597_v32, %v9596_v29  ;;  %v9603_v16 = vld [vmem:[#allocation146_spill] sm:$0xff]  ;;  %vm9612_vm6 = vmmov %vm9599_vm4  ;;  %v9613_v48 = vld [vmem:[#allocation141_spill] sm:$0xff] }
 0x4b9   : > { %3774 = vrot.lane.b32.xlu0 %v8242_v17, %s9580_s19  ;;  %4922 = vmatpush2.msra.mxu0 %v1916_v42  ;;  %v8423_v54 = vpop.permute.xlu0 %3390  ;;  %v9607_v42 = vld [vmem:[#allocation145_spill] sm:$0xff]  ;;  %v9615_v7 = vld [vmem:[#allocation138_spill] sm:$0xff] }
 0x4ba   : > { %4923 = vmatprep.subr.mxu0 %v1885_v9  ;;  %4976 = vmatprep.subr.mxu1 %v3173_v27  ;;  %v9604_v27 = vld [vmem:[#allocation144_spill] sm:$0xff]  ;;  %v9610_v9 = vld [vmem:[#allocation142_spill] sm:$0xff] }
 0x4bb   : > { %4924 = vmatpush2.msra.mxu0 %v1884_v22  ;;  %4977 = vmatpush2.msra.mxu1 %v3172_v3  ;;  %v1789_v52 = vsel %vm9605_vm8, %v9604_v27, %v9603_v16  ;;  %v1788_v3 = vsel %vm9608_vm5, %v9607_v42, %v9604_v27  ;;  %v1757_v22 = vsel %vm9612_vm6, %v9611_v44, %v9610_v9  ;;  %vm9618_vm8 = vmmov %vm9606_vm7  ;;  %v9625_v27 = vld [vmem:[#allocation206_spill] sm:$0xff] }
 0x4bc   : > { %4925 = vmatprep.subr.mxu0 %v1853_v58  ;;  %3744 = vrot.lane.b32.xlu1 %v8279_v25, %s9593_s23  ;;  %v3105_v26 = vpop.permute.xlu1 %3104  ;;  %v9600_v25 = vld [vmem:[#allocation147_spill] sm:$0xff]  ;;  %v1756_v58 = vsel %vm9599_vm4, %v9613_v48, %v9611_v44  ;;  %vm9624_vm4 = vcmask 523264   ;;  %v3589_v9 = vsel %vm793_vm11, %v8183_v60, %v8181_v1  ;;  %v3556_v1 = vsel %vm760_vm15, %v7380_v10, %v8215_v6 }
 0x4bd   : > { %3742 = vrot.lane.b32.xlu0 %v8242_v17, %s9593_s23  ;;  %4926 = vmatpush2.msra.mxu0 %v1852_v62  ;;  %v3103_v8 = vpop.permute.xlu0 %3102  ;;  %v1820_v41 = vsel %vm9601_vm13, %v9600_v25, %v9597_v32  ;;  %vm9616_vm13 = vmmov %vm9606_vm7  ;;  %v9617_v62 = vld [vmem:[#allocation139_spill] sm:$0xff]  ;;  %v5213_v32 = vld [vmem:[%s8653_s1 + $0x28] sm:$0xff]  ;;  %v3492_v10 = vsel %vm694_vm10, %v7438_v46, %v8270_v28  ;;  %v3429_v46 = vsel %vm628_vm1, %v8375_v36, %v8367_v23 }
 0x4be   : > { %4927 = vmatprep.subr.mxu0 %v1821_v2  ;;  %4978 = vmatprep.subr.mxu1 %v3141_v39  ;;  %v3109_v55 = vsel %vm9606_vm7, %v3103_v8, %v3105_v26  ;;  %v3108_v20 = vsel %vm9609_vm14, %v7642_v13, %v3103_v8  ;;  %v9614_v39 = vld [vmem:[#allocation140_spill] sm:$0xff]  ;;  %v1724_v26 = vsel %vm9618_vm8, %v9617_v62, %v9615_v7  ;;  %vm9619_vm7 = vcmask 515072   ;;  %v9620_v8 = vld [vmem:[#allocation205_spill] sm:$0xff] }
 0x4bf   : > { %4928 = vmatpush2.msra.mxu0 %v1820_v41  ;;  %4935 = vmatprep.mubr.f32.mxu0 %v5212_v56  ;;  %v1725_v13 = vsel %vm9616_vm13, %v9615_v7, %v9614_v39  ;;  %v3717_v2 = vsel %vm9619_vm7, %v8080_v49, %v8075_v21  ;;  %vm9621_vm5 = vmmov %vm9619_vm7  ;;  %v5214_v41 = vld [vmem:[%s8653_s1 + $0x10] sm:$0xff]  ;;  %vm9622_vm14 = vcmask 1022976   ;;  %v3685_v21 = vsel %vm9624_vm4, %v8109_v0, %v8101_v4  ;;  %v5215_v4 = vld [vmem:[%s8653_s1 + $0x38] sm:$0xff] }
 0x4c0   : > { %4929 = vmatprep.subr.mxu0 %v1789_v52  ;;  %4979 = vmatpush2.msra.mxu1 %v3140_v57  ;;  %v8462_v53 = vpop.permute.xlu1 %3360  ;;  %v3716_v25 = vsel %vm9621_vm5, %v9620_v8, %v8080_v49  ;;  %vm9623_vm6 = vmmov %vm9622_vm14  ;;  %vm9627_vm8 = vcmask 703488   ;;  %vm9628_vm7 = vcmask 588800  }
 0x4c1   : > { %4930 = vmatpush2.msra.mxu0 %v1788_v3  ;;  %4509 = vperm.xlu0 %5209, %v4506_v37   ;;  %v8467_v31 = vpop.permute.xlu0 %3358  ;;  %vm9626_vm13 = vmmov %vm9624_vm4  ;;  %vm9634_vm4 = vcmask 1031168  }
 0x4c2   : > { %4931 = vmatprep.subr.mxu0 %v1757_v22  ;;  %4980 = vmatprep.subr.mxu1 %v3109_v55  ;;  %v3684_v49 = vsel %vm9626_vm13, %v9625_v27, %v8109_v0  ;;  %v9629_v55 = vld [vmem:[#allocation207_spill] sm:$0xff]  ;;  %vm9630_vm5 = vmmov %vm9627_vm8  ;;  %v3364_v23 = vsel %vm562_vm3, %v7497_v12, %v8467_v31  ;;  %v9653_v27 = vld [vmem:[#allocation44_spill] sm:$0xff] }
 0x4c3   : > { %4932 = vmatpush2.msra.mxu0 %v1756_v58  ;;  %4981 = vmatpush2.msra.mxu1 %v3108_v20  ;;  %v3652_v0 = vsel %vm9630_vm5, %v9629_v55, %v8132_v34  ;;  %vm9635_vm13 = vmmov %vm9634_vm4  ;;  %vm9650_vm5 = vcmask 179200  }
 0x4c4   : > { %4933 = vmatprep.subr.mxu0 %v1725_v13  ;;  %v3073_v29 = vpop.permute.xlu1 %3072  ;;  %5006 = vmatprep.mubr.f32.mxu1 %v5213_v32 }
 0x4c5   : > { %4934 = vmatpush2.msra.mxu0 %v1724_v26  ;;  %v3071_v57 = vpop.permute.xlu0 %3070  ;;  %v9647_v26 = vld [vmem:[#allocation211_spill] sm:$0xff] }
 0x4c6   : > { %5013 = vmatprep.subr.mxu0 %v3717_v2  ;;  %4936 = vmatmul.mubr.f32.vlgmr.msra.gmra.mxu0 %v5214_v41  ;;  %v3076_v37 = vsel %vm9622_vm14, %v7664_v19, %v3071_v57  ;;  %v3077_v16 = vsel %vm9623_vm6, %v3071_v57, %v3073_v29  ;;  %v3653_v19 = vsel %vm9627_vm8, %v8132_v34, %v8127_v18  ;;  %vm9631_vm14 = vcmask 711680   ;;  %v9632_v18 = vld [vmem:[#allocation208_spill] sm:$0xff]  ;;  %v9649_v29 = vld [vmem:[#allocation221_spill] sm:$0xff] }
 0x4c7   : > { %5014 = vmatpush1.msra.mxu0 %v3716_v25  ;;  %4982 = vmatprep.subr.mxu1 %v3077_v16  ;;  %v3621_v42 = vsel %vm9631_vm14, %v8161_v33, %v8149_v51  ;;  %vm9633_vm6 = vmmov %vm9631_vm14  ;;  %v3588_v34 = vsel %vm793_vm11, %v7359_v11, %v8183_v60  ;;  %v3525_v11 = vsel %vm727_vm9, %v8244_v38, %v8233_v30  ;;  %vm9646_vm8 = vcmask 982016   ;;  %v9652_v25 = vld [vmem:[#allocation212_spill] sm:$0xff] }
 0x4c8   : > { %5015 = vmatprep.subr.mxu0 %v3685_v21  ;;  %4983 = vmatpush2.msra.mxu1 %v3076_v37  ;;  %v8499_v52 = vpop.permute.xlu1 %3328  ;;  %v3620_v3 = vsel %vm9633_vm6, %v9632_v18, %v8161_v33  ;;  %v3557_v33 = vsel %vm760_vm15, %v8215_v6, %v8207_v59  ;;  %v3524_v60 = vsel %vm727_vm9, %v7417_v50, %v8244_v38  ;;  %vm9636_vm9 = vcmask 1039360   ;;  %vm9651_vm14 = vmmov %vm9650_vm5 }
 0x4c9   : > { %5016 = vmatpush1.msra.mxu0 %v3684_v49  ;;  %v8504_v56 = vpop.permute.xlu0 %3326  ;;  %5152 = vmatprep.mubr.msk.f32.mxu0 %vm9628_vm7, %v5215_v4  ;;  %v3493_v59 = vsel %vm694_vm10, %v8270_v28, %v8262_v35  ;;  %v3461_v30 = vsel %vm661_vm0, %v8321_v43, %v8319_v63  ;;  %v3460_v50 = vsel %vm661_vm0, %v7464_v47, %v8321_v43  ;;  %vm9637_vm11 = vmmov %vm9636_vm9  ;;  %vm9638_vm0 = vcmask 785408   ;;  %v9656_v4 = vld [vmem:[#allocation213_spill] sm:$0xff] }
 0x4ca   : > { %5017 = vmatprep.subr.mxu0 %v3653_v19  ;;  %v3428_v28 = vsel %vm628_vm1, %v7472_v24, %v8375_v36  ;;  %v3397_v47 = vsel %vm595_vm2, %v8423_v54, %v8416_v61  ;;  %v3396_v43 = vsel %vm595_vm2, %v7486_v14, %v8423_v54  ;;  %v3365_v24 = vsel %vm562_vm3, %v8467_v31, %v8462_v53  ;;  %vm9640_vm2 = vmmov %vm9638_vm0  ;;  %v9641_v54 = vld [vmem:[#allocation209_spill] sm:$0xff]  ;;  %v9644_v31 = vld [vmem:[#allocation210_spill] sm:$0xff] }
 0x4cb   : > { %5018 = vmatpush1.msra.mxu0 %v3652_v0  ;;  %vm9639_vm1 = vcmask 965632   ;;  %vm9643_vm3 = vcmask 973824   ;;  %vm9648_vm7 = vmmov %vm9646_vm8  ;;  %vm9654_vm6 = vcmask 187392  }
 0x4cc   : > { %5019 = vmatprep.subr.mxu0 %v3621_v42  ;;  %v3041_v20 = vpop.permute.xlu1 %3040  ;;  %vm9642_vm10 = vmmov %vm9639_vm1 }
 0x4cd   : > { %5020 = vmatpush1.msra.mxu0 %v3620_v3  ;;  %v3039_v44 = vpop.permute.xlu0 %3038  ;;  %vm9645_vm15 = vmmov %vm9643_vm3  ;;  %v9659_v3 = vld [vmem:[#allocation43_spill] sm:$0xff] }
 0x4ce   : > { %5021 = vmatprep.subr.mxu0 %v3589_v9  ;;  %v3044_v51 = vsel %vm9634_vm4, %v7686_v5, %v3039_v44  ;;  %v3045_v22 = vsel %vm9635_vm13, %v3039_v44, %v3041_v20  ;;  %vm9655_vm4 = vmmov %vm9654_vm6  ;;  %vm9657_vm13 = vcmask 449536  }
 0x4cf   : > { %5022 = vmatpush1.msra.mxu0 %v3588_v34  ;;  %4984 = vmatprep.subr.mxu1 %v3045_v22 }
 0x4d0   : > { %5023 = vmatprep.subr.mxu0 %v3557_v33  ;;  %4985 = vmatpush2.msra.mxu1 %v3044_v51  ;;  %v3297_v48 = vpop.permute.xlu1 %3296  ;;  %v9662_v51 = vld [vmem:[#allocation214_spill] sm:$0xff] }
 0x4d1   : > { %5024 = vmatpush1.msra.mxu0 %v3556_v1  ;;  %v3295_v5 = vpop.permute.xlu0 %3294 }
 0x4d2   : > { %5025 = vmatprep.subr.mxu0 %v3525_v11  ;;  %v3301_v14 = vsel %vm9639_vm1, %v3295_v5, %v3297_v48  ;;  %v3300_v53 = vsel %vm9642_vm10, %v9641_v54, %v3295_v5  ;;  %v9665_v11 = vld [vmem:[#allocation41_spill] sm:$0xff] }
 0x4d3   : > { %5026 = vmatpush1.msra.mxu0 %v3524_v60 }
 0x4d4   : > { %5027 = vmatprep.subr.mxu0 %v3493_v59  ;;  %v3009_v6 = vpop.permute.xlu1 %3008 }
 0x4d5   : > { %5028 = vmatpush1.msra.mxu0 %v3492_v10  ;;  %v3007_v58 = vpop.permute.xlu0 %3006 }
 0x4d6   : > { %5029 = vmatprep.subr.mxu0 %v3461_v30  ;;  %v3012_v38 = vsel %vm9636_vm9, %v7708_v45, %v3007_v58  ;;  %v3013_v35 = vsel %vm9637_vm11, %v3007_v58, %v3009_v6  ;;  %vm9658_vm9 = vmmov %vm9657_vm13  ;;  %v9668_v6 = vld [vmem:[#allocation215_spill] sm:$0xff] }
 0x4d7   : > { %5030 = vmatpush1.msra.mxu0 %v3460_v50  ;;  %4986 = vmatprep.subr.mxu1 %v3013_v35  ;;  %v9671_v35 = vld [vmem:[#allocation42_spill] sm:$0xff] }
 0x4d8   : > { %5031 = vmatprep.subr.mxu0 %v3429_v46  ;;  %4987 = vmatpush2.msra.mxu1 %v3012_v38  ;;  %v3265_v63 = vpop.permute.xlu1 %3264 }
 0x4d9   : > { %5032 = vmatpush1.msra.mxu0 %v3428_v28  ;;  %v3263_v45 = vpop.permute.xlu0 %3262  ;;  %4988 = vmatprep.subr.mxu1 %v8242_v17  ;;  %v3333_v17 = vsel %vm9638_vm0, %v8504_v56, %v8499_v52  ;;  %vm9663_vm0 = vcmask 457728  }
 0x4da   : > { %5033 = vmatprep.subr.mxu0 %v3397_v47  ;;  %4989 = vmatpush2.msra.mxu1 %v7931_v40  ;;  %v3332_v40 = vsel %vm9640_vm2, %v7512_v15, %v8504_v56  ;;  %v3269_v12 = vsel %vm9643_vm3, %v3263_v45, %v3265_v63  ;;  %v3268_v39 = vsel %vm9645_vm15, %v9644_v31, %v3263_v45  ;;  %vm9664_vm1 = vmmov %vm9663_vm0  ;;  %vm9666_vm2 = vcmask 203776   ;;  %v9674_v45 = vld [vmem:[#allocation216_spill] sm:$0xff] }
 0x4db   : > { %5034 = vmatpush1.msra.mxu0 %v3396_v43  ;;  %vm9667_vm10 = vmmov %vm9666_vm2  ;;  %vm9669_vm3 = vcmask 465920  }
 0x4dc   : > { %5035 = vmatprep.subr.mxu0 %v3365_v24  ;;  %v3233_v36 = vpop.permute.xlu1 %3232  ;;  %vm9670_vm15 = vmmov %vm9669_vm3 }
 0x4dd   : > { %5036 = vmatpush1.msra.mxu0 %v3364_v23  ;;  %v3231_v61 = vpop.permute.xlu0 %3230 }
 0x4de   : > { %5037 = vmatprep.subr.mxu0 %v3333_v17  ;;  %v3237_v13 = vsel %vm9646_vm8, %v3231_v61, %v3233_v36  ;;  %v3236_v15 = vsel %vm9648_vm7, %v9647_v26, %v3231_v61  ;;  %vm9672_vm8 = vcmask 211968   ;;  %v9677_v17 = vld [vmem:[#allocation39_spill] sm:$0xff] }
 0x4df   : > { %5038 = vmatpush1.msra.mxu0 %v3332_v40  ;;  %vm9673_vm7 = vmmov %vm9672_vm8 }
 0x4e0   : > { %5039 = vmatprep.subr.mxu0 %v3301_v14  ;;  %v2969_v7 = vpop.permute.xlu1 %2968 }
 0x4e1   : > { %5040 = vmatpush1.msra.mxu0 %v3300_v53  ;;  %v2967_v62 = vpop.permute.xlu0 %2966  ;;  %v9680_v53 = vld [vmem:[#allocation217_spill] sm:$0xff] }
 0x4e2   : > { %5041 = vmatprep.subr.mxu0 %v3269_v12  ;;  %v2972_v32 = vsel %vm9650_vm5, %v9649_v29, %v2967_v62  ;;  %v2973_v2 = vsel %vm9651_vm14, %v2967_v62, %v2969_v7  ;;  %vm9675_vm5 = vcmask 474112  }
 0x4e3   : > { %5042 = vmatpush1.msra.mxu0 %v3268_v39  ;;  %4990 = vmatprep.subr.mxu1 %v2973_v2  ;;  %vm9676_vm14 = vmmov %vm9675_vm5 }
 0x4e4   : > { %5043 = vmatprep.subr.mxu0 %v3237_v13  ;;  %4991 = vmatpush2.msra.mxu1 %v2972_v32  ;;  %v4001_v57 = vpop.permute.xlu1 %4000  ;;  %v9683_v13 = vld [vmem:[#allocation40_spill] sm:$0xff]  ;;  %v9686_v32 = vld [vmem:[#allocation218_spill] sm:$0xff] }
 0x4e5   : > { %5044 = vmatpush1.msra.mxu0 %v3236_v15  ;;  %v3999_v8 = vpop.permute.xlu0 %3998 }
 0x4e6   : > { %v4004_v41 = vsel %vm1222_vm12, %v9652_v25, %v3999_v8  ;;  %v4005_v37 = vsel %vm1222_vm12, %v3999_v8, %v4001_v57  ;;  %vm9660_vm12 = vcmask 195584  }
 0x4e7   : > { %5059 = vmatprep.subr.mxu0 %v4005_v37  ;;  %vm9661_vm11 = vmmov %vm9660_vm12 }
 0x4e8   : > { %5060 = vmatpush2.msra.mxu0 %v4004_v41  ;;  %v2937_v16 = vpop.permute.xlu1 %2936  ;;  %v9689_v41 = vld [vmem:[#allocation38_spill] sm:$0xff] }
 0x4e9   : > { %v2935_v21 = vpop.permute.xlu0 %2934 }
 0x4ea   : > { %v2940_v49 = vsel %vm9654_vm6, %v9653_v27, %v2935_v21  ;;  %v2941_v52 = vsel %vm9655_vm4, %v2935_v21, %v2937_v16  ;;  %vm9678_vm6 = vcmask 220160   ;;  %v9692_v27 = vld [vmem:[#allocation37_spill] sm:$0xff] }
 0x4eb   : > { %4992 = vmatprep.subr.mxu1 %v2941_v52  ;;  %vm9679_vm4 = vmmov %vm9678_vm6  ;;  %v9693_v52 = vld [vmem:[#allocation219_spill] sm:$0xff] }
 0x4ec   : > { %4993 = vmatpush2.msra.mxu1 %v2940_v49 }
 0x4ee   : > { %v3969_v19 = vpop.permute.xlu1 %3968 }
 0x4ef   : > { %v3967_v56 = vpop.permute.xlu0 %3966 }
 0x4f0   : > { %v3972_v55 = vsel %vm9657_vm13, %v9656_v4, %v3967_v56  ;;  %v3973_v0 = vsel %vm9658_vm9, %v3967_v56, %v3969_v19  ;;  %vm9681_vm13 = vcmask 482304  }
 0x4f1   : > { %5061 = vmatprep.subr.mxu0 %v3973_v0  ;;  %vm9682_vm9 = vmmov %vm9681_vm13  ;;  %v9696_v0 = vld [vmem:[#allocation220_spill] sm:$0xff] }
 0x4f2   : > { %5062 = vmatpush2.msra.mxu0 %v3972_v55 }
 0x4f3   : > { %v2905_v42 = vpop.permute.xlu1 %2904 }
 0x4f4   : > { %v2903_v18 = vpop.permute.xlu0 %2902 }
 0x4f5   : > { %v2908_v20 = vsel %vm9660_vm12, %v9659_v3, %v2903_v18  ;;  %v2909_v9 = vsel %vm9661_vm11, %v2903_v18, %v2905_v42  ;;  %vm9684_vm12 = vcmask 228352   ;;  %v5216_v3 = vld [vmem:[%s8653_s1 + $0x30] sm:$0xff] }
 0x4f6   : > { %4994 = vmatprep.subr.mxu1 %v2909_v9  ;;  %vm9685_vm11 = vmmov %vm9684_vm12  ;;  %v4653_v9 = vpop.f32.mrf.mxu1 }
 0x4f7   : > { %4995 = vmatpush2.msra.mxu1 %v2908_v20  ;;  %v4582_v20 = vpop.f32.mrf.mxu0 }
 0x4f8   : > { %v3937_v44 = vpop.permute.xlu1 %3936 }
 0x4f9   : > { %v3935_v34 = vpop.permute.xlu0 %3934 }
 0x4fa   : > { %v3940_v22 = vsel %vm9663_vm0, %v9662_v51, %v3935_v34  ;;  %v3941_v33 = vsel %vm9664_vm1, %v3935_v34, %v3937_v44  ;;  %vm9687_vm0 = vcmask 490496   ;;  %v4584_v44 = vpop.f32.mrf.mxu0  ;;  %v4655_v34 = vpop.f32.mrf.mxu1 }
 0x4fb   : > { %5063 = vmatprep.subr.mxu0 %v3941_v33  ;;  %vm9688_vm1 = vmmov %vm9687_vm0 }
 0x4fc   : > { %5064 = vmatpush2.msra.mxu0 %v3940_v22 }
 0x4fd   : > { %v2873_v1 = vpop.permute.xlu1 %2872 }
 0x4fe   : > { %v2871_v48 = vpop.permute.xlu0 %2870 }
 0x4ff   : > { %v2876_v5 = vsel %vm9666_vm2, %v9665_v11, %v2871_v48  ;;  %v2877_v60 = vsel %vm9667_vm10, %v2871_v48, %v2873_v1  ;;  %vm9690_vm2 = vcmask 236544  }
 0x500   : > { %4996 = vmatprep.subr.mxu1 %v2877_v60  ;;  %vm9691_vm10 = vmmov %vm9690_vm2 }
 0x501   : > { %4997 = vmatpush2.msra.mxu1 %v2876_v5 }
 0x503   : > { %v3905_v59 = vpop.permute.xlu1 %3904  ;;  %v3903_v10 = vpop.permute.xlu0 %3902 }
 0x504   : > { %v3908_v30 = vsel %vm9669_vm3, %v9668_v6, %v3903_v10  ;;  %v3909_v58 = vsel %vm9670_vm15, %v3903_v10, %v3905_v59  ;;  %vm9694_vm3 = vcmask 498688  }
 0x505   : > { %5065 = vmatprep.subr.mxu0 %v3909_v58  ;;  %vm9695_vm15 = vmmov %vm9694_vm3 }
 0x506   : > { %5066 = vmatpush2.msra.mxu0 %v3908_v30 }
 0x508   : > { %v2841_v50 = vpop.permute.xlu1 %2840  ;;  %v2839_v38 = vpop.permute.xlu0 %2838 }
 0x509   : > { %v2844_v46 = vsel %vm9672_vm8, %v9671_v35, %v2839_v38  ;;  %v2845_v28 = vsel %vm9673_vm7, %v2839_v38, %v2841_v50  ;;  %vm9697_vm8 = vcmask 506880   ;;  %v4795_v33 = vpop.f32.mrf.mxu1 }
 0x50a   : > { %4998 = vmatprep.subr.mxu1 %v2845_v28  ;;  %vm9698_vm7 = vmmov %vm9697_vm8 }
 0x50b   : > { %4999 = vmatpush2.msra.mxu1 %v2844_v46  ;;  %v4797_v59 = vpop.f32.mrf.mxu1 }
 0x50d   : > { %v3873_v63 = vpop.permute.xlu1 %3872  ;;  %v3871_v47 = vpop.permute.xlu0 %3870 }
 0x50e   : > { %v3876_v43 = vsel %vm9675_vm5, %v9674_v45, %v3871_v47  ;;  %v3877_v24 = vsel %vm9676_vm14, %v3871_v47, %v3873_v63 }
 0x50f   : > { %5067 = vmatprep.subr.mxu0 %v3877_v24 }
 0x510   : > { %5068 = vmatpush2.msra.mxu0 %v3876_v43 }
 0x512   : > { %v2809_v23 = vpop.permute.xlu1 %2808  ;;  %v2807_v36 = vpop.permute.xlu0 %2806 }
 0x513   : > { %v2812_v14 = vsel %vm9678_vm6, %v9677_v17, %v2807_v36  ;;  %v2813_v61 = vsel %vm9679_vm4, %v2807_v36, %v2809_v23 }
 0x514   : > { %5000 = vmatprep.subr.mxu1 %v2813_v61 }
 0x515   : > { %5001 = vmatpush2.msra.mxu1 %v2812_v14 }
 0x517   : > { %v3841_v40 = vpop.permute.xlu1 %3840  ;;  %v3839_v54 = vpop.permute.xlu0 %3838 }
 0x518   : > { %v3844_v12 = vsel %vm9681_vm13, %v9680_v53, %v3839_v54  ;;  %v3845_v31 = vsel %vm9682_vm9, %v3839_v54, %v3841_v40 }
 0x519   : > { %5069 = vmatprep.subr.mxu0 %v3845_v31 }
 0x51a   : > { %5070 = vmatpush2.msra.mxu0 %v3844_v12 }
 0x51c   : > { %v2777_v39 = vpop.permute.xlu1 %2776  ;;  %v2775_v7 = vpop.permute.xlu0 %2774 }
 0x51d   : > { %v2780_v62 = vsel %vm9684_vm12, %v9683_v13, %v2775_v7  ;;  %v2781_v26 = vsel %vm9685_vm11, %v2775_v7, %v2777_v39 }
 0x51e   : > { %5002 = vmatprep.subr.mxu1 %v2781_v26 }
 0x51f   : > { %5003 = vmatpush2.msra.mxu1 %v2780_v62 }
 0x521   : > { %v3809_v15 = vpop.permute.xlu1 %3808  ;;  %v3807_v29 = vpop.permute.xlu0 %3806 }
 0x522   : > { %v3812_v2 = vsel %vm9687_vm0, %v9686_v32, %v3807_v29  ;;  %v3813_v57 = vsel %vm9688_vm1, %v3807_v29, %v3809_v15 }
 0x523   : > { %5071 = vmatprep.subr.mxu0 %v3813_v57 }
 0x524   : > { %5072 = vmatpush2.msra.mxu0 %v3812_v2 }
 0x526   : > { %v2745_v8 = vpop.permute.xlu1 %2744  ;;  %v2743_v25 = vpop.permute.xlu0 %2742 }
 0x527   : > { %v2748_v37 = vsel %vm9690_vm2, %v9689_v41, %v2743_v25  ;;  %v2749_v16 = vsel %vm9691_vm10, %v2743_v25, %v2745_v8 }
 0x528   : > { %5004 = vmatprep.subr.mxu1 %v2749_v16 }
 0x529   : > { %5005 = vmatpush2.msra.mxu1 %v2748_v37 }
 0x52a   : > { %v3777_v21 = vpop.permute.xlu1 %3776  ;;  %5007 = vmatmul.mubr.f32.vlgmr.msra.gmra.mxu1 %v9692_v27 }
 0x52b   : > { %v3775_v49 = vpop.permute.xlu0 %3774 }
 0x52c   : > { %v3780_v19 = vsel %vm9694_vm3, %v9693_v52, %v3775_v49  ;;  %v3781_v56 = vsel %vm9695_vm15, %v3775_v49, %v3777_v21 }
 0x52d   : > { %5073 = vmatprep.subr.mxu0 %v3781_v56 }
 0x52e   : > { %5074 = vmatpush2.msra.mxu0 %v3780_v19  ;;  %v3745_v4 = vpop.permute.xlu1 %3744 }
 0x52f   : > { %v3743_v55 = vpop.permute.xlu0 %3742 }
 0x530   : > { %v3748_v42 = vsel %vm9697_vm8, %v9696_v0, %v3743_v55  ;;  %v3749_v18 = vsel %vm9698_vm7, %v3743_v55, %v3745_v4 }
 0x531   : > { %5075 = vmatprep.subr.mxu0 %v3749_v18 }
 0x532   : > { %5076 = vmatpush2.msra.mxu0 %v3748_v42 }
 0x533   : > { %5078 = vmatmul.mubr.f32.vlgmr.msra.gmra.mxu0 %v5216_v3 }
 0x539   : > { %v4724_v51 = vpop.f32.mrf.mxu0 }
 0x53b   : > { %v4726_v11 = vpop.f32.mrf.mxu0 }
 0x53c   : > { %v4510_v22 = vpop.permute.xlu0 %4509 }
 0x53d   : > { %v4583_v1 = vadd.f32 %v4582_v20, %v4510_v22  ;;  %v4585_v48 = vadd.f32 %v4584_v44, %v4510_v22 }
 0x53f   : > { %v4656_v5 = vadd.f32 %v4655_v34, %v4585_v48  ;;  %v4654_v60 = vadd.f32 %v4653_v9, %v4583_v1 }
 0x541   : > { %v4725_v10 = vadd.f32 %v4724_v51, %v4654_v60  ;;  %v4727_v6 = vadd.f32 %v4726_v11, %v4656_v5 }
 0x543   : > { %v4796_v30 = vadd.f32 %v4795_v33, %v4725_v10  ;;  %v4798_v58 = vadd.f32 %v4797_v59, %v4727_v6 }
 0x545   : > { %5084 = vst [vmem:[%s170_s29] sm:$0xff] %v4796_v30  ;;  %5085 = vst [vmem:[%s170_s29 + $0x8] sm:$0xff] %v4798_v58 }
 0x54e   : > { %v4866_v50 = vpop.f32.mrf.mxu1 }
 0x54f   : > { %v4867_v46 = vadd.f32 %v4866_v50, %v4510_v22 }
 0x550   : > { %v4868_v38 = vpop.f32.mrf.mxu1 }
 0x551   : > { %v4869_v63 = vadd.f32 %v4868_v38, %v4510_v22 }
 0x586   : > { %v4937_v35 = vpop.f32.mrf.mxu0 }
 0x587   : > { %v4938_v45 = vadd.f32 %v4937_v35, %v4867_v46 }
 0x588   : > { %v4939_v47 = vpop.f32.mrf.mxu0 }
 0x589   : > { %v4940_v24 = vadd.f32 %v4939_v47, %v4869_v63 }
 0x5ea   : > { %v5008_v28 = vpop.f32.mrf.mxu1 }
 0x5eb   : > { %v5009_v23 = vadd.f32 %v5008_v28, %v4938_v45 }
 0x5ec   : > { %v5010_v43 = vpop.f32.mrf.mxu1 }
 0x5ed   : > { %v5011_v17 = vadd.f32 %v5010_v43, %v4940_v24 }
 0x5f3   : > { %v5079_v36 = vpop.f32.mrf.mxu0 }
 0x5f4   : > { %v5080_v14 = vadd.f32 %v5079_v36, %v5009_v23 }
 0x5f5   : > { %v5081_v61 = vpop.f32.mrf.mxu0 }
 0x5f6   : > { %5086 = vst [vmem:[%s170_s29 + $0x10] sm:$0xff] %v5080_v14  ;;  %v5082_v40 = vadd.f32 %v5081_v61, %v5011_v17 }
 0x5f8   : > { %5087 = vst [vmem:[%s170_s29 + $0x18] sm:$0xff] %v5082_v40 }
 0x5f9 PF: > { %s9701_s9 = sld [smem:[#allocation3_spill]] }
 0x5ff   : > { %s13_s12 = sadd.s32 1, %s9701_s9  }
 0x600   : > { %p10_p4 = scmp.ge.s32.totalorder %s13_s12, 4  }
 0x602   :  { %12 = sbr.rel (!%p10_p4) target bundleno = 4 (0x4), region = 62 }

</bundles_post_ra>
